<compile_context>
chip_gen: v5e
topology: v5e:2x2
jax: 0.10.0
libtpu: 0.0.40
codegen_flags: <defaults>
</compile_context>

<pallas_src>
import functools

import jax
import jax.numpy as jnp
import numpy as np
from jax import lax
from jax.experimental import pallas as pl
from jax.experimental.pallas import tpu as pltpu

_EPS = 1e-5
_LANES = 128


def _zero_halo(ref, h, w, c):
    """Zero only the 1-pixel border ring of an (h+2, w+2, c) padded scratch."""
    dt = ref.dtype
    ref[0:1, :, :] = jnp.zeros((1, w + 2, c), dt)
    ref[h + 1:h + 2, :, :] = jnp.zeros((1, w + 2, c), dt)
    ref[:, 0:1, :] = jnp.zeros((h + 2, 1, c), dt)
    ref[:, w + 1:w + 2, :] = jnp.zeros((h + 2, 1, c), dt)


def basic_block_kernel(x_ref, w1_ref, g1_ref, b1_ref, w2_ref, g2_ref, b2_ref,
                       out_ref, xpad_ref, midpad_ref,
                       *, H, W, Ho, Wo, Cinp, Cp, P, stride, RB):
    cnt = float(Ho * Wo * P)     # GroupNorm(1, P): stats over REAL channels only

    # Stage input with a 1-px halo in bf16 (only the ring needs zeroing; the
    # interior is fully rewritten).  Per step: with "parallel" grid semantics
    # each TensorCore owns its own scratch and may never run step 0.
    _zero_halo(xpad_ref, H, W, Cinp)
    xpad_ref[1:H + 1, 1:W + 1, :] = x_ref[0]

    # ------------------------------------------------------------------ conv1
    # Row-tiled 9-tap accumulating matmul (K = Cinp >= 128, full lane width,
    # no im2col patch buffer).  Raw f32 output is staged in out_ref (reused as
    # scratch); GN1 sum/sumsq accumulate in the same traversal.
    s1 = jnp.float32(0.0)
    ss1 = jnp.float32(0.0)
    for r0 in range(0, Ho, RB):
        acc = None
        for dy in range(3):
            for dx in range(3):
                rs = r0 * stride + dy
                re = rs + stride * (RB - 1) + 1
                ce = dx + stride * (Wo - 1) + 1
                tap = xpad_ref[rs:re, dx:ce, :]          # bf16, already MXU dtype
                if stride > 1:
                    tap = tap[::stride, ::stride, :]     # per-tap, (RB,Wo) sized
                d = jnp.dot(tap.reshape(RB * Wo, Cinp), w1_ref[dy, dx],
                            preferred_element_type=jnp.float32)
                acc = d if acc is None else acc + d      # init from first tap
        s1 = s1 + jnp.sum(acc)
        ss1 = ss1 + jnp.sum(acc * acc)
        out_ref[:, r0:r0 + RB, :, :] = acc.reshape(1, RB, Wo, Cp)

    # GN1 + ReLU: folded scale/bias, rsqrt on the EUP, var clamped >= 0.
    mean1 = s1 / cnt
    var1 = jnp.maximum(ss1 / cnt - mean1 * mean1, 0.0)
    scale1 = lax.rsqrt(var1 + _EPS) * g1_ref[...]        # (1, Cp)
    bias1 = b1_ref[...] - mean1 * scale1                 # (1, Cp); 0 on padding

    # Normalize pass: read staged f32 conv1 from out_ref, write bf16 into the
    # halo-padded conv2 input scratch (cast exactly once).
    _zero_halo(midpad_ref, Ho, Wo, Cp)
    for r0 in range(0, Ho, RB):
        y = out_ref[:, r0:r0 + RB, :, :].reshape(RB * Wo, Cp)
        y = jnp.maximum(y * scale1 + bias1, 0.0)
        midpad_ref[1 + r0:1 + r0 + RB, 1:Wo + 1, :] = (
            y.reshape(RB, Wo, Cp).astype(jnp.bfloat16))

    # ------------------------------------------------------------------ conv2
    # Same row-tiled 9-tap structure; taps come straight from the bf16 scratch
    # (no per-tap casts).  Raw f32 output overwrites out_ref; GN2 stats fused.
    s2 = jnp.float32(0.0)
    ss2 = jnp.float32(0.0)
    for r0 in range(0, Ho, RB):
        acc = None
        for dy in range(3):
            for dx in range(3):
                tap = midpad_ref[r0 + dy:r0 + dy + RB, dx:dx + Wo, :]
                d = jnp.dot(tap.reshape(RB * Wo, Cp), w2_ref[dy, dx],
                            preferred_element_type=jnp.float32)
                acc = d if acc is None else acc + d
        s2 = s2 + jnp.sum(acc)
        ss2 = ss2 + jnp.sum(acc * acc)
        out_ref[:, r0:r0 + RB, :, :] = acc.reshape(1, RB, Wo, Cp)

    mean2 = s2 / cnt
    var2 = jnp.maximum(ss2 / cnt - mean2 * mean2, 0.0)
    scale2 = lax.rsqrt(var2 + _EPS) * g2_ref[...]
    bias2 = b2_ref[...] - mean2 * scale2

    # GN2 + ReLU in place on the (lane-dense) output block.
    for r0 in range(0, Ho, RB):
        y = out_ref[:, r0:r0 + RB, :, :].reshape(RB * Wo, Cp)
        y = jnp.maximum(y * scale2 + bias2, 0.0)
        out_ref[:, r0:r0 + RB, :, :] = (
            y.reshape(1, RB, Wo, Cp).astype(out_ref.dtype))


def _pick_rb(Ho, Wo, Cp):
    """Largest divisor of Ho with M = RB*Wo <= 256 and a <= 32-vreg f32 acc."""
    best = 1
    for rb in range(1, Ho + 1):
        if Ho % rb == 0 and rb * Wo <= 256 and rb * Wo * Cp * 4 <= 32 * 4096:
            best = rb
    return best


def basic_block_forward(x_nhwc, params, stride=1):
    """x_nhwc: (N, H, W, Cin) f32.  Returns (N, Ho, Wo, planes) in NHWC."""
    w1, g1, b1, w2, g2, b2 = params
    N, H, W, Cin = x_nhwc.shape
    P = w1.shape[-1]
    Ho = (H + 2 - 3) // stride + 1
    Wo = (W + 2 - 3) // stride + 1
    Cp = ((P + _LANES - 1) // _LANES) * _LANES       # lane-dense out channels
    Cinp = ((Cin + _LANES - 1) // _LANES) * _LANES   # lane-dense in channels

    # Host-side packing: lane-pad channels with ZERO weights / ZERO affine
    # (required for the GN-stat correctness argument above), cast to bf16.
    x_p = jnp.pad(x_nhwc, ((0, 0), (0, 0), (0, 0), (0, Cinp - Cin))
                  ).astype(jnp.bfloat16)
    w1p = jnp.pad(w1, ((0, 0), (0, 0), (0, Cinp - Cin), (0, Cp - P))
                  ).astype(jnp.bfloat16)                       # (3,3,Cinp,Cp)
    w2p = jnp.pad(w2, ((0, 0), (0, 0), (0, Cp - P), (0, Cp - P))
                  ).astype(jnp.bfloat16)                       # (3,3,Cp,Cp)
    g1p = jnp.pad(g1.astype(jnp.float32), (0, Cp - P)).reshape(1, Cp)
    b1p = jnp.pad(b1.astype(jnp.float32), (0, Cp - P)).reshape(1, Cp)
    g2p = jnp.pad(g2.astype(jnp.float32), (0, Cp - P)).reshape(1, Cp)
    b2p = jnp.pad(b2.astype(jnp.float32), (0, Cp - P)).reshape(1, Cp)

    RB = _pick_rb(Ho, Wo, Cp)

    kernel = functools.partial(basic_block_kernel, H=H, W=W, Ho=Ho, Wo=Wo,
                               Cinp=Cinp, Cp=Cp, P=P, stride=stride, RB=RB)

    # Re-derived VMEM budget: actual double-buffered footprint + 25% headroom,
    # capped at 48 MiB (safe on v7x's 64 MiB physical VMEM).
    nbytes = lambda shape, s: int(np.prod(shape)) * s
    need = (2 * nbytes((1, H, W, Cinp), 2)            # x block (double-buffered)
            + 2 * nbytes((3, 3, Cinp, Cp), 2)         # w1
            + 2 * nbytes((3, 3, Cp, Cp), 2)           # w2
            + 8 * nbytes((1, Cp), 4)                  # affine params
            + 2 * nbytes((1, Ho, Wo, Cp), 4)          # out block
            + nbytes((H + 2, W + 2, Cinp), 2)         # xpad scratch (bf16)
            + nbytes((Ho + 2, Wo + 2, Cp), 2)         # midpad scratch (bf16)
            + 4 * nbytes((RB * Wo, Cp), 4))           # live acc / temps
    vmem_limit = int(min(48 * 1024 * 1024,
                         max(int(need * 1.25) + (2 << 20), 16 * 1024 * 1024)))

    flops = 2 * N * Ho * Wo * 9 * (Cinp * Cp + Cp * Cp)
    bytes_accessed = (int(x_p.size) * 2 + int(w1p.size) * 2 + int(w2p.size) * 2
                      + 4 * Cp * 4 + N * Ho * Wo * Cp * 4)

    out = pl.pallas_call(
        kernel,
        out_shape=jax.ShapeDtypeStruct((N, Ho, Wo, Cp), jnp.float32),
        grid_spec=pltpu.PrefetchScalarGridSpec(
            num_scalar_prefetch=0,
            grid=(N,),
            in_specs=[
                pl.BlockSpec((1, H, W, Cinp), lambda n: (n, 0, 0, 0)),
                pl.BlockSpec((3, 3, Cinp, Cp), lambda n: (0, 0, 0, 0)),
                pl.BlockSpec((1, Cp), lambda n: (0, 0)),
                pl.BlockSpec((1, Cp), lambda n: (0, 0)),
                pl.BlockSpec((3, 3, Cp, Cp), lambda n: (0, 0, 0, 0)),
                pl.BlockSpec((1, Cp), lambda n: (0, 0)),
                pl.BlockSpec((1, Cp), lambda n: (0, 0)),
            ],
            out_specs=pl.BlockSpec((1, Ho, Wo, Cp), lambda n: (n, 0, 0, 0)),
            scratch_shapes=[
                pltpu.VMEM((H + 2, W + 2, Cinp), jnp.bfloat16),   # padded input
                pltpu.VMEM((Ho + 2, Wo + 2, Cp), jnp.bfloat16),   # padded conv2 in
            ],
        ),
        compiler_params=pltpu.CompilerParams(
            dimension_semantics=("parallel",),   # v7x: both TCs take batch items
            vmem_limit_bytes=vmem_limit),
        cost_estimate=pl.CostEstimate(
            flops=flops, transcendentals=2 * N, bytes_accessed=bytes_accessed),
    )(x_p, w1p, g1p, b1p, w2p, g2p, b2p)

    return out[..., :P].astype(x_nhwc.dtype)   # drop zero lane-padding channels


# ------------------------------ pure-JAX reference ---------------------------
# Mirrors the kernel's MXU numerics (bf16 operands, f32 accumulation); versus
# full-f32 PyTorch this differs only at the ~1e-2 level, which is standard for
# bf16 TPU matmul/conv kernels.
def _ref_gn(x, g, b, eps=_EPS):
    mean = jnp.mean(x, axis=(1, 2, 3), keepdims=True)
    var = jnp.mean((x - mean) ** 2, axis=(1, 2, 3), keepdims=True)
    y = (x - mean) / jnp.sqrt(var + eps)
    return y * g.reshape(1, 1, 1, -1) + b.reshape(1, 1, 1, -1)


def _ref_conv(x, w, stride):
    dn = lax.conv_dimension_numbers(x.shape, w.shape, ("NHWC", "HWIO", "NHWC"))
    return lax.conv_general_dilated(
        x.astype(jnp.bfloat16), w.astype(jnp.bfloat16), (stride, stride),
        ((1, 1), (1, 1)), dimension_numbers=dn,
        preferred_element_type=jnp.float32)


def ref_forward(x_nhwc, params, stride=1):
    w1, g1, b1, w2, g2, b2 = params
    out = jnp.maximum(_ref_gn(_ref_conv(x_nhwc, w1, stride), g1, b1), 0.0)
    out = jnp.maximum(_ref_gn(_ref_conv(out, w2, 1), g2, b2), 0.0)
    return out


if __name__ == "__main__":
    # Small shapes: batch=2, in_planes=4, planes=4, spatial 16x16, stride=1.
    N, Cin, P, H, W, stride = 2, 4, 4, 16, 16, 1

    key = jax.random.PRNGKey(0)
    kx, kw1, kw2, kg1, kb1, kg2, kb2 = jax.random.split(key, 7)

    # PyTorch input is NCHW; the kernel layout is NHWC.
    x_nchw = jax.random.normal(kx, (N, Cin, H, W), jnp.float32)
    x_nhwc = jnp.transpose(x_nchw, (0, 2, 3, 1))

    # Deterministic synthetic parameters (HWIO conv weights, per-channel affine).
    w1 = 0.1 * jax.random.normal(kw1, (3, 3, Cin, P), jnp.float32)
    w2 = 0.1 * jax.random.normal(kw2, (3, 3, P, P), jnp.float32)
    g1 = 1.0 + 0.1 * jax.random.normal(kg1, (P,), jnp.float32)
    b1 = 0.1 * jax.random.normal(kb1, (P,), jnp.float32)
    g2 = 1.0 + 0.1 * jax.random.normal(kg2, (P,), jnp.float32)
    b2 = 0.1 * jax.random.normal(kb2, (P,), jnp.float32)
    params = (w1, g1, b1, w2, g2, b2)

    out = jax.block_until_ready(basic_block_forward(x_nhwc, params, stride=stride))
    ref = jax.block_until_ready(ref_forward(x_nhwc, params, stride=stride))

    np.testing.assert_allclose(np.asarray(out), np.asarray(ref),
                               rtol=2e-3, atol=2e-3)
    print("KERNEL_OK")
</pallas_src>

<mosaic_0001>
module attributes {stable_mosaic.version = 11 : i64} {
  func.func @basic_block_kernel(%arg0: i32, %arg1: memref<1x16x16x128xbf16, #tpu.memory_space<vmem>>, %arg2: memref<3x3x128x128xbf16, #tpu.memory_space<vmem>>, %arg3: memref<1x128xf32, #tpu.memory_space<vmem>>, %arg4: memref<1x128xf32, #tpu.memory_space<vmem>>, %arg5: memref<3x3x128x128xbf16, #tpu.memory_space<vmem>>, %arg6: memref<1x128xf32, #tpu.memory_space<vmem>>, %arg7: memref<1x128xf32, #tpu.memory_space<vmem>>, %arg8: memref<1x16x16x128xf32, #tpu.memory_space<vmem>>, %arg9: memref<18x18x128xbf16, #tpu.memory_space<vmem>>, %arg10: memref<18x18x128xbf16, #tpu.memory_space<vmem>>) attributes {dimension_semantics = [#tpu.dimension_semantics<parallel>], iteration_bounds = array<i64: 2>, scalar_prefetch = 0 : i64, scratch_operands = 2 : i64, tpu.core_type = #tpu.core_type<tc>, window_params = [{transform_indices = @transform_0, window_bounds = array<i64: 1, 16, 16, 128>}, {pipeline_mode = #tpu.pipeline_mode<synchronous>, transform_indices = @transform_1, window_bounds = array<i64: 3, 3, 128, 128>}, {pipeline_mode = #tpu.pipeline_mode<synchronous>, transform_indices = @transform_2, window_bounds = array<i64: 1, 128>}, {pipeline_mode = #tpu.pipeline_mode<synchronous>, transform_indices = @transform_3, window_bounds = array<i64: 1, 128>}, {pipeline_mode = #tpu.pipeline_mode<synchronous>, transform_indices = @transform_4, window_bounds = array<i64: 3, 3, 128, 128>}, {pipeline_mode = #tpu.pipeline_mode<synchronous>, transform_indices = @transform_5, window_bounds = array<i64: 1, 128>}, {pipeline_mode = #tpu.pipeline_mode<synchronous>, transform_indices = @transform_6, window_bounds = array<i64: 1, 128>}, {transform_indices = @transform_7, window_bounds = array<i64: 1, 16, 16, 128>}]} {
    %cst = arith.constant 0.000000e+00 : bf16
    %0 = vector.broadcast %cst : bf16 to vector<1x18x128xbf16>
    %c0 = arith.constant 0 : index
    %c0_0 = arith.constant 0 : index
    %c0_1 = arith.constant 0 : index
    %1 = vector.load %arg9[%c0, %c0_0, %c0_1] : memref<18x18x128xbf16, #tpu.memory_space<vmem>>, vector<1x18x128xbf16>
    tpu.vector_store %arg9[%c0, %c0_0, %c0_1], %0 {strides = array<i32>} : memref<18x18x128xbf16, #tpu.memory_space<vmem>>, vector<1x18x128xbf16>,
    %cst_2 = arith.constant 0.000000e+00 : bf16
    %2 = vector.broadcast %cst_2 : bf16 to vector<1x18x128xbf16>
    %c17 = arith.constant 17 : index
    %c0_3 = arith.constant 0 : index
    %c0_4 = arith.constant 0 : index
    %3 = vector.load %arg9[%c17, %c0_3, %c0_4] : memref<18x18x128xbf16, #tpu.memory_space<vmem>>, vector<1x18x128xbf16>
    tpu.vector_store %arg9[%c17, %c0_3, %c0_4], %2 {strides = array<i32>} : memref<18x18x128xbf16, #tpu.memory_space<vmem>>, vector<1x18x128xbf16>,
    %cst_5 = arith.constant 0.000000e+00 : bf16
    %4 = vector.broadcast %cst_5 : bf16 to vector<18x1x128xbf16>
    %c0_6 = arith.constant 0 : index
    %c0_7 = arith.constant 0 : index
    %c0_8 = arith.constant 0 : index
    %5 = vector.load %arg9[%c0_6, %c0_7, %c0_8] : memref<18x18x128xbf16, #tpu.memory_space<vmem>>, vector<18x1x128xbf16>
    tpu.vector_store %arg9[%c0_6, %c0_7, %c0_8], %4 {strides = array<i32>} : memref<18x18x128xbf16, #tpu.memory_space<vmem>>, vector<18x1x128xbf16>,
    %cst_9 = arith.constant 0.000000e+00 : bf16
    %6 = vector.broadcast %cst_9 : bf16 to vector<18x1x128xbf16>
    %c0_10 = arith.constant 0 : index
    %c17_11 = arith.constant 17 : index
    %c0_12 = arith.constant 0 : index
    %7 = vector.load %arg9[%c0_10, %c17_11, %c0_12] : memref<18x18x128xbf16, #tpu.memory_space<vmem>>, vector<18x1x128xbf16>
    tpu.vector_store %arg9[%c0_10, %c17_11, %c0_12], %6 {strides = array<i32>} : memref<18x18x128xbf16, #tpu.memory_space<vmem>>, vector<18x1x128xbf16>,
    %c0_13 = arith.constant 0 : index
    %c0_14 = arith.constant 0 : index
    %c0_15 = arith.constant 0 : index
    %c0_16 = arith.constant 0 : index
    %8 = vector.load %arg1[%c0_13, %c0_14, %c0_15, %c0_16] : memref<1x16x16x128xbf16, #tpu.memory_space<vmem>>, vector<1x16x16x128xbf16>
    %9 = vector.shape_cast %8 : vector<1x16x16x128xbf16> to vector<16x16x128xbf16>
    %c1 = arith.constant 1 : index
    %c1_17 = arith.constant 1 : index
    %c0_18 = arith.constant 0 : index
    %10 = vector.load %arg9[%c1, %c1_17, %c0_18] : memref<18x18x128xbf16, #tpu.memory_space<vmem>>, vector<16x16x128xbf16>
    tpu.vector_store %arg9[%c1, %c1_17, %c0_18], %9 {strides = array<i32>} : memref<18x18x128xbf16, #tpu.memory_space<vmem>>, vector<16x16x128xbf16>,
    %c0_19 = arith.constant 0 : index
    %c0_20 = arith.constant 0 : index
    %c0_21 = arith.constant 0 : index
    %11 = vector.load %arg9[%c0_19, %c0_20, %c0_21] : memref<18x18x128xbf16, #tpu.memory_space<vmem>>, vector<16x16x128xbf16>
    %12 = vector.shape_cast %11 : vector<16x16x128xbf16> to vector<256x128xbf16>
    %c0_22 = arith.constant 0 : index
    %c0_23 = arith.constant 0 : index
    %c0_24 = arith.constant 0 : index
    %c0_25 = arith.constant 0 : index
    %13 = vector.load %arg2[%c0_22, %c0_23, %c0_24, %c0_25] : memref<3x3x128x128xbf16, #tpu.memory_space<vmem>>, vector<1x1x128x128xbf16>
    %14 = vector.shape_cast %13 : vector<1x1x128x128xbf16> to vector<128x128xbf16>
    %cst_26 = arith.constant dense<0.000000e+00> : vector<256x128xf32>
    %15 = tpu.matmul %12, %14, %cst_26 {dimension_numbers = #tpu.dot_dimension_numbers<[1], [0], [0], [1], [0, 0, 1, 1], [], []>} : vector<256x128xbf16>, vector<128x128xbf16>, vector<256x128xf32> -> vector<256x128xf32>
    %c0_27 = arith.constant 0 : index
    %c1_28 = arith.constant 1 : index
    %c0_29 = arith.constant 0 : index
    %16 = vector.load %arg9[%c0_27, %c1_28, %c0_29] : memref<18x18x128xbf16, #tpu.memory_space<vmem>>, vector<16x16x128xbf16>
    %17 = vector.shape_cast %16 : vector<16x16x128xbf16> to vector<256x128xbf16>
    %c0_30 = arith.constant 0 : index
    %c1_31 = arith.constant 1 : index
    %c0_32 = arith.constant 0 : index
    %c0_33 = arith.constant 0 : index
    %18 = vector.load %arg2[%c0_30, %c1_31, %c0_32, %c0_33] : memref<3x3x128x128xbf16, #tpu.memory_space<vmem>>, vector<1x1x128x128xbf16>
    %19 = vector.shape_cast %18 : vector<1x1x128x128xbf16> to vector<128x128xbf16>
    %cst_34 = arith.constant dense<0.000000e+00> : vector<256x128xf32>
    %20 = tpu.matmul %17, %19, %cst_34 {dimension_numbers = #tpu.dot_dimension_numbers<[1], [0], [0], [1], [0, 0, 1, 1], [], []>} : vector<256x128xbf16>, vector<128x128xbf16>, vector<256x128xf32> -> vector<256x128xf32>
    %21 = arith.addf %15, %20 : vector<256x128xf32>
    %c0_35 = arith.constant 0 : index
    %c2 = arith.constant 2 : index
    %c0_36 = arith.constant 0 : index
    %22 = vector.load %arg9[%c0_35, %c2, %c0_36] : memref<18x18x128xbf16, #tpu.memory_space<vmem>>, vector<16x16x128xbf16>
    %23 = vector.shape_cast %22 : vector<16x16x128xbf16> to vector<256x128xbf16>
    %c0_37 = arith.constant 0 : index
    %c2_38 = arith.constant 2 : index
    %c0_39 = arith.constant 0 : index
    %c0_40 = arith.constant 0 : index
    %24 = vector.load %arg2[%c0_37, %c2_38, %c0_39, %c0_40] : memref<3x3x128x128xbf16, #tpu.memory_space<vmem>>, vector<1x1x128x128xbf16>
    %25 = vector.shape_cast %24 : vector<1x1x128x128xbf16> to vector<128x128xbf16>
    %cst_41 = arith.constant dense<0.000000e+00> : vector<256x128xf32>
    %26 = tpu.matmul %23, %25, %cst_41 {dimension_numbers = #tpu.dot_dimension_numbers<[1], [0], [0], [1], [0, 0, 1, 1], [], []>} : vector<256x128xbf16>, vector<128x128xbf16>, vector<256x128xf32> -> vector<256x128xf32>
    %27 = arith.addf %21, %26 : vector<256x128xf32>
    %c1_42 = arith.constant 1 : index
    %c0_43 = arith.constant 0 : index
    %c0_44 = arith.constant 0 : index
    %28 = vector.load %arg9[%c1_42, %c0_43, %c0_44] : memref<18x18x128xbf16, #tpu.memory_space<vmem>>, vector<16x16x128xbf16>
    %29 = vector.shape_cast %28 : vector<16x16x128xbf16> to vector<256x128xbf16>
    %c1_45 = arith.constant 1 : index
    %c0_46 = arith.constant 0 : index
    %c0_47 = arith.constant 0 : index
    %c0_48 = arith.constant 0 : index
    %30 = vector.load %arg2[%c1_45, %c0_46, %c0_47, %c0_48] : memref<3x3x128x128xbf16, #tpu.memory_space<vmem>>, vector<1x1x128x128xbf16>
    %31 = vector.shape_cast %30 : vector<1x1x128x128xbf16> to vector<128x128xbf16>
    %cst_49 = arith.constant dense<0.000000e+00> : vector<256x128xf32>
    %32 = tpu.matmul %29, %31, %cst_49 {dimension_numbers = #tpu.dot_dimension_numbers<[1], [0], [0], [1], [0, 0, 1, 1], [], []>} : vector<256x128xbf16>, vector<128x128xbf16>, vector<256x128xf32> -> vector<256x128xf32>
    %33 = arith.addf %27, %32 : vector<256x128xf32>
    %c1_50 = arith.constant 1 : index
    %c1_51 = arith.constant 1 : index
    %c0_52 = arith.constant 0 : index
    %34 = vector.load %arg9[%c1_50, %c1_51, %c0_52] : memref<18x18x128xbf16, #tpu.memory_space<vmem>>, vector<16x16x128xbf16>
    %35 = vector.shape_cast %34 : vector<16x16x128xbf16> to vector<256x128xbf16>
    %c1_53 = arith.constant 1 : index
    %c1_54 = arith.constant 1 : index
    %c0_55 = arith.constant 0 : index
    %c0_56 = arith.constant 0 : index
    %36 = vector.load %arg2[%c1_53, %c1_54, %c0_55, %c0_56] : memref<3x3x128x128xbf16, #tpu.memory_space<vmem>>, vector<1x1x128x128xbf16>
    %37 = vector.shape_cast %36 : vector<1x1x128x128xbf16> to vector<128x128xbf16>
    %cst_57 = arith.constant dense<0.000000e+00> : vector<256x128xf32>
    %38 = tpu.matmul %35, %37, %cst_57 {dimension_numbers = #tpu.dot_dimension_numbers<[1], [0], [0], [1], [0, 0, 1, 1], [], []>} : vector<256x128xbf16>, vector<128x128xbf16>, vector<256x128xf32> -> vector<256x128xf32>
    %39 = arith.addf %33, %38 : vector<256x128xf32>
    %c1_58 = arith.constant 1 : index
    %c2_59 = arith.constant 2 : index
    %c0_60 = arith.constant 0 : index
    %40 = vector.load %arg9[%c1_58, %c2_59, %c0_60] : memref<18x18x128xbf16, #tpu.memory_space<vmem>>, vector<16x16x128xbf16>
    %41 = vector.shape_cast %40 : vector<16x16x128xbf16> to vector<256x128xbf16>
    %c1_61 = arith.constant 1 : index
    %c2_62 = arith.constant 2 : index
    %c0_63 = arith.constant 0 : index
    %c0_64 = arith.constant 0 : index
    %42 = vector.load %arg2[%c1_61, %c2_62, %c0_63, %c0_64] : memref<3x3x128x128xbf16, #tpu.memory_space<vmem>>, vector<1x1x128x128xbf16>
    %43 = vector.shape_cast %42 : vector<1x1x128x128xbf16> to vector<128x128xbf16>
    %cst_65 = arith.constant dense<0.000000e+00> : vector<256x128xf32>
    %44 = tpu.matmul %41, %43, %cst_65 {dimension_numbers = #tpu.dot_dimension_numbers<[1], [0], [0], [1], [0, 0, 1, 1], [], []>} : vector<256x128xbf16>, vector<128x128xbf16>, vector<256x128xf32> -> vector<256x128xf32>
    %45 = arith.addf %39, %44 : vector<256x128xf32>
    %c2_66 = arith.constant 2 : index
    %c0_67 = arith.constant 0 : index
    %c0_68 = arith.constant 0 : index
    %46 = vector.load %arg9[%c2_66, %c0_67, %c0_68] : memref<18x18x128xbf16, #tpu.memory_space<vmem>>, vector<16x16x128xbf16>
    %47 = vector.shape_cast %46 : vector<16x16x128xbf16> to vector<256x128xbf16>
    %c2_69 = arith.constant 2 : index
    %c0_70 = arith.constant 0 : index
    %c0_71 = arith.constant 0 : index
    %c0_72 = arith.constant 0 : index
    %48 = vector.load %arg2[%c2_69, %c0_70, %c0_71, %c0_72] : memref<3x3x128x128xbf16, #tpu.memory_space<vmem>>, vector<1x1x128x128xbf16>
    %49 = vector.shape_cast %48 : vector<1x1x128x128xbf16> to vector<128x128xbf16>
    %cst_73 = arith.constant dense<0.000000e+00> : vector<256x128xf32>
    %50 = tpu.matmul %47, %49, %cst_73 {dimension_numbers = #tpu.dot_dimension_numbers<[1], [0], [0], [1], [0, 0, 1, 1], [], []>} : vector<256x128xbf16>, vector<128x128xbf16>, vector<256x128xf32> -> vector<256x128xf32>
    %51 = arith.addf %45, %50 : vector<256x128xf32>
    %c2_74 = arith.constant 2 : index
    %c1_75 = arith.constant 1 : index
    %c0_76 = arith.constant 0 : index
    %52 = vector.load %arg9[%c2_74, %c1_75, %c0_76] : memref<18x18x128xbf16, #tpu.memory_space<vmem>>, vector<16x16x128xbf16>
    %53 = vector.shape_cast %52 : vector<16x16x128xbf16> to vector<256x128xbf16>
    %c2_77 = arith.constant 2 : index
    %c1_78 = arith.constant 1 : index
    %c0_79 = arith.constant 0 : index
    %c0_80 = arith.constant 0 : index
    %54 = vector.load %arg2[%c2_77, %c1_78, %c0_79, %c0_80] : memref<3x3x128x128xbf16, #tpu.memory_space<vmem>>, vector<1x1x128x128xbf16>
    %55 = vector.shape_cast %54 : vector<1x1x128x128xbf16> to vector<128x128xbf16>
    %cst_81 = arith.constant dense<0.000000e+00> : vector<256x128xf32>
    %56 = tpu.matmul %53, %55, %cst_81 {dimension_numbers = #tpu.dot_dimension_numbers<[1], [0], [0], [1], [0, 0, 1, 1], [], []>} : vector<256x128xbf16>, vector<128x128xbf16>, vector<256x128xf32> -> vector<256x128xf32>
    %57 = arith.addf %51, %56 : vector<256x128xf32>
    %c2_82 = arith.constant 2 : index
    %c2_83 = arith.constant 2 : index
    %c0_84 = arith.constant 0 : index
    %58 = vector.load %arg9[%c2_82, %c2_83, %c0_84] : memref<18x18x128xbf16, #tpu.memory_space<vmem>>, vector<16x16x128xbf16>
    %59 = vector.shape_cast %58 : vector<16x16x128xbf16> to vector<256x128xbf16>
    %c2_85 = arith.constant 2 : index
    %c2_86 = arith.constant 2 : index
    %c0_87 = arith.constant 0 : index
    %c0_88 = arith.constant 0 : index
    %60 = vector.load %arg2[%c2_85, %c2_86, %c0_87, %c0_88] : memref<3x3x128x128xbf16, #tpu.memory_space<vmem>>, vector<1x1x128x128xbf16>
    %61 = vector.shape_cast %60 : vector<1x1x128x128xbf16> to vector<128x128xbf16>
    %cst_89 = arith.constant dense<0.000000e+00> : vector<256x128xf32>
    %62 = tpu.matmul %59, %61, %cst_89 {dimension_numbers = #tpu.dot_dimension_numbers<[1], [0], [0], [1], [0, 0, 1, 1], [], []>} : vector<256x128xbf16>, vector<128x128xbf16>, vector<256x128xf32> -> vector<256x128xf32>
    %63 = arith.addf %57, %62 : vector<256x128xf32>
    %64 = vector.shape_cast %63 : vector<256x128xf32> to vector<1x256x128xf32>
    %cst_90 = arith.constant dense<0.000000e+00> : vector<1xf32>
    %65 = vector.multi_reduction <add>, %64, %cst_90 [1, 2] : vector<1x256x128xf32> to vector<1xf32>
    %66 = vector.shape_cast %65 : vector<1xf32> to vector<1x1x1xf32>
    %67 = vector.extract %66[0, 0, 0] : f32 from vector<1x1x1xf32>
    %cst_91 = arith.constant 0.000000e+00 : f32
    %68 = arith.addf %cst_91, %67 : f32
    %69 = arith.mulf %63, %63 : vector<256x128xf32>
    %70 = vector.shape_cast %69 : vector<256x128xf32> to vector<1x256x128xf32>
    %cst_92 = arith.constant dense<0.000000e+00> : vector<1xf32>
    %71 = vector.multi_reduction <add>, %70, %cst_92 [1, 2] : vector<1x256x128xf32> to vector<1xf32>
    %72 = vector.shape_cast %71 : vector<1xf32> to vector<1x1x1xf32>
    %73 = vector.extract %72[0, 0, 0] : f32 from vector<1x1x1xf32>
    %cst_93 = arith.constant 0.000000e+00 : f32
    %74 = arith.addf %cst_93, %73 : f32
    %75 = vector.shape_cast %63 : vector<256x128xf32> to vector<1x16x16x128xf32>
    %c0_94 = arith.constant 0 : index
    %c0_95 = arith.constant 0 : index
    %c0_96 = arith.constant 0 : index
    %c0_97 = arith.constant 0 : index
    %76 = vector.load %arg8[%c0_94, %c0_95, %c0_96, %c0_97] : memref<1x16x16x128xf32, #tpu.memory_space<vmem>>, vector<1x16x16x128xf32>
    tpu.vector_store %arg8[%c0_94, %c0_95, %c0_96, %c0_97], %75 {strides = array<i32>} : memref<1x16x16x128xf32, #tpu.memory_space<vmem>>, vector<1x16x16x128xf32>,
    %cst_98 = arith.constant 1.024000e+03 : f32
    %77 = arith.divf %68, %cst_98 : f32
    %cst_99 = arith.constant 1.024000e+03 : f32
    %78 = arith.divf %74, %cst_99 : f32
    %79 = arith.mulf %77, %77 : f32
    %80 = arith.subf %78, %79 : f32
    %cst_100 = arith.constant 0.000000e+00 : f32
    %81 = arith.maximumf %80, %cst_100 : f32
    %cst_101 = arith.constant 9.99999974E-6 : f32
    %82 = arith.addf %81, %cst_101 : f32
    %83 = math.rsqrt %82 : f32
    %c0_102 = arith.constant 0 : index
    %c0_103 = arith.constant 0 : index
    %84 = vector.load %arg3[%c0_102, %c0_103] : memref<1x128xf32, #tpu.memory_space<vmem>>, vector<1x128xf32>
    %85 = vector.broadcast %83 : f32 to vector<1x128xf32>
    %86 = arith.mulf %85, %84 : vector<1x128xf32>
    %c0_104 = arith.constant 0 : index
    %c0_105 = arith.constant 0 : index
    %87 = vector.load %arg4[%c0_104, %c0_105] : memref<1x128xf32, #tpu.memory_space<vmem>>, vector<1x128xf32>
    %88 = vector.broadcast %77 : f32 to vector<1x128xf32>
    %89 = arith.mulf %88, %86 : vector<1x128xf32>
    %90 = arith.subf %87, %89 : vector<1x128xf32>
    %cst_106 = arith.constant 0.000000e+00 : bf16
    %91 = vector.broadcast %cst_106 : bf16 to vector<1x18x128xbf16>
    %c0_107 = arith.constant 0 : index
    %c0_108 = arith.constant 0 : index
    %c0_109 = arith.constant 0 : index
    %92 = vector.load %arg10[%c0_107, %c0_108, %c0_109] : memref<18x18x128xbf16, #tpu.memory_space<vmem>>, vector<1x18x128xbf16>
    tpu.vector_store %arg10[%c0_107, %c0_108, %c0_109], %91 {strides = array<i32>} : memref<18x18x128xbf16, #tpu.memory_space<vmem>>, vector<1x18x128xbf16>,
    %cst_110 = arith.constant 0.000000e+00 : bf16
    %93 = vector.broadcast %cst_110 : bf16 to vector<1x18x128xbf16>
    %c17_111 = arith.constant 17 : index
    %c0_112 = arith.constant 0 : index
    %c0_113 = arith.constant 0 : index
    %94 = vector.load %arg10[%c17_111, %c0_112, %c0_113] : memref<18x18x128xbf16, #tpu.memory_space<vmem>>, vector<1x18x128xbf16>
    tpu.vector_store %arg10[%c17_111, %c0_112, %c0_113], %93 {strides = array<i32>} : memref<18x18x128xbf16, #tpu.memory_space<vmem>>, vector<1x18x128xbf16>,
    %cst_114 = arith.constant 0.000000e+00 : bf16
    %95 = vector.broadcast %cst_114 : bf16 to vector<18x1x128xbf16>
    %c0_115 = arith.constant 0 : index
    %c0_116 = arith.constant 0 : index
    %c0_117 = arith.constant 0 : index
    %96 = vector.load %arg10[%c0_115, %c0_116, %c0_117] : memref<18x18x128xbf16, #tpu.memory_space<vmem>>, vector<18x1x128xbf16>
    tpu.vector_store %arg10[%c0_115, %c0_116, %c0_117], %95 {strides = array<i32>} : memref<18x18x128xbf16, #tpu.memory_space<vmem>>, vector<18x1x128xbf16>,
    %cst_118 = arith.constant 0.000000e+00 : bf16
    %97 = vector.broadcast %cst_118 : bf16 to vector<18x1x128xbf16>
    %c0_119 = arith.constant 0 : index
    %c17_120 = arith.constant 17 : index
    %c0_121 = arith.constant 0 : index
    %98 = vector.load %arg10[%c0_119, %c17_120, %c0_121] : memref<18x18x128xbf16, #tpu.memory_space<vmem>>, vector<18x1x128xbf16>
    tpu.vector_store %arg10[%c0_119, %c17_120, %c0_121], %97 {strides = array<i32>} : memref<18x18x128xbf16, #tpu.memory_space<vmem>>, vector<18x1x128xbf16>,
    %c0_122 = arith.constant 0 : index
    %c0_123 = arith.constant 0 : index
    %c0_124 = arith.constant 0 : index
    %c0_125 = arith.constant 0 : index
    %99 = vector.load %arg8[%c0_122, %c0_123, %c0_124, %c0_125] : memref<1x16x16x128xf32, #tpu.memory_space<vmem>>, vector<1x16x16x128xf32>
    %100 = vector.shape_cast %99 : vector<1x16x16x128xf32> to vector<256x128xf32>
    %101 = vector.broadcast %86 : vector<1x128xf32> to vector<256x128xf32>
    %102 = arith.mulf %100, %101 : vector<256x128xf32>
    %103 = vector.broadcast %90 : vector<1x128xf32> to vector<256x128xf32>
    %104 = arith.addf %102, %103 : vector<256x128xf32>
    %cst_126 = arith.constant 0.000000e+00 : f32
    %105 = vector.broadcast %cst_126 : f32 to vector<256x128xf32>
    %106 = arith.maximumf %104, %105 : vector<256x128xf32>
    %107 = vector.shape_cast %106 : vector<256x128xf32> to vector<16x16x128xf32>
    %108 = arith.truncf %107 : vector<16x16x128xf32> to vector<16x16x128xbf16>
    %c1_127 = arith.constant 1 : index
    %c1_128 = arith.constant 1 : index
    %c0_129 = arith.constant 0 : index
    %109 = vector.load %arg10[%c1_127, %c1_128, %c0_129] : memref<18x18x128xbf16, #tpu.memory_space<vmem>>, vector<16x16x128xbf16>
    tpu.vector_store %arg10[%c1_127, %c1_128, %c0_129], %108 {strides = array<i32>} : memref<18x18x128xbf16, #tpu.memory_space<vmem>>, vector<16x16x128xbf16>,
    %c0_130 = arith.constant 0 : index
    %c0_131 = arith.constant 0 : index
    %c0_132 = arith.constant 0 : index
    %110 = vector.load %arg10[%c0_130, %c0_131, %c0_132] : memref<18x18x128xbf16, #tpu.memory_space<vmem>>, vector<16x16x128xbf16>
    %111 = vector.shape_cast %110 : vector<16x16x128xbf16> to vector<256x128xbf16>
    %c0_133 = arith.constant 0 : index
    %c0_134 = arith.constant 0 : index
    %c0_135 = arith.constant 0 : index
    %c0_136 = arith.constant 0 : index
    %112 = vector.load %arg5[%c0_133, %c0_134, %c0_135, %c0_136] : memref<3x3x128x128xbf16, #tpu.memory_space<vmem>>, vector<1x1x128x128xbf16>
    %113 = vector.shape_cast %112 : vector<1x1x128x128xbf16> to vector<128x128xbf16>
    %cst_137 = arith.constant dense<0.000000e+00> : vector<256x128xf32>
    %114 = tpu.matmul %111, %113, %cst_137 {dimension_numbers = #tpu.dot_dimension_numbers<[1], [0], [0], [1], [0, 0, 1, 1], [], []>} : vector<256x128xbf16>, vector<128x128xbf16>, vector<256x128xf32> -> vector<256x128xf32>
    %c0_138 = arith.constant 0 : index
    %c1_139 = arith.constant 1 : index
    %c0_140 = arith.constant 0 : index
    %115 = vector.load %arg10[%c0_138, %c1_139, %c0_140] : memref<18x18x128xbf16, #tpu.memory_space<vmem>>, vector<16x16x128xbf16>
    %116 = vector.shape_cast %115 : vector<16x16x128xbf16> to vector<256x128xbf16>
    %c0_141 = arith.constant 0 : index
    %c1_142 = arith.constant 1 : index
    %c0_143 = arith.constant 0 : index
    %c0_144 = arith.constant 0 : index
    %117 = vector.load %arg5[%c0_141, %c1_142, %c0_143, %c0_144] : memref<3x3x128x128xbf16, #tpu.memory_space<vmem>>, vector<1x1x128x128xbf16>
    %118 = vector.shape_cast %117 : vector<1x1x128x128xbf16> to vector<128x128xbf16>
    %cst_145 = arith.constant dense<0.000000e+00> : vector<256x128xf32>
    %119 = tpu.matmul %116, %118, %cst_145 {dimension_numbers = #tpu.dot_dimension_numbers<[1], [0], [0], [1], [0, 0, 1, 1], [], []>} : vector<256x128xbf16>, vector<128x128xbf16>, vector<256x128xf32> -> vector<256x128xf32>
    %120 = arith.addf %114, %119 : vector<256x128xf32>
    %c0_146 = arith.constant 0 : index
    %c2_147 = arith.constant 2 : index
    %c0_148 = arith.constant 0 : index
    %121 = vector.load %arg10[%c0_146, %c2_147, %c0_148] : memref<18x18x128xbf16, #tpu.memory_space<vmem>>, vector<16x16x128xbf16>
    %122 = vector.shape_cast %121 : vector<16x16x128xbf16> to vector<256x128xbf16>
    %c0_149 = arith.constant 0 : index
    %c2_150 = arith.constant 2 : index
    %c0_151 = arith.constant 0 : index
    %c0_152 = arith.constant 0 : index
    %123 = vector.load %arg5[%c0_149, %c2_150, %c0_151, %c0_152] : memref<3x3x128x128xbf16, #tpu.memory_space<vmem>>, vector<1x1x128x128xbf16>
    %124 = vector.shape_cast %123 : vector<1x1x128x128xbf16> to vector<128x128xbf16>
    %cst_153 = arith.constant dense<0.000000e+00> : vector<256x128xf32>
    %125 = tpu.matmul %122, %124, %cst_153 {dimension_numbers = #tpu.dot_dimension_numbers<[1], [0], [0], [1], [0, 0, 1, 1], [], []>} : vector<256x128xbf16>, vector<128x128xbf16>, vector<256x128xf32> -> vector<256x128xf32>
    %126 = arith.addf %120, %125 : vector<256x128xf32>
    %c1_154 = arith.constant 1 : index
    %c0_155 = arith.constant 0 : index
    %c0_156 = arith.constant 0 : index
    %127 = vector.load %arg10[%c1_154, %c0_155, %c0_156] : memref<18x18x128xbf16, #tpu.memory_space<vmem>>, vector<16x16x128xbf16>
    %128 = vector.shape_cast %127 : vector<16x16x128xbf16> to vector<256x128xbf16>
    %c1_157 = arith.constant 1 : index
    %c0_158 = arith.constant 0 : index
    %c0_159 = arith.constant 0 : index
    %c0_160 = arith.constant 0 : index
    %129 = vector.load %arg5[%c1_157, %c0_158, %c0_159, %c0_160] : memref<3x3x128x128xbf16, #tpu.memory_space<vmem>>, vector<1x1x128x128xbf16>
    %130 = vector.shape_cast %129 : vector<1x1x128x128xbf16> to vector<128x128xbf16>
    %cst_161 = arith.constant dense<0.000000e+00> : vector<256x128xf32>
    %131 = tpu.matmul %128, %130, %cst_161 {dimension_numbers = #tpu.dot_dimension_numbers<[1], [0], [0], [1], [0, 0, 1, 1], [], []>} : vector<256x128xbf16>, vector<128x128xbf16>, vector<256x128xf32> -> vector<256x128xf32>
    %132 = arith.addf %126, %131 : vector<256x128xf32>
    %c1_162 = arith.constant 1 : index
    %c1_163 = arith.constant 1 : index
    %c0_164 = arith.constant 0 : index
    %133 = vector.load %arg10[%c1_162, %c1_163, %c0_164] : memref<18x18x128xbf16, #tpu.memory_space<vmem>>, vector<16x16x128xbf16>
    %134 = vector.shape_cast %133 : vector<16x16x128xbf16> to vector<256x128xbf16>
    %c1_165 = arith.constant 1 : index
    %c1_166 = arith.constant 1 : index
    %c0_167 = arith.constant 0 : index
    %c0_168 = arith.constant 0 : index
    %135 = vector.load %arg5[%c1_165, %c1_166, %c0_167, %c0_168] : memref<3x3x128x128xbf16, #tpu.memory_space<vmem>>, vector<1x1x128x128xbf16>
    %136 = vector.shape_cast %135 : vector<1x1x128x128xbf16> to vector<128x128xbf16>
    %cst_169 = arith.constant dense<0.000000e+00> : vector<256x128xf32>
    %137 = tpu.matmul %134, %136, %cst_169 {dimension_numbers = #tpu.dot_dimension_numbers<[1], [0], [0], [1], [0, 0, 1, 1], [], []>} : vector<256x128xbf16>, vector<128x128xbf16>, vector<256x128xf32> -> vector<256x128xf32>
    %138 = arith.addf %132, %137 : vector<256x128xf32>
    %c1_170 = arith.constant 1 : index
    %c2_171 = arith.constant 2 : index
    %c0_172 = arith.constant 0 : index
    %139 = vector.load %arg10[%c1_170, %c2_171, %c0_172] : memref<18x18x128xbf16, #tpu.memory_space<vmem>>, vector<16x16x128xbf16>
    %140 = vector.shape_cast %139 : vector<16x16x128xbf16> to vector<256x128xbf16>
    %c1_173 = arith.constant 1 : index
    %c2_174 = arith.constant 2 : index
    %c0_175 = arith.constant 0 : index
    %c0_176 = arith.constant 0 : index
    %141 = vector.load %arg5[%c1_173, %c2_174, %c0_175, %c0_176] : memref<3x3x128x128xbf16, #tpu.memory_space<vmem>>, vector<1x1x128x128xbf16>
    %142 = vector.shape_cast %141 : vector<1x1x128x128xbf16> to vector<128x128xbf16>
    %cst_177 = arith.constant dense<0.000000e+00> : vector<256x128xf32>
    %143 = tpu.matmul %140, %142, %cst_177 {dimension_numbers = #tpu.dot_dimension_numbers<[1], [0], [0], [1], [0, 0, 1, 1], [], []>} : vector<256x128xbf16>, vector<128x128xbf16>, vector<256x128xf32> -> vector<256x128xf32>
    %144 = arith.addf %138, %143 : vector<256x128xf32>
    %c2_178 = arith.constant 2 : index
    %c0_179 = arith.constant 0 : index
    %c0_180 = arith.constant 0 : index
    %145 = vector.load %arg10[%c2_178, %c0_179, %c0_180] : memref<18x18x128xbf16, #tpu.memory_space<vmem>>, vector<16x16x128xbf16>
    %146 = vector.shape_cast %145 : vector<16x16x128xbf16> to vector<256x128xbf16>
    %c2_181 = arith.constant 2 : index
    %c0_182 = arith.constant 0 : index
    %c0_183 = arith.constant 0 : index
    %c0_184 = arith.constant 0 : index
    %147 = vector.load %arg5[%c2_181, %c0_182, %c0_183, %c0_184] : memref<3x3x128x128xbf16, #tpu.memory_space<vmem>>, vector<1x1x128x128xbf16>
    %148 = vector.shape_cast %147 : vector<1x1x128x128xbf16> to vector<128x128xbf16>
    %cst_185 = arith.constant dense<0.000000e+00> : vector<256x128xf32>
    %149 = tpu.matmul %146, %148, %cst_185 {dimension_numbers = #tpu.dot_dimension_numbers<[1], [0], [0], [1], [0, 0, 1, 1], [], []>} : vector<256x128xbf16>, vector<128x128xbf16>, vector<256x128xf32> -> vector<256x128xf32>
    %150 = arith.addf %144, %149 : vector<256x128xf32>
    %c2_186 = arith.constant 2 : index
    %c1_187 = arith.constant 1 : index
    %c0_188 = arith.constant 0 : index
    %151 = vector.load %arg10[%c2_186, %c1_187, %c0_188] : memref<18x18x128xbf16, #tpu.memory_space<vmem>>, vector<16x16x128xbf16>
    %152 = vector.shape_cast %151 : vector<16x16x128xbf16> to vector<256x128xbf16>
    %c2_189 = arith.constant 2 : index
    %c1_190 = arith.constant 1 : index
    %c0_191 = arith.constant 0 : index
    %c0_192 = arith.constant 0 : index
    %153 = vector.load %arg5[%c2_189, %c1_190, %c0_191, %c0_192] : memref<3x3x128x128xbf16, #tpu.memory_space<vmem>>, vector<1x1x128x128xbf16>
    %154 = vector.shape_cast %153 : vector<1x1x128x128xbf16> to vector<128x128xbf16>
    %cst_193 = arith.constant dense<0.000000e+00> : vector<256x128xf32>
    %155 = tpu.matmul %152, %154, %cst_193 {dimension_numbers = #tpu.dot_dimension_numbers<[1], [0], [0], [1], [0, 0, 1, 1], [], []>} : vector<256x128xbf16>, vector<128x128xbf16>, vector<256x128xf32> -> vector<256x128xf32>
    %156 = arith.addf %150, %155 : vector<256x128xf32>
    %c2_194 = arith.constant 2 : index
    %c2_195 = arith.constant 2 : index
    %c0_196 = arith.constant 0 : index
    %157 = vector.load %arg10[%c2_194, %c2_195, %c0_196] : memref<18x18x128xbf16, #tpu.memory_space<vmem>>, vector<16x16x128xbf16>
    %158 = vector.shape_cast %157 : vector<16x16x128xbf16> to vector<256x128xbf16>
    %c2_197 = arith.constant 2 : index
    %c2_198 = arith.constant 2 : index
    %c0_199 = arith.constant 0 : index
    %c0_200 = arith.constant 0 : index
    %159 = vector.load %arg5[%c2_197, %c2_198, %c0_199, %c0_200] : memref<3x3x128x128xbf16, #tpu.memory_space<vmem>>, vector<1x1x128x128xbf16>
    %160 = vector.shape_cast %159 : vector<1x1x128x128xbf16> to vector<128x128xbf16>
    %cst_201 = arith.constant dense<0.000000e+00> : vector<256x128xf32>
    %161 = tpu.matmul %158, %160, %cst_201 {dimension_numbers = #tpu.dot_dimension_numbers<[1], [0], [0], [1], [0, 0, 1, 1], [], []>} : vector<256x128xbf16>, vector<128x128xbf16>, vector<256x128xf32> -> vector<256x128xf32>
    %162 = arith.addf %156, %161 : vector<256x128xf32>
    %163 = vector.shape_cast %162 : vector<256x128xf32> to vector<1x256x128xf32>
    %cst_202 = arith.constant dense<0.000000e+00> : vector<1xf32>
    %164 = vector.multi_reduction <add>, %163, %cst_202 [1, 2] : vector<1x256x128xf32> to vector<1xf32>
    %165 = vector.shape_cast %164 : vector<1xf32> to vector<1x1x1xf32>
    %166 = vector.extract %165[0, 0, 0] : f32 from vector<1x1x1xf32>
    %cst_203 = arith.constant 0.000000e+00 : f32
    %167 = arith.addf %cst_203, %166 : f32
    %168 = arith.mulf %162, %162 : vector<256x128xf32>
    %169 = vector.shape_cast %168 : vector<256x128xf32> to vector<1x256x128xf32>
    %cst_204 = arith.constant dense<0.000000e+00> : vector<1xf32>
    %170 = vector.multi_reduction <add>, %169, %cst_204 [1, 2] : vector<1x256x128xf32> to vector<1xf32>
    %171 = vector.shape_cast %170 : vector<1xf32> to vector<1x1x1xf32>
    %172 = vector.extract %171[0, 0, 0] : f32 from vector<1x1x1xf32>
    %cst_205 = arith.constant 0.000000e+00 : f32
    %173 = arith.addf %cst_205, %172 : f32
    %174 = vector.shape_cast %162 : vector<256x128xf32> to vector<1x16x16x128xf32>
    %c0_206 = arith.constant 0 : index
    %c0_207 = arith.constant 0 : index
    %c0_208 = arith.constant 0 : index
    %c0_209 = arith.constant 0 : index
    %175 = vector.load %arg8[%c0_206, %c0_207, %c0_208, %c0_209] : memref<1x16x16x128xf32, #tpu.memory_space<vmem>>, vector<1x16x16x128xf32>
    tpu.vector_store %arg8[%c0_206, %c0_207, %c0_208, %c0_209], %174 {strides = array<i32>} : memref<1x16x16x128xf32, #tpu.memory_space<vmem>>, vector<1x16x16x128xf32>,
    %cst_210 = arith.constant 1.024000e+03 : f32
    %176 = arith.divf %167, %cst_210 : f32
    %cst_211 = arith.constant 1.024000e+03 : f32
    %177 = arith.divf %173, %cst_211 : f32
    %178 = arith.mulf %176, %176 : f32
    %179 = arith.subf %177, %178 : f32
    %cst_212 = arith.constant 0.000000e+00 : f32
    %180 = arith.maximumf %179, %cst_212 : f32
    %cst_213 = arith.constant 9.99999974E-6 : f32
    %181 = arith.addf %180, %cst_213 : f32
    %182 = math.rsqrt %181 : f32
    %c0_214 = arith.constant 0 : index
    %c0_215 = arith.constant 0 : index
    %183 = vector.load %arg6[%c0_214, %c0_215] : memref<1x128xf32, #tpu.memory_space<vmem>>, vector<1x128xf32>
    %184 = vector.broadcast %182 : f32 to vector<1x128xf32>
    %185 = arith.mulf %184, %183 : vector<1x128xf32>
    %c0_216 = arith.constant 0 : index
    %c0_217 = arith.constant 0 : index
    %186 = vector.load %arg7[%c0_216, %c0_217] : memref<1x128xf32, #tpu.memory_space<vmem>>, vector<1x128xf32>
    %187 = vector.broadcast %176 : f32 to vector<1x128xf32>
    %188 = arith.mulf %187, %185 : vector<1x128xf32>
    %189 = arith.subf %186, %188 : vector<1x128xf32>
    %c0_218 = arith.constant 0 : index
    %c0_219 = arith.constant 0 : index
    %c0_220 = arith.constant 0 : index
    %c0_221 = arith.constant 0 : index
    %190 = vector.load %arg8[%c0_218, %c0_219, %c0_220, %c0_221] : memref<1x16x16x128xf32, #tpu.memory_space<vmem>>, vector<1x16x16x128xf32>
    %191 = vector.shape_cast %190 : vector<1x16x16x128xf32> to vector<256x128xf32>
    %192 = vector.broadcast %185 : vector<1x128xf32> to vector<256x128xf32>
    %193 = arith.mulf %191, %192 : vector<256x128xf32>
    %194 = vector.broadcast %189 : vector<1x128xf32> to vector<256x128xf32>
    %195 = arith.addf %193, %194 : vector<256x128xf32>
    %cst_222 = arith.constant 0.000000e+00 : f32
    %196 = vector.broadcast %cst_222 : f32 to vector<256x128xf32>
    %197 = arith.maximumf %195, %196 : vector<256x128xf32>
    %198 = vector.shape_cast %197 : vector<256x128xf32> to vector<1x16x16x128xf32>
    %c0_223 = arith.constant 0 : index
    %c0_224 = arith.constant 0 : index
    %c0_225 = arith.constant 0 : index
    %c0_226 = arith.constant 0 : index
    %199 = vector.load %arg8[%c0_223, %c0_224, %c0_225, %c0_226] : memref<1x16x16x128xf32, #tpu.memory_space<vmem>>, vector<1x16x16x128xf32>
    tpu.vector_store %arg8[%c0_223, %c0_224, %c0_225, %c0_226], %198 {strides = array<i32>} : memref<1x16x16x128xf32, #tpu.memory_space<vmem>>, vector<1x16x16x128xf32>,
    return
  }
  func.func @transform_0(%arg0: i32) -> (i32, i32, i32, i32) {
    %c0_i32 = arith.constant 0 : i32
    %c0_i32_0 = arith.constant 0 : i32
    %c0_i32_1 = arith.constant 0 : i32
    %c0_i32_2 = arith.constant 0 : i32
    return %arg0, %c0_i32, %c0_i32_0, %c0_i32_1 : i32, i32, i32, i32
  }
  func.func @transform_1(%arg0: i32) -> (i32, i32, i32, i32) {
    %c0_i32 = arith.constant 0 : i32
    %c0_i32_0 = arith.constant 0 : i32
    %c0_i32_1 = arith.constant 0 : i32
    %c0_i32_2 = arith.constant 0 : i32
    %c0_i32_3 = arith.constant 0 : i32
    return %c0_i32, %c0_i32_0, %c0_i32_1, %c0_i32_2 : i32, i32, i32, i32
  }
  func.func @transform_2(%arg0: i32) -> (i32, i32) {
    %c0_i32 = arith.constant 0 : i32
    %c0_i32_0 = arith.constant 0 : i32
    %c0_i32_1 = arith.constant 0 : i32
    return %c0_i32, %c0_i32_0 : i32, i32
  }
  func.func @transform_3(%arg0: i32) -> (i32, i32) {
    %c0_i32 = arith.constant 0 : i32
    %c0_i32_0 = arith.constant 0 : i32
    %c0_i32_1 = arith.constant 0 : i32
    return %c0_i32, %c0_i32_0 : i32, i32
  }
  func.func @transform_4(%arg0: i32) -> (i32, i32, i32, i32) {
    %c0_i32 = arith.constant 0 : i32
    %c0_i32_0 = arith.constant 0 : i32
    %c0_i32_1 = arith.constant 0 : i32
    %c0_i32_2 = arith.constant 0 : i32
    %c0_i32_3 = arith.constant 0 : i32
    return %c0_i32, %c0_i32_0, %c0_i32_1, %c0_i32_2 : i32, i32, i32, i32
  }
  func.func @transform_5(%arg0: i32) -> (i32, i32) {
    %c0_i32 = arith.constant 0 : i32
    %c0_i32_0 = arith.constant 0 : i32
    %c0_i32_1 = arith.constant 0 : i32
    return %c0_i32, %c0_i32_0 : i32, i32
  }
  func.func @transform_6(%arg0: i32) -> (i32, i32) {
    %c0_i32 = arith.constant 0 : i32
    %c0_i32_0 = arith.constant 0 : i32
    %c0_i32_1 = arith.constant 0 : i32
    return %c0_i32, %c0_i32_0 : i32, i32
  }
  func.func @transform_7(%arg0: i32) -> (i32, i32, i32, i32) {
    %c0_i32 = arith.constant 0 : i32
    %c0_i32_0 = arith.constant 0 : i32
    %c0_i32_1 = arith.constant 0 : i32
    %c0_i32_2 = arith.constant 0 : i32
    return %arg0, %c0_i32, %c0_i32_0, %c0_i32_1 : i32, i32, i32, i32
  }
}

</mosaic_0001>

<bundles_post_ra>
// kernel: tpu_custom_call.1
= control target key start
LH: loop header
LB: loop body
LE: loop exit
PB: predicated region body
PF: predicated region fallthrough
CT: control target
= control target key end

     0   :  { %s15712_s0 = inlined_call_operand.hbm [shape: bf16[2,16,16,128], index: 0, kind: input, shape index: {}]   ;;  %s15713_s1 = inlined_call_operand.hbm [shape: bf16[3,3,128,128], index: 1, kind: input, shape index: {}]   ;;  %s15714_s2 = inlined_call_operand.vmem [shape: f32[1,128], index: 2, kind: input, shape index: {}]   ;;  %s15715_s3 = inlined_call_operand.vmem [shape: f32[1,128], index: 3, kind: input, shape index: {}]   ;;  %s15716_s4 = inlined_call_operand.hbm [shape: bf16[3,3,128,128], index: 4, kind: input, shape index: {}]   ;;  %s15717_s5 = inlined_call_operand.vmem [shape: f32[1,128], index: 5, kind: input, shape index: {}]   ;;  %s15718_s6 = inlined_call_operand.vmem [shape: f32[1,128], index: 6, kind: input, shape index: {}]   ;;  %s15719_s7 = inlined_call_operand.hbm [shape: f32[2,16,16,128], index: 7, kind: output, shape index: {}]  }
   0x1   :  { %15748 = sst [smem:[#allocation46_spill]] %s15713_s1 }
   0x2   :  { %12 = vsyncpa [#allocation5], 0 }
   0x3   :  { %14 = vsyncpa [#allocation5 + $0x1], 0 }
   0x4   :  { %15 = vsyncpa [#allocation8], 0 }
   0x5   :  { %16 = vsyncpa [#allocation6], 0 }
   0x6   :  { %18 = vsyncpa [#allocation6 + $0x1], 0  ;;  %s12288_s24 = smov 0   ;;  %s12290_s25 = smov 0  }
   0x7   :  { %s12292_s26 = smov 0   ;;  %s12294_s27 = smov 0  }
   0x8 LB: > { %s12309_s28 = sadd.s32 4294967295, %s12237_s27   ;;  %s10598_s29 = sadd.s32 4294967294, %s12237_s27   ;;  %s12237_s27 = sphi %s12294_s27, %s15919_s27   ;;  %s12233_s26 = sphi %s12292_s26, %s15918_s26   ;;  %s12229_s25 = sphi %s12290_s25, %s15917_s25   ;;  %s12225_s24 = sphi %s12288_s24, %s15916_s24  }
   0x9   : > { %p44_p0 = scmp.ne.s32.totalorder %s12229_s25, %s12225_s24  ;;  %p45_p1 = scmp.eq.s32.totalorder %s12309_s28, 0 }
   0xa   : > { %p194_p2 = scmp.eq.s32.totalorder %s12309_s28, 1  ;;  %p200_p3 = scmp.eq.s32.totalorder %s10598_s29, 1 }
   0xb   : > { %p12318_p4 = por %p45_p1, %p44_p0  ;;  %p10599_p5 = scmp.ge.s32.totalorder %s12237_s27, 1 }
   0xc   : > { %p12323_p6 = por %p200_p3, %p44_p0  ;;  %p207_p7 = scmp.lt.s32.totalorder %s12237_s27, 3 }
   0xd   : > { %s15751_s1 = sld [smem:[#allocation46_spill]]  ;;  %s12239_s13 = smov [#allocation7]  }
   0xe   : > { %p12331_p8 = pnand %p10599_p5, %p207_p7  ;;  %s220_s14 = sshll.u32 %s12239_s13, 4  ;;  %s221_s14 = int_to_ptr.vmem [resolvable:$true] %s220_s14 }
   0xf   : > { %s238_s17 = sshll.u32 %s15716_s4, 4  ;;  %s15720_s18 = smov 64   ;;  %s239_s17 = int_to_ptr.hbm [resolvable:$true] %s238_s17 }
  0x10   : > { %p11956_p9 = pneg %p12331_p8  ;;  %s15721_s19 = smov 4  }
  0x11   : > { %s12242_s20 = smov [#allocation9]   ;;  %s12350_s22 = sadd.s32 1, %s12237_s27  }
  0x12   : > { %p11957_p10 = pnand %p11956_p9, %p45_p1  ;;  %s240_s21 = sshll.u32 %s12242_s20, 4  ;;  %s241_s21 = int_to_ptr.vmem [resolvable:$true] %s240_s21 }
  0x13   : > { %s218_s11 = sshll.u32 %s15751_s1, 4  ;;  %s31_s23 = sadd.s32 1, %s12233_s26  ;;  %s219_s11 = int_to_ptr.hbm [resolvable:$true] %s218_s11 }
  0x14   : > { %11959 = dma.hbm_to_vmem [thread:$0]  (!%p11957_p10), %s219_s11, 9216, %s221_s14, [#allocation8], %s15720_s18, %s15720_s18, %s15721_s19  }
  0x15   : > { %11962 = dma.hbm_to_vmem [thread:$0]  (!%p11957_p10), %s239_s17, 9216, %s241_s21, [#allocation8], %s15720_s18, %s15720_s18, %s15721_s19  }
  0x16   : > { %s28_s29 = ssub.s32 %s12237_s27, %s12350_s22  ;;  %p38_p12 = scmp.ne.s32.totalorder %s12233_s26, %s12229_s25 }
  0x17   : > { %p29_p13 = scmp.eq.s32.totalorder %s28_s29, 0  ;;  %p39_p0 = scmp.eq.s32.totalorder %s12237_s27, 0 }
  0x18   : > { %p12360_p3 = por %p194_p2, %p38_p12  ;;  %p11973_p5 = scmp.lt.s32.totalorder %s12237_s27, 2 }
  0x19   : > { %s12366_s10 = scalar_select %p29_p13, %s12233_s26, %s31_s23  }
  0x1a   : > { %p40_p7 = por %p39_p0, %p38_p12  ;;  %s260_s11 = sand.u32 1, %s12233_s26  }
  0x1b   : > { %s10603_s13 = sshll.u32 %s260_s11, 7  ;;  %s11672_s14 = sshll.u32 %s12237_s27, 7 }
  0x1c   : > { %s269_s17 = scalar_lea.hbm %s15712_s0, %s11672_s14  ;;  %s264_s20 = scalar_lea.vmem [#allocation4], %s10603_s13 }
  0x1d   : > { %s272_s21 = sshll.u32 %s264_s20, 4  ;;  %s270_s29 = sshll.u32 %s269_s17, 4  ;;  %s273_s21 = int_to_ptr.vmem [resolvable:$true] %s272_s21  ;;  %s271_s29 = int_to_ptr.hbm [resolvable:$true] %s270_s29 }
  0x1e   : > { %p12373_p2 = pnand %p11973_p5, %p40_p7  ;;  %s261_s23 = scalar_lea.sflag [#allocation5], %s260_s11 }
  0x1f   : > { %s12137_s19 = sshra.s32 %s271_s29, 4  ;;  %s12144_s15 = scalar_lea.hbm %s15712_s0, 256  ;;  %s12138_s19 = int_to_ptr.hbm [resolvable:$true] %s12137_s19 }
  0x20   : > { %s12139_s1 = scalar_lea.hbm %s12138_s19, 128  ;;  %p12141_p10 = pneg %p12373_p2 }
  0x21   : > { %p12140_p9 = scmp.ne.s32.totalorder %s12138_s19, %s12139_s1  ;;  %p12145_p0 = scmp.lt.s32.totalorder %s12138_s19, %s15712_s0 }
  0x22   : > { %p12146_p5 = scmp.lt.s32.totalorder %s12144_s15, %s12139_s1 }
  0x23   : > { %p12142_p12 = pnand %p12141_p10, %p12140_p9 }
  0x24   : > { %p12147_p7 = por %p12146_p5, %p12145_p0 }
  0x25   : > { %p12143_p13 = pneg %p12142_p12 }
  0x27   : > { %p12148_p11 = pnand %p12147_p7, %p12143_p13 }
  0x29   : > { %12151 = shalt.err (!%p12148_p11)
}
  0x2a   : > { %s15755_s11 = smov 4   ;;  %s15756_s20 = smov 64  }
  0x2b   : > { %11966 = dma.hbm_to_vmem [thread:$0]  (!%p12373_p2), %s271_s29, 2048, %s273_s21, %s261_s23, %s15756_s20, %s15756_s20, %s15755_s11  }
  0x2c   : > { %284 = sbr.rel (%p12331_p8) target bundleno = 2387 (0x953), region = 48 }
  0x31   : > { %s12393_s14 = sand.u32 1, %s12229_s25  }
  0x32   : > { %s10607_s19 = sshll.u32 %s12393_s14, 7  ;;  %s287_s1 = scalar_lea.sflag [#allocation5], %s12393_s14 }
  0x33   : > { %s12397_s13 = scalar_lea.vmem [#allocation4], %s10607_s19 }
  0x34   : > { %12212 = dma.done.wait (%p12318_p4), %s287_s1, 2048  }
  0x35   : > { %12214 = vsyncadd (%p12318_p4), %s287_s1, 4294965248 }
  0x36   : > { %12216 = dma.done.wait (%p45_p1), [#allocation8], 18432  }
  0x37   : > { %12218 = vsyncadd (%p45_p1), [#allocation8], 4294948864  ;;  %v12243_v0 = vmov 0   ;;  %vm340_vm0 = vcmask 1040384   ;;  %vm341_vm1 = vsmask.f32 256 }
  0x38   : > { %333 = vst [vmem:[#allocation2] sm:$0xf] %v12243_v0  ;;  %v11704_v1 = vld [vmem:[#allocation7 + $0x78] sm:$0xff]  ;;  %vm397_vm2 = vsmask.f32 7938  ;;  %v11703_v3 = vld [vmem:[#allocation7 + $0x70] sm:$0xff]  ;;  %vm12416_vm3 = vmand %vm340_vm0, %vm341_vm1 }
  0x39   : > { %334 = vst [vmem:[#allocation2 + $0x4] sm:$0xf] %v12243_v0  ;;  %v11696_v2 = vld [vmem:[#allocation7 + $0x38] sm:$0xff]  ;;  %11914 = vmatpush.bf16.msra.mxu2 %v11704_v1  ;;  %v11695_v4 = vld [vmem:[#allocation7 + $0x30] sm:$0xff]  ;;  %v15757_v5 = vmov 0  ;;  %1502 = vmatpush.bf16.msra.mxu0 %v11704_v1  ;;  %vm12423_vm4 = vmand %vm340_vm0, %vm397_vm2  ;;  %v15760_v6 = vmov 0 }
  0x3a   : > { %335 = vst [vmem:[#allocation2 + $0x8] sm:$0x1] %v12243_v0  ;;  %11922 = vmatpush.bf16.msra.mxu3 %v11696_v2  ;;  %v15758_v5 = vsel %vm12416_vm3, 4294967295, %v15757_v5  ;;  %1735 = vmatpush.bf16.msra.mxu1 %v11696_v2  ;;  %v15761_v6 = vsel %vm12423_vm4, 4294967295, %v15760_v6  ;;  %v11702_v7 = vld [vmem:[#allocation7 + $0x68] sm:$0xff]  ;;  %vm808_vm6 = vcmask 1043456  }
  0x3b   : > { %337 = vst [vmem:[#allocation2 + $0xcc] sm:$0xf] %v12243_v0  ;;  %vm485_vm5 = vsmask.f32 4368  ;;  %v11694_v8 = vld [vmem:[#allocation7 + $0x28] sm:$0xff]  ;;  %v11701_v20 = vld [vmem:[#allocation7 + $0x60] sm:$0xff]  ;;  %vm12447_vm10 = vmand %vm808_vm6, %vm397_vm2 }
  0x3c   : > { %338 = vst [vmem:[#allocation2 + $0xd0] sm:$0xf] %v12243_v0  ;;  %v367_v9 = vld [vmem:[#allocation2 + $0x60] sm:$0x1]  ;;  %v423_v10 = vld [vmem:[#allocation2 + $0x68] sm:$0x1]  ;;  %vm12439_vm7 = vmor %vm341_vm1, %vm485_vm5 }
  0x3d   : > { %339 = vst [vmem:[#allocation2 + $0xd4] sm:$0x1] %v12243_v0  ;;  %11915 = vmatpush.bf16.msra.mxu2 %v11703_v3  ;;  %v368_v11 = vsel %vm12416_vm3, 0, %v367_v9  ;;  %v424_v12 = vsel %vm12423_vm4, 0, %v423_v10  ;;  %v467_v13 = vld [vmem:[%s12397_s13 + $0x38] sm:$0xf]  ;;  %1503 = vmatpush.bf16.msra.mxu0 %v11703_v3 }
  0x3e   : > { %5269 = vst [vmem:[#allocation3] sm:$0xf] %v12243_v0  ;;  %11923 = vmatpush.bf16.msra.mxu3 %v11695_v4  ;;  %v468_v14 = vld [vmem:[%s12397_s13 + $0x3c] sm:$0xf]  ;;  %1736 = vmatpush.bf16.msra.mxu1 %v11695_v4  ;;  %v607_v15 = vshrl.u32 %v467_v13, 16  ;;  %v610_v16 = vshll.u32 %v467_v13, 16 }
  0x3f   : > { %15759 = vst [vmem:[#allocation14_spill] sm:$0xff] %v15758_v5  ;;  %v615_v17 = vshrl.u32 %v468_v14, 16  ;;  %v618_v18 = vshll.u32 %v468_v14, 16  ;;  %v343_v19 = vld [vmem:[#allocation2] sm:$0x1]  ;;  %v11693_v25 = vld [vmem:[#allocation7 + $0x20] sm:$0xff] }
  0x40   : > { %5270 = vst [vmem:[#allocation3 + $0x4] sm:$0xf] %v12243_v0  ;;  %v609_v21 = vrot.slane %v607_v15, 7  ;;  %v344_v23 = vsel %vm12416_vm3, 0, %v343_v19  ;;  %v15763_v26 = vmov 0  ;;  %v11700_v33 = vld [vmem:[#allocation7 + $0x58] sm:$0xff] }
  0x41   : > { %15762 = vst [vmem:[#allocation15_spill] sm:$0xff] %v15761_v6  ;;  %v617_v22 = vrot.slane %v615_v17, 7  ;;  %v399_v24 = vld [vmem:[#allocation2 + $0x8] sm:$0x1]  ;;  %11916 = vmatpush.bf16.msra.mxu2 %v11702_v7  ;;  %v15764_v26 = vsel %vm12439_vm7, 4294967295, %v15763_v26  ;;  %1504 = vmatpush.bf16.msra.mxu0 %v11702_v7  ;;  %v15766_v36 = vmov 0 }
  0x42   : > { %5271 = vst [vmem:[#allocation3 + $0x8] sm:$0x1] %v12243_v0  ;;  %11924 = vmatpush.bf16.msra.mxu3 %v11694_v8  ;;  %v400_v27 = vsel %vm12423_vm4, 0, %v399_v24  ;;  %v923_v28 = vld [vmem:[#allocation2 + $0x4] sm:$0xf]  ;;  %1737 = vmatpush.bf16.msra.mxu1 %v11694_v8  ;;  %v612_v29 = vor.u32 %v610_v16, %v609_v21  ;;  %v613_v30 = vrot.slane %v609_v21, 4 }
  0x43   : > { %5273 = vst [vmem:[#allocation3 + $0xcc] sm:$0xf] %v12243_v0  ;;  %v620_v31 = vor.u32 %v618_v18, %v617_v22  ;;  %vm986_vm8 = vsmask.f32 3328  ;;  %vm987_vm9 = vsmask.f32 7440 }
  0x44   : > { %369 = vst [vmem:[#allocation2 + $0x60] sm:$0x1] %v368_v11  ;;  %v370_v32 = vld [vmem:[#allocation2 + $0x6c] sm:$0x1]  ;;  %v622_v35 = vrot.slane %v617_v22, 4  ;;  %v15767_v36 = vsel %vm12447_vm10, 4294967295, %v15766_v36  ;;  %vm12472_vm11 = vmor %vm986_vm8, %vm987_vm9 }
  0x45   : > { %425 = vst [vmem:[#allocation2 + $0x68] sm:$0x1] %v424_v12  ;;  %v11692_v34 = vld [vmem:[#allocation7 + $0x18] sm:$0xff]  ;;  %v999_v37 = vshll.u32 %v923_v28, 16  ;;  %v1003_v38 = vshrl.u32 %v923_v28, 16  ;;  %v371_v39 = vsel %vm12416_vm3, 0, %v370_v32  ;;  %v621_v40 = vsel %vm12439_vm7, %v613_v30, %v620_v31  ;;  %11917 = vmatpush.bf16.msra.mxu2 %v11701_v20  ;;  %1505 = vmatpush.bf16.msra.mxu0 %v11701_v20 }
  0x46   : > { %15765 = vst [vmem:[#allocation16_spill] sm:$0xff] %v15764_v26  ;;  %v426_v41 = vld [vmem:[#allocation2 + $0x74] sm:$0x1]  ;;  %v469_v42 = vld [vmem:[%s12397_s13 + $0x40] sm:$0xf]  ;;  %11925 = vmatpush.bf16.msra.mxu3 %v11693_v25  ;;  %1738 = vmatpush.bf16.msra.mxu1 %v11693_v25  ;;  %v11699_v54 = vld [vmem:[#allocation7 + $0x50] sm:$0xff] }
  0x47   : > { %345 = vst [vmem:[#allocation2] sm:$0x1] %v344_v23  ;;  %v12458_v44 = vrot.slane %v999_v37, 5  ;;  %v1005_v45 = vrot.slane %v1003_v38, 4  ;;  %v624_v48 = vshrl.u32 %v469_v42, 16  ;;  %v427_v51 = vsel %vm12423_vm4, 0, %v426_v41 }
  0x48   : > { %401 = vst [vmem:[#allocation2 + $0x8] sm:$0x1] %v400_v27  ;;  %v470_v52 = vld [vmem:[%s12397_s13 + $0x44] sm:$0xf]  ;;  %v627_v53 = vshll.u32 %v469_v42, 16  ;;  %v11691_v57 = vld [vmem:[#allocation7 + $0x10] sm:$0xff] }
  0x49   : > { %15768 = vst [vmem:[#allocation17_spill] sm:$0xff] %v15767_v36  ;;  %v1006_v50 = vor.u32 %v1005_v45, %v12458_v44  ;;  %v626_v56 = vrot.slane %v624_v48, 7  ;;  %11918 = vmatpush.bf16.msra.mxu2 %v11700_v33  ;;  %v632_v61 = vshrl.u32 %v470_v52, 16  ;;  %1506 = vmatpush.bf16.msra.mxu0 %v11700_v33  ;;  %v635_v1 = vshll.u32 %v470_v52, 16  ;;  %v11698_v2 = vld [vmem:[#allocation7 + $0x48] sm:$0xff]  ;;  %v11697_v25 = vld [vmem:[#allocation7 + $0x40] sm:$0xff] }
  0x4a   : > { %5274 = vst [vmem:[#allocation3 + $0xd0] sm:$0xf] %v12243_v0  ;;  %11926 = vmatpush.bf16.msra.mxu3 %v11692_v34  ;;  %1739 = vmatpush.bf16.msra.mxu1 %v11692_v34  ;;  %v346_v8 = vld [vmem:[#allocation2 + $0xc] sm:$0x1]  ;;  %v11690_v9 = vld [vmem:[#allocation7 + $0x8] sm:$0xff]  ;;  %v15769_v14 = vmov 0 }
  0x4b   : > { %5275 = vst [vmem:[#allocation3 + $0xd4] sm:$0x1] %v12243_v0  ;;  %v859_v43 = vld [vmem:[#allocation2 + $0x60] sm:$0xf]  ;;  %v1007_v62 = vrot.slane %v1006_v50, 4  ;;  %v629_v0 = vor.u32 %v627_v53, %v626_v56  ;;  %v634_v7 = vrot.slane %v632_v61, 7 }
  0x4c   : > { %862 = vst [vmem:[#allocation2 + $0x64] sm:$0xf] %v621_v40  ;;  %v860_v46 = vsel %vm12447_vm10, %v612_v29, %v859_v43  ;;  %v863_v47 = vld [vmem:[#allocation2 + $0x68] sm:$0x1]  ;;  %v630_v12 = vrot.slane %v626_v56, 4  ;;  %v347_v13 = vsel %vm12416_vm3, 0, %v346_v8 }
  0x4d   : > { %372 = vst [vmem:[#allocation2 + $0x6c] sm:$0x1] %v371_v39  ;;  %v864_v49 = vsel %vm12416_vm3, %v622_v35, %v863_v47  ;;  %11919 = vmatpush.bf16.msra.mxu2 %v11699_v54  ;;  %v15770_v14 = vsel %vm12472_vm11, 4294967295, %v15769_v14  ;;  %v637_v18 = vor.u32 %v635_v1, %v634_v7  ;;  %1507 = vmatpush.bf16.msra.mxu0 %v11699_v54  ;;  %v639_v22 = vrot.slane %v634_v7, 4  ;;  %v402_v24 = vld [vmem:[#allocation2 + $0x14] sm:$0x1] }
  0x4e   : > { %861 = vst [vmem:[#allocation2 + $0x60] sm:$0xf] %v860_v46  ;;  %v922_v55 = vld [vmem:[#allocation2] sm:$0xf]  ;;  %11927 = vmatpush.bf16.msra.mxu3 %v11691_v57  ;;  %1740 = vmatpush.bf16.msra.mxu1 %v11691_v57  ;;  %v11689_v27 = vld [vmem:[#allocation7] sm:$0xff]  ;;  %v11712_v41 = vld [vmem:[#allocation7 + $0xb8] sm:$0xff] }
  0x4f   : > { %865 = vst [vmem:[#allocation2 + $0x68] sm:$0x1] %v864_v49  ;;  %v970_v58 = vld [vmem:[#allocation2 + $0x8] sm:$0x1]  ;;  %v990_v59 = vshrl.u32 %v922_v55, 16  ;;  %v993_v60 = vshll.u32 %v922_v55, 16  ;;  %v638_v35 = vsel %vm12439_vm7, %v630_v12, %v637_v18 }
  0x50   : > { %v1009_v63 = vshll.u32 %v970_v58, 16  ;;  %428 = vst [vmem:[#allocation2 + $0x74] sm:$0x1] %v427_v51  ;;  %v453_v37 = vld [vmem:[%s12397_s13] sm:$0xf]  ;;  %v11736_v43 = vld [vmem:[#allocation7 + $0xf8] sm:$0xff] }
  0x51   : > { %v992_v3 = vrot.slane %v990_v59, 4  ;;  %v995_v4 = vrot.slane %v993_v60, 5  ;;  %15771 = vst [vmem:[#allocation18_spill] sm:$0xff] %v15770_v14  ;;  %11920 = vmatpush.bf16.msra.mxu2 %v11698_v2  ;;  %1508 = vmatpush.bf16.msra.mxu0 %v11698_v2  ;;  %v11744_v49 = vld [vmem:[#allocation7 + $0x138] sm:$0xff]  ;;  %v403_v51 = vsel %vm12423_vm4, 0, %v402_v24  ;;  %v11673_v56 = vld [vmem:[#allocation2] sm:$0xff] }
  0x52   : > { %v1011_v11 = vrot.slane %v1009_v63, 5  ;;  %348 = vst [vmem:[#allocation2 + $0xc] sm:$0x1] %v347_v13  ;;  %11928 = vmatpush.bf16.msra.mxu3 %v11690_v9  ;;  %1741 = vmatpush.bf16.msra.mxu1 %v11690_v9  ;;  %v454_v52 = vld [vmem:[%s12397_s13 + $0x4] sm:$0xf]  ;;  %v488_v57 = vshrl.u32 %v453_v37, 16 }
  0x53   : > { %v939_v10 = vld [vmem:[#allocation2 + $0x64] sm:$0xf]  ;;  %v996_v17 = vor.u32 %v995_v4, %v992_v3  ;;  %869 = vst [vmem:[#allocation2 + $0x70] sm:$0xf] %v638_v35  ;;  %v373_v58 = vld [vmem:[#allocation2 + $0x78] sm:$0x1] }
  0x54   : > { %v1191_v15 = vshll.u32 %v939_v10, 16  ;;  %v1195_v16 = vshrl.u32 %v939_v10, 16  ;;  %v866_v19 = vld [vmem:[#allocation2 + $0x6c] sm:$0xf]  ;;  %v1012_v21 = vsel %vm12472_vm11, %v1007_v62, %v1011_v11  ;;  %404 = vst [vmem:[#allocation2 + $0x14] sm:$0x1] %v403_v51 }
  0x55   : > { %v938_v20 = vld [vmem:[#allocation2 + $0x60] sm:$0xf]  ;;  %v867_v23 = vsel %vm12447_vm10, %v629_v0, %v866_v19  ;;  %v997_v34 = vrot.slane %v996_v17, 4  ;;  %v1391_v42 = vunpack.c.l.b16 %v1012_v21  ;;  %v491_v59 = vshll.u32 %v453_v37, 16  ;;  %11921 = vmatpush.bf16.msra.mxu2 %v11697_v25  ;;  %1509 = vmatpush.bf16.msra.mxu0 %v11697_v25  ;;  %v471_v17 = vld [vmem:[%s12397_s13 + $0x48] sm:$0xf] }
  0x56   : > { %v978_v28 = vld [vmem:[#allocation2 + $0x68] sm:$0x1]  ;;  %v1182_v29 = vshrl.u32 %v938_v20, 16  ;;  %v1185_v30 = vshll.u32 %v938_v20, 16  ;;  %v1193_v31 = vrot.slane %v1191_v15, 5  ;;  %v1197_v32 = vrot.slane %v1195_v16, 4  ;;  %11929 = vmatpush.bf16.msra.mxu3 %v11689_v27  ;;  %1742 = vmatpush.bf16.msra.mxu1 %v11689_v27 }
  0x57   : > { %v1201_v33 = vshll.u32 %v978_v28, 16  ;;  %868 = vst [vmem:[#allocation2 + $0x6c] sm:$0xf] %v867_v23  ;;  %v870_v45 = vld [vmem:[#allocation2 + $0x74] sm:$0x1]  ;;  %v11681_v47 = vld [vmem:[#allocation2 + $0x60] sm:$0xff]  ;;  %v1002_v48 = vsel %vm12472_vm11, %v997_v34, %v12458_v44 }
  0x58   : > { %v1184_v38 = vrot.slane %v1182_v29, 4  ;;  %v1187_v39 = vrot.slane %v1185_v30, 5  ;;  %v1198_v40 = vor.u32 %v1197_v32, %v1193_v31  ;;  %v871_v50 = vsel %vm12416_vm3, %v639_v22, %v870_v45  ;;  %v11711_v1 = vld [vmem:[#allocation7 + $0xb0] sm:$0xff]  ;;  %v472_v23 = vld [vmem:[%s12397_s13 + $0x4c] sm:$0xf]  ;;  %s12245_s16 = smov 0.0  }
  0x59   : > { %v1203_v46 = vrot.slane %v1201_v33, 5  ;;  %v1390_v55 = vunpack.c.l.b16 %v1002_v48  ;;  %872 = vst [vmem:[#allocation2 + $0x74] sm:$0x1] %v871_v50  ;;  %v496_v60 = vshrl.u32 %v454_v52, 16  ;;  %v499_v61 = vshll.u32 %v454_v52, 16  ;;  %v11735_v3 = vld [vmem:[#allocation7 + $0xf0] sm:$0xff]  ;;  %2116 = vmatpush.bf16.msrb.mxu2 %v11712_v41  ;;  %1783 = vmatmul.bf16.vlgmr.msra.gmra.mxu3 %v11681_v47 }
  0x5a   : > { %v1188_v53 = vor.u32 %v1187_v39, %v1184_v38  ;;  %v1199_v54 = vrot.slane %v1198_v40, 4  ;;  %v374_v44 = vsel %vm12416_vm3, 0, %v373_v58  ;;  %v490_v2 = vrot.slane %v488_v57, 7  ;;  %v810_v8 = vld [vmem:[#allocation2 + $0xc] sm:$0xf]  ;;  %v11743_v9 = vld [vmem:[#allocation7 + $0x130] sm:$0xff]  ;;  %2430 = vmatpush.bf16.msrb.mxu3 %v11736_v43  ;;  %3112 = vmatpush.bf16.msrb.mxu0 %v11744_v49 }
  0x5b   : > { %v1422_v0 = vpack.c.b16 %v1391_v42, %v1390_v55  ;;  %375 = vst [vmem:[#allocation2 + $0x78] sm:$0x1] %v374_v44  ;;  %v498_v7 = vrot.slane %v496_v60, 7  ;;  %v429_v10 = vld [vmem:[#allocation2 + $0x80] sm:$0x1]  ;;  %1743 = vmatmul.bf16.vlgmr.msra.gmra.mxu1 %v11673_v56  ;;  %v641_v38 = vshrl.u32 %v471_v17, 16 }
  0x5c   : > { %v1189_v62 = vrot.slane %v1188_v53, 4  ;;  %v1204_v63 = vsel %vm12472_vm11, %v1199_v54, %v1203_v46  ;;  %v493_v13 = vor.u32 %v491_v59, %v490_v2  ;;  %v494_v15 = vrot.slane %v490_v2, 4  ;;  %v941_v19 = vld [vmem:[#allocation2 + $0x70] sm:$0xf]  ;;  %v814_v40 = vld [vmem:[#allocation2 + $0x14] sm:$0x1] }
  0x5d   : > { %v1407_v4 = vunpack.c.l.b16 %v1204_v63  ;;  %v430_v16 = vsel %vm12423_vm4, 0, %v429_v10  ;;  %v501_v22 = vor.u32 %v499_v61, %v498_v7  ;;  %1510 = vmatmul.bf16.vlgmr.msra.gmra.mxu0 %v1422_v0  ;;  %v1215_v24 = vshll.u32 %v941_v19, 16  ;;  %2117 = vmatpush.bf16.msrb.mxu2 %v11711_v1  ;;  %v11710_v45 = vld [vmem:[#allocation7 + $0xa8] sm:$0xff]  ;;  %v405_v58 = vld [vmem:[#allocation2 + $0x20] sm:$0x1] }
  0x5e   : > { %v1194_v11 = vsel %vm12472_vm11, %v1189_v62, %v1193_v31  ;;  %v940_v12 = vld [vmem:[#allocation2 + $0x6c] sm:$0xf]  ;;  %v1219_v25 = vshrl.u32 %v941_v19, 16  ;;  %v503_v27 = vrot.slane %v498_v7, 4  ;;  %v811_v28 = vsel %vm12447_vm10, %v493_v13, %v810_v8  ;;  %431 = vst [vmem:[#allocation2 + $0x80] sm:$0x1] %v430_v16  ;;  %2431 = vmatpush.bf16.msrb.mxu3 %v11735_v3  ;;  %3113 = vmatpush.bf16.msrb.mxu0 %v11743_v9 }
  0x5f   : > { %v1406_v18 = vunpack.c.l.b16 %v1194_v11  ;;  %v1206_v20 = vshrl.u32 %v940_v12, 16  ;;  %v1209_v21 = vshll.u32 %v940_v12, 16  ;;  %v502_v33 = vsel %vm12439_vm7, %v494_v15, %v501_v22  ;;  %812 = vst [vmem:[#allocation2 + $0xc] sm:$0xf] %v811_v28  ;;  %v349_v51 = vld [vmem:[#allocation2 + $0x18] sm:$0x1] }
  0x60   : > { %v979_v30 = vld [vmem:[#allocation2 + $0x74] sm:$0x1]  ;;  %v1217_v34 = vrot.slane %v1215_v24, 5  ;;  %v1221_v35 = vrot.slane %v1219_v25, 4  ;;  %813 = vst [vmem:[#allocation2 + $0x10] sm:$0xf] %v502_v33  ;;  %v815_v48 = vsel %vm12416_vm3, %v503_v27, %v814_v40 }
  0x61   : > { %v1430_v29 = vpack.c.b16 %v1407_v4, %v1406_v18  ;;  %v1208_v31 = vrot.slane %v1206_v20, 4  ;;  %v1211_v32 = vrot.slane %v1209_v21, 5  ;;  %v1225_v37 = vshll.u32 %v979_v30, 16  ;;  %816 = vst [vmem:[#allocation2 + $0x14] sm:$0x1] %v815_v48  ;;  %2118 = vmatpush.bf16.msrb.mxu2 %v11710_v45  ;;  %v11682_v7 = vld [vmem:[#allocation2 + $0x6c] sm:$0xff] }
  0x62   : > { %v644_v41 = vshll.u32 %v471_v17, 16  ;;  %v649_v42 = vshrl.u32 %v472_v23, 16  ;;  %v652_v43 = vshll.u32 %v472_v23, 16  ;;  %v1222_v46 = vor.u32 %v1221_v35, %v1217_v34  ;;  %v873_v50 = vld [vmem:[#allocation2 + $0x78] sm:$0xf] }
  0x63   : > { %1550 = vmatmul.bf16.vlgmr.msra.gmra.mxu2 %v1430_v29  ;;  %v1212_v39 = vor.u32 %v1211_v32, %v1208_v31  ;;  %v1227_v47 = vrot.slane %v1225_v37, 5  ;;  %v643_v49 = vrot.slane %v641_v38, 7  ;;  %v350_v54 = vsel %vm12416_vm3, 0, %v349_v51  ;;  %v455_v63 = vld [vmem:[%s12397_s13 + $0x8] sm:$0xf] }
  0x64   : > { %v651_v53 = vrot.slane %v649_v42, 7  ;;  %v1223_v55 = vrot.slane %v1222_v46, 4  ;;  %351 = vst [vmem:[#allocation2 + $0x18] sm:$0x1] %v350_v54  ;;  %v406_v62 = vsel %vm12423_vm4, 0, %v405_v58  ;;  %v505_v18 = vshrl.u32 %v455_v63, 16 }
  0x65   : > { %v1213_v52 = vrot.slane %v1212_v39, 4  ;;  %v646_v56 = vor.u32 %v644_v41, %v643_v49  ;;  %v647_v57 = vrot.slane %v643_v49, 4  ;;  %v877_v44 = vld [vmem:[#allocation2 + $0x80] sm:$0x1]  ;;  %407 = vst [vmem:[#allocation2 + $0x20] sm:$0x1] %v406_v62 }
  0x66   : > { %v654_v60 = vor.u32 %v652_v43, %v651_v53  ;;  %v656_v61 = vrot.slane %v651_v53, 4  ;;  %v1228_v0 = vsel %vm12472_vm11, %v1223_v55, %v1227_v47  ;;  %v924_v2 = vld [vmem:[#allocation2 + $0xc] sm:$0xf]  ;;  %v456_v12 = vld [vmem:[%s12397_s13 + $0xc] sm:$0xf]  ;;  %v508_v21 = vshll.u32 %v455_v63, 16 }
  0x67   : > { %v1218_v59 = vsel %vm12472_vm11, %v1213_v52, %v1217_v34  ;;  %v874_v3 = vsel %vm12447_vm10, %v646_v56, %v873_v50  ;;  %v1409_v4 = vunpack.c.l.b16 %v1228_v0  ;;  %v925_v8 = vld [vmem:[#allocation2 + $0x10] sm:$0xf]  ;;  %v1014_v9 = vshrl.u32 %v924_v2, 16  ;;  %v11734_v22 = vld [vmem:[#allocation7 + $0xe8] sm:$0xff]  ;;  %v376_v37 = vld [vmem:[#allocation2 + $0x84] sm:$0x1] }
  0x68   : > { %v1408_v1 = vunpack.c.l.b16 %v1218_v59  ;;  %v1017_v10 = vshll.u32 %v924_v2, 16  ;;  %v655_v11 = vsel %vm12439_vm7, %v647_v57, %v654_v60  ;;  %v1023_v13 = vshll.u32 %v925_v8, 16  ;;  %v11674_v16 = vld [vmem:[#allocation2 + $0xc] sm:$0xff]  ;;  %875 = vst [vmem:[#allocation2 + $0x78] sm:$0xf] %v874_v3  ;;  %2432 = vmatpush.bf16.msrb.mxu3 %v11734_v22  ;;  %v11742_v32 = vld [vmem:[#allocation7 + $0x128] sm:$0xff] }
  0x69   : > { %v1027_v15 = vshrl.u32 %v925_v8, 16  ;;  %v878_v17 = vsel %vm12416_vm3, %v656_v61, %v877_v44  ;;  %v1016_v19 = vrot.slane %v1014_v9, 4  ;;  %876 = vst [vmem:[#allocation2 + $0x7c] sm:$0xf] %v655_v11  ;;  %v971_v23 = vld [vmem:[#allocation2 + $0x14] sm:$0x1]  ;;  %1788 = vmatmul.bf16.gmra.mxu3 %v11682_v7  ;;  %3114 = vmatpush.bf16.msrb.mxu0 %v11742_v32 }
  0x6a   : > { %v1019_v20 = vrot.slane %v1017_v10, 5  ;;  %v1025_v24 = vrot.slane %v1023_v13, 5  ;;  %879 = vst [vmem:[#allocation2 + $0x80] sm:$0x1] %v878_v17  ;;  %v1033_v28 = vshll.u32 %v971_v23, 16  ;;  %v507_v29 = vrot.slane %v505_v18, 7 }
  0x6b   : > { %v1029_v25 = vrot.slane %v1027_v15, 4  ;;  %v513_v30 = vshrl.u32 %v456_v12, 16  ;;  %v817_v31 = vld [vmem:[#allocation2 + $0x18] sm:$0xf]  ;;  %v1431_v33 = vpack.c.b16 %v1409_v4, %v1408_v1  ;;  %v516_v35 = vshll.u32 %v456_v12, 16  ;;  %1748 = vmatmul.bf16.gmra.mxu1 %v11674_v16  ;;  %v11709_v9 = vld [vmem:[#allocation7 + $0xa0] sm:$0xff] }
  0x6c   : > { %v1020_v27 = vor.u32 %v1019_v20, %v1016_v19  ;;  %v432_v38 = vld [vmem:[#allocation2 + $0x8c] sm:$0x1]  ;;  %v1035_v40 = vrot.slane %v1033_v28, 5  ;;  %v510_v41 = vor.u32 %v508_v21, %v507_v29  ;;  %v511_v42 = vrot.slane %v507_v29, 4  ;;  %v821_v51 = vld [vmem:[#allocation2 + $0x20] sm:$0x1]  ;;  %2119 = vmatpush.bf16.msrb.mxu2 %v11709_v9 }
  0x6d   : > { %v1030_v34 = vor.u32 %v1029_v25, %v1025_v24  ;;  %v515_v45 = vrot.slane %v513_v30, 7  ;;  %v377_v46 = vsel %vm12416_vm3, 0, %v376_v37  ;;  %v433_v47 = vsel %vm12423_vm4, 0, %v432_v38  ;;  %v473_v52 = vld [vmem:[%s12397_s13 + $0x50] sm:$0xf] }
  0x6e   : > { %v1021_v39 = vrot.slane %v1020_v27, 4  ;;  %v818_v50 = vsel %vm12447_vm10, %v510_v41, %v817_v31  ;;  %378 = vst [vmem:[#allocation2 + $0x84] sm:$0x1] %v377_v46  ;;  %v474_v58 = vld [vmem:[%s12397_s13 + $0x54] sm:$0xf]  ;;  %v658_v15 = vshrl.u32 %v473_v52, 16 }
  0x6f   : > { %v1031_v43 = vrot.slane %v1030_v34, 4  ;;  %v942_v49 = vld [vmem:[#allocation2 + $0x78] sm:$0xf]  ;;  %v518_v62 = vor.u32 %v516_v35, %v515_v45  ;;  %819 = vst [vmem:[#allocation2 + $0x18] sm:$0xf] %v818_v50  ;;  %v520_v2 = vrot.slane %v515_v45, 4 }
  0x70   : > { %v1026_v48 = vsel %vm12472_vm11, %v1021_v39, %v1025_v24  ;;  %v943_v55 = vld [vmem:[#allocation2 + $0x7c] sm:$0xf]  ;;  %v1230_v56 = vshrl.u32 %v942_v49, 16  ;;  %v1233_v57 = vshll.u32 %v942_v49, 16  ;;  %434 = vst [vmem:[#allocation2 + $0x8c] sm:$0x1] %v433_v47 }
  0x71   : > { %v1036_v53 = vsel %vm12472_vm11, %v1031_v43, %v1035_v40  ;;  %v1392_v54 = vunpack.c.l.b16 %v1026_v48  ;;  %v980_v60 = vld [vmem:[#allocation2 + $0x80] sm:$0x1]  ;;  %v1239_v61 = vshll.u32 %v943_v55, 16  ;;  %v1243_v44 = vshrl.u32 %v943_v55, 16  ;;  %v352_v10 = vld [vmem:[#allocation2 + $0x24] sm:$0x1] }
  0x72   : > { %v1393_v59 = vunpack.c.l.b16 %v1036_v53  ;;  %v1232_v63 = vrot.slane %v1230_v56, 4  ;;  %v1235_v0 = vrot.slane %v1233_v57, 5  ;;  %v1249_v1 = vshll.u32 %v980_v60, 16  ;;  %v408_v16 = vld [vmem:[#allocation2 + $0x2c] sm:$0x1]  ;;  %v11683_v38 = vld [vmem:[#allocation2 + $0x78] sm:$0xff] }
  0x73   : > { %1555 = vmatmul.bf16.gmra.mxu2 %v1431_v33  ;;  %v1241_v4 = vrot.slane %v1239_v61, 5  ;;  %v1245_v7 = vrot.slane %v1243_v44, 4  ;;  %v519_v8 = vsel %vm12439_vm7, %v511_v42, %v518_v62  ;;  %v822_v13 = vsel %vm12416_vm3, %v520_v2, %v821_v51  ;;  %v457_v29 = vld [vmem:[%s12397_s13 + $0x10] sm:$0xf]  ;;  %v458_v47 = vld [vmem:[%s12397_s13 + $0x14] sm:$0xf] }
  0x74   : > { %v1423_v3 = vpack.c.b16 %v1393_v59, %v1392_v54  ;;  %v1236_v11 = vor.u32 %v1235_v0, %v1232_v63  ;;  %v1251_v12 = vrot.slane %v1249_v1, 5  ;;  %820 = vst [vmem:[#allocation2 + $0x1c] sm:$0xf] %v519_v8  ;;  %v661_v18 = vshll.u32 %v473_v52, 16  ;;  %v11733_v48 = vld [vmem:[#allocation7 + $0xe0] sm:$0xff] }
  0x75   : > { %v1246_v17 = vor.u32 %v1245_v7, %v1241_v4  ;;  %823 = vst [vmem:[#allocation2 + $0x20] sm:$0x1] %v822_v13  ;;  %v666_v19 = vshrl.u32 %v474_v58, 16  ;;  %v669_v20 = vshll.u32 %v474_v58, 16  ;;  %v660_v22 = vrot.slane %v658_v15, 7  ;;  %v11741_v49 = vld [vmem:[#allocation7 + $0x120] sm:$0xff]  ;;  %2433 = vmatpush.bf16.msrb.mxu3 %v11733_v48 }
  0x76   : > { %1515 = vmatmul.bf16.gmra.mxu0 %v1423_v3  ;;  %v1237_v21 = vrot.slane %v1236_v11, 4  ;;  %v880_v23 = vld [vmem:[#allocation2 + $0x84] sm:$0xf]  ;;  %v353_v24 = vsel %vm12416_vm3, 0, %v352_v10  ;;  %v409_v25 = vsel %vm12423_vm4, 0, %v408_v16  ;;  %v522_v34 = vshrl.u32 %v457_v29, 16 }
  0x77   : > { %v1247_v27 = vrot.slane %v1246_v17, 4  ;;  %v668_v28 = vrot.slane %v666_v19, 7  ;;  %354 = vst [vmem:[#allocation2 + $0x24] sm:$0x1] %v353_v24  ;;  %v926_v31 = vld [vmem:[#allocation2 + $0x18] sm:$0xf]  ;;  %v663_v32 = vor.u32 %v661_v18, %v660_v22  ;;  %3115 = vmatpush.bf16.msrb.mxu0 %v11741_v49 }
  0x78   : > { %v1242_v30 = vsel %vm12472_vm11, %v1237_v21, %v1241_v4  ;;  %v664_v33 = vrot.slane %v660_v22, 4  ;;  %410 = vst [vmem:[#allocation2 + $0x2c] sm:$0x1] %v409_v25  ;;  %v1038_v39 = vshrl.u32 %v926_v31, 16  ;;  %v1041_v40 = vshll.u32 %v926_v31, 16 }
  0x79   : > { %v1252_v35 = vsel %vm12472_vm11, %v1247_v27, %v1251_v12  ;;  %v1410_v37 = vunpack.c.l.b16 %v1242_v30  ;;  %v884_v41 = vld [vmem:[#allocation2 + $0x8c] sm:$0x1]  ;;  %v671_v43 = vor.u32 %v669_v20, %v668_v28  ;;  %v673_v45 = vrot.slane %v668_v28, 4  ;;  %v379_v55 = vld [vmem:[#allocation2 + $0x90] sm:$0x1]  ;;  %1793 = vmatmul.bf16.gmra.mxu3 %v11683_v38 }
  0x7a   : > { %v1411_v42 = vunpack.c.l.b16 %v1252_v35  ;;  %v881_v46 = vsel %vm12447_vm10, %v663_v32, %v880_v23  ;;  %v1040_v51 = vrot.slane %v1038_v39, 4  ;;  %v1043_v52 = vrot.slane %v1041_v40, 5  ;;  %v435_v0 = vld [vmem:[#allocation2 + $0x98] sm:$0x1]  ;;  %v475_v20 = vld [vmem:[%s12397_s13 + $0x58] sm:$0xf] }
  0x7b   : > { %v927_v50 = vld [vmem:[#allocation2 + $0x1c] sm:$0xf]  ;;  %v524_v54 = vrot.slane %v522_v34, 7  ;;  %v672_v60 = vsel %vm12439_vm7, %v664_v33, %v671_v43  ;;  %882 = vst [vmem:[#allocation2 + $0x84] sm:$0xf] %v881_v46  ;;  %v885_v62 = vsel %vm12416_vm3, %v673_v45, %v884_v41  ;;  %v525_v63 = vshll.u32 %v457_v29, 16 }
  0x7c   : > { %v11675_v53 = vld [vmem:[#allocation2 + $0x18] sm:$0xff]  ;;  %v1432_v56 = vpack.c.b16 %v1411_v42, %v1410_v37  ;;  %v972_v57 = vld [vmem:[#allocation2 + $0x20] sm:$0x1]  ;;  %v1047_v58 = vshll.u32 %v927_v50, 16  ;;  %v1051_v59 = vshrl.u32 %v927_v50, 16  ;;  %v1044_v61 = vor.u32 %v1043_v52, %v1040_v51  ;;  %v11708_v35 = vld [vmem:[#allocation7 + $0x98] sm:$0xff] }
  0x7d   : > { %v1057_v44 = vshll.u32 %v972_v57, 16  ;;  %883 = vst [vmem:[#allocation2 + $0x88] sm:$0xf] %v672_v60  ;;  %1753 = vmatmul.bf16.gmra.mxu1 %v11675_v53  ;;  %v528_v3 = vrot.slane %v524_v54, 4  ;;  %v530_v4 = vshrl.u32 %v458_v47, 16  ;;  %v527_v9 = vor.u32 %v525_v63, %v524_v54  ;;  %2120 = vmatpush.bf16.msrb.mxu2 %v11708_v35 }
  0x7e   : > { %v1049_v1 = vrot.slane %v1047_v58, 5  ;;  %v1053_v2 = vrot.slane %v1051_v59, 4  ;;  %886 = vst [vmem:[#allocation2 + $0x8c] sm:$0x1] %v885_v62  ;;  %v1045_v7 = vrot.slane %v1044_v61, 4  ;;  %v533_v10 = vshll.u32 %v458_v47, 16 }
  0x7f   : > { %v1059_v8 = vrot.slane %v1057_v44, 5  ;;  %v824_v11 = vld [vmem:[#allocation2 + $0x24] sm:$0xf]  ;;  %v532_v13 = vrot.slane %v530_v4, 7  ;;  %v380_v15 = vsel %vm12416_vm3, 0, %v379_v55  ;;  %v436_v16 = vsel %vm12423_vm4, 0, %v435_v0 }
  0x80   : > { %v1054_v12 = vor.u32 %v1053_v2, %v1049_v1  ;;  %v1050_v17 = vsel %vm12472_vm11, %v1045_v7, %v1049_v1  ;;  %v825_v18 = vsel %vm12447_vm10, %v527_v9, %v824_v11  ;;  %v828_v19 = vld [vmem:[#allocation2 + $0x2c] sm:$0x1]  ;;  %381 = vst [vmem:[#allocation2 + $0x90] sm:$0x1] %v380_v15  ;;  %v675_v28 = vshrl.u32 %v475_v20, 16 }
  0x81   : > { %v535_v22 = vor.u32 %v533_v10, %v532_v13  ;;  %v537_v23 = vrot.slane %v532_v13, 4  ;;  %826 = vst [vmem:[#allocation2 + $0x24] sm:$0xf] %v825_v18  ;;  %v476_v24 = vld [vmem:[%s12397_s13 + $0x5c] sm:$0xf]  ;;  %v1394_v25 = vunpack.c.l.b16 %v1050_v17  ;;  %v678_v29 = vshll.u32 %v475_v20, 16 }
  0x82   : > { %v1055_v21 = vrot.slane %v1054_v12, 4  ;;  %v944_v27 = vld [vmem:[#allocation2 + $0x84] sm:$0xf]  ;;  %437 = vst [vmem:[#allocation2 + $0x98] sm:$0x1] %v436_v16  ;;  %v677_v47 = vrot.slane %v675_v28, 7 }
  0x83   : > { %1560 = vmatmul.bf16.gmra.mxu2 %v1432_v56  ;;  %v1254_v32 = vshrl.u32 %v944_v27, 16  ;;  %v1257_v33 = vshll.u32 %v944_v27, 16  ;;  %v536_v34 = vsel %vm12439_vm7, %v528_v3, %v535_v22  ;;  %v355_v37 = vld [vmem:[#allocation2 + $0x30] sm:$0x1]  ;;  %v829_v42 = vsel %vm12416_vm3, %v537_v23, %v828_v19  ;;  %v411_v52 = vld [vmem:[#allocation2 + $0x38] sm:$0x1] }
  0x84   : > { %v1060_v30 = vsel %vm12472_vm11, %v1055_v21, %v1059_v8  ;;  %v945_v31 = vld [vmem:[#allocation2 + $0x88] sm:$0xf]  ;;  %827 = vst [vmem:[#allocation2 + $0x28] sm:$0xf] %v536_v34  ;;  %v683_v51 = vshrl.u32 %v476_v24, 16  ;;  %v680_v55 = vor.u32 %v678_v29, %v677_v47  ;;  %v681_v56 = vrot.slane %v677_v47, 4 }
  0x85   : > { %v1395_v38 = vunpack.c.l.b16 %v1060_v30  ;;  %v981_v39 = vld [vmem:[#allocation2 + $0x8c] sm:$0x1]  ;;  %v1263_v40 = vshll.u32 %v945_v31, 16  ;;  %v1267_v41 = vshrl.u32 %v945_v31, 16  ;;  %v1256_v43 = vrot.slane %v1254_v32, 4  ;;  %v11684_v60 = vld [vmem:[#allocation2 + $0x84] sm:$0xff] }
  0x86   : > { %v1259_v45 = vrot.slane %v1257_v33, 5  ;;  %v1273_v46 = vshll.u32 %v981_v39, 16  ;;  %830 = vst [vmem:[#allocation2 + $0x2c] sm:$0x1] %v829_v42  ;;  %v459_v58 = vld [vmem:[%s12397_s13 + $0x18] sm:$0xf] }
  0x87   : > { %v1424_v48 = vpack.c.b16 %v1395_v38, %v1394_v25  ;;  %v1265_v49 = vrot.slane %v1263_v40, 5  ;;  %v1269_v50 = vrot.slane %v1267_v41, 4  ;;  %v887_v57 = vld [vmem:[#allocation2 + $0x90] sm:$0xf]  ;;  %v685_v44 = vrot.slane %v683_v51, 7  ;;  %v11732_v29 = vld [vmem:[#allocation7 + $0xd8] sm:$0xff] }
  0x88   : > { %v1260_v53 = vor.u32 %v1259_v45, %v1256_v43  ;;  %v1275_v54 = vrot.slane %v1273_v46, 5  ;;  %v928_v61 = vld [vmem:[#allocation2 + $0x24] sm:$0xf]  ;;  %v686_v62 = vshll.u32 %v476_v24, 16  ;;  %v356_v63 = vsel %vm12416_vm3, 0, %v355_v37  ;;  %v11740_v34 = vld [vmem:[#allocation7 + $0x118] sm:$0xff]  ;;  %2434 = vmatpush.bf16.msrb.mxu3 %v11732_v29 }
  0x89   : > { %1520 = vmatmul.bf16.gmra.mxu0 %v1424_v48  ;;  %v1270_v59 = vor.u32 %v1269_v50, %v1265_v49  ;;  %v1062_v1 = vshrl.u32 %v928_v61, 16  ;;  %v1065_v2 = vshll.u32 %v928_v61, 16  ;;  %v888_v3 = vsel %vm12447_vm10, %v680_v55, %v887_v57  ;;  %v891_v4 = vld [vmem:[#allocation2 + $0x98] sm:$0x1]  ;;  %1798 = vmatmul.bf16.gmra.mxu3 %v11684_v60  ;;  %357 = vst [vmem:[#allocation2 + $0x30] sm:$0x1] %v356_v63 }
  0x8a   : > { %v1261_v0 = vrot.slane %v1260_v53, 4  ;;  %v688_v8 = vor.u32 %v686_v62, %v685_v44  ;;  %v690_v9 = vrot.slane %v685_v44, 4  ;;  %889 = vst [vmem:[#allocation2 + $0x90] sm:$0xf] %v888_v3  ;;  %v412_v10 = vsel %vm12423_vm4, 0, %v411_v52  ;;  %3116 = vmatpush.bf16.msrb.mxu0 %v11740_v34 }
  0x8b   : > { %v1271_v7 = vrot.slane %v1270_v59, 4  ;;  %v929_v12 = vld [vmem:[#allocation2 + $0x28] sm:$0xf]  ;;  %v1064_v13 = vrot.slane %v1062_v1, 4  ;;  %v1067_v15 = vrot.slane %v1065_v2, 5  ;;  %v539_v17 = vshrl.u32 %v459_v58, 16 }
  0x8c   : > { %v1266_v11 = vsel %vm12472_vm11, %v1261_v0, %v1265_v49  ;;  %v11676_v16 = vld [vmem:[#allocation2 + $0x24] sm:$0xff]  ;;  %v1071_v21 = vshll.u32 %v929_v12, 16  ;;  %v1075_v22 = vshrl.u32 %v929_v12, 16  ;;  %v689_v27 = vsel %vm12439_vm7, %v681_v56, %v688_v8  ;;  %413 = vst [vmem:[#allocation2 + $0x38] sm:$0x1] %v412_v10 }
  0x8d   : > { %v1276_v18 = vsel %vm12472_vm11, %v1271_v7, %v1275_v54  ;;  %v1412_v19 = vunpack.c.l.b16 %v1266_v11  ;;  %v973_v20 = vld [vmem:[#allocation2 + $0x2c] sm:$0x1]  ;;  %v1068_v24 = vor.u32 %v1067_v15, %v1064_v13  ;;  %1758 = vmatmul.bf16.gmra.mxu1 %v11676_v16  ;;  %890 = vst [vmem:[#allocation2 + $0x94] sm:$0xf] %v689_v27  ;;  %v892_v32 = vsel %vm12416_vm3, %v690_v9, %v891_v4  ;;  %v382_v42 = vld [vmem:[#allocation2 + $0x9c] sm:$0x1] }
  0x8e   : > { %v1413_v23 = vunpack.c.l.b16 %v1276_v18  ;;  %v1081_v25 = vshll.u32 %v973_v20, 16  ;;  %v460_v28 = vld [vmem:[%s12397_s13 + $0x1c] sm:$0xf]  ;;  %v1073_v30 = vrot.slane %v1071_v21, 5  ;;  %v1077_v31 = vrot.slane %v1075_v22, 4  ;;  %v11707_v16 = vld [vmem:[#allocation7 + $0x90] sm:$0xff] }
  0x8f   : > { %v541_v33 = vrot.slane %v539_v17, 7  ;;  %v1069_v37 = vrot.slane %v1068_v24, 4  ;;  %893 = vst [vmem:[#allocation2 + $0x98] sm:$0x1] %v892_v32  ;;  %v542_v38 = vshll.u32 %v459_v58, 16  ;;  %v547_v41 = vshrl.u32 %v460_v28, 16  ;;  %2121 = vmatpush.bf16.msrb.mxu2 %v11707_v16 }
  0x90   : > { %v1433_v35 = vpack.c.b16 %v1413_v23, %v1412_v19  ;;  %v1078_v39 = vor.u32 %v1077_v31, %v1073_v30  ;;  %v1083_v40 = vrot.slane %v1081_v25, 5  ;;  %v550_v47 = vshll.u32 %v460_v28, 16  ;;  %v438_v49 = vld [vmem:[#allocation2 + $0xa4] sm:$0x1]  ;;  %v831_v56 = vld [vmem:[#allocation2 + $0x30] sm:$0xf] }
  0x91   : > { %v1074_v43 = vsel %vm12472_vm11, %v1069_v37, %v1073_v30  ;;  %v946_v45 = vld [vmem:[#allocation2 + $0x90] sm:$0xf]  ;;  %v544_v46 = vor.u32 %v542_v38, %v541_v33  ;;  %v383_v48 = vsel %vm12416_vm3, 0, %v382_v42  ;;  %v545_v53 = vrot.slane %v541_v33, 4  ;;  %v478_v10 = vld [vmem:[%s12397_s13 + $0x64] sm:$0xf] }
  0x92   : > { %v1079_v50 = vrot.slane %v1078_v39, 4  ;;  %v1278_v51 = vshrl.u32 %v946_v45, 16  ;;  %v1281_v52 = vshll.u32 %v946_v45, 16  ;;  %384 = vst [vmem:[#allocation2 + $0x9c] sm:$0x1] %v383_v48  ;;  %v1396_v54 = vunpack.c.l.b16 %v1074_v43 }
  0x93   : > { %1565 = vmatmul.bf16.gmra.mxu2 %v1433_v35  ;;  %v549_v55 = vrot.slane %v547_v41, 7  ;;  %v439_v57 = vsel %vm12423_vm4, 0, %v438_v49  ;;  %v477_v58 = vld [vmem:[%s12397_s13 + $0x60] sm:$0xf]  ;;  %v832_v44 = vsel %vm12447_vm10, %v544_v46, %v831_v56  ;;  %v835_v62 = vld [vmem:[#allocation2 + $0x38] sm:$0x1] }
  0x94   : > { %v1084_v59 = vsel %vm12472_vm11, %v1079_v50, %v1083_v40  ;;  %v1280_v60 = vrot.slane %v1278_v51, 4  ;;  %v1283_v61 = vrot.slane %v1281_v52, 5  ;;  %440 = vst [vmem:[#allocation2 + $0xa4] sm:$0x1] %v439_v57  ;;  %v947_v0 = vld [vmem:[#allocation2 + $0x94] sm:$0xf] }
  0x95   : > { %v1397_v63 = vunpack.c.l.b16 %v1084_v59  ;;  %v552_v1 = vor.u32 %v550_v47, %v549_v55  ;;  %v554_v2 = vrot.slane %v549_v55, 4  ;;  %833 = vst [vmem:[#allocation2 + $0x30] sm:$0xf] %v832_v44  ;;  %v1287_v7 = vshll.u32 %v947_v0, 16  ;;  %v11685_v9 = vld [vmem:[#allocation2 + $0x90] sm:$0xff] }
  0x96   : > { %v982_v3 = vld [vmem:[#allocation2 + $0x98] sm:$0x1]  ;;  %v1284_v4 = vor.u32 %v1283_v61, %v1280_v60  ;;  %v1291_v8 = vshrl.u32 %v947_v0, 16  ;;  %v358_v17 = vld [vmem:[#allocation2 + $0x3c] sm:$0x1]  ;;  %v692_v22 = vshrl.u32 %v477_v58, 16 }
  0x97   : > { %v1425_v11 = vpack.c.b16 %v1397_v63, %v1396_v54  ;;  %v1297_v12 = vshll.u32 %v982_v3, 16  ;;  %v553_v13 = vsel %vm12439_vm7, %v545_v53, %v552_v1  ;;  %v836_v15 = vsel %vm12416_vm3, %v554_v2, %v835_v62  ;;  %v414_v18 = vld [vmem:[#allocation2 + $0x44] sm:$0x1]  ;;  %v461_v35 = vld [vmem:[%s12397_s13 + $0x20] sm:$0xf] }
  0x98   : > { %v1285_v19 = vrot.slane %v1284_v4, 4  ;;  %v1289_v20 = vrot.slane %v1287_v7, 5  ;;  %v1293_v21 = vrot.slane %v1291_v8, 4  ;;  %834 = vst [vmem:[#allocation2 + $0x34] sm:$0xf] %v553_v13  ;;  %v695_v24 = vshll.u32 %v477_v58, 16 }
  0x99   : > { %1525 = vmatmul.bf16.gmra.mxu0 %v1425_v11  ;;  %v1299_v23 = vrot.slane %v1297_v12, 5  ;;  %837 = vst [vmem:[#allocation2 + $0x38] sm:$0x1] %v836_v15  ;;  %v700_v25 = vshrl.u32 %v478_v10, 16  ;;  %v703_v27 = vshll.u32 %v478_v10, 16  ;;  %v694_v30 = vrot.slane %v692_v22, 7  ;;  %1803 = vmatmul.bf16.gmra.mxu3 %v11685_v9 }
  0x9a   : > { %v1290_v28 = vsel %vm12472_vm11, %v1285_v19, %v1289_v20  ;;  %v1294_v29 = vor.u32 %v1293_v21, %v1289_v20  ;;  %v894_v31 = vld [vmem:[#allocation2 + $0x9c] sm:$0xf]  ;;  %v359_v32 = vsel %vm12416_vm3, 0, %v358_v17  ;;  %v415_v34 = vsel %vm12423_vm4, 0, %v414_v18  ;;  %v462_v50 = vld [vmem:[%s12397_s13 + $0x24] sm:$0xf] }
  0x9b   : > { %v702_v33 = vrot.slane %v700_v25, 7  ;;  %360 = vst [vmem:[#allocation2 + $0x3c] sm:$0x1] %v359_v32  ;;  %v1414_v38 = vunpack.c.l.b16 %v1290_v28  ;;  %v697_v40 = vor.u32 %v695_v24, %v694_v30  ;;  %v698_v41 = vrot.slane %v694_v30, 4  ;;  %v898_v47 = vld [vmem:[#allocation2 + $0xa4] sm:$0x1] }
  0x9c   : > { %v1295_v37 = vrot.slane %v1294_v29, 4  ;;  %v930_v39 = vld [vmem:[#allocation2 + $0x30] sm:$0xf]  ;;  %416 = vst [vmem:[#allocation2 + $0x44] sm:$0x1] %v415_v34  ;;  %v556_v51 = vshrl.u32 %v461_v35, 16 }
  0x9d   : > { %v1086_v42 = vshrl.u32 %v930_v39, 16  ;;  %v1089_v43 = vshll.u32 %v930_v39, 16  ;;  %v705_v45 = vor.u32 %v703_v27, %v702_v33  ;;  %v707_v46 = vrot.slane %v702_v33, 4  ;;  %v11731_v53 = vld [vmem:[#allocation7 + $0xd0] sm:$0xff]  ;;  %v385_v61 = vld [vmem:[#allocation2 + $0xa8] sm:$0x1] }
  0x9e   : > { %v1300_v48 = vsel %vm12472_vm11, %v1295_v37, %v1299_v23  ;;  %v895_v49 = vsel %vm12447_vm10, %v697_v40, %v894_v31  ;;  %v559_v52 = vshll.u32 %v461_v35, 16  ;;  %v11739_v54 = vld [vmem:[#allocation7 + $0x110] sm:$0xff]  ;;  %2435 = vmatpush.bf16.msrb.mxu3 %v11731_v53  ;;  %v558_v4 = vrot.slane %v556_v51, 7  ;;  %v441_v7 = vld [vmem:[#allocation2 + $0xb0] sm:$0x1] }
  0x9f   : > { %v1415_v55 = vunpack.c.l.b16 %v1300_v48  ;;  %v931_v56 = vld [vmem:[#allocation2 + $0x34] sm:$0xf]  ;;  %v1088_v57 = vrot.slane %v1086_v42, 4  ;;  %v1091_v58 = vrot.slane %v1089_v43, 5  ;;  %v706_v60 = vsel %vm12439_vm7, %v698_v41, %v705_v45  ;;  %896 = vst [vmem:[#allocation2 + $0x9c] sm:$0xf] %v895_v49  ;;  %3117 = vmatpush.bf16.msrb.mxu0 %v11739_v54 }
  0xa0   : > { %v11677_v59 = vld [vmem:[#allocation2 + $0x30] sm:$0xff]  ;;  %v974_v44 = vld [vmem:[#allocation2 + $0x38] sm:$0x1]  ;;  %v1095_v62 = vshll.u32 %v931_v56, 16  ;;  %v1099_v63 = vshrl.u32 %v931_v56, 16  ;;  %v899_v0 = vsel %vm12416_vm3, %v707_v46, %v898_v47  ;;  %v564_v10 = vshrl.u32 %v462_v50, 16 }
  0xa1   : > { %v1434_v1 = vpack.c.b16 %v1415_v55, %v1414_v38  ;;  %v1092_v2 = vor.u32 %v1091_v58, %v1088_v57  ;;  %v1105_v3 = vshll.u32 %v974_v44, 16  ;;  %1763 = vmatmul.bf16.gmra.mxu1 %v11677_v59  ;;  %897 = vst [vmem:[#allocation2 + $0xa0] sm:$0xf] %v706_v60  ;;  %v567_v11 = vshll.u32 %v462_v50, 16  ;;  %v479_v25 = vld [vmem:[%s12397_s13 + $0x68] sm:$0xf] }
  0xa2   : > { %v1097_v8 = vrot.slane %v1095_v62, 5  ;;  %v1101_v9 = vrot.slane %v1099_v63, 4  ;;  %900 = vst [vmem:[#allocation2 + $0xa4] sm:$0x1] %v899_v0  ;;  %v561_v15 = vor.u32 %v559_v52, %v558_v4  ;;  %v562_v16 = vrot.slane %v558_v4, 4  ;;  %v11706_v42 = vld [vmem:[#allocation7 + $0x88] sm:$0xff] }
  0xa3   : > { %1570 = vmatmul.bf16.gmra.mxu2 %v1434_v1  ;;  %v1093_v12 = vrot.slane %v1092_v2, 4  ;;  %v1107_v13 = vrot.slane %v1105_v3, 5  ;;  %v838_v17 = vld [vmem:[#allocation2 + $0x3c] sm:$0xf]  ;;  %v566_v19 = vrot.slane %v564_v10, 7  ;;  %v386_v20 = vsel %vm12416_vm3, 0, %v385_v61 }
  0xa4   : > { %v1102_v18 = vor.u32 %v1101_v9, %v1097_v8  ;;  %v442_v21 = vsel %vm12423_vm4, 0, %v441_v7  ;;  %v839_v23 = vsel %vm12447_vm10, %v561_v15, %v838_v17  ;;  %v842_v24 = vld [vmem:[#allocation2 + $0x44] sm:$0x1]  ;;  %387 = vst [vmem:[#allocation2 + $0xa8] sm:$0x1] %v386_v20  ;;  %v709_v33 = vshrl.u32 %v479_v25, 16  ;;  %2122 = vmatpush.bf16.msrb.mxu2 %v11706_v42 }
  0xa5   : > { %v1098_v22 = vsel %vm12472_vm11, %v1093_v12, %v1097_v8  ;;  %v569_v28 = vor.u32 %v567_v11, %v566_v19  ;;  %v571_v29 = vrot.slane %v566_v19, 4  ;;  %840 = vst [vmem:[#allocation2 + $0x3c] sm:$0xf] %v839_v23  ;;  %v480_v30 = vld [vmem:[%s12397_s13 + $0x6c] sm:$0xf]  ;;  %v712_v34 = vshll.u32 %v479_v25, 16 }
  0xa6   : > { %v1103_v27 = vrot.slane %v1102_v18, 4  ;;  %v1398_v31 = vunpack.c.l.b16 %v1098_v22  ;;  %v948_v32 = vld [vmem:[#allocation2 + $0x9c] sm:$0xf]  ;;  %443 = vst [vmem:[#allocation2 + $0xb0] sm:$0x1] %v442_v21  ;;  %v711_v53 = vrot.slane %v709_v33, 7 }
  0xa7   : > { %v1302_v38 = vshrl.u32 %v948_v32, 16  ;;  %v1305_v39 = vshll.u32 %v948_v32, 16  ;;  %v570_v41 = vsel %vm12439_vm7, %v562_v16, %v569_v28  ;;  %v361_v43 = vld [vmem:[#allocation2 + $0x48] sm:$0x1]  ;;  %v843_v49 = vsel %vm12416_vm3, %v571_v29, %v842_v24  ;;  %v417_v58 = vld [vmem:[#allocation2 + $0x50] sm:$0x1] }
  0xa8   : > { %v1108_v35 = vsel %vm12472_vm11, %v1103_v27, %v1107_v13  ;;  %v949_v37 = vld [vmem:[#allocation2 + $0xa0] sm:$0xf]  ;;  %841 = vst [vmem:[#allocation2 + $0x40] sm:$0xf] %v570_v41  ;;  %v717_v57 = vshrl.u32 %v480_v30, 16  ;;  %v714_v61 = vor.u32 %v712_v34, %v711_v53  ;;  %v715_v44 = vrot.slane %v711_v53, 4 }
  0xa9   : > { %v11686_v40 = vld [vmem:[#allocation2 + $0x9c] sm:$0xff]  ;;  %v1399_v45 = vunpack.c.l.b16 %v1108_v35  ;;  %v983_v46 = vld [vmem:[#allocation2 + $0xa4] sm:$0x1]  ;;  %v1311_v47 = vshll.u32 %v949_v37, 16  ;;  %v1315_v48 = vshrl.u32 %v949_v37, 16  ;;  %v1304_v50 = vrot.slane %v1302_v38, 4 }
  0xaa   : > { %v1307_v51 = vrot.slane %v1305_v39, 5  ;;  %v1321_v52 = vshll.u32 %v983_v46, 16  ;;  %844 = vst [vmem:[#allocation2 + $0x44] sm:$0x1] %v843_v49  ;;  %1808 = vmatmul.bf16.gmra.mxu3 %v11686_v40  ;;  %v463_v63 = vld [vmem:[%s12397_s13 + $0x28] sm:$0xf] }
  0xab   : > { %v1426_v54 = vpack.c.b16 %v1399_v45, %v1398_v31  ;;  %v1313_v55 = vrot.slane %v1311_v47, 5  ;;  %v1317_v56 = vrot.slane %v1315_v48, 4  ;;  %v901_v62 = vld [vmem:[#allocation2 + $0xa8] sm:$0xf]  ;;  %v719_v2 = vrot.slane %v717_v57, 7  ;;  %v11730_v34 = vld [vmem:[#allocation7 + $0xc8] sm:$0xff] }
  0xac   : > { %v1308_v59 = vor.u32 %v1307_v51, %v1304_v50  ;;  %v1323_v60 = vrot.slane %v1321_v52, 5  ;;  %v932_v1 = vld [vmem:[#allocation2 + $0x3c] sm:$0xf]  ;;  %v720_v3 = vshll.u32 %v480_v30, 16  ;;  %v362_v4 = vsel %vm12416_vm3, 0, %v361_v43  ;;  %2436 = vmatpush.bf16.msrb.mxu3 %v11730_v34  ;;  %v11752_v45 = vld [vmem:[#allocation7 + $0x178] sm:$0xff] }
  0xad   : > { %1530 = vmatmul.bf16.gmra.mxu0 %v1426_v54  ;;  %v1318_v0 = vor.u32 %v1317_v56, %v1313_v55  ;;  %v1110_v8 = vshrl.u32 %v932_v1, 16  ;;  %v1113_v9 = vshll.u32 %v932_v1, 16  ;;  %v902_v10 = vsel %vm12447_vm10, %v714_v61, %v901_v62  ;;  %v905_v11 = vld [vmem:[#allocation2 + $0xb0] sm:$0x1]  ;;  %363 = vst [vmem:[#allocation2 + $0x48] sm:$0x1] %v362_v4  ;;  %3538 = vmatpush.bf16.msrb.mxu1 %v11752_v45 }
  0xae   : > { %v1309_v7 = vrot.slane %v1308_v59, 4  ;;  %v722_v13 = vor.u32 %v720_v3, %v719_v2  ;;  %v724_v15 = vrot.slane %v719_v2, 4  ;;  %903 = vst [vmem:[#allocation2 + $0xa8] sm:$0xf] %v902_v10  ;;  %v418_v16 = vsel %vm12423_vm4, 0, %v417_v58  ;;  %v11738_v40 = vld [vmem:[#allocation7 + $0x108] sm:$0xff] }
  0xaf   : > { %v1319_v12 = vrot.slane %v1318_v0, 4  ;;  %v933_v18 = vld [vmem:[#allocation2 + $0x40] sm:$0xf]  ;;  %v1112_v19 = vrot.slane %v1110_v8, 4  ;;  %v1115_v20 = vrot.slane %v1113_v9, 5  ;;  %v573_v22 = vshrl.u32 %v463_v63, 16  ;;  %3118 = vmatpush.bf16.msrb.mxu0 %v11738_v40 }
  0xb0   : > { %v1314_v17 = vsel %vm12472_vm11, %v1309_v7, %v1313_v55  ;;  %v11678_v21 = vld [vmem:[#allocation2 + $0x3c] sm:$0xff]  ;;  %v1119_v27 = vshll.u32 %v933_v18, 16  ;;  %v1123_v28 = vshrl.u32 %v933_v18, 16  ;;  %v723_v32 = vsel %vm12439_vm7, %v715_v44, %v722_v13  ;;  %419 = vst [vmem:[#allocation2 + $0x50] sm:$0x1] %v418_v16 }
  0xb1   : > { %v1324_v23 = vsel %vm12472_vm11, %v1319_v12, %v1323_v60  ;;  %v1416_v24 = vunpack.c.l.b16 %v1314_v17  ;;  %v975_v25 = vld [vmem:[#allocation2 + $0x44] sm:$0x1]  ;;  %v1116_v30 = vor.u32 %v1115_v20, %v1112_v19  ;;  %1768 = vmatmul.bf16.gmra.mxu1 %v11678_v21  ;;  %v464_v33 = vld [vmem:[%s12397_s13 + $0x2c] sm:$0xf]  ;;  %904 = vst [vmem:[#allocation2 + $0xac] sm:$0xf] %v723_v32  ;;  %v906_v38 = vsel %vm12416_vm3, %v724_v15, %v905_v11 }
  0xb2   : > { %v1417_v29 = vunpack.c.l.b16 %v1324_v23  ;;  %v1129_v31 = vshll.u32 %v975_v25, 16  ;;  %v1121_v35 = vrot.slane %v1119_v27, 5  ;;  %v1125_v37 = vrot.slane %v1123_v28, 4  ;;  %907 = vst [vmem:[#allocation2 + $0xb0] sm:$0x1] %v906_v38  ;;  %v11751_v23 = vld [vmem:[#allocation7 + $0x170] sm:$0xff] }
  0xb3   : > { %v575_v39 = vrot.slane %v573_v22, 7  ;;  %v1117_v42 = vrot.slane %v1116_v30, 4  ;;  %v576_v43 = vshll.u32 %v463_v63, 16  ;;  %v581_v48 = vshrl.u32 %v464_v33, 16  ;;  %v388_v49 = vld [vmem:[#allocation2 + $0xb4] sm:$0x1]  ;;  %3539 = vmatpush.bf16.msrb.mxu1 %v11751_v23 }
  0xb4   : > { %v1435_v41 = vpack.c.b16 %v1417_v29, %v1416_v24  ;;  %v1126_v46 = vor.u32 %v1125_v37, %v1121_v35  ;;  %v1131_v47 = vrot.slane %v1129_v31, 5  ;;  %v584_v53 = vshll.u32 %v464_v33, 16  ;;  %v444_v55 = vld [vmem:[#allocation2 + $0xbc] sm:$0x1]  ;;  %v845_v44 = vld [vmem:[#allocation2 + $0x48] sm:$0xf] }
  0xb5   : > { %v1122_v50 = vsel %vm12472_vm11, %v1117_v42, %v1121_v35  ;;  %v950_v51 = vld [vmem:[#allocation2 + $0xa8] sm:$0xf]  ;;  %v578_v52 = vor.u32 %v576_v43, %v575_v39  ;;  %v389_v54 = vsel %vm12416_vm3, 0, %v388_v49  ;;  %v579_v59 = vrot.slane %v575_v39, 4  ;;  %v481_v63 = vld [vmem:[%s12397_s13 + $0x70] sm:$0xf] }
  0xb6   : > { %1575 = vmatmul.bf16.gmra.mxu2 %v1435_v41  ;;  %v1127_v56 = vrot.slane %v1126_v46, 4  ;;  %v1326_v57 = vshrl.u32 %v950_v51, 16  ;;  %v1329_v58 = vshll.u32 %v950_v51, 16  ;;  %390 = vst [vmem:[#allocation2 + $0xb4] sm:$0x1] %v389_v54  ;;  %v1400_v60 = vunpack.c.l.b16 %v1122_v50  ;;  %v11705_v22 = vld [vmem:[#allocation7 + $0x80] sm:$0xff] }
  0xb7   : > { %v583_v61 = vrot.slane %v581_v48, 7  ;;  %v445_v62 = vsel %vm12423_vm4, 0, %v444_v55  ;;  %v846_v3 = vsel %vm12447_vm10, %v578_v52, %v845_v44  ;;  %v849_v4 = vld [vmem:[#allocation2 + $0x50] sm:$0x1]  ;;  %v482_v17 = vld [vmem:[%s12397_s13 + $0x74] sm:$0xf]  ;;  %2123 = vmatpush.bf16.msrb.mxu2 %v11705_v22 }
  0xb8   : > { %v1132_v0 = vsel %vm12472_vm11, %v1127_v56, %v1131_v47  ;;  %v1328_v1 = vrot.slane %v1326_v57, 4  ;;  %v1331_v2 = vrot.slane %v1329_v58, 5  ;;  %446 = vst [vmem:[#allocation2 + $0xbc] sm:$0x1] %v445_v62  ;;  %v951_v8 = vld [vmem:[#allocation2 + $0xac] sm:$0xf] }
  0xb9   : > { %v1401_v7 = vunpack.c.l.b16 %v1132_v0  ;;  %v11687_v9 = vld [vmem:[#allocation2 + $0xa8] sm:$0xff]  ;;  %v586_v10 = vor.u32 %v584_v53, %v583_v61  ;;  %v588_v11 = vrot.slane %v583_v61, 4  ;;  %847 = vst [vmem:[#allocation2 + $0x48] sm:$0xf] %v846_v3  ;;  %v984_v12 = vld [vmem:[#allocation2 + $0xb0] sm:$0x1] }
  0xba   : > { %v1332_v13 = vor.u32 %v1331_v2, %v1328_v1  ;;  %v1335_v15 = vshll.u32 %v951_v8, 16  ;;  %v1339_v16 = vshrl.u32 %v951_v8, 16  ;;  %v1345_v19 = vshll.u32 %v984_v12, 16  ;;  %1813 = vmatmul.bf16.gmra.mxu3 %v11687_v9  ;;  %v364_v24 = vld [vmem:[#allocation2 + $0x54] sm:$0x1]  ;;  %v11750_v61 = vld [vmem:[#allocation7 + $0x168] sm:$0xff] }
  0xbb   : > { %v1427_v18 = vpack.c.b16 %v1401_v7, %v1400_v60  ;;  %v587_v20 = vsel %vm12439_vm7, %v579_v59, %v586_v10  ;;  %v850_v21 = vsel %vm12416_vm3, %v588_v11, %v849_v4  ;;  %v726_v29 = vshrl.u32 %v481_v63, 16  ;;  %v420_v40 = vld [vmem:[#allocation2 + $0x5c] sm:$0x1]  ;;  %v465_v54 = vld [vmem:[%s12397_s13 + $0x30] sm:$0xf]  ;;  %v11729_v60 = vld [vmem:[#allocation7 + $0xc0] sm:$0xff]  ;;  %3540 = vmatpush.bf16.msrb.mxu1 %v11750_v61 }
  0xbc   : > { %v1333_v25 = vrot.slane %v1332_v13, 4  ;;  %v1337_v27 = vrot.slane %v1335_v15, 5  ;;  %v1341_v28 = vrot.slane %v1339_v16, 4  ;;  %848 = vst [vmem:[#allocation2 + $0x4c] sm:$0xf] %v587_v20  ;;  %v1347_v30 = vrot.slane %v1345_v19, 5  ;;  %2437 = vmatpush.bf16.msrb.mxu3 %v11729_v60 }
  0xbd   : > { %1535 = vmatmul.bf16.gmra.mxu0 %v1427_v18  ;;  %851 = vst [vmem:[#allocation2 + $0x50] sm:$0x1] %v850_v21  ;;  %v729_v31 = vshll.u32 %v481_v63, 16  ;;  %v734_v32 = vshrl.u32 %v482_v17, 16  ;;  %v737_v33 = vshll.u32 %v482_v17, 16  ;;  %v728_v37 = vrot.slane %v726_v29, 7 }
  0xbe   : > { %v1338_v34 = vsel %vm12472_vm11, %v1333_v25, %v1337_v27  ;;  %v1342_v35 = vor.u32 %v1341_v28, %v1337_v27  ;;  %v908_v38 = vld [vmem:[#allocation2 + $0xb4] sm:$0xf]  ;;  %v365_v39 = vsel %vm12416_vm3, 0, %v364_v24  ;;  %v421_v43 = vsel %vm12423_vm4, 0, %v420_v40  ;;  %v466_v57 = vld [vmem:[%s12397_s13 + $0x34] sm:$0xf] }
  0xbf   : > { %v736_v41 = vrot.slane %v734_v32, 7  ;;  %v912_v42 = vld [vmem:[#allocation2 + $0xbc] sm:$0x1]  ;;  %366 = vst [vmem:[#allocation2 + $0x54] sm:$0x1] %v365_v39  ;;  %v1418_v46 = vunpack.c.l.b16 %v1338_v34  ;;  %v731_v48 = vor.u32 %v729_v31, %v728_v37  ;;  %v732_v49 = vrot.slane %v728_v37, 4 }
  0xc0   : > { %v1343_v45 = vrot.slane %v1342_v35, 4  ;;  %v934_v47 = vld [vmem:[#allocation2 + $0x48] sm:$0xf]  ;;  %422 = vst [vmem:[#allocation2 + $0x5c] sm:$0x1] %v421_v43  ;;  %v590_v58 = vshrl.u32 %v465_v54, 16 }
  0xc1   : > { %v1134_v50 = vshrl.u32 %v934_v47, 16  ;;  %v1137_v51 = vshll.u32 %v934_v47, 16  ;;  %v739_v52 = vor.u32 %v737_v33, %v736_v41  ;;  %v741_v53 = vrot.slane %v736_v41, 4  ;;  %v11749_v3 = vld [vmem:[#allocation7 + $0x160] sm:$0xff]  ;;  %v11748_v28 = vld [vmem:[#allocation7 + $0x158] sm:$0xff] }
  0xc2   : > { %v1348_v55 = vsel %vm12472_vm11, %v1343_v45, %v1347_v30  ;;  %v909_v56 = vsel %vm12447_vm10, %v731_v48, %v908_v38  ;;  %v593_v59 = vshll.u32 %v465_v54, 16  ;;  %v592_v13 = vrot.slane %v590_v58, 7  ;;  %v11737_v15 = vld [vmem:[#allocation7 + $0x100] sm:$0xff]  ;;  %3541 = vmatpush.bf16.msrb.mxu1 %v11749_v3  ;;  %v11776_v35 = vld [vmem:[#allocation7 + $0x1b8] sm:$0xff] }
  0xc3   : > { %v1419_v44 = vunpack.c.l.b16 %v1348_v55  ;;  %v12679_v62 = vld [vmem:[#allocation2 + $0x4c] sm:$0xf]  ;;  %v1136_v63 = vrot.slane %v1134_v50, 4  ;;  %v1139_v0 = vrot.slane %v1137_v51, 5  ;;  %v740_v2 = vsel %vm12439_vm7, %v732_v49, %v739_v52  ;;  %910 = vst [vmem:[#allocation2 + $0xb4] sm:$0xf] %v909_v56  ;;  %3119 = vmatpush.bf16.msrb.mxu0 %v11737_v15  ;;  %3853 = vmatpush.bf16.msra.mxu2 %v11776_v35 }
  0xc4   : > { %v11679_v1 = vld [vmem:[#allocation2 + $0x48] sm:$0xff]  ;;  %v12683_v4 = vld [vmem:[#allocation2 + $0x50] sm:$0x1]  ;;  %v1143_v7 = vshll.u32 %v12679_v62, 16  ;;  %v1147_v8 = vshrl.u32 %v12679_v62, 16  ;;  %v913_v9 = vsel %vm12416_vm3, %v741_v53, %v912_v42  ;;  %v598_v18 = vshrl.u32 %v466_v57, 16 }
  0xc5   : > { %v1436_v10 = vpack.c.b16 %v1419_v44, %v1418_v46  ;;  %v1140_v11 = vor.u32 %v1139_v0, %v1136_v63  ;;  %v1153_v12 = vshll.u32 %v12683_v4, 16  ;;  %1773 = vmatmul.bf16.gmra.mxu1 %v11679_v1  ;;  %911 = vst [vmem:[#allocation2 + $0xb8] sm:$0xf] %v740_v2  ;;  %v601_v19 = vshll.u32 %v466_v57, 16  ;;  %v11747_v46 = vld [vmem:[#allocation7 + $0x150] sm:$0xff]  ;;  %v11784_v3 = vld [vmem:[#allocation7 + $0x1f8] sm:$0xff] }
  0xc6   : > { %v1145_v16 = vrot.slane %v1143_v7, 5  ;;  %v1149_v17 = vrot.slane %v1147_v8, 4  ;;  %914 = vst [vmem:[#allocation2 + $0xbc] sm:$0x1] %v913_v9  ;;  %v595_v21 = vor.u32 %v593_v59, %v592_v13  ;;  %v852_v22 = vld [vmem:[#allocation2 + $0x54] sm:$0xf]  ;;  %3542 = vmatpush.bf16.msrb.mxu1 %v11748_v28  ;;  %4535 = vmatpush.bf16.msra.mxu3 %v11784_v3 }
  0xc7   : > { %1580 = vmatmul.bf16.gmra.mxu2 %v1436_v10  ;;  %v1141_v20 = vrot.slane %v1140_v11, 4  ;;  %v1155_v24 = vrot.slane %v1153_v12, 5  ;;  %v596_v25 = vrot.slane %v592_v13, 4  ;;  %v600_v27 = vrot.slane %v598_v18, 7  ;;  %v856_v31 = vld [vmem:[#allocation2 + $0x5c] sm:$0x1] }
  0xc8   : > { %v1150_v23 = vor.u32 %v1149_v17, %v1145_v16  ;;  %v853_v30 = vsel %vm12447_vm10, %v595_v21, %v852_v22  ;;  %v2551_v59 = vld [vmem:[#allocation2 + $0xc] sm:$0xf]  ;;  %v12700_v60 = vld [vmem:[#allocation2 + $0x10] sm:$0xf]  ;;  %vm1872_vm12 = vcmask 1042432   ;;  %v11746_v7 = vld [vmem:[#allocation7 + $0x148] sm:$0xff] }
  0xc9   : > { %v1146_v29 = vsel %vm12472_vm11, %v1141_v20, %v1145_v16  ;;  %v603_v33 = vor.u32 %v601_v19, %v600_v27  ;;  %v605_v34 = vrot.slane %v600_v27, 4  ;;  %854 = vst [vmem:[#allocation2 + $0x54] sm:$0xf] %v853_v30  ;;  %v2600_v9 = vshrl.u32 %v2551_v59, 16  ;;  %v11745_v12 = vld [vmem:[#allocation7 + $0x140] sm:$0xff]  ;;  %v11792_v13 = vld [vmem:[#allocation7 + $0x238] sm:$0xff] }
  0xca   : > { %v1151_v32 = vrot.slane %v1150_v23, 4  ;;  %v1402_v37 = vunpack.c.l.b16 %v1146_v29  ;;  %v952_v38 = vld [vmem:[#allocation2 + $0xb4] sm:$0xf]  ;;  %3543 = vmatpush.bf16.msrb.mxu1 %v11747_v46  ;;  %v2603_v10 = vshll.u32 %v2551_v59, 16  ;;  %v2609_v11 = vshll.u32 %v12700_v60, 16  ;;  %4961 = vmatpush.bf16.msra.mxu0 %v11792_v13 }
  0xcb   : > { %v1350_v41 = vshrl.u32 %v952_v38, 16  ;;  %v1353_v42 = vshll.u32 %v952_v38, 16  ;;  %v604_v45 = vsel %vm12439_vm7, %v596_v25, %v603_v33  ;;  %v857_v51 = vsel %vm12416_vm3, %v605_v34, %v856_v31  ;;  %v12024_v30 = vld [vmem:[#allocation2 + $0x4] sm:$0xf]  ;;  %v1824_v35 = vld [vmem:[#allocation2] sm:$0xe] }
  0xcc   : > { %v1156_v39 = vsel %vm12472_vm11, %v1151_v32, %v1155_v24  ;;  %v953_v40 = vld [vmem:[#allocation2 + $0xb8] sm:$0xf]  ;;  %855 = vst [vmem:[#allocation2 + $0x58] sm:$0xf] %v604_v45  ;;  %v2613_v20 = vshrl.u32 %v12700_v60, 16  ;;  %v1877_v31 = vrot.slane %v12024_v30, 5 }
  0xcd   : > { %v11688_v43 = vld [vmem:[#allocation2 + $0xb4] sm:$0xff]  ;;  %v1403_v47 = vunpack.c.l.b16 %v1156_v39  ;;  %v985_v48 = vld [vmem:[#allocation2 + $0xbc] sm:$0x1]  ;;  %v1359_v49 = vshll.u32 %v953_v40, 16  ;;  %v1363_v50 = vshrl.u32 %v953_v40, 16  ;;  %v1352_v52 = vrot.slane %v1350_v41, 4 }
  0xce   : > { %v1355_v53 = vrot.slane %v1353_v42, 5  ;;  %v1369_v54 = vshll.u32 %v985_v48, 16  ;;  %1818 = vmatmul.bf16.gmra.mxu3 %v11688_v43  ;;  %858 = vst [vmem:[#allocation2 + $0x5c] sm:$0x1] %v857_v51  ;;  %3544 = vmatpush.bf16.msrb.mxu1 %v11746_v7  ;;  %v3233_v32 = vld [vmem:[#allocation2 + $0xc] sm:$0xe] }
  0xcf   : > { %v1428_v55 = vpack.c.b16 %v1403_v47, %v1402_v37  ;;  %v1361_v56 = vrot.slane %v1359_v49, 5  ;;  %v1365_v57 = vrot.slane %v1363_v50, 4  ;;  %v2602_v37 = vrot.slane %v2600_v9, 4 }
  0xd0   : > { %v1356_v58 = vor.u32 %v1355_v53, %v1352_v52  ;;  %v1371_v44 = vrot.slane %v1369_v54, 5  ;;  %v936_v63 = vld [vmem:[#allocation2 + $0x54] sm:$0xf]  ;;  %v2605_v38 = vrot.slane %v2603_v10, 5  ;;  %vm1873_vm13 = vcmask 1046532   ;;  %v11713_v52 = vld [vmem:[#allocation2 + $0xc] sm:$0xff] }
  0xd1   : > { %1540 = vmatmul.bf16.gmra.mxu0 %v1428_v55  ;;  %v1366_v61 = vor.u32 %v1365_v57, %v1361_v56  ;;  %v1158_v1 = vshrl.u32 %v936_v63, 16  ;;  %v1161_v2 = vshll.u32 %v936_v63, 16  ;;  %v12715_v41 = vrot.slane %v2609_v11, 5  ;;  %v2553_v53 = vld [vmem:[#allocation2 + $0x14] sm:$0x1]  ;;  %vm12724_vm14 = vmor %vm1872_vm12, %vm1873_vm13 }
  0xd2   : > { %v1357_v0 = vrot.slane %v1356_v58, 4  ;;  %3545 = vmatpush.bf16.msrb.mxu1 %v11745_v12  ;;  %v2615_v47 = vrot.slane %v2613_v20, 4  ;;  %v10915_v48 = vrot.slane %v3233_v32, 9  ;;  %v10739_v51 = vrot.slane %v1824_v35, 9  ;;  %v12025_v58 = vld [vmem:[#allocation2 + $0x8] sm:$0x1] }
  0xd3   : > { %v1367_v8 = vrot.slane %v1366_v61, 4  ;;  %v12705_v16 = vld [vmem:[#allocation2 + $0x58] sm:$0xf]  ;;  %v1160_v17 = vrot.slane %v1158_v1, 4  ;;  %v1163_v18 = vrot.slane %v1161_v2, 5  ;;  %v3299_v54 = vrot.slane %v12700_v60, 5 }
  0xd4   : > { %v1362_v15 = vsel %vm12472_vm11, %v1357_v0, %v1361_v56  ;;  %v11680_v19 = vld [vmem:[#allocation2 + $0x54] sm:$0xff]  ;;  %v1167_v24 = vshll.u32 %v12705_v16, 16  ;;  %v1171_v25 = vshrl.u32 %v12705_v16, 16  ;;  %v15772_v56 = vmov 0  ;;  %v12026_v35 = vld [vmem:[#allocation2 + $0x10] sm:$0xf] }
  0xd5   : > { %v1372_v21 = vsel %vm12472_vm11, %v1367_v8, %v1371_v44  ;;  %v1420_v22 = vunpack.c.l.b16 %v1362_v15  ;;  %v12710_v23 = vld [vmem:[#allocation2 + $0x5c] sm:$0x1]  ;;  %v1164_v28 = vor.u32 %v1163_v18, %v1160_v17  ;;  %1778 = vmatmul.bf16.gmra.mxu1 %v11680_v19  ;;  %v15773_v56 = vsel %vm12724_vm14, 4294967295, %v15772_v56 }
  0xd6   : > { %v1421_v27 = vunpack.c.l.b16 %v1372_v21  ;;  %v1177_v29 = vshll.u32 %v12710_v23, 16  ;;  %v1169_v33 = vrot.slane %v1167_v24, 5  ;;  %v1173_v34 = vrot.slane %v1171_v25, 4  ;;  %15774 = vst [vmem:[#allocation19_spill] sm:$0xff] %v15773_v56 }
  0xd7   : > { %v1165_v40 = vrot.slane %v1164_v28, 4  ;;  %v1879_v57 = vrot.slane %v1877_v31, 4  ;;  %v1880_v59 = vrot.slane %v12025_v58, 5  ;;  %v2606_v61 = vor.u32 %v2605_v38, %v2602_v37 }
  0xd8   : > { %v1437_v39 = vpack.c.b16 %v1421_v27, %v1420_v22  ;;  %v1174_v42 = vor.u32 %v1173_v34, %v1169_v33  ;;  %v1179_v43 = vrot.slane %v1177_v29, 5  ;;  %v1744_v46 = vpop.f32.mrf.mxu1  ;;  %v3300_v63 = vsel %vm12724_vm14, %v10915_v48, %v3299_v54  ;;  %v2554_v27 = vld [vmem:[#allocation2 + $0x18] sm:$0xf]  ;;  %v2555_v29 = vld [vmem:[#allocation2 + $0x1c] sm:$0xf] }
  0xd9   : > { %v1170_v49 = vsel %vm12472_vm11, %v1165_v40, %v1169_v33  ;;  %v3301_v0 = vrot.slane %v3299_v54, 4  ;;  %v3302_v1 = vrot.slane %v2553_v53, 5  ;;  %v2616_v2 = vor.u32 %v2615_v47, %v12715_v41  ;;  %v1825_v34 = vld [vmem:[#allocation2 + $0xc] sm:$0xe] }
  0xda   : > { %v1511_v45 = vpop.f32.mrf.mxu0  ;;  %1585 = vmatmul.bf16.gmra.mxu2 %v1437_v39  ;;  %v1175_v55 = vrot.slane %v1174_v42, 4  ;;  %v1404_v44 = vunpack.c.l.b16 %v1170_v49  ;;  %v2619_v3 = vshll.u32 %v2553_v53, 16  ;;  %v3426_v10 = vunpack.c.l.b16 %v3300_v63  ;;  %v11714_v63 = vld [vmem:[#allocation2 + $0x18] sm:$0xff] }
  0xdb   : > { %v12719_v50 = vadd.f32 %v1744_v46, %v1511_v45  ;;  %v3303_v9 = vsel %vm12724_vm14, %v3301_v0, %v3302_v1  ;;  %v1878_v11 = vsel %vm12724_vm14, %v10739_v51, %v1877_v31  ;;  %v1881_v12 = vsel %vm12724_vm14, %v1879_v57, %v1880_v59  ;;  %v3234_v31 = vld [vmem:[#allocation2 + $0x18] sm:$0xe]  ;;  %v2556_v45 = vld [vmem:[#allocation2 + $0x20] sm:$0x1]  ;;  %v12027_v57 = vld [vmem:[#allocation2 + $0x14] sm:$0x1] }
  0xdc   : > { %v1180_v60 = vsel %vm12472_vm11, %v1175_v55, %v1179_v43  ;;  %v1784_v8 = vpop.f32.mrf.mxu3  ;;  %v3427_v13 = vunpack.c.l.b16 %v3303_v9  ;;  %v2607_v17 = vrot.slane %v2606_v61, 4  ;;  %v2617_v18 = vrot.slane %v2616_v2, 4 }
  0xdd   : > { %v1405_v7 = vunpack.c.l.b16 %v1180_v60  ;;  %v2621_v19 = vrot.slane %v2619_v3, 5  ;;  %v2004_v21 = vunpack.c.l.b16 %v1878_v11  ;;  %v2005_v22 = vunpack.c.l.b16 %v1881_v12  ;;  %v11775_v60 = vld [vmem:[#allocation7 + $0x1b0] sm:$0xff] }
  0xde   : > { %2438 = vmatmul.bf16.vlgmr.msrb.gmra.mxu3 %v11713_v52  ;;  %v3458_v25 = vpack.c.b16 %v3427_v13, %v3426_v10  ;;  %v2612_v30 = vsel %vm12472_vm11, %v2607_v17, %v12715_v41  ;;  %v3306_v32 = vrot.slane %v2555_v29, 5  ;;  %v1884_v37 = vrot.slane %v12026_v35, 5  ;;  %3854 = vmatpush.bf16.msra.mxu2 %v11775_v60  ;;  %v11783_v35 = vld [vmem:[#allocation7 + $0x1f0] sm:$0xff] }
  0xdf   : > { %v1429_v15 = vpack.c.b16 %v1405_v7, %v1404_v44  ;;  %v2622_v33 = vsel %vm12472_vm11, %v2617_v18, %v2621_v19  ;;  %v2624_v38 = vshrl.u32 %v2554_v27, 16  ;;  %v2627_v39 = vshll.u32 %v2554_v27, 16  ;;  %4536 = vmatpush.bf16.msra.mxu3 %v11783_v35 }
  0xe0   : > { %v12739_v20 = vpop.f32.mrf.mxu1  ;;  %v2036_v40 = vpack.c.b16 %v2005_v22, %v2004_v21  ;;  %v2633_v46 = vshll.u32 %v2555_v29, 16  ;;  %v2637_v47 = vshrl.u32 %v2555_v29, 16  ;;  %v10916_v48 = vrot.slane %v3234_v31, 9  ;;  %v2557_v29 = vld [vmem:[#allocation2 + $0x24] sm:$0xf] }
  0xe1   : > { %1545 = vmatmul.bf16.gmra.mxu0 %v1429_v15  ;;  %v3308_v41 = vrot.slane %v3306_v32, 4  ;;  %v3309_v49 = vrot.slane %v2556_v45, 5  ;;  %v3000_v51 = vunpack.c.l.b16 %v2612_v30  ;;  %v3001_v52 = vunpack.c.l.b16 %v2622_v33 }
  0xe2   : > { %v12748_v42 = vpop.f32.mrf.mxu0  ;;  %v10740_v53 = vrot.slane %v1825_v34, 9  ;;  %v1886_v55 = vrot.slane %v1884_v37, 4  ;;  %v1887_v58 = vrot.slane %v12027_v57, 5  ;;  %v2626_v59 = vrot.slane %v2624_v38, 4  ;;  %v2558_v34 = vld [vmem:[#allocation2 + $0x28] sm:$0xf] }
  0xe3   : > { %v2629_v61 = vrot.slane %v2627_v39, 5  ;;  %v2635_v0 = vrot.slane %v2633_v46, 5  ;;  %v2639_v1 = vrot.slane %v2637_v47, 4  ;;  %v3307_v3 = vsel %vm12724_vm14, %v10916_v48, %v3306_v32  ;;  %v1826_v46 = vld [vmem:[#allocation2 + $0x18] sm:$0xe] }
  0xe4   : > { %v1786_v43 = vpop.f32.mrf.mxu3  ;;  %v3310_v7 = vsel %vm12724_vm14, %v3308_v41, %v3309_v49  ;;  %v1885_v9 = vsel %vm12724_vm14, %v10740_v53, %v1884_v37  ;;  %v1888_v10 = vsel %vm12724_vm14, %v1886_v55, %v1887_v58  ;;  %v2643_v13 = vshll.u32 %v2556_v45, 16  ;;  %v11791_v37 = vld [vmem:[#allocation7 + $0x230] sm:$0xff]  ;;  %v12028_v47 = vld [vmem:[#allocation2 + $0x1c] sm:$0xf] }
  0xe5   : > { %3546 = vmatmul.bf16.vlgmr.msrb.gmra.mxu1 %v3458_v25  ;;  %v2630_v11 = vor.u32 %v2629_v61, %v2626_v59  ;;  %v2640_v12 = vor.u32 %v2639_v1, %v2635_v0  ;;  %v3428_v17 = vunpack.c.l.b16 %v3307_v3  ;;  %v3429_v18 = vunpack.c.l.b16 %v3310_v7  ;;  %4962 = vmatpush.bf16.msra.mxu0 %v11791_v37  ;;  %v12029_v61 = vld [vmem:[#allocation2 + $0x20] sm:$0x1] }
  0xe6   : > { %v1551_v24 = vpop.f32.mrf.mxu2  ;;  %v2006_v22 = vunpack.c.l.b16 %v1885_v9  ;;  %v2645_v31 = vrot.slane %v2643_v13, 5  ;;  %v3313_v39 = vrot.slane %v2558_v34, 5  ;;  %v1891_v48 = vrot.slane %v12028_v47, 5  ;;  %v11715_v9 = vld [vmem:[#allocation2 + $0x24] sm:$0xff]  ;;  %v2560_v47 = vld [vmem:[#allocation2 + $0x30] sm:$0xf] }
  0xe7   : > { %v12741_v28 = vadd.f32 %v1784_v8, %v1551_v24  ;;  %v3032_v8 = vpack.c.b16 %v3001_v52, %v3000_v51  ;;  %v2007_v24 = vunpack.c.l.b16 %v1888_v10  ;;  %v2631_v25 = vrot.slane %v2630_v11, 4  ;;  %v2559_v52 = vld [vmem:[#allocation2 + $0x2c] sm:$0x1] }
  0xe8   : > { %v1749_v54 = vpop.f32.mrf.mxu1  ;;  %v2641_v30 = vrot.slane %v2640_v12, 4  ;;  %v3459_v33 = vpack.c.b16 %v3429_v18, %v3428_v17  ;;  %v2648_v41 = vshrl.u32 %v2557_v29, 16  ;;  %v2651_v53 = vshll.u32 %v2557_v29, 16 }
  0xe9   : > { %v2636_v45 = vsel %vm12472_vm11, %v2631_v25, %v2635_v0  ;;  %v2661_v55 = vshrl.u32 %v2558_v34, 16  ;;  %v3315_v58 = vrot.slane %v3313_v39, 4  ;;  %v3316_v59 = vrot.slane %v2559_v52, 5 }
  0xea   : > { %2124 = vmatmul.bf16.vlgmr.msrb.gmra.mxu2 %v2036_v40  ;;  %v3235_v40 = vld [vmem:[#allocation2 + $0x24] sm:$0xe]  ;;  %v2646_v49 = vsel %vm12472_vm11, %v2641_v30, %v2645_v31  ;;  %v10741_v60 = vrot.slane %v1826_v46, 9  ;;  %v1893_v3 = vrot.slane %v1891_v48, 4  ;;  %v2650_v10 = vrot.slane %v2648_v41, 4 }
  0xeb   : > { %v10917_v57 = vrot.slane %v3235_v40, 9  ;;  %v3003_v0 = vunpack.c.l.b16 %v2646_v49  ;;  %v2653_v11 = vrot.slane %v2651_v53, 5  ;;  %v2663_v13 = vrot.slane %v2661_v55, 4 }
  0xec   : > { %v1789_v15 = vpop.f32.mrf.mxu3  ;;  %v3317_v18 = vsel %vm12724_vm14, %v3315_v58, %v3316_v59  ;;  %v2667_v25 = vshll.u32 %v2559_v52, 16  ;;  %v3236_v52 = vld [vmem:[#allocation2 + $0x30] sm:$0xe]  ;;  %v2672_v55 = vshrl.u32 %v2560_v47, 16 }
  0xed   : > { %v3314_v17 = vsel %vm12724_vm14, %v10917_v57, %v3313_v39  ;;  %v2654_v29 = vor.u32 %v2653_v11, %v2650_v10  ;;  %v2675_v57 = vshll.u32 %v2560_v47, 16 }
  0xee   : > { %v1553_v44 = vpop.f32.mrf.mxu2  ;;  %2443 = vmatmul.bf16.gmra.mxu3 %v11714_v63  ;;  %v3002_v63 = vunpack.c.l.b16 %v2636_v45  ;;  %v2669_v37 = vrot.slane %v2667_v25, 5  ;;  %v2674_v25 = vrot.slane %v2672_v55, 4 }
  0xef   : > { %v12750_v2 = vadd.f32 %v1786_v43, %v1553_v44  ;;  %v2037_v43 = vpack.c.b16 %v2007_v24, %v2006_v22  ;;  %v1894_v44 = vrot.slane %v12029_v61, 5  ;;  %v1892_v22 = vsel %vm12724_vm14, %v10741_v60, %v1891_v48  ;;  %v2561_v48 = vld [vmem:[#allocation2 + $0x34] sm:$0xf] }
  0xf0   : > { %v12762_v27 = vpop.f32.mrf.mxu1  ;;  %v2655_v40 = vrot.slane %v2654_v29, 4  ;;  %v3320_v49 = vrot.slane %v2561_v48, 5  ;;  %v2685_v60 = vshrl.u32 %v2561_v48, 16  ;;  %v2677_v29 = vrot.slane %v2675_v57, 5 }
  0xf1   : > { %3120 = vmatmul.bf16.vlgmr.msrb.gmra.mxu0 %v3032_v8  ;;  %v1895_v24 = vsel %vm12724_vm14, %v1893_v3, %v1894_v44  ;;  %v1827_v44 = vld [vmem:[#allocation2 + $0x24] sm:$0xe]  ;;  %v12030_v3 = vld [vmem:[#allocation2 + $0x28] sm:$0xf] }
  0xf2   : > { %v2009_v35 = vunpack.c.l.b16 %v1895_v24  ;;  %v11716_v24 = vld [vmem:[#allocation2 + $0x30] sm:$0xff]  ;;  %v2678_v47 = vor.u32 %v2677_v29, %v2674_v25 }
  0xf3   : > { %v1516_v19 = vpop.f32.mrf.mxu0 }
  0xf4   : > { %v12760_v21 = vadd.f32 %v1749_v54, %v1516_v19  ;;  %v1791_v51 = vpop.f32.mrf.mxu3  ;;  %v2657_v54 = vshll.u32 %v2558_v34, 16  ;;  %v3033_v19 = vpack.c.b16 %v3003_v0, %v3002_v63  ;;  %v2008_v34 = vunpack.c.l.b16 %v1892_v22  ;;  %v2562_v63 = vld [vmem:[#allocation2 + $0x38] sm:$0x1] }
  0xf5   : > { %3551 = vmatmul.bf16.gmra.mxu1 %v3459_v33  ;;  %v3431_v33 = vunpack.c.l.b16 %v3317_v18  ;;  %v2681_v0 = vshll.u32 %v2561_v48, 16  ;;  %v3323_v10 = vrot.slane %v2562_v63, 5  ;;  %v10742_v18 = vrot.slane %v1827_v44, 9 }
  0xf6   : > { %v1556_v32 = vpop.f32.mrf.mxu2  ;;  %v2659_v12 = vrot.slane %v2657_v54, 5  ;;  %v2038_v54 = vpack.c.b16 %v2009_v35, %v2008_v34 }
  0xf7   : > { %v12764_v38 = vadd.f32 %v1789_v15, %v1556_v32  ;;  %v3430_v32 = vunpack.c.l.b16 %v3314_v17 }
  0xf8   : > { %v2664_v30 = vor.u32 %v2663_v13, %v2659_v12  ;;  %v2660_v58 = vsel %vm12472_vm11, %v2655_v40, %v2659_v12 }
  0xf9   : > { %v3460_v46 = vpack.c.b16 %v3431_v33, %v3430_v32  ;;  %v3004_v11 = vunpack.c.l.b16 %v2660_v58  ;;  %v11774_v32 = vld [vmem:[#allocation7 + $0x1a8] sm:$0xff] }
  0xfa   : > { %v1754_v1 = vpop.f32.mrf.mxu1  ;;  %2129 = vmatmul.bf16.gmra.mxu2 %v2037_v43  ;;  %v2665_v43 = vrot.slane %v2664_v30, 4  ;;  %v2683_v30 = vrot.slane %v2681_v0, 5  ;;  %v2563_v58 = vld [vmem:[#allocation2 + $0x3c] sm:$0xf] }
  0xfb   : > { %v12770_v7 = vpop.f32.mrf.mxu0  ;;  %3855 = vmatpush.bf16.msra.mxu2 %v11774_v32 }
  0xfc   : > { %v1794_v31 = vpop.f32.mrf.mxu3  ;;  %v2670_v59 = vsel %vm12472_vm11, %v2665_v43, %v2669_v37 }
  0xfd   : > { %v3005_v13 = vunpack.c.l.b16 %v2670_v59 }
  0xfe   : > { %v1558_v8 = vpop.f32.mrf.mxu2  ;;  %2448 = vmatmul.bf16.gmra.mxu3 %v11715_v9  ;;  %v10918_v9 = vrot.slane %v3236_v52, 9 }
  0xff   : > { %v12772_v15 = vadd.f32 %v1791_v51, %v1558_v8  ;;  %v1898_v8 = vrot.slane %v12030_v3, 5  ;;  %v3034_v43 = vpack.c.b16 %v3005_v13, %v3004_v11  ;;  %v11782_v3 = vld [vmem:[#allocation7 + $0x1e8] sm:$0xff]  ;;  %v2696_v11 = vshrl.u32 %v2563_v58, 16 }
 0x100   : > { %v3321_v35 = vsel %vm12724_vm14, %v10918_v9, %v3320_v49  ;;  %v2699_v13 = vshll.u32 %v2563_v58, 16  ;;  %4537 = vmatpush.bf16.msra.mxu3 %v11782_v3 }
 0x101   : > { %3125 = vmatmul.bf16.gmra.mxu0 %v3033_v19  ;;  %v12031_v19 = vld [vmem:[#allocation2 + $0x2c] sm:$0x1]  ;;  %v1900_v34 = vrot.slane %v1898_v8, 4  ;;  %v3432_v52 = vunpack.c.l.b16 %v3321_v35  ;;  %v1828_v35 = vld [vmem:[#allocation2 + $0x30] sm:$0xe] }
 0x102   : > { %v12782_v39 = vpop.f32.mrf.mxu1  ;;  %v1901_v12 = vrot.slane %v12031_v19, 5 }
 0x104   : > { %v1796_v61 = vpop.f32.mrf.mxu3 }
 0x105   : > { %3556 = vmatmul.bf16.gmra.mxu1 %v3460_v46  ;;  %v2691_v46 = vshll.u32 %v2562_v63, 16  ;;  %v11790_v63 = vld [vmem:[#allocation7 + $0x228] sm:$0xff] }
 0x106   : > { %v1561_v45 = vpop.f32.mrf.mxu2  ;;  %v1521_v51 = vpop.f32.mrf.mxu0  ;;  %4963 = vmatpush.bf16.msra.mxu0 %v11790_v63 }
 0x107   : > { %v12784_v41 = vadd.f32 %v1794_v31, %v1561_v45  ;;  %v12786_v53 = vadd.f32 %v1754_v1, %v1521_v51  ;;  %v3322_v1 = vrot.slane %v3320_v49, 4  ;;  %v2687_v31 = vrot.slane %v2685_v60, 4  ;;  %v2564_v60 = vld [vmem:[#allocation2 + $0x40] sm:$0xf] }
 0x108   : > { %v1899_v45 = vsel %vm12724_vm14, %v10742_v18, %v1898_v8  ;;  %v1902_v49 = vsel %vm12724_vm14, %v1900_v34, %v1901_v12  ;;  %v2693_v57 = vrot.slane %v2691_v46, 5  ;;  %v3237_v18 = vld [vmem:[#allocation2 + $0x3c] sm:$0xe]  ;;  %v2705_v12 = vshll.u32 %v2564_v60, 16  ;;  %v2565_v34 = vld [vmem:[#allocation2 + $0x44] sm:$0x1] }
 0x109   : > { %15775 = vst [vmem:[#allocation20_spill] sm:$0xff] %v12784_v41  ;;  %v3324_v37 = vsel %vm12724_vm14, %v3322_v1, %v3323_v10  ;;  %v2688_v48 = vor.u32 %v2687_v31, %v2683_v30  ;;  %v2010_v55 = vunpack.c.l.b16 %v1899_v45  ;;  %v2011_v59 = vunpack.c.l.b16 %v1902_v49 }
 0x10a   : > { %v1759_v17 = vpop.f32.mrf.mxu1  ;;  %2134 = vmatmul.bf16.gmra.mxu2 %v2038_v54  ;;  %v3433_v54 = vunpack.c.l.b16 %v3324_v37  ;;  %v3327_v1 = vrot.slane %v2564_v60, 5  ;;  %v12032_v37 = vld [vmem:[#allocation2 + $0x34] sm:$0xf]  ;;  %v10919_v45 = vrot.slane %v3237_v18, 9 }
 0x10b   : > { %v2689_v44 = vrot.slane %v2688_v48, 4  ;;  %v2039_v25 = vpack.c.b16 %v2011_v59, %v2010_v55  ;;  %v2698_v48 = vrot.slane %v2696_v11, 4  ;;  %v11717_v55 = vld [vmem:[#allocation2 + $0x3c] sm:$0xff]  ;;  %v12033_v59 = vld [vmem:[#allocation2 + $0x38] sm:$0x1]  ;;  %v2715_v11 = vshll.u32 %v2565_v34, 16 }
 0x10c   : > { %v1799_v51 = vpop.f32.mrf.mxu3  ;;  %v3461_v0 = vpack.c.b16 %v3433_v54, %v3432_v52  ;;  %v3329_v46 = vrot.slane %v3327_v1, 4 }
 0x10d   : > { %v2694_v31 = vsel %vm12472_vm11, %v2689_v44, %v2693_v57  ;;  %v3328_v44 = vsel %vm12724_vm14, %v10919_v45, %v3327_v1 }
 0x10e   : > { %v1563_v22 = vpop.f32.mrf.mxu2  ;;  %v12798_v40 = vpop.f32.mrf.mxu0  ;;  %2453 = vmatmul.bf16.gmra.mxu3 %v11716_v24  ;;  %v3007_v49 = vunpack.c.l.b16 %v2694_v31 }
 0x10f   : > { %v12792_v33 = vadd.f32 %v1796_v61, %v1563_v22  ;;  %v2679_v61 = vrot.slane %v2678_v47, 4  ;;  %v2709_v22 = vshrl.u32 %v2564_v60, 16  ;;  %v3330_v47 = vrot.slane %v2565_v34, 5 }
 0x111   : > { %15776 = vst [vmem:[#allocation21_spill] sm:$0xff] %v12792_v33  ;;  %3130 = vmatmul.bf16.gmra.mxu0 %v3034_v43  ;;  %v2684_v29 = vsel %vm12472_vm11, %v2679_v61, %v2683_v30  ;;  %v1905_v43 = vrot.slane %v12032_v37, 5  ;;  %v2711_v52 = vrot.slane %v2709_v22, 4  ;;  %v10743_v30 = vrot.slane %v1828_v35, 9  ;;  %v2566_v35 = vld [vmem:[#allocation2 + $0x48] sm:$0xf] }
 0x112   : > { %v12804_v9 = vpop.f32.mrf.mxu1  ;;  %v3006_v54 = vunpack.c.l.b16 %v2684_v29  ;;  %v1908_v61 = vrot.slane %v12033_v59, 5  ;;  %v11722_v33 = vld [vmem:[#allocation2 + $0x78] sm:$0xff] }
 0x113   : > { %v1907_v57 = vrot.slane %v1905_v43, 4 }
 0x114   : > { %v1801_v32 = vpop.f32.mrf.mxu3 }
 0x115   : > { %3561 = vmatmul.bf16.gmra.mxu1 %v3461_v0  ;;  %v3331_v0 = vsel %vm12724_vm14, %v3329_v46, %v3330_v47  ;;  %v1909_v1 = vsel %vm12724_vm14, %v1907_v57, %v1908_v61  ;;  %v2567_v46 = vld [vmem:[#allocation2 + $0x4c] sm:$0xf] }
 0x116   : > { %v1566_v8 = vpop.f32.mrf.mxu2  ;;  %v1526_v19 = vpop.f32.mrf.mxu0  ;;  %v2013_v34 = vunpack.c.l.b16 %v1909_v1  ;;  %v3334_v47 = vrot.slane %v2567_v46, 5 }
 0x117   : > { %v12806_v10 = vadd.f32 %v1799_v51, %v1566_v8  ;;  %v12808_v24 = vadd.f32 %v1759_v17, %v1526_v19  ;;  %v2701_v51 = vrot.slane %v2699_v13, 5  ;;  %v2707_v17 = vrot.slane %v2705_v12, 5 }
 0x118   : > { %v3035_v13 = vpack.c.b16 %v3007_v49, %v3006_v54  ;;  %v3434_v19 = vunpack.c.l.b16 %v3328_v44  ;;  %v3435_v12 = vunpack.c.l.b16 %v3331_v0  ;;  %v1829_v44 = vld [vmem:[#allocation2 + $0x3c] sm:$0xe]  ;;  %v12034_v0 = vld [vmem:[#allocation2 + $0x40] sm:$0xf] }
 0x119   : > { %15777 = vst [vmem:[#allocation22_spill] sm:$0xff] %v12806_v10  ;;  %v2702_v3 = vor.u32 %v2701_v51, %v2698_v48  ;;  %v2712_v8 = vor.u32 %v2711_v52, %v2707_v17  ;;  %v2720_v51 = vshrl.u32 %v2566_v35, 16  ;;  %v3238_v52 = vld [vmem:[#allocation2 + $0x48] sm:$0xe] }
 0x11a   : > { %2139 = vmatmul.bf16.gmra.mxu2 %v2039_v25  ;;  %v1906_v25 = vsel %vm12724_vm14, %v10743_v30, %v1905_v43  ;;  %v3462_v45 = vpack.c.b16 %v3435_v12, %v3434_v19  ;;  %v2723_v30 = vshll.u32 %v2566_v35, 16 }
 0x11b   : > { %v2703_v29 = vrot.slane %v2702_v3, 4  ;;  %v2713_v31 = vrot.slane %v2712_v8, 4  ;;  %v2012_v37 = vunpack.c.l.b16 %v1906_v25  ;;  %v1912_v3 = vrot.slane %v12034_v0, 5  ;;  %v2568_v8 = vld [vmem:[#allocation2 + $0x50] sm:$0x1] }
 0x11c   : > { %v1804_v18 = vpop.f32.mrf.mxu3  ;;  %v2722_v25 = vrot.slane %v2720_v51, 4 }
 0x11d   : > { %v2708_v48 = vsel %vm12472_vm11, %v2703_v29, %v2707_v17  ;;  %v2040_v57 = vpack.c.b16 %v2013_v34, %v2012_v37  ;;  %v10920_v17 = vrot.slane %v3238_v52, 9  ;;  %v10744_v29 = vrot.slane %v1829_v44, 9  ;;  %v12035_v34 = vld [vmem:[#allocation2 + $0x44] sm:$0x1] }
 0x11e   : > { %v1568_v58 = vpop.f32.mrf.mxu2  ;;  %v1764_v63 = vpop.f32.mrf.mxu1  ;;  %2458 = vmatmul.bf16.gmra.mxu3 %v11717_v55  ;;  %v2729_v55 = vshll.u32 %v2567_v46, 16  ;;  %v3008_v19 = vunpack.c.l.b16 %v2708_v48 }
 0x11f   : > { %v12818_v60 = vadd.f32 %v1801_v32, %v1568_v58  ;;  %v12820_v22 = vpop.f32.mrf.mxu0  ;;  %v2717_v32 = vrot.slane %v2715_v11, 5  ;;  %v2733_v58 = vshrl.u32 %v2567_v46, 16  ;;  %v3336_v11 = vrot.slane %v3334_v47, 4  ;;  %v11718_v46 = vld [vmem:[#allocation2 + $0x48] sm:$0xff] }
 0x120   : > { %v3335_v52 = vsel %vm12724_vm14, %v10920_v17, %v3334_v47 }
 0x121   : > { %15778 = vst [vmem:[#allocation23_spill] sm:$0xff] %v12818_v60  ;;  %3135 = vmatmul.bf16.gmra.mxu0 %v3035_v13  ;;  %v2718_v43 = vsel %vm12472_vm11, %v2713_v31, %v2717_v32  ;;  %v3337_v13 = vrot.slane %v2568_v8, 5  ;;  %v2725_v31 = vrot.slane %v2723_v30, 5  ;;  %v2731_v32 = vrot.slane %v2729_v55, 5 }
 0x122   : > { %v3009_v12 = vunpack.c.l.b16 %v2718_v43  ;;  %v2735_v35 = vrot.slane %v2733_v58, 4  ;;  %v3436_v47 = vunpack.c.l.b16 %v3335_v52 }
 0x123   : > { %v3338_v48 = vsel %vm12724_vm14, %v3336_v11, %v3337_v13  ;;  %v2726_v30 = vor.u32 %v2725_v31, %v2722_v25  ;;  %v2569_v25 = vld [vmem:[#allocation2 + $0x54] sm:$0xf] }
 0x124   : > { %v1806_v61 = vpop.f32.mrf.mxu3  ;;  %v3036_v43 = vpack.c.b16 %v3009_v12, %v3008_v19  ;;  %v2736_v55 = vor.u32 %v2735_v35, %v2731_v32  ;;  %v3437_v17 = vunpack.c.l.b16 %v3338_v48  ;;  %v11781_v31 = vld [vmem:[#allocation7 + $0x1e0] sm:$0xff]  ;;  %v2744_v52 = vshrl.u32 %v2569_v25, 16 }
 0x125   : > { %3566 = vmatmul.bf16.gmra.mxu1 %v3462_v45  ;;  %v1915_v45 = vrot.slane %v12035_v34, 5  ;;  %v2727_v12 = vrot.slane %v2726_v30, 4  ;;  %4538 = vmatpush.bf16.msra.mxu3 %v11781_v31  ;;  %v2747_v48 = vshll.u32 %v2569_v25, 16  ;;  %v11719_v31 = vld [vmem:[#allocation2 + $0x54] sm:$0xff] }
 0x126   : > { %v1571_v54 = vpop.f32.mrf.mxu2  ;;  %v1766_v49 = vpop.f32.mrf.mxu1  ;;  %v2737_v34 = vrot.slane %v2736_v55, 4  ;;  %v2746_v25 = vrot.slane %v2744_v52, 4 }
 0x127   : > { %v12830_v59 = vadd.f32 %v1804_v18, %v1571_v54  ;;  %v1914_v18 = vrot.slane %v1912_v3, 4  ;;  %v1913_v54 = vsel %vm12724_vm14, %v10744_v29, %v1912_v3  ;;  %v2570_v29 = vld [vmem:[#allocation2 + $0x58] sm:$0xf] }
 0x128   : > { %v2014_v13 = vunpack.c.l.b16 %v1913_v54  ;;  %v3341_v35 = vrot.slane %v2570_v29, 5  ;;  %v2571_v54 = vld [vmem:[#allocation2 + $0x5c] sm:$0x1]  ;;  %v2753_v30 = vshll.u32 %v2570_v29, 16  ;;  %v2757_v55 = vshrl.u32 %v2570_v29, 16 }
 0x129   : > { %15779 = vst [vmem:[#allocation24_spill] sm:$0xff] %v12830_v59  ;;  %v1916_v44 = vsel %vm12724_vm14, %v1914_v18, %v1915_v45  ;;  %v3239_v18 = vld [vmem:[#allocation2 + $0x54] sm:$0xe]  ;;  %v1922_v29 = vrot.slane %v12683_v4, 5 }
 0x12a   : > { %v1531_v1 = vpop.f32.mrf.mxu0  ;;  %2144 = vmatmul.bf16.gmra.mxu2 %v2040_v57  ;;  %v2015_v19 = vunpack.c.l.b16 %v1916_v44  ;;  %v11789_v44 = vld [vmem:[#allocation7 + $0x220] sm:$0xff]  ;;  %v2759_v59 = vrot.slane %v2757_v55, 4  ;;  %v2763_v55 = vshll.u32 %v2571_v54, 16 }
 0x12b   : > { %v12832_v37 = vadd.f32 %v1764_v63, %v1531_v1  ;;  %v2739_v63 = vshll.u32 %v2568_v8, 16  ;;  %v11773_v1 = vld [vmem:[#allocation7 + $0x1a0] sm:$0xff]  ;;  %v3463_v8 = vpack.c.b16 %v3437_v17, %v3436_v47  ;;  %v10921_v47 = vrot.slane %v3239_v18, 9  ;;  %4964 = vmatpush.bf16.msra.mxu0 %v11789_v44 }
 0x12c   : > { %3856 = vmatpush.bf16.msra.mxu2 %v11773_v1  ;;  %v2041_v45 = vpack.c.b16 %v2015_v19, %v2014_v13  ;;  %v3343_v17 = vrot.slane %v3341_v35, 4  ;;  %v3344_v1 = vrot.slane %v2571_v54, 5 }
 0x12d   : > { %v1809_v0 = vpop.f32.mrf.mxu3 }
 0x12e   : > { %v1573_v51 = vpop.f32.mrf.mxu2  ;;  %v1769_v57 = vpop.f32.mrf.mxu1  ;;  %2463 = vmatmul.bf16.gmra.mxu3 %v11718_v46  ;;  %v2732_v46 = vsel %vm12472_vm11, %v2727_v12, %v2731_v32 }
 0x12f   : > { %v12840_v58 = vadd.f32 %v1806_v61, %v1573_v51  ;;  %v2741_v61 = vrot.slane %v2739_v63, 5  ;;  %v1830_v63 = vld [vmem:[#allocation2 + $0x48] sm:$0xe] }
 0x131   : > { %15780 = vst [vmem:[#allocation25_spill] sm:$0xff] %v12840_v58  ;;  %3140 = vmatmul.bf16.gmra.mxu0 %v3036_v43  ;;  %v2742_v51 = vsel %vm12472_vm11, %v2737_v34, %v2741_v61  ;;  %v2749_v34 = vrot.slane %v2747_v48, 5  ;;  %v2755_v58 = vrot.slane %v2753_v30, 5 }
 0x132   : > { %v1533_v11 = vpop.f32.mrf.mxu0  ;;  %v3011_v19 = vunpack.c.l.b16 %v2742_v51 }
 0x133   : > { %v12844_v3 = vadd.f32 %v1766_v49, %v1533_v11  ;;  %v1919_v49 = vrot.slane %v12679_v62, 5  ;;  %v3010_v11 = vunpack.c.l.b16 %v2732_v46  ;;  %v10745_v62 = vrot.slane %v1830_v63, 9 }
 0x134   : > { %v3342_v46 = vsel %vm12724_vm14, %v10921_v47, %v3341_v35  ;;  %v2750_v48 = vor.u32 %v2749_v34, %v2746_v25  ;;  %v2760_v30 = vor.u32 %v2759_v59, %v2755_v58  ;;  %v2572_v35 = vld [vmem:[#allocation2 + $0x60] sm:$0xf]  ;;  %v2573_v34 = vld [vmem:[#allocation2 + $0x64] sm:$0xf] }
 0x135   : > { %v1811_v43 = vpop.f32.mrf.mxu3  ;;  %3571 = vmatmul.bf16.gmra.mxu1 %v3463_v8  ;;  %v1921_v8 = vrot.slane %v1919_v49, 4  ;;  %v3037_v52 = vpack.c.b16 %v3011_v19, %v3010_v11  ;;  %v1920_v4 = vsel %vm12724_vm14, %v10745_v62, %v1919_v49  ;;  %v2765_v62 = vrot.slane %v2763_v55, 5  ;;  %v3240_v59 = vld [vmem:[#allocation2 + $0x60] sm:$0xe] }
 0x136   : > { %v1771_v32 = vpop.f32.mrf.mxu1  ;;  %v2751_v19 = vrot.slane %v2750_v48, 4  ;;  %v2761_v49 = vrot.slane %v2760_v30, 4  ;;  %v2771_v54 = vshll.u32 %v2572_v35, 16  ;;  %v1926_v48 = vrot.slane %v12705_v16, 5 }
 0x137   : > { %v1929_v16 = vrot.slane %v12710_v23, 5 }
 0x139   : > { %v1576_v13 = vpop.f32.mrf.mxu2 }
 0x13a   : > { %v12851_v12 = vadd.f32 %v1809_v0, %v1576_v13  ;;  %v1536_v61 = vpop.f32.mrf.mxu0  ;;  %2149 = vmatmul.bf16.gmra.mxu2 %v2041_v45  ;;  %v3345_v0 = vsel %vm12724_vm14, %v3343_v17, %v3344_v1  ;;  %v3438_v45 = vunpack.c.l.b16 %v3342_v46  ;;  %v2016_v1 = vunpack.c.l.b16 %v1920_v4 }
 0x13b   : > { %v12854_v18 = vadd.f32 %v1769_v57, %v1536_v61  ;;  %v3439_v63 = vunpack.c.l.b16 %v3345_v0  ;;  %v1923_v57 = vsel %vm12724_vm14, %v1921_v8, %v1922_v29  ;;  %v2768_v8 = vshrl.u32 %v2572_v35, 16 }
 0x13c   : > { %15781 = vst [vmem:[#allocation26_spill] sm:$0xff] %v12851_v12  ;;  %v2017_v11 = vunpack.c.l.b16 %v1923_v57  ;;  %v2777_v29 = vshll.u32 %v2573_v34, 16  ;;  %v2756_v0 = vsel %vm12472_vm11, %v2751_v19, %v2755_v58  ;;  %v10922_v4 = vrot.slane %v3240_v59, 9 }
 0x13d   : > { %v1814_v51 = vpop.f32.mrf.mxu3  ;;  %v3464_v25 = vpack.c.b16 %v3439_v63, %v3438_v45  ;;  %v2574_v45 = vld [vmem:[#allocation2 + $0x68] sm:$0x1]  ;;  %v2770_v55 = vrot.slane %v2768_v8, 4  ;;  %v2773_v35 = vrot.slane %v2771_v54, 5 }
 0x13e   : > { %2468 = vmatmul.bf16.gmra.mxu3 %v11719_v31  ;;  %v3348_v31 = vrot.slane %v2573_v34, 5  ;;  %v2042_v46 = vpack.c.b16 %v2017_v11, %v2016_v1  ;;  %v3351_v30 = vrot.slane %v2574_v45, 5  ;;  %v3012_v11 = vunpack.c.l.b16 %v2756_v0 }
 0x13f   : > { %v2774_v59 = vor.u32 %v2773_v35, %v2770_v55  ;;  %v2576_v35 = vld [vmem:[#allocation2 + $0x70] sm:$0xf] }
 0x140   : > { %v3350_v57 = vrot.slane %v3348_v31, 4 }
 0x141   : > { %v1578_v44 = vpop.f32.mrf.mxu2  ;;  %3145 = vmatmul.bf16.gmra.mxu0 %v3037_v52  ;;  %v1831_v52 = vld [vmem:[#allocation2 + $0x54] sm:$0xe] }
 0x142   : > { %v12864_v13 = vadd.f32 %v1811_v43, %v1578_v44  ;;  %v1538_v47 = vpop.f32.mrf.mxu0  ;;  %v1774_v17 = vpop.f32.mrf.mxu1  ;;  %v2781_v43 = vshrl.u32 %v2573_v34, 16  ;;  %v10746_v44 = vrot.slane %v1831_v52, 9  ;;  %v1928_v34 = vrot.slane %v1926_v48, 4 }
 0x143   : > { %v12866_v61 = vadd.f32 %v1771_v32, %v1538_v47  ;;  %v2766_v32 = vsel %vm12472_vm11, %v2761_v49, %v2765_v62  ;;  %v2779_v47 = vrot.slane %v2777_v29, 5  ;;  %v3349_v49 = vsel %vm12724_vm14, %v10922_v4, %v3348_v31  ;;  %v11772_v31 = vld [vmem:[#allocation7 + $0x198] sm:$0xff] }
 0x144   : > { %15782 = vst [vmem:[#allocation27_spill] sm:$0xff] %v12864_v13  ;;  %v2783_v1 = vrot.slane %v2781_v43, 4  ;;  %v3013_v58 = vunpack.c.l.b16 %v2766_v32  ;;  %v11720_v13 = vld [vmem:[#allocation2 + $0x60] sm:$0xff]  ;;  %v3352_v62 = vsel %vm12724_vm14, %v3350_v57, %v3351_v30  ;;  %v1927_v8 = vsel %vm12724_vm14, %v10746_v44, %v1926_v48  ;;  %3857 = vmatpush.bf16.msra.mxu2 %v11772_v31  ;;  %v2575_v44 = vld [vmem:[#allocation2 + $0x6c] sm:$0xf] }
 0x145   : > { %3576 = vmatmul.bf16.gmra.mxu1 %v3464_v25  ;;  %v1816_v63 = vpop.f32.mrf.mxu3  ;;  %v2787_v29 = vshll.u32 %v2574_v45, 16  ;;  %v1930_v23 = vsel %vm12724_vm14, %v1928_v34, %v1929_v16  ;;  %v3441_v0 = vunpack.c.l.b16 %v3352_v62  ;;  %v2018_v32 = vunpack.c.l.b16 %v1927_v8 }
 0x146   : > { %v2784_v54 = vor.u32 %v2783_v1, %v2779_v47  ;;  %v2019_v4 = vunpack.c.l.b16 %v1930_v23  ;;  %v2775_v57 = vrot.slane %v2774_v59, 4  ;;  %v11780_v1 = vld [vmem:[#allocation7 + $0x1d8] sm:$0xff]  ;;  %v2792_v62 = vshrl.u32 %v2575_v44, 16  ;;  %v12036_v59 = vld [vmem:[#allocation2 + $0x64] sm:$0xf] }
 0x147   : > { %4539 = vmatpush.bf16.msra.mxu3 %v11780_v1  ;;  %v11721_v1 = vld [vmem:[#allocation2 + $0x6c] sm:$0xff] }
 0x148   : > { %v2785_v30 = vrot.slane %v2784_v54, 4  ;;  %v2043_v34 = vpack.c.b16 %v2019_v4, %v2018_v32  ;;  %v2780_v16 = vsel %vm12472_vm11, %v2775_v57, %v2779_v47  ;;  %v1933_v54 = vrot.slane %v12036_v59, 5 }
 0x149   : > { %v3014_v47 = vunpack.c.l.b16 %v2780_v16 }
 0x14a   : > { %2154 = vmatmul.bf16.gmra.mxu2 %v2042_v46  ;;  %v1581_v19 = vpop.f32.mrf.mxu2  ;;  %v1776_v25 = vpop.f32.mrf.mxu1  ;;  %v3038_v46 = vpack.c.b16 %v3013_v58, %v3012_v11  ;;  %v3355_v58 = vrot.slane %v2576_v35, 5 }
 0x14b   : > { %v12874_v12 = vadd.f32 %v1814_v51, %v1581_v19  ;;  %v3440_v51 = vunpack.c.l.b16 %v3349_v49  ;;  %v2789_v19 = vrot.slane %v2787_v29, 5  ;;  %v2577_v29 = vld [vmem:[#allocation2 + $0x74] sm:$0x1] }
 0x14c   : > { %v3357_v32 = vrot.slane %v3355_v58, 4  ;;  %v3358_v4 = vrot.slane %v2577_v29, 5 }
 0x14d   : > { %15783 = vst [vmem:[#allocation28_spill] sm:$0xff] %v12874_v12  ;;  %v3465_v55 = vpack.c.b16 %v3441_v0, %v3440_v51  ;;  %v2790_v49 = vsel %vm12472_vm11, %v2785_v30, %v2789_v19  ;;  %v1832_v51 = vld [vmem:[#allocation2 + $0x60] sm:$0xe]  ;;  %v11788_v0 = vld [vmem:[#allocation7 + $0x218] sm:$0xff]  ;;  %v2794_v30 = vrot.slane %v2792_v62, 4 }
 0x14e   : > { %v1541_v43 = vpop.f32.mrf.mxu0  ;;  %2473 = vmatmul.bf16.gmra.mxu3 %v11720_v13  ;;  %v3015_v57 = vunpack.c.l.b16 %v2790_v49  ;;  %4965 = vmatpush.bf16.msra.mxu0 %v11788_v0  ;;  %v10747_v19 = vrot.slane %v1832_v51, 9  ;;  %v3359_v16 = vsel %vm12724_vm14, %v3357_v32, %v3358_v4  ;;  %v2578_v4 = vld [vmem:[#allocation2 + $0x78] sm:$0xf] }
 0x14f   : > { %v12884_v52 = vadd.f32 %v1774_v17, %v1541_v43  ;;  %v3241_v17 = vld [vmem:[#allocation2 + $0x6c] sm:$0xe]  ;;  %v2795_v43 = vshll.u32 %v2575_v44, 16  ;;  %v3443_v0 = vunpack.c.l.b16 %v3359_v16  ;;  %v2819_v16 = vshll.u32 %v2578_v4, 16 }
 0x150   : > { %v10923_v31 = vrot.slane %v3241_v17, 9  ;;  %v3039_v49 = vpack.c.b16 %v3015_v57, %v3014_v47 }
 0x151   : > { %v1819_v48 = vpop.f32.mrf.mxu3  ;;  %3150 = vmatmul.bf16.gmra.mxu0 %v3038_v46  ;;  %v2805_v46 = vshrl.u32 %v2576_v35, 16  ;;  %v2797_v59 = vrot.slane %v2795_v43, 5 }
 0x152   : > { %v1583_v45 = vpop.f32.mrf.mxu2  ;;  %v1779_v13 = vpop.f32.mrf.mxu1  ;;  %v3356_v17 = vsel %vm12724_vm14, %v10923_v31, %v3355_v58  ;;  %v2811_v58 = vshll.u32 %v2577_v29, 16  ;;  %v1833_v29 = vld [vmem:[#allocation2 + $0x6c] sm:$0xe] }
 0x153   : > { %v12886_v11 = vadd.f32 %v1816_v63, %v1583_v45  ;;  %v2801_v63 = vshll.u32 %v2576_v35, 16  ;;  %v12037_v35 = vld [vmem:[#allocation2 + $0x68] sm:$0x1]  ;;  %v3442_v51 = vunpack.c.l.b16 %v3356_v17 }
 0x155   : > { %15784 = vst [vmem:[#allocation29_spill] sm:$0xff] %v12886_v11  ;;  %3581 = vmatmul.bf16.gmra.mxu1 %v3465_v55  ;;  %v1935_v55 = vrot.slane %v1933_v54, 4  ;;  %v2803_v44 = vrot.slane %v2801_v63, 5  ;;  %v1934_v63 = vsel %vm12724_vm14, %v10747_v19, %v1933_v54  ;;  %v3466_v57 = vpack.c.b16 %v3443_v0, %v3442_v51  ;;  %v2580_v51 = vld [vmem:[#allocation2 + $0x80] sm:$0x1] }
 0x156   : > { %v1543_v8 = vpop.f32.mrf.mxu0  ;;  %v2816_v19 = vshrl.u32 %v2578_v4, 16  ;;  %v3365_v4 = vrot.slane %v2580_v51, 5 }
 0x157   : > { %v12892_v23 = vadd.f32 %v1776_v25, %v1543_v8  ;;  %v1936_v25 = vrot.slane %v12037_v35, 5  ;;  %v2807_v8 = vrot.slane %v2805_v46, 4 }
 0x158   : > { %v2818_v10 = vrot.slane %v2816_v19, 4 }
 0x159   : > { %v1821_v45 = vpop.f32.mrf.mxu3  ;;  %v1937_v46 = vsel %vm12724_vm14, %v1935_v55, %v1936_v25  ;;  %v2808_v35 = vor.u32 %v2807_v8, %v2803_v44  ;;  %v3242_v55 = vld [vmem:[#allocation2 + $0x78] sm:$0xe] }
 0x15a   : > { %2159 = vmatmul.bf16.gmra.mxu2 %v2043_v34  ;;  %v1781_v11 = vpop.f32.mrf.mxu1  ;;  %v2798_v34 = vor.u32 %v2797_v59, %v2794_v30  ;;  %v2579_v30 = vld [vmem:[#allocation2 + $0x7c] sm:$0xf]  ;;  %v2813_v59 = vrot.slane %v2811_v58, 5 }
 0x15b   : > { %v3362_v54 = vrot.slane %v2579_v30, 5 }
 0x15c   : > { %v2799_v47 = vrot.slane %v2798_v34, 4 }
 0x15d   : > { %v1586_v12 = vpop.f32.mrf.mxu2  ;;  %v3364_v58 = vrot.slane %v3362_v54, 4 }
 0x15e   : > { %v12898_v62 = vadd.f32 %v1819_v48, %v1586_v12  ;;  %2478 = vmatmul.bf16.gmra.mxu3 %v11721_v1  ;;  %v1546_v43 = vpop.f32.mrf.mxu0  ;;  %v2020_v12 = vunpack.c.l.b16 %v1934_v63  ;;  %v2021_v48 = vunpack.c.l.b16 %v1937_v46  ;;  %v2809_v1 = vrot.slane %v2808_v35, 4 }
 0x15f   : > { %v12904_v31 = vadd.f32 %v1779_v13, %v1546_v43  ;;  %v12038_v13 = vld [vmem:[#allocation2 + $0x70] sm:$0xf]  ;;  %v2825_v43 = vshll.u32 %v2579_v30, 16  ;;  %v2804_v34 = vsel %vm12472_vm11, %v2799_v47, %v2803_v44  ;;  %v10924_v35 = vrot.slane %v3242_v55, 9 }
 0x160   : > { %15785 = vst [vmem:[#allocation30_spill] sm:$0xff] %v12898_v62  ;;  %v1940_v8 = vrot.slane %v12038_v13, 5  ;;  %v2829_v62 = vshrl.u32 %v2579_v30, 16  ;;  %v2044_v63 = vpack.c.b16 %v2021_v48, %v2020_v12  ;;  %v2814_v46 = vsel %vm12472_vm11, %v2809_v1, %v2813_v59  ;;  %v12039_v48 = vld [vmem:[#allocation2 + $0x74] sm:$0x1] }
 0x161   : > { %v2439_v32 = vpop.f32.mrf.mxu3  ;;  %3155 = vmatmul.bf16.gmra.mxu0 %v3039_v49  ;;  %v10748_v13 = vrot.slane %v1833_v29, 9  ;;  %v2821_v30 = vrot.slane %v2819_v16, 5  ;;  %v2827_v44 = vrot.slane %v2825_v43, 5  ;;  %v3366_v59 = vsel %vm12724_vm14, %v3364_v58, %v3365_v4 }
 0x162   : > { %v12906_v17 = vpop.f32.mrf.mxu1  ;;  %v1942_v12 = vrot.slane %v1940_v8, 4  ;;  %v2831_v47 = vrot.slane %v2829_v62, 4  ;;  %v2835_v43 = vshll.u32 %v2580_v51, 16 }
 0x163   : > { %v2822_v19 = vor.u32 %v2821_v30, %v2818_v10  ;;  %v1941_v55 = vsel %vm12724_vm14, %v10748_v13, %v1940_v8 }
 0x164   : > { %v2832_v29 = vor.u32 %v2831_v47, %v2827_v44  ;;  %v2022_v58 = vunpack.c.l.b16 %v1941_v55  ;;  %v2837_v41 = vrot.slane %v2835_v43, 5  ;;  %v12040_v43 = vld [vmem:[#allocation2 + $0x7c] sm:$0xf] }
 0x165   : > { %v1588_v25 = vpop.f32.mrf.mxu2  ;;  %3586 = vmatmul.bf16.gmra.mxu1 %v3466_v57  ;;  %v3016_v57 = vunpack.c.l.b16 %v2804_v34  ;;  %v2823_v4 = vrot.slane %v2822_v19, 4 }
 0x166   : > { %v12908_v49 = vadd.f32 %v1821_v45, %v1588_v25  ;;  %v1548_v0 = vpop.f32.mrf.mxu0  ;;  %v1943_v25 = vrot.slane %v12039_v48, 5  ;;  %v2833_v30 = vrot.slane %v2832_v29, 4 }
 0x167   : > { %v12914_v60 = vadd.f32 %v1781_v11, %v1548_v0  ;;  %v3363_v11 = vsel %vm12724_vm14, %v10924_v35, %v3362_v54  ;;  %v11771_v35 = vld [vmem:[#allocation7 + $0x190] sm:$0xff]  ;;  %v2828_v19 = vsel %vm12472_vm11, %v2823_v4, %v2827_v44 }
 0x168   : > { %15786 = vst [vmem:[#allocation31_spill] sm:$0xff] %v12908_v49  ;;  %v3017_v49 = vunpack.c.l.b16 %v2814_v46  ;;  %v1944_v62 = vsel %vm12724_vm14, %v1942_v12, %v1943_v25  ;;  %v3444_v0 = vunpack.c.l.b16 %v3363_v11  ;;  %v3445_v46 = vunpack.c.l.b16 %v3366_v59  ;;  %3858 = vmatpush.bf16.msra.mxu2 %v11771_v35  ;;  %v2582_v12 = vld [vmem:[#allocation2 + $0x88] sm:$0xf]  ;;  %v3243_v11 = vld [vmem:[#allocation2 + $0x84] sm:$0xe] }
 0x169   : > { %v12916_v45 = vpop.f32.mrf.mxu3  ;;  %v2023_v10 = vunpack.c.l.b16 %v1944_v62  ;;  %v3369_v25 = vrot.slane %v2582_v12, 5 }
 0x16a   : > { %2164 = vmatmul.bf16.gmra.mxu2 %v2044_v63  ;;  %v12918_v1 = vpop.f32.mrf.mxu1  ;;  %v3040_v63 = vpack.c.b16 %v3017_v49, %v3016_v57  ;;  %v3467_v51 = vpack.c.b16 %v3445_v46, %v3444_v0  ;;  %v2581_v49 = vld [vmem:[#allocation2 + $0x84] sm:$0xf]  ;;  %v1834_v0 = vld [vmem:[#allocation2 + $0x78] sm:$0xe] }
 0x16b   : > { %v2045_v57 = vpack.c.b16 %v2023_v10, %v2022_v58  ;;  %v2840_v55 = vshrl.u32 %v2581_v49, 16  ;;  %v2843_v62 = vshll.u32 %v2581_v49, 16  ;;  %v11787_v46 = vld [vmem:[#allocation7 + $0x210] sm:$0xff]  ;;  %v3371_v35 = vrot.slane %v3369_v25, 4 }
 0x16c   : > { %v3018_v58 = vunpack.c.l.b16 %v2828_v19  ;;  %4966 = vmatpush.bf16.msra.mxu0 %v11787_v46 }
 0x16d   : > { %v2125_v16 = vpop.f32.mrf.mxu2  ;;  %v2842_v4 = vrot.slane %v2840_v55, 4 }
 0x16e   : > { %v2205_v34 = vadd.f32 %v2125_v16, %v12719_v50  ;;  %2483 = vmatmul.bf16.gmra.mxu3 %v11722_v33  ;;  %v3121_v54 = vpop.f32.mrf.mxu0  ;;  %v11779_v50 = vld [vmem:[#allocation7 + $0x1d0] sm:$0xff]  ;;  %v2838_v16 = vsel %vm12472_vm11, %v2833_v30, %v2837_v41  ;;  %v2845_v30 = vrot.slane %v2843_v62, 5 }
 0x16f   : > { %4540 = vmatpush.bf16.msra.mxu3 %v11779_v50  ;;  %v3019_v10 = vunpack.c.l.b16 %v2838_v16 }
 0x170   : > { %v2519_v48 = vadd.f32 %v2439_v32, %v2205_v34  ;;  %v1747_v32 = vadd.f32 %v12739_v20, %v12748_v42  ;;  %v2583_v20 = vld [vmem:[#allocation2 + $0x8c] sm:$0x1]  ;;  %v2849_v42 = vshll.u32 %v2582_v12, 16  ;;  %v2846_v62 = vor.u32 %v2845_v30, %v2842_v4  ;;  %v2585_v4 = vld [vmem:[#allocation2 + $0x94] sm:$0xf] }
 0x171   : > { %v12929_v8 = vpop.f32.mrf.mxu3  ;;  %3160 = vmatmul.bf16.gmra.mxu0 %v3040_v63  ;;  %v1947_v63 = vrot.slane %v12040_v43, 5 }
 0x172   : > { %v3201_v13 = vadd.f32 %v3121_v54, %v2519_v48  ;;  %v12931_v33 = vpop.f32.mrf.mxu1  ;;  %v10925_v54 = vrot.slane %v3243_v11, 9  ;;  %v3372_v48 = vrot.slane %v2583_v20, 5  ;;  %v12947_v11 = vrot.slane %v2849_v42, 5 }
 0x173   : > { %v1949_v49 = vrot.slane %v1947_v63, 4 }
 0x174   : > { %v12936_v47 = vadd.f32 %v12906_v17, %v3201_v13  ;;  %v2853_v17 = vshrl.u32 %v2582_v12, 16  ;;  %v12041_v12 = vld [vmem:[#allocation2 + $0x80] sm:$0x1]  ;;  %v3373_v19 = vsel %vm12724_vm14, %v3371_v35, %v3372_v48 }
 0x175   : > { %v2127_v59 = vpop.f32.mrf.mxu2  ;;  %3591 = vmatmul.bf16.gmra.mxu1 %v3467_v51  ;;  %v10749_v51 = vrot.slane %v1834_v0, 9  ;;  %v1950_v50 = vrot.slane %v12041_v12, 5 }
 0x176   : > { %v2206_v29 = vadd.f32 %v2127_v59, %v1747_v32  ;;  %v3123_v34 = vpop.f32.mrf.mxu0  ;;  %v11723_v32 = vld [vmem:[#allocation2 + $0x84] sm:$0xff]  ;;  %v2855_v43 = vrot.slane %v2853_v17, 4  ;;  %v3447_v17 = vunpack.c.l.b16 %v3373_v19 }
 0x177   : > { %v12042_v19 = vld [vmem:[#allocation2 + $0x88] sm:$0xf] }
 0x178   : > { %v2520_v44 = vadd.f32 %v12916_v45, %v2206_v29  ;;  %v3370_v45 = vsel %vm12724_vm14, %v10925_v54, %v3369_v25  ;;  %v1951_v25 = vsel %vm12724_vm14, %v1949_v49, %v1950_v50  ;;  %v2856_v46 = vor.u32 %v2855_v43, %v12947_v11 }
 0x179   : > { %v12943_v41 = vpop.f32.mrf.mxu3  ;;  %v3446_v42 = vunpack.c.l.b16 %v3370_v45  ;;  %v2859_v54 = vshll.u32 %v2583_v20, 16  ;;  %v3376_v49 = vrot.slane %v2585_v4, 5  ;;  %v1752_v20 = vadd.f32 %v12762_v27, %v12770_v7  ;;  %v1835_v45 = vld [vmem:[#allocation2 + $0x84] sm:$0xe]  ;;  %v2586_v27 = vld [vmem:[#allocation2 + $0x98] sm:$0x1] }
 0x17a   : > { %2169 = vmatmul.bf16.gmra.mxu2 %v2045_v57  ;;  %v3202_v13 = vadd.f32 %v3123_v34, %v2520_v44  ;;  %v12945_v59 = vpop.f32.mrf.mxu1  ;;  %v3041_v57 = vpack.c.b16 %v3019_v10, %v3018_v58  ;;  %v1948_v34 = vsel %vm12724_vm14, %v10749_v51, %v1947_v63  ;;  %v2584_v44 = vld [vmem:[#allocation2 + $0x90] sm:$0xf]  ;;  %v2025_v58 = vunpack.c.l.b16 %v1951_v25 }
 0x17b   : > { %v2024_v35 = vunpack.c.l.b16 %v1948_v34  ;;  %v2847_v63 = vrot.slane %v2846_v62, 4  ;;  %v3468_v10 = vpack.c.b16 %v3447_v17, %v3446_v42  ;;  %v2857_v30 = vrot.slane %v2856_v46, 4 }
 0x17c   : > { %v12954_v16 = vadd.f32 %v12918_v1, %v3202_v13  ;;  %v2861_v13 = vrot.slane %v2859_v54, 5  ;;  %v2864_v12 = vshrl.u32 %v2584_v44, 16  ;;  %v2867_v50 = vshll.u32 %v2584_v44, 16 }
 0x17d   : > { %v2130_v55 = vpop.f32.mrf.mxu2  ;;  %v2877_v62 = vshrl.u32 %v2585_v4, 16  ;;  %v2046_v34 = vpack.c.b16 %v2025_v58, %v2024_v35  ;;  %v2852_v42 = vsel %vm12472_vm11, %v2847_v63, %v12947_v11  ;;  %v3379_v25 = vrot.slane %v2586_v27, 5  ;;  %v12043_v58 = vld [vmem:[#allocation2 + $0x8c] sm:$0x1] }
 0x17e   : > { %v2207_v29 = vadd.f32 %v2130_v55, %v12760_v21  ;;  %2488 = vmatmul.bf16.gmra.mxu3 %v11723_v32  ;;  %v3126_v0 = vpop.f32.mrf.mxu0  ;;  %v3244_v32 = vld [vmem:[#allocation2 + $0x90] sm:$0xe]  ;;  %v2873_v55 = vshll.u32 %v2585_v4, 16  ;;  %v10750_v54 = vrot.slane %v1835_v45, 9  ;;  %v2869_v44 = vrot.slane %v2867_v50, 5 }
 0x17f   : > { %v10926_v17 = vrot.slane %v3244_v32, 9  ;;  %v1957_v4 = vrot.slane %v12043_v58, 5  ;;  %v2879_v63 = vrot.slane %v2877_v62, 4 }
 0x180   : > { %v2521_v1 = vadd.f32 %v12929_v8, %v2207_v29  ;;  %v12980_v11 = vrot.slane %v2873_v55, 5 }
 0x181   : > { %v12963_v48 = vpop.f32.mrf.mxu3  ;;  %3165 = vmatmul.bf16.gmra.mxu0 %v3041_v57  ;;  %v1954_v57 = vrot.slane %v12042_v19, 5 }
 0x182   : > { %v3203_v21 = vadd.f32 %v3126_v0, %v2521_v1  ;;  %v12965_v51 = vpop.f32.mrf.mxu1  ;;  %v3378_v0 = vrot.slane %v3376_v49, 4  ;;  %v2866_v1 = vrot.slane %v2864_v12, 4  ;;  %v2880_v62 = vor.u32 %v2879_v63, %v12980_v11 }
 0x183   : > { %v1956_v35 = vrot.slane %v1954_v57, 4  ;;  %v1955_v19 = vsel %vm12724_vm14, %v10750_v54, %v1954_v57 }
 0x184   : > { %v12970_v8 = vadd.f32 %v12931_v33, %v3203_v21  ;;  %v2862_v33 = vsel %vm12472_vm11, %v2857_v30, %v2861_v13  ;;  %v11724_v13 = vld [vmem:[#allocation2 + $0x90] sm:$0xff]  ;;  %v3380_v12 = vsel %vm12724_vm14, %v3378_v0, %v3379_v25  ;;  %v2588_v0 = vld [vmem:[#allocation2 + $0xa0] sm:$0xf] }
 0x185   : > { %v2132_v43 = vpop.f32.mrf.mxu2  ;;  %3596 = vmatmul.bf16.gmra.mxu1 %v3468_v10  ;;  %v3021_v30 = vunpack.c.l.b16 %v2862_v33  ;;  %v1958_v55 = vsel %vm12724_vm14, %v1956_v35, %v1957_v4  ;;  %v2587_v33 = vld [vmem:[#allocation2 + $0x9c] sm:$0xf]  ;;  %v2897_v63 = vshll.u32 %v2588_v0, 16 }
 0x186   : > { %v2208_v29 = vadd.f32 %v2132_v43, %v1752_v20  ;;  %v3128_v7 = vpop.f32.mrf.mxu0  ;;  %v3020_v20 = vunpack.c.l.b16 %v2852_v42  ;;  %v2870_v43 = vor.u32 %v2869_v44, %v2866_v1  ;;  %v2027_v57 = vunpack.c.l.b16 %v1958_v55  ;;  %v12044_v55 = vld [vmem:[#allocation2 + $0x94] sm:$0xf] }
 0x187   : > { %v2881_v1 = vrot.slane %v2880_v62, 4  ;;  %v2891_v4 = vshll.u32 %v2587_v33, 16  ;;  %v1961_v62 = vrot.slane %v12044_v55, 5  ;;  %v2590_v55 = vld [vmem:[#allocation2 + $0xa8] sm:$0xf] }
 0x188   : > { %v2522_v46 = vadd.f32 %v12943_v41, %v2208_v29  ;;  %v3377_v41 = vsel %vm12724_vm14, %v10926_v17, %v3376_v49  ;;  %v2883_v29 = vshll.u32 %v2586_v27, 16  ;;  %v11770_v17 = vld [vmem:[#allocation7 + $0x188] sm:$0xff]  ;;  %v2871_v54 = vrot.slane %v2870_v43, 4 }
 0x189   : > { %v12978_v21 = vpop.f32.mrf.mxu3  ;;  %v3448_v42 = vunpack.c.l.b16 %v3377_v41  ;;  %3859 = vmatpush.bf16.msra.mxu2 %v11770_v17  ;;  %v2888_v27 = vshrl.u32 %v2587_v33, 16 }
 0x18a   : > { %2174 = vmatmul.bf16.gmra.mxu2 %v2046_v34  ;;  %v3204_v10 = vadd.f32 %v3128_v7, %v2522_v46  ;;  %v12982_v32 = vpop.f32.mrf.mxu1  ;;  %v3042_v34 = vpack.c.b16 %v3021_v30, %v3020_v20  ;;  %v3449_v7 = vunpack.c.l.b16 %v3380_v12  ;;  %v2026_v46 = vunpack.c.l.b16 %v1955_v19  ;;  %v3245_v12 = vld [vmem:[#allocation2 + $0x9c] sm:$0xe] }
 0x18b   : > { %v2885_v44 = vrot.slane %v2883_v29, 5  ;;  %v2901_v30 = vshrl.u32 %v2588_v0, 16  ;;  %v2876_v19 = vsel %vm12472_vm11, %v2871_v54, %v12980_v11  ;;  %v2890_v29 = vrot.slane %v2888_v27, 4 }
 0x18c   : > { %v12989_v50 = vadd.f32 %v12945_v59, %v3204_v10  ;;  %v3469_v58 = vpack.c.b16 %v3449_v7, %v3448_v42  ;;  %v11778_v10 = vld [vmem:[#allocation7 + $0x1c8] sm:$0xff]  ;;  %v13012_v42 = vrot.slane %v2897_v63, 5  ;;  %v10927_v17 = vrot.slane %v3245_v12, 9 }
 0x18d   : > { %v2135_v45 = vpop.f32.mrf.mxu2  ;;  %4541 = vmatpush.bf16.msra.mxu3 %v11778_v10  ;;  %v2903_v33 = vrot.slane %v2901_v30, 4 }
 0x18e   : > { %v2209_v49 = vadd.f32 %v2135_v45, %v12786_v53  ;;  %2493 = vmatmul.bf16.gmra.mxu3 %v11724_v13  ;;  %v3131_v59 = vpop.f32.mrf.mxu0  ;;  %v3383_v13 = vrot.slane %v2588_v0, 5  ;;  %v2047_v45 = vpack.c.b16 %v2027_v57, %v2026_v46  ;;  %v3022_v46 = vunpack.c.l.b16 %v2876_v19 }
 0x18f   : > { %v2904_v30 = vor.u32 %v2903_v33, %v13012_v42 }
 0x190   : > { %v2523_v25 = vadd.f32 %v12963_v48, %v2209_v49  ;;  %v1757_v48 = vadd.f32 %v12782_v39, %v12798_v40  ;;  %v2886_v49 = vsel %vm12472_vm11, %v2881_v1, %v2885_v44  ;;  %v1836_v39 = vld [vmem:[#allocation2 + $0x90] sm:$0xe]  ;;  %v2589_v40 = vld [vmem:[#allocation2 + $0xa4] sm:$0x1]  ;;  %v3385_v0 = vrot.slane %v3383_v13, 4 }
 0x191   : > { %v12998_v35 = vpop.f32.mrf.mxu3  ;;  %3170 = vmatmul.bf16.gmra.mxu0 %v3042_v34  ;;  %v3023_v57 = vunpack.c.l.b16 %v2886_v49  ;;  %v10751_v27 = vrot.slane %v1836_v39, 9  ;;  %v1963_v44 = vrot.slane %v1961_v62, 4 }
 0x192   : > { %v3205_v53 = vadd.f32 %v3131_v59, %v2523_v25  ;;  %v13000_v20 = vpop.f32.mrf.mxu1  ;;  %v11786_v59 = vld [vmem:[#allocation7 + $0x208] sm:$0xff]  ;;  %v3386_v25 = vrot.slane %v2589_v40, 5 }
 0x193   : > { %4967 = vmatpush.bf16.msra.mxu0 %v11786_v59  ;;  %v2912_v59 = vshrl.u32 %v2590_v55, 16 }
 0x194   : > { %v13005_v41 = vadd.f32 %v12965_v51, %v3205_v53  ;;  %v2893_v51 = vrot.slane %v2891_v4, 5  ;;  %v12045_v53 = vld [vmem:[#allocation2 + $0x98] sm:$0x1]  ;;  %v11725_v4 = vld [vmem:[#allocation2 + $0x9c] sm:$0xff]  ;;  %v3387_v12 = vsel %vm12724_vm14, %v3385_v0, %v3386_v25 }
 0x195   : > { %v2137_v43 = vpop.f32.mrf.mxu2  ;;  %3601 = vmatmul.bf16.gmra.mxu1 %v3469_v58  ;;  %v1964_v58 = vrot.slane %v12045_v53, 5  ;;  %v3451_v39 = vunpack.c.l.b16 %v3387_v12  ;;  %v391_v53 = vld [vmem:[#allocation2 + $0xc0] sm:$0x1]  ;;  %v3246_v12 = vld [vmem:[#allocation2 + $0xa8] sm:$0xe] }
 0x196   : > { %v2210_v34 = vadd.f32 %v2137_v43, %v1757_v48  ;;  %v3133_v7 = vpop.f32.mrf.mxu0  ;;  %v2894_v63 = vor.u32 %v2893_v51, %v2890_v29  ;;  %v2907_v48 = vshll.u32 %v2589_v40, 16  ;;  %v1962_v29 = vsel %vm12724_vm14, %v10751_v27, %v1961_v62  ;;  %v12046_v62 = vld [vmem:[#allocation2 + $0xa0] sm:$0xf] }
 0x197   : > { %v1968_v25 = vrot.slane %v12046_v62, 5 }
 0x198   : > { %v2524_v11 = vadd.f32 %v12978_v21, %v2210_v34  ;;  %v3384_v21 = vsel %vm12724_vm14, %v10927_v17, %v3383_v13  ;;  %v1965_v13 = vsel %vm12724_vm14, %v1963_v44, %v1964_v58  ;;  %v2895_v51 = vrot.slane %v2894_v63, 4  ;;  %v1837_v44 = vld [vmem:[#allocation2 + $0x9c] sm:$0xe] }
 0x199   : > { %v13015_v54 = vpop.f32.mrf.mxu3  ;;  %v3450_v49 = vunpack.c.l.b16 %v3384_v21  ;;  %v2909_v33 = vrot.slane %v2907_v48, 5  ;;  %v2915_v17 = vshll.u32 %v2590_v55, 16  ;;  %v2029_v27 = vunpack.c.l.b16 %v1965_v13  ;;  %v2592_v13 = vld [vmem:[#allocation2 + $0xb0] sm:$0x1] }
 0x19a   : > { %2179 = vmatmul.bf16.gmra.mxu2 %v2047_v45  ;;  %v3206_v1 = vadd.f32 %v3133_v7, %v2524_v11  ;;  %v13017_v10 = vpop.f32.mrf.mxu1  ;;  %v3043_v45 = vpack.c.b16 %v3023_v57, %v3022_v46  ;;  %v2905_v7 = vrot.slane %v2904_v30, 4  ;;  %v2591_v11 = vld [vmem:[#allocation2 + $0xac] sm:$0xf]  ;;  %v2028_v57 = vunpack.c.l.b16 %v1962_v29 }
 0x19b   : > { %v2914_v30 = vrot.slane %v2912_v59, 4  ;;  %v2917_v48 = vrot.slane %v2915_v17, 5  ;;  %v2921_v21 = vshll.u32 %v2591_v11, 16  ;;  %v1970_v55 = vrot.slane %v1968_v25, 4 }
 0x19c   : > { %v13025_v43 = vadd.f32 %v12982_v32, %v3206_v1  ;;  %v3470_v1 = vpack.c.b16 %v3451_v39, %v3450_v49  ;;  %v2910_v58 = vsel %vm12472_vm11, %v2905_v7, %v2909_v33  ;;  %v2925_v29 = vshrl.u32 %v2591_v11, 16 }
 0x19d   : > { %v2140_v19 = vpop.f32.mrf.mxu2  ;;  %v2048_v39 = vpack.c.b16 %v2029_v27, %v2028_v57  ;;  %v10928_v7 = vrot.slane %v3246_v12, 9  ;;  %v2918_v17 = vor.u32 %v2917_v48, %v2914_v30  ;;  %v13050_v62 = vrot.slane %v2921_v21, 5  ;;  %v484_v30 = vld [vmem:[%s12397_s13 + $0x7c] sm:$0xf] }
 0x19e   : > { %v2211_v34 = vadd.f32 %v2140_v19, %v12808_v24  ;;  %2498 = vmatmul.bf16.gmra.mxu3 %v11725_v4  ;;  %v3136_v40 = vpop.f32.mrf.mxu0  ;;  %v1762_v24 = vadd.f32 %v12804_v9, %v12820_v22  ;;  %v3390_v22 = vrot.slane %v2591_v11, 5  ;;  %v392_v4 = vsel %vm12416_vm3, 0, %v391_v53  ;;  %v11726_v53 = vld [vmem:[#allocation2 + $0xa8] sm:$0xff] }
 0x19f   : > { %v10752_v19 = vrot.slane %v1837_v44, 9  ;;  %393 = vst [vmem:[#allocation2 + $0xc0] sm:$0x1] %v392_v4  ;;  %v2927_v57 = vrot.slane %v2925_v29, 4  ;;  %v2931_v27 = vshll.u32 %v2592_v13, 16 }
 0x1a0   : > { %v2525_v32 = vadd.f32 %v12998_v35, %v2211_v34  ;;  %v2900_v35 = vsel %vm12472_vm11, %v2895_v51, %v13012_v42  ;;  %v12047_v42 = vld [vmem:[#allocation2 + $0xa4] sm:$0x1]  ;;  %v3392_v33 = vrot.slane %v3390_v22, 4 }
 0x1a1   : > { %v13035_v0 = vpop.f32.mrf.mxu3  ;;  %3175 = vmatmul.bf16.gmra.mxu0 %v3043_v45  ;;  %v1971_v34 = vrot.slane %v12047_v42, 5  ;;  %v2928_v42 = vor.u32 %v2927_v57, %v13050_v62 }
 0x1a2   : > { %v3207_v46 = vadd.f32 %v3136_v40, %v2525_v32  ;;  %v13042_v9 = vpop.f32.mrf.mxu1  ;;  %v3024_v40 = vunpack.c.l.b16 %v2900_v35  ;;  %v3393_v32 = vrot.slane %v2592_v13, 5  ;;  %v13078_v13 = vld [vmem:[#allocation2 + $0xb8] sm:$0xf] }
 0x1a3   : > { %v1972_v11 = vsel %vm12724_vm14, %v1970_v55, %v1971_v34  ;;  %v13075_v34 = vrot.slane %v2931_v27, 5  ;;  %v2929_v27 = vrot.slane %v2928_v42, 4 }
 0x1a4   : > { %v13047_v63 = vadd.f32 %v13000_v20, %v3207_v46  ;;  %v3025_v20 = vunpack.c.l.b16 %v2910_v58  ;;  %v483_v46 = vld [vmem:[%s12397_s13 + $0x78] sm:$0xf]  ;;  %v3391_v58 = vsel %vm12724_vm14, %v10928_v7, %v3390_v22  ;;  %v3394_v4 = vsel %vm12724_vm14, %v3392_v33, %v3393_v32  ;;  %v11769_v33 = vld [vmem:[#allocation7 + $0x180] sm:$0xff] }
 0x1a5   : > { %v2142_v45 = vpop.f32.mrf.mxu2  ;;  %3606 = vmatmul.bf16.gmra.mxu1 %v3470_v1  ;;  %v2031_v12 = vunpack.c.l.b16 %v1972_v11  ;;  %v746_v29 = vshll.u32 %v483_v46, 16  ;;  %3860 = vmatpush.bf16.msra.mxu2 %v11769_v33 }
 0x1a6   : > { %v2212_v49 = vadd.f32 %v2142_v45, %v1762_v24  ;;  %v3138_v51 = vpop.f32.mrf.mxu0  ;;  %v13057_v24 = vsel %vm12724_vm14, %v10752_v19, %v1968_v25  ;;  %v743_v25 = vshrl.u32 %v483_v46, 16  ;;  %v13072_v45 = vrot.slane %v2918_v17, 4  ;;  %v2593_v19 = vld [vmem:[#allocation2 + $0xb4] sm:$0xf] }
 0x1a7   : > { %v2030_v21 = vunpack.c.l.b16 %v13057_v24  ;;  %v2936_v32 = vshrl.u32 %v2593_v19, 16  ;;  %v754_v46 = vshll.u32 %v484_v30, 16 }
 0x1a8   : > { %v2526_v59 = vadd.f32 %v13015_v54, %v2212_v49  ;;  %v3044_v54 = vpack.c.b16 %v3025_v20, %v3024_v40  ;;  %v745_v22 = vrot.slane %v743_v25, 7  ;;  %v447_v49 = vld [vmem:[#allocation2 + $0xc8] sm:$0x1]  ;;  %v3452_v40 = vunpack.c.l.b16 %v3391_v58  ;;  %v915_v20 = vld [vmem:[#allocation2 + $0xc0] sm:$0xf] }
 0x1a9   : > { %v13053_v44 = vpop.f32.mrf.mxu3  ;;  %v2949_v58 = vshrl.u32 %v13078_v13, 16 }
 0x1aa   : > { %2184 = vmatmul.bf16.gmra.mxu2 %v2048_v39  ;;  %v3208_v1 = vadd.f32 %v3138_v51, %v2526_v59  ;;  %v13061_v35 = vpop.f32.mrf.mxu1  ;;  %v751_v51 = vshrl.u32 %v484_v30, 16  ;;  %v2939_v59 = vshll.u32 %v2593_v19, 16  ;;  %v748_v17 = vor.u32 %v746_v29, %v745_v22  ;;  %v12048_v19 = vld [vmem:[#allocation2 + $0xac] sm:$0xf]  ;;  %v1838_v29 = vld [vmem:[#allocation2 + $0xa8] sm:$0xe] }
 0x1ab   : > { %v749_v24 = vrot.slane %v745_v22, 4  ;;  %v1975_v30 = vrot.slane %v12048_v19, 5 }
 0x1ac   : > { %v13069_v48 = vadd.f32 %v13017_v10, %v3208_v1  ;;  %v3453_v10 = vunpack.c.l.b16 %v3394_v4  ;;  %v753_v57 = vrot.slane %v751_v51, 7  ;;  %v916_v4 = vsel %vm12447_vm10, %v748_v17, %v915_v20 }
 0x1ad   : > { %v2145_v55 = vpop.f32.mrf.mxu2  ;;  %917 = vst [vmem:[#allocation2 + $0xc0] sm:$0xf] %v916_v4  ;;  %v3397_v51 = vrot.slane %v13078_v13, 5  ;;  %v2049_v20 = vpack.c.b16 %v2031_v12, %v2030_v21  ;;  %v10753_v12 = vrot.slane %v1838_v29, 9  ;;  %v1977_v17 = vrot.slane %v1975_v30, 4 }
 0x1ae   : > { %v2213_v39 = vadd.f32 %v2145_v55, %v12832_v37  ;;  %2503 = vmatmul.bf16.gmra.mxu3 %v11726_v53  ;;  %v3141_v7 = vpop.f32.mrf.mxu0  ;;  %v448_v37 = vsel %vm12423_vm4, 0, %v447_v49  ;;  %v2945_v53 = vshll.u32 %v13078_v13, 16  ;;  %v11777_v55 = vld [vmem:[#allocation7 + $0x1c0] sm:$0xff]  ;;  %v756_v22 = vor.u32 %v754_v46, %v753_v57 }
 0x1af   : > { %449 = vst [vmem:[#allocation2 + $0xc8] sm:$0x1] %v448_v37  ;;  %v2938_v49 = vrot.slane %v2936_v32, 4  ;;  %4542 = vmatpush.bf16.msra.mxu3 %v11777_v55  ;;  %v2934_v32 = vsel %vm12472_vm11, %v2929_v27, %v13075_v34  ;;  %v1976_v29 = vsel %vm12724_vm14, %v10753_v12, %v1975_v30 }
 0x1b0   : > { %v2527_v11 = vadd.f32 %v13035_v0, %v2213_v39  ;;  %v3471_v0 = vpack.c.b16 %v3453_v10, %v3452_v40  ;;  %v2941_v39 = vrot.slane %v2939_v59, 5  ;;  %v3247_v40 = vld [vmem:[#allocation2 + $0xb4] sm:$0xe]  ;;  %v757_v10 = vsel %vm12439_vm7, %v749_v24, %v756_v22 }
 0x1b1   : > { %v13083_v1 = vpop.f32.mrf.mxu3  ;;  %3180 = vmatmul.bf16.gmra.mxu0 %v3044_v54  ;;  %v2924_v54 = vsel %vm12472_vm11, %v13072_v45, %v13050_v62  ;;  %v2947_v13 = vrot.slane %v2945_v53, 5  ;;  %v2951_v59 = vrot.slane %v2949_v58, 4  ;;  %918 = vst [vmem:[#allocation2 + $0xc4] sm:$0xf] %v757_v10  ;;  %v12049_v62 = vld [vmem:[#allocation2 + $0xb0] sm:$0x1]  ;;  %v3027_v22 = vunpack.c.l.b16 %v2934_v32 }
 0x1b2   : > { %v3209_v25 = vadd.f32 %v3141_v7, %v2527_v11  ;;  %v13089_v42 = vpop.f32.mrf.mxu1  ;;  %v1978_v45 = vrot.slane %v12049_v62, 5  ;;  %v2595_v11 = vld [vmem:[#allocation2 + $0xbc] sm:$0x1]  ;;  %v2942_v37 = vor.u32 %v2941_v39, %v2938_v49  ;;  %v11785_v24 = vld [vmem:[#allocation7 + $0x200] sm:$0xff]  ;;  %v10929_v4 = vrot.slane %v3247_v40, 9 }
 0x1b3   : > { %v3400_v19 = vrot.slane %v2595_v11, 5  ;;  %v3026_v53 = vunpack.c.l.b16 %v2924_v54  ;;  %v2952_v58 = vor.u32 %v2951_v59, %v2947_v13  ;;  %4968 = vmatpush.bf16.msra.mxu0 %v11785_v24  ;;  %v11727_v49 = vld [vmem:[#allocation2 + $0xb4] sm:$0xff] }
 0x1b4   : > { %v13093_v33 = vadd.f32 %v13042_v9, %v3209_v25  ;;  %v758_v9 = vrot.slane %v753_v57, 4  ;;  %v3399_v25 = vrot.slane %v3397_v51, 4  ;;  %v2943_v54 = vrot.slane %v2942_v37, 4 }
 0x1b5   : > { %v2147_v7 = vpop.f32.mrf.mxu2  ;;  %3611 = vmatmul.bf16.gmra.mxu1 %v3471_v0  ;;  %v3398_v40 = vsel %vm12724_vm14, %v10929_v4, %v3397_v51  ;;  %v2953_v59 = vrot.slane %v2952_v58, 4  ;;  %v3045_v30 = vpack.c.b16 %v3027_v22, %v3026_v53  ;;  %v3974_v58 = vld [vmem:[#allocation2 + $0x18] sm:$0xf]  ;;  %v13134_v22 = vld [vmem:[#allocation2 + $0x1c] sm:$0xf] }
 0x1b6   : > { %v2214_v21 = vadd.f32 %v2147_v7, %v12844_v3  ;;  %v3143_v46 = vpop.f32.mrf.mxu0  ;;  %v919_v27 = vld [vmem:[#allocation2 + $0xc8] sm:$0x1]  ;;  %v2955_v3 = vshll.u32 %v2595_v11, 16  ;;  %v2032_v7 = vunpack.c.l.b16 %v1976_v29  ;;  %v3454_v12 = vunpack.c.l.b16 %v3398_v40  ;;  %v2596_v11 = vld [vmem:[#allocation2 + $0xc0] sm:$0xf] }
 0x1b7   : > { %v920_v0 = vsel %vm12416_vm3, %v758_v9, %v919_v27  ;;  %v12050_v27 = vld [vmem:[#allocation2 + $0xb8] sm:$0xf]  ;;  %v4023_v29 = vshrl.u32 %v3974_v58, 16 }
 0x1b8   : > { %v2528_v34 = vadd.f32 %v13053_v44, %v2214_v21  ;;  %v1979_v44 = vsel %vm12724_vm14, %v1977_v17, %v1978_v45  ;;  %921 = vst [vmem:[#allocation2 + $0xc8] sm:$0x1] %v920_v0  ;;  %v2957_v9 = vrot.slane %v2955_v3, 5  ;;  %v2948_v45 = vsel %vm12472_vm11, %v2943_v54, %v2947_v13  ;;  %v2597_v4 = vld [vmem:[#allocation2 + $0xc4] sm:$0xf] }
 0x1b9   : > { %v13106_v57 = vpop.f32.mrf.mxu3  ;;  %v2033_v32 = vunpack.c.l.b16 %v1979_v44  ;;  %v1982_v53 = vrot.slane %v12050_v27, 5  ;;  %v2963_v3 = vshll.u32 %v2596_v11, 16  ;;  %v3404_v0 = vrot.slane %v2597_v4, 5 }
 0x1ba   : > { %2189 = vmatmul.bf16.gmra.mxu2 %v2049_v20  ;;  %v13110_v55 = vadd.f32 %v3143_v46, %v2528_v34  ;;  %v13116_v39 = vpop.f32.mrf.mxu1  ;;  %v3401_v20 = vsel %vm12724_vm14, %v3399_v25, %v3400_v19  ;;  %v2958_v37 = vsel %vm12472_vm11, %v2953_v59, %v2957_v9  ;;  %v1839_v34 = vld [vmem:[#allocation2 + $0xb4] sm:$0xe]  ;;  %v2969_v40 = vshll.u32 %v2597_v4, 16 }
 0x1bb   : > { %15787 = vst [vmem:[#allocation32_spill] sm:$0xff] %v13116_v39  ;;  %v3455_v17 = vunpack.c.l.b16 %v3401_v20  ;;  %v2050_v46 = vpack.c.b16 %v2033_v32, %v2032_v7  ;;  %v3248_v20 = vld [vmem:[#allocation2 + $0xc0] sm:$0xe]  ;;  %v2973_v32 = vshrl.u32 %v2597_v4, 16  ;;  %v3406_v9 = vrot.slane %v3404_v0, 4 }
 0x1bc   : > { %v10930_v59 = vrot.slane %v3248_v20, 9  ;;  %v4036_v27 = vshrl.u32 %v13134_v22, 16  ;;  %v2965_v20 = vrot.slane %v2963_v3, 5  ;;  %v13145_v36 = vrot.slane %v2969_v40, 5 }
 0x1bd   : > { %v2150_v10 = vpop.f32.mrf.mxu2  ;;  %v3472_v19 = vpack.c.b16 %v3455_v17, %v3454_v12  ;;  %v4025_v12 = vrot.slane %v4023_v29, 4 }
 0x1be   : > { %v2215_v21 = vadd.f32 %v2150_v10, %v12854_v18  ;;  %2508 = vmatmul.bf16.gmra.mxu3 %v11727_v49  ;;  %v3146_v62 = vpop.f32.mrf.mxu0  ;;  %v13130_v18 = vunpack.c.l.b16 %v2948_v45  ;;  %v3029_v49 = vunpack.c.l.b16 %v2958_v37  ;;  %v4026_v10 = vshll.u32 %v3974_v58, 16 }
 0x1bf   : > { %v2598_v54 = vld [vmem:[#allocation2 + $0xc8] sm:$0x1]  ;;  %v3405_v29 = vsel %vm12724_vm14, %v10930_v59, %v3404_v0 }
 0x1c0   : > { %v2529_v51 = vadd.f32 %v13083_v1, %v2215_v21  ;;  %v2960_v1 = vshrl.u32 %v2596_v11, 16  ;;  %v4028_v17 = vrot.slane %v4026_v10, 5  ;;  %v12051_v11 = vld [vmem:[#allocation2 + $0xbc] sm:$0x1]  ;;  %v3046_v40 = vpack.c.b16 %v3029_v49, %v13130_v18 }
 0x1c1   : > { %v13128_v24 = vpop.f32.mrf.mxu3  ;;  %3185 = vmatmul.bf16.gmra.mxu0 %v3045_v30  ;;  %v3407_v30 = vrot.slane %v2598_v54, 5  ;;  %v1985_v37 = vrot.slane %v12051_v11, 5  ;;  %v11728_v11 = vld [vmem:[#allocation2 + $0xc0] sm:$0xff] }
 0x1c2   : > { %v3211_v25 = vadd.f32 %v3146_v62, %v2529_v51  ;;  %v13132_v13 = vpop.f32.mrf.mxu1  ;;  %v4032_v62 = vshll.u32 %v13134_v22, 16  ;;  %v1984_v51 = vrot.slane %v1982_v53, 4  ;;  %v2962_v58 = vrot.slane %v2960_v1, 4 }
 0x1c3   : > { %v3408_v26 = vsel %vm12724_vm14, %v3406_v9, %v3407_v30  ;;  %v4029_v39 = vor.u32 %v4028_v17, %v4025_v12  ;;  %v3456_v9 = vunpack.c.l.b16 %v3405_v29 }
 0x1c4   : > { %v13137_v44 = vadd.f32 %v13089_v42, %v3211_v25  ;;  %v10754_v42 = vrot.slane %v1839_v34, 9  ;;  %v13141_v25 = vld [vmem:[#allocation2 + $0x20] sm:$0x1]  ;;  %v4034_v10 = vrot.slane %v4032_v62, 5  ;;  %v4038_v34 = vrot.slane %v4036_v27, 4 }
 0x1c5   : > { %v2152_v7 = vpop.f32.mrf.mxu2  ;;  %3616 = vmatmul.bf16.gmra.mxu1 %v3472_v19  ;;  %v2975_v19 = vrot.slane %v2973_v32, 4  ;;  %v2966_v32 = vor.u32 %v2965_v20, %v2962_v58  ;;  %v2979_v62 = vshll.u32 %v2598_v54, 16  ;;  %v3457_v30 = vunpack.c.l.b16 %v3408_v26 }
 0x1c6   : > { %v2216_v21 = vadd.f32 %v2152_v7, %v12866_v61  ;;  %v3148_v45 = vpop.f32.mrf.mxu0  ;;  %v4039_v3 = vor.u32 %v4038_v34, %v4034_v10  ;;  %v1983_v0 = vsel %vm12724_vm14, %v10754_v42, %v1982_v53  ;;  %v4030_v17 = vrot.slane %v4029_v39, 4  ;;  %v3977_v39 = vld [vmem:[#allocation2 + $0x24] sm:$0xf] }
 0x1c7   : > { %v2034_v53 = vunpack.c.l.b16 %v1983_v0  ;;  %v3473_v54 = vpack.c.b16 %v3457_v30, %v3456_v9  ;;  %v4047_v29 = vshrl.u32 %v3977_v39, 16 }
 0x1c8   : > { %v2530_v4 = vadd.f32 %v13106_v57, %v2216_v21  ;;  %v4042_v57 = vshll.u32 %v13141_v25, 16  ;;  %v2976_v21 = vor.u32 %v2975_v19, %v13145_v36  ;;  %v4035_v26 = vsel %vm12472_vm11, %v4030_v17, %v4034_v10  ;;  %v13168_v19 = vld [vmem:[#allocation2 + $0x28] sm:$0xf]  ;;  %v13181_v17 = vld [vmem:[#allocation2 + $0x2c] sm:$0x1] }
 0x1c9   : > { %v2471_v61 = vpop.f32.mrf.mxu3  ;;  %v4056_v34 = vshll.u32 %v13168_v19, 16 }
 0x1ca   : > { %2194 = vmatmul.bf16.gmra.mxu2 %v2050_v46  ;;  %v13149_v7 = vadd.f32 %v3148_v45, %v2530_v4  ;;  %v13154_v1 = vpop.f32.mrf.mxu1  ;;  %v1986_v46 = vsel %vm12724_vm14, %v1984_v51, %v1985_v37  ;;  %v4040_v45 = vrot.slane %v4039_v3, 4  ;;  %v4044_v27 = vrot.slane %v4042_v57, 5 }
 0x1cb   : > { %v2035_v42 = vunpack.c.l.b16 %v1986_v46  ;;  %v2967_v4 = vrot.slane %v2966_v32, 4  ;;  %v2977_v51 = vrot.slane %v2976_v21, 4  ;;  %v2981_v37 = vrot.slane %v2979_v62, 5 }
 0x1cc   : > { %v4423_v32 = vunpack.c.l.b16 %v4035_v26  ;;  %v4049_v21 = vrot.slane %v4047_v29, 4  ;;  %v4058_v30 = vrot.slane %v4056_v34, 5 }
 0x1cd   : > { %v2155_v59 = vpop.f32.mrf.mxu2  ;;  %v2051_v3 = vpack.c.b16 %v2035_v42, %v2034_v53  ;;  %v2972_v10 = vsel %vm12472_vm11, %v2967_v4, %v13145_v36  ;;  %v2982_v0 = vsel %vm12472_vm11, %v2977_v51, %v2981_v37  ;;  %v4066_v51 = vshll.u32 %v13181_v17, 16 }
 0x1ce   : > { %v2217_v12 = vadd.f32 %v2155_v59, %v12884_v52  ;;  %2513 = vmatmul.bf16.gmra.mxu3 %v11728_v11  ;;  %v3151_v18 = vpop.f32.mrf.mxu0  ;;  %v4045_v52 = vsel %vm12472_vm11, %v4040_v45, %v4044_v27  ;;  %v4060_v11 = vshrl.u32 %v13168_v19, 16  ;;  %v3030_v27 = vunpack.c.l.b16 %v2972_v10 }
 0x1cf   : > { %v4424_v59 = vunpack.c.l.b16 %v4045_v52  ;;  %v3031_v36 = vunpack.c.l.b16 %v2982_v0  ;;  %v4725_v10 = vrot.slane %v13141_v25, 5 }
 0x1d0   : > { %v2531_v49 = vadd.f32 %v13128_v24, %v2217_v12  ;;  %v4050_v24 = vshll.u32 %v3977_v39, 16  ;;  %v4068_v39 = vrot.slane %v4066_v51, 5 }
 0x1d1   : > { %v2474_v58 = vpop.f32.mrf.mxu3  ;;  %3190 = vmatmul.bf16.gmra.mxu0 %v3046_v40 }
 0x1d2   : > { %v3213_v20 = vadd.f32 %v3151_v18, %v2531_v49  ;;  %v3582_v46 = vpop.f32.mrf.mxu1  ;;  %v4052_v9 = vrot.slane %v4050_v24, 5  ;;  %v4455_v49 = vpack.c.b16 %v4424_v59, %v4423_v32  ;;  %v3980_v32 = vld [vmem:[#allocation2 + $0x30] sm:$0xf]  ;;  %v13195_v59 = vld [vmem:[#allocation2 + $0x34] sm:$0xf] }
 0x1d4   : > { %v13173_v57 = vadd.f32 %v13132_v13, %v3213_v20  ;;  %v4062_v13 = vrot.slane %v4060_v11, 4  ;;  %v4053_v42 = vor.u32 %v4052_v9, %v4049_v21  ;;  %v4656_v20 = vld [vmem:[#allocation2 + $0x18] sm:$0xe]  ;;  %v4071_v21 = vshrl.u32 %v3980_v32, 16 }
 0x1d5   : > { %v2157_v40 = vpop.f32.mrf.mxu2  ;;  %3621 = vmatmul.bf16.gmra.mxu1 %v3473_v54  ;;  %v4722_v54 = vrot.slane %v13134_v22, 5  ;;  %v11091_v11 = vrot.slane %v4656_v20, 9  ;;  %v4084_v9 = vshrl.u32 %v13195_v59, 16  ;;  %v13206_v20 = vld [vmem:[#allocation2 + $0x38] sm:$0x1] }
 0x1d6   : > { %v2218_v62 = vadd.f32 %v2157_v40, %v12892_v23  ;;  %v3153_v12 = vpop.f32.mrf.mxu0  ;;  %v4063_v4 = vor.u32 %v4062_v13, %v4058_v30  ;;  %v3047_v23 = vpack.c.b16 %v3031_v36, %v3030_v27  ;;  %v4073_v36 = vrot.slane %v4071_v21, 4 }
 0x1d7   : > { %v4723_v25 = vsel %vm12724_vm14, %v11091_v11, %v4722_v54 }
 0x1d8   : > { %v2532_v45 = vadd.f32 %v2471_v61, %v2218_v62  ;;  %v4054_v61 = vrot.slane %v4053_v42, 4  ;;  %v4064_v52 = vrot.slane %v4063_v4, 4  ;;  %v4074_v62 = vshll.u32 %v3980_v32, 16  ;;  %v11753_v42 = vld [vmem:[#allocation2 + $0x18] sm:$0xff] }
 0x1d9   : > { %v2476_v18 = vpop.f32.mrf.mxu3 }
 0x1da   : > { %2199 = vmatmul.bf16.gmra.mxu2 %v2051_v3  ;;  %v13183_v53 = vadd.f32 %v3153_v12, %v2532_v45  ;;  %v13188_v24 = vpop.f32.mrf.mxu1  ;;  %v4724_v3 = vrot.slane %v4722_v54, 4  ;;  %v4059_v22 = vsel %vm12472_vm11, %v4054_v61, %v4058_v30  ;;  %v4076_v4 = vrot.slane %v4074_v62, 5 }
 0x1db   : > { %v4425_v45 = vunpack.c.l.b16 %v4059_v22  ;;  %v4729_v22 = vrot.slane %v13168_v19, 5 }
 0x1dc   : > { %v4726_v30 = vsel %vm12724_vm14, %v4724_v3, %v4725_v10 }
 0x1dd   : > { %v2160_v37 = vpop.f32.mrf.mxu2  ;;  %v4850_v61 = vunpack.c.l.b16 %v4726_v30 }
 0x1de   : > { %v2219_v26 = vadd.f32 %v2160_v37, %v12904_v31  ;;  %4543 = vmatmul.bf16.vlgmr.msra.gmra.mxu3 %v4455_v49  ;;  %v3156_v29 = vpop.f32.mrf.mxu0  ;;  %v4069_v31 = vsel %vm12472_vm11, %v4064_v52, %v4068_v39 }
 0x1df   : > { %v4426_v27 = vunpack.c.l.b16 %v4069_v31 }
 0x1e0   : > { %v2533_v34 = vadd.f32 %v2474_v58, %v2219_v26  ;;  %v4080_v58 = vshll.u32 %v13195_v59, 16  ;;  %v4849_v26 = vunpack.c.l.b16 %v4723_v25  ;;  %v4731_v25 = vrot.slane %v4729_v22, 4 }
 0x1e1   : > { %v2479_v40 = vpop.f32.mrf.mxu3  ;;  %3195 = vmatmul.bf16.gmra.mxu0 %v3047_v23  ;;  %v4086_v23 = vrot.slane %v4084_v9, 4  ;;  %v4456_v39 = vpack.c.b16 %v4426_v27, %v4425_v45 }
 0x1e2   : > { %v3215_v0 = vadd.f32 %v3156_v29, %v2533_v34  ;;  %v4082_v51 = vrot.slane %v4080_v58, 5  ;;  %v3587_v54 = vpop.f32.mrf.mxu1  ;;  %v4077_v34 = vor.u32 %v4076_v4, %v4073_v36  ;;  %v4881_v3 = vpack.c.b16 %v4850_v61, %v4849_v26  ;;  %v13218_v36 = vld [vmem:[#allocation2 + $0x40] sm:$0xf] }
 0x1e3   : > { %v4104_v4 = vshll.u32 %v13218_v36, 16 }
 0x1e4   : > { %v13199_v13 = vadd.f32 %v3582_v46, %v3215_v0  ;;  %v4087_v11 = vor.u32 %v4086_v23, %v4082_v51  ;;  %v4657_v0 = vld [vmem:[#allocation2 + $0x24] sm:$0xe] }
 0x1e5   : > { %v2162_v12 = vpop.f32.mrf.mxu2  ;;  %v11092_v9 = vrot.slane %v4657_v0, 9 }
 0x1e6   : > { %v2220_v49 = vadd.f32 %v2162_v12, %v12914_v60  ;;  %v3158_v37 = vpop.f32.mrf.mxu0  ;;  %v4090_v60 = vshll.u32 %v13206_v20, 16  ;;  %v4088_v32 = vrot.slane %v4087_v11, 4  ;;  %v4732_v12 = vrot.slane %v13181_v17, 5  ;;  %v11754_v11 = vld [vmem:[#allocation2 + $0x24] sm:$0xff] }
 0x1e7   : > { %v4108_v17 = vshrl.u32 %v13218_v36, 16 }
 0x1e8   : > { %v2534_v46 = vadd.f32 %v2476_v18, %v2220_v49  ;;  %v4078_v18 = vrot.slane %v4077_v34, 4  ;;  %v4092_v21 = vrot.slane %v4090_v60, 5 }
 0x1e9   : > { %v2481_v52 = vpop.f32.mrf.mxu3 }
 0x1ea   : > { %3861 = vmatmul.bf16.vlgmr.msra.gmra.mxu2 %v11753_v42  ;;  %v13208_v29 = vadd.f32 %v3158_v37, %v2534_v46  ;;  %v4083_v27 = vsel %vm12472_vm11, %v4078_v18, %v4082_v51  ;;  %v4093_v19 = vsel %vm12472_vm11, %v4088_v32, %v4092_v21  ;;  %v13220_v49 = vpop.f32.mrf.mxu1  ;;  %v4730_v37 = vsel %vm12724_vm14, %v11092_v9, %v4729_v22 }
 0x1eb   : > { %v4733_v46 = vsel %vm12724_vm14, %v4731_v25, %v4732_v12  ;;  %v4427_v26 = vunpack.c.l.b16 %v4083_v27  ;;  %v4428_v61 = vunpack.c.l.b16 %v4093_v19  ;;  %v4851_v18 = vunpack.c.l.b16 %v4730_v37  ;;  %v4658_v27 = vld [vmem:[#allocation2 + $0x30] sm:$0xe] }
 0x1ec   : > { %v4852_v32 = vunpack.c.l.b16 %v4733_v46  ;;  %v4736_v19 = vrot.slane %v13195_v59, 5  ;;  %v11093_v37 = vrot.slane %v4658_v27, 9  ;;  %v4739_v46 = vrot.slane %v13206_v20, 5 }
 0x1ed   : > { %v2165_v10 = vpop.f32.mrf.mxu2  ;;  %v4457_v21 = vpack.c.b16 %v4428_v61, %v4427_v26 }
 0x1ee   : > { %v2221_v31 = vadd.f32 %v2165_v10, %v12741_v28  ;;  %4548 = vmatmul.bf16.gmra.mxu3 %v4456_v39  ;;  %v3161_v62 = vpop.f32.mrf.mxu0  ;;  %v3983_v28 = vld [vmem:[#allocation2 + $0x3c] sm:$0xf]  ;;  %v4110_v10 = vrot.slane %v4108_v17, 4  ;;  %v4737_v20 = vsel %vm12724_vm14, %v11093_v37, %v4736_v19 }
 0x1ef   : > { %v4095_v42 = vshrl.u32 %v3983_v28, 16 }
 0x1f0   : > { %v2535_v58 = vadd.f32 %v2479_v40, %v2221_v31  ;;  %v4098_v40 = vshll.u32 %v3983_v28, 16  ;;  %v13231_v31 = vld [vmem:[#allocation2 + $0x44] sm:$0x1] }
 0x1f1   : > { %v2484_v30 = vpop.f32.mrf.mxu3  ;;  %4969 = vmatmul.bf16.vlgmr.msra.gmra.mxu0 %v4881_v3  ;;  %v4097_v39 = vrot.slane %v4095_v42, 4  ;;  %v4106_v3 = vrot.slane %v4104_v4, 5  ;;  %v4114_v25 = vshll.u32 %v13231_v31, 16 }
 0x1f2   : > { %v3217_v45 = vadd.f32 %v3161_v62, %v2535_v58  ;;  %v4100_v60 = vrot.slane %v4098_v40, 5 }
 0x1f3   : > { %v4111_v9 = vor.u32 %v4110_v10, %v4106_v3  ;;  %v4116_v40 = vrot.slane %v4114_v25, 5 }
 0x1f4   : > { %v13224_v23 = vadd.f32 %v3587_v54, %v3217_v45  ;;  %v4101_v58 = vor.u32 %v4100_v60, %v4097_v39  ;;  %v3592_v45 = vpop.f32.mrf.mxu1 }
 0x1f5   : > { %v2167_v51 = vpop.f32.mrf.mxu2  ;;  %v4112_v42 = vrot.slane %v4111_v9, 4  ;;  %v11755_v9 = vld [vmem:[#allocation2 + $0x30] sm:$0xff] }
 0x1f6   : > { %v2222_v34 = vadd.f32 %v2167_v51, %v12750_v2  ;;  %v3163_v0 = vpop.f32.mrf.mxu0  ;;  %v4882_v2 = vpack.c.b16 %v4852_v32, %v4851_v18  ;;  %v4738_v51 = vrot.slane %v4736_v19, 4  ;;  %v4853_v19 = vunpack.c.l.b16 %v4737_v20 }
 0x1f7   : > { %v4117_v59 = vsel %vm12472_vm11, %v4112_v42, %v4116_v40 }
 0x1f8   : > { %v2536_v54 = vadd.f32 %v2481_v52, %v2222_v34  ;;  %v4102_v52 = vrot.slane %v4101_v58, 4  ;;  %v13243_v34 = vld [vmem:[#allocation2 + $0x4c] sm:$0xf]  ;;  %v4430_v32 = vunpack.c.l.b16 %v4117_v59  ;;  %v4743_v59 = vrot.slane %v13218_v36, 5 }
 0x1f9   : > { %v2486_v22 = vpop.f32.mrf.mxu3  ;;  %v4132_v10 = vshrl.u32 %v13243_v34, 16 }
 0x1fa   : > { %3866 = vmatmul.bf16.gmra.mxu2 %v11754_v11  ;;  %v13233_v62 = vadd.f32 %v3163_v0, %v2536_v54  ;;  %v4107_v39 = vsel %vm12472_vm11, %v4102_v52, %v4106_v3  ;;  %v4740_v3 = vsel %vm12724_vm14, %v4738_v51, %v4739_v46 }
 0x1fb   : > { %v4429_v18 = vunpack.c.l.b16 %v4107_v39  ;;  %v4854_v42 = vunpack.c.l.b16 %v4740_v3  ;;  %v4659_v39 = vld [vmem:[#allocation2 + $0x3c] sm:$0xe] }
 0x1fd   : > { %v2170_v12 = vpop.f32.mrf.mxu2  ;;  %v4883_v46 = vpack.c.b16 %v4854_v42, %v4853_v19 }
 0x1fe   : > { %v2223_v28 = vadd.f32 %v2170_v12, %v12764_v38  ;;  %4553 = vmatmul.bf16.gmra.mxu3 %v4457_v21  ;;  %v3166_v4 = vpop.f32.mrf.mxu0  ;;  %v3986_v38 = vld [vmem:[#allocation2 + $0x48] sm:$0xf]  ;;  %v4134_v12 = vrot.slane %v4132_v10, 4 }
 0x1ff   : > { %v4119_v11 = vshrl.u32 %v3986_v38, 16  ;;  %v4122_v60 = vshll.u32 %v3986_v38, 16  ;;  %v15788_v38 = vld [vmem:[#allocation20_spill] sm:$0xff] }
 0x200   : > { %v2537_v17 = vadd.f32 %v2484_v30, %v2223_v28  ;;  %v4128_v30 = vshll.u32 %v13243_v34, 16  ;;  %v13254_v28 = vpop.f32.mrf.mxu1 }
 0x201   : > { %v2489_v26 = vpop.f32.mrf.mxu3  ;;  %4974 = vmatmul.bf16.gmra.mxu0 %v4882_v2  ;;  %v4121_v21 = vrot.slane %v4119_v11, 4  ;;  %v4124_v25 = vrot.slane %v4122_v60, 5 }
 0x202   : > { %v3219_v61 = vadd.f32 %v3166_v4, %v2537_v17  ;;  %v4130_v2 = vrot.slane %v4128_v30, 5  ;;  %v4458_v4 = vpack.c.b16 %v4430_v32, %v4429_v18  ;;  %v4745_v18 = vrot.slane %v4743_v59, 4 }
 0x203   : > { %v4125_v37 = vor.u32 %v4124_v25, %v4121_v21  ;;  %v4746_v32 = vrot.slane %v13231_v31, 5  ;;  %v3989_v25 = vld [vmem:[#allocation2 + $0x54] sm:$0xf] }
 0x204   : > { %v13247_v0 = vadd.f32 %v3592_v45, %v3219_v61  ;;  %v13256_v45 = vld [vmem:[#allocation2 + $0x50] sm:$0x1]  ;;  %v4135_v51 = vor.u32 %v4134_v12, %v4130_v2  ;;  %v13268_v12 = vld [vmem:[#allocation2 + $0x58] sm:$0xf] }
 0x205   : > { %v2172_v54 = vpop.f32.mrf.mxu2  ;;  %v4156_v19 = vshrl.u32 %v13268_v12, 16 }
 0x206   : > { %v2224_v58 = vadd.f32 %v2172_v54, %v12772_v15  ;;  %v3168_v27 = vpop.f32.mrf.mxu0  ;;  %v4138_v15 = vshll.u32 %v13256_v45, 16  ;;  %v4136_v60 = vrot.slane %v4135_v51, 4  ;;  %v11094_v54 = vrot.slane %v4659_v39, 9  ;;  %v11756_v39 = vld [vmem:[#allocation2 + $0x3c] sm:$0xff] }
 0x208   : > { %v2538_v52 = vadd.f32 %v2486_v22, %v2224_v58  ;;  %v4126_v22 = vrot.slane %v4125_v37, 4  ;;  %v4140_v30 = vrot.slane %v4138_v15, 5  ;;  %v3597_v3 = vpop.f32.mrf.mxu1  ;;  %v4744_v31 = vsel %vm12724_vm14, %v11094_v54, %v4743_v59 }
 0x209   : > { %v2491_v40 = vpop.f32.mrf.mxu3 }
 0x20a   : > { %3871 = vmatmul.bf16.gmra.mxu2 %v11755_v9  ;;  %v13258_v17 = vadd.f32 %v3168_v27, %v2538_v52  ;;  %v4131_v9 = vsel %vm12472_vm11, %v4126_v22, %v4130_v2  ;;  %v4141_v36 = vsel %vm12472_vm11, %v4136_v60, %v4140_v30  ;;  %v4143_v27 = vshrl.u32 %v3989_v25, 16  ;;  %v13279_v30 = vld [vmem:[#allocation2 + $0x5c] sm:$0x1] }
 0x20b   : > { %v4146_v52 = vshll.u32 %v3989_v25, 16  ;;  %v4747_v2 = vsel %vm12724_vm14, %v4745_v18, %v4746_v32  ;;  %v4431_v37 = vunpack.c.l.b16 %v4131_v9  ;;  %v4432_v51 = vunpack.c.l.b16 %v4141_v36 }
 0x20c   : > { %v4145_v15 = vrot.slane %v4143_v27, 4  ;;  %v4158_v22 = vrot.slane %v4156_v19, 4  ;;  %v4162_v9 = vshll.u32 %v13279_v30, 16  ;;  %v4660_v27 = vld [vmem:[#allocation2 + $0x48] sm:$0xe] }
 0x20d   : > { %v2175_v61 = vpop.f32.mrf.mxu2  ;;  %v4459_v54 = vpack.c.b16 %v4432_v51, %v4431_v37  ;;  %v11095_v51 = vrot.slane %v4660_v27, 9  ;;  %v11757_v27 = vld [vmem:[#allocation2 + $0x48] sm:$0xff] }
 0x20e   : > { %v2225_v11 = vadd.f32 %v2175_v61, %v15788_v38  ;;  %4558 = vmatmul.bf16.gmra.mxu3 %v4458_v4  ;;  %v3171_v10 = vpop.f32.mrf.mxu0  ;;  %v4148_v38 = vrot.slane %v4146_v52, 5  ;;  %v4750_v52 = vrot.slane %v13243_v34, 5 }
 0x210   : > { %v2539_v20 = vadd.f32 %v2489_v26, %v2225_v11  ;;  %v4152_v26 = vshll.u32 %v13268_v12, 16  ;;  %v4149_v18 = vor.u32 %v4148_v38, %v4145_v15  ;;  %v4753_v15 = vrot.slane %v13256_v45, 5 }
 0x211   : > { %v2494_v21 = vpop.f32.mrf.mxu3  ;;  %4979 = vmatmul.bf16.gmra.mxu0 %v4883_v46  ;;  %v15789_v46 = vld [vmem:[#allocation21_spill] sm:$0xff]  ;;  %v4751_v45 = vsel %vm12724_vm14, %v11095_v51, %v4750_v52 }
 0x212   : > { %v3221_v58 = vadd.f32 %v3171_v10, %v2539_v20  ;;  %v4154_v11 = vrot.slane %v4152_v26, 5  ;;  %v4855_v20 = vunpack.c.l.b16 %v4744_v31  ;;  %v15790_v26 = vld [vmem:[#allocation22_spill] sm:$0xff] }
 0x214   : > { %v13272_v42 = vadd.f32 %v3597_v3, %v3221_v58  ;;  %v4856_v3 = vunpack.c.l.b16 %v4747_v2  ;;  %v4159_v32 = vor.u32 %v4158_v22, %v4154_v11  ;;  %v3992_v22 = vld [vmem:[#allocation2 + $0x60] sm:$0xf] }
 0x215   : > { %v2177_v4 = vpop.f32.mrf.mxu2 }
 0x216   : > { %v2226_v61 = vadd.f32 %v2177_v4, %v15789_v46  ;;  %v3173_v60 = vpop.f32.mrf.mxu0  ;;  %v4884_v36 = vpack.c.b16 %v4856_v3, %v4855_v20  ;;  %v4160_v31 = vrot.slane %v4159_v32, 4  ;;  %v4164_v4 = vrot.slane %v4162_v9, 5 }
 0x217   : > { %v4752_v46 = vrot.slane %v4750_v52, 4  ;;  %v4170_v20 = vshll.u32 %v3992_v22, 16 }
 0x218   : > { %v2540_v10 = vadd.f32 %v2491_v40, %v2226_v61  ;;  %v4150_v40 = vrot.slane %v4149_v18, 4  ;;  %v4165_v34 = vsel %vm12472_vm11, %v4160_v31, %v4164_v4  ;;  %v13302_v4 = vld [vmem:[#allocation2 + $0x68] sm:$0x1] }
 0x219   : > { %v2496_v59 = vpop.f32.mrf.mxu3  ;;  %v4754_v18 = vsel %vm12724_vm14, %v4752_v46, %v4753_v15  ;;  %v4434_v32 = vunpack.c.l.b16 %v4165_v34 }
 0x21a   : > { %3876 = vmatmul.bf16.gmra.mxu2 %v11756_v39  ;;  %v13281_v58 = vadd.f32 %v3173_v60, %v2540_v10  ;;  %v4155_v38 = vsel %vm12472_vm11, %v4150_v40, %v4154_v11  ;;  %v13293_v60 = vld [vmem:[#allocation2 + $0x64] sm:$0xf]  ;;  %v4167_v10 = vshrl.u32 %v3992_v22, 16  ;;  %v4858_v22 = vunpack.c.l.b16 %v4754_v18 }
 0x21b   : > { %v4180_v3 = vshrl.u32 %v13293_v60, 16  ;;  %v4433_v11 = vunpack.c.l.b16 %v4155_v38  ;;  %v4186_v38 = vshll.u32 %v13302_v4, 16 }
 0x21c   : > { %v4169_v9 = vrot.slane %v4167_v10, 4 }
 0x21d   : > { %v2180_v25 = vpop.f32.mrf.mxu2  ;;  %v4182_v40 = vrot.slane %v4180_v3, 4  ;;  %v4460_v51 = vpack.c.b16 %v4434_v32, %v4433_v11  ;;  %v15794_v3 = vld [vmem:[#allocation24_spill] sm:$0xff]  ;;  %v4188_v18 = vrot.slane %v4186_v38, 5 }
 0x21e   : > { %v2227_v19 = vadd.f32 %v2180_v25, %v15790_v26  ;;  %4563 = vmatmul.bf16.gmra.mxu3 %v4459_v54  ;;  %v3176_v2 = vpop.f32.mrf.mxu0  ;;  %v4172_v26 = vrot.slane %v4170_v20, 5  ;;  %v4661_v20 = vld [vmem:[#allocation2 + $0x54] sm:$0xe] }
 0x21f   : > { %v11096_v32 = vrot.slane %v4661_v20, 9 }
 0x220   : > { %v2541_v37 = vadd.f32 %v2494_v21, %v2227_v19  ;;  %v4176_v21 = vshll.u32 %v13293_v60, 16  ;;  %v4173_v46 = vor.u32 %v4172_v26, %v4169_v9  ;;  %v4760_v9 = vrot.slane %v13279_v30, 5 }
 0x221   : > { %v2499_v61 = vpop.f32.mrf.mxu3  ;;  %4984 = vmatmul.bf16.gmra.mxu0 %v4884_v36  ;;  %v15792_v36 = vld [vmem:[#allocation23_spill] sm:$0xff] }
 0x222   : > { %v13287_v39 = vadd.f32 %v3176_v2, %v2541_v37  ;;  %v4178_v19 = vrot.slane %v4176_v21, 5  ;;  %v4857_v37 = vunpack.c.l.b16 %v4751_v45  ;;  %v4757_v21 = vrot.slane %v13268_v12, 5 }
 0x224   : > { %15791 = vst [vmem:[#allocation20_spill] sm:$0xff] %v13287_v39  ;;  %v4183_v15 = vor.u32 %v4182_v40, %v4178_v19  ;;  %v4885_v34 = vpack.c.b16 %v4858_v22, %v4857_v37  ;;  %v4758_v30 = vsel %vm12724_vm14, %v11096_v32, %v4757_v21 }
 0x225   : > { %v2182_v54 = vpop.f32.mrf.mxu2 }
 0x226   : > { %v2228_v25 = vadd.f32 %v2182_v54, %v15792_v36  ;;  %v3178_v31 = vpop.f32.mrf.mxu0  ;;  %v4184_v45 = vrot.slane %v4183_v15, 4 }
 0x228   : > { %v2542_v2 = vadd.f32 %v2496_v59, %v2228_v25  ;;  %v4174_v59 = vrot.slane %v4173_v46, 4  ;;  %v4759_v25 = vrot.slane %v4757_v21, 4  ;;  %v4189_v12 = vsel %vm12472_vm11, %v4184_v45, %v4188_v18 }
 0x229   : > { %v2501_v52 = vpop.f32.mrf.mxu3  ;;  %v4436_v38 = vunpack.c.l.b16 %v4189_v12 }
 0x22a   : > { %3881 = vmatmul.bf16.gmra.mxu2 %v11757_v27  ;;  %v13304_v39 = vadd.f32 %v3178_v31, %v2542_v2  ;;  %v4179_v40 = vsel %vm12472_vm11, %v4174_v59, %v4178_v19  ;;  %v3995_v31 = vld [vmem:[#allocation2 + $0x6c] sm:$0xf]  ;;  %v13316_v2 = vld [vmem:[#allocation2 + $0x70] sm:$0xf]  ;;  %v4761_v15 = vsel %vm12724_vm14, %v4759_v25, %v4760_v9 }
 0x22b   : > { %v4191_v37 = vshrl.u32 %v3995_v31, 16  ;;  %v4194_v22 = vshll.u32 %v3995_v31, 16  ;;  %v4435_v19 = vunpack.c.l.b16 %v4179_v40  ;;  %v4859_v31 = vunpack.c.l.b16 %v4758_v30 }
 0x22c   : > { %15793 = vst [vmem:[#allocation21_spill] sm:$0xff] %v13304_v39 }
 0x22d   : > { %v2185_v10 = vpop.f32.mrf.mxu2  ;;  %v4461_v32 = vpack.c.b16 %v4436_v38, %v4435_v19 }
 0x22e   : > { %v2229_v54 = vadd.f32 %v2185_v10, %v15794_v3  ;;  %4568 = vmatmul.bf16.gmra.mxu3 %v4460_v51  ;;  %v3181_v36 = vpop.f32.mrf.mxu0  ;;  %v4204_v51 = vshrl.u32 %v13316_v2, 16  ;;  %v15796_v10 = vld [vmem:[#allocation25_spill] sm:$0xff]  ;;  %v11758_v3 = vld [vmem:[#allocation2 + $0x54] sm:$0xff] }
 0x230   : > { %v2543_v11 = vadd.f32 %v2499_v61, %v2229_v54  ;;  %v4200_v61 = vshll.u32 %v13316_v2, 16  ;;  %v4196_v54 = vrot.slane %v4194_v22, 5  ;;  %v4206_v45 = vrot.slane %v4204_v51, 4  ;;  %v4662_v22 = vld [vmem:[#allocation2 + $0x60] sm:$0xe]  ;;  %v15798_v51 = vld [vmem:[#allocation26_spill] sm:$0xff] }
 0x231   : > { %v2504_v27 = vpop.f32.mrf.mxu3  ;;  %4989 = vmatmul.bf16.gmra.mxu0 %v4885_v34  ;;  %v4193_v34 = vrot.slane %v4191_v37, 4  ;;  %v11097_v38 = vrot.slane %v4662_v22, 9 }
 0x232   : > { %v13310_v26 = vadd.f32 %v3181_v36, %v2543_v11  ;;  %v4202_v59 = vrot.slane %v4200_v61, 5  ;;  %v13325_v36 = vld [vmem:[#allocation2 + $0x74] sm:$0x1]  ;;  %v4764_v61 = vrot.slane %v13293_v60, 5 }
 0x233   : > { %v4197_v25 = vor.u32 %v4196_v54, %v4193_v34  ;;  %v4210_v40 = vshll.u32 %v13325_v36, 16  ;;  %v4767_v34 = vrot.slane %v13302_v4, 5 }
 0x234   : > { %15795 = vst [vmem:[#allocation22_spill] sm:$0xff] %v13310_v26  ;;  %v4860_v26 = vunpack.c.l.b16 %v4761_v15  ;;  %v4207_v9 = vor.u32 %v4206_v45, %v4202_v59  ;;  %v3998_v45 = vld [vmem:[#allocation2 + $0x78] sm:$0xf]  ;;  %v4765_v4 = vsel %vm12724_vm14, %v11097_v38, %v4764_v61 }
 0x235   : > { %v2187_v46 = vpop.f32.mrf.mxu2  ;;  %v4212_v15 = vrot.slane %v4210_v40, 5 }
 0x236   : > { %v2230_v20 = vadd.f32 %v2187_v46, %v15796_v10  ;;  %v3183_v18 = vpop.f32.mrf.mxu0  ;;  %v4886_v12 = vpack.c.b16 %v4860_v26, %v4859_v31  ;;  %v4208_v30 = vrot.slane %v4207_v9, 4  ;;  %v4218_v31 = vshll.u32 %v3998_v45, 16 }
 0x238   : > { %v2544_v11 = vadd.f32 %v2501_v52, %v2230_v20  ;;  %v4198_v52 = vrot.slane %v4197_v25, 4  ;;  %v4766_v20 = vrot.slane %v4764_v61, 4  ;;  %v4213_v60 = vsel %vm12472_vm11, %v4208_v30, %v4212_v15 }
 0x239   : > { %v2506_v21 = vpop.f32.mrf.mxu3  ;;  %v4438_v40 = vunpack.c.l.b16 %v4213_v60 }
 0x23a   : > { %3886 = vmatmul.bf16.gmra.mxu2 %v11758_v3  ;;  %v13327_v39 = vadd.f32 %v3183_v18, %v2544_v11  ;;  %v4203_v26 = vsel %vm12472_vm11, %v4198_v52, %v4202_v59  ;;  %v13339_v18 = vld [vmem:[#allocation2 + $0x7c] sm:$0xf]  ;;  %v4215_v11 = vshrl.u32 %v3998_v45, 16  ;;  %v4768_v9 = vsel %vm12724_vm14, %v4766_v20, %v4767_v34 }
 0x23b   : > { %v4437_v59 = vunpack.c.l.b16 %v4203_v26  ;;  %v4861_v45 = vunpack.c.l.b16 %v4765_v4 }
 0x23c   : > { %15797 = vst [vmem:[#allocation23_spill] sm:$0xff] %v13327_v39 }
 0x23d   : > { %v2190_v37 = vpop.f32.mrf.mxu2  ;;  %v4462_v38 = vpack.c.b16 %v4438_v40, %v4437_v59 }
 0x23e   : > { %v2231_v46 = vadd.f32 %v2190_v37, %v15798_v51  ;;  %4573 = vmatmul.bf16.gmra.mxu3 %v4461_v32  ;;  %v3186_v10 = vpop.f32.mrf.mxu0  ;;  %v4228_v32 = vshrl.u32 %v13339_v18, 16  ;;  %v15800_v37 = vld [vmem:[#allocation27_spill] sm:$0xff]  ;;  %v11759_v51 = vld [vmem:[#allocation2 + $0x60] sm:$0xff] }
 0x240   : > { %v2545_v19 = vadd.f32 %v2504_v27, %v2231_v46  ;;  %v4224_v27 = vshll.u32 %v13339_v18, 16  ;;  %v4220_v46 = vrot.slane %v4218_v31, 5  ;;  %v4230_v30 = vrot.slane %v4228_v32, 4  ;;  %v4663_v31 = vld [vmem:[#allocation2 + $0x6c] sm:$0xe]  ;;  %v15802_v32 = vld [vmem:[#allocation28_spill] sm:$0xff] }
 0x241   : > { %v2509_v3 = vpop.f32.mrf.mxu3  ;;  %4994 = vmatmul.bf16.gmra.mxu0 %v4886_v12  ;;  %v4217_v12 = vrot.slane %v4215_v11, 4  ;;  %v11098_v40 = vrot.slane %v4663_v31, 9 }
 0x242   : > { %v13333_v54 = vadd.f32 %v3186_v10, %v2545_v19  ;;  %v4226_v52 = vrot.slane %v4224_v27, 5  ;;  %v13348_v10 = vld [vmem:[#allocation2 + $0x80] sm:$0x1]  ;;  %v4771_v27 = vrot.slane %v13316_v2, 5 }
 0x243   : > { %v4221_v20 = vor.u32 %v4220_v46, %v4217_v12  ;;  %v4234_v26 = vshll.u32 %v13348_v10, 16  ;;  %v4774_v12 = vrot.slane %v13325_v36, 5 }
 0x244   : > { %15799 = vst [vmem:[#allocation24_spill] sm:$0xff] %v13333_v54  ;;  %v4862_v54 = vunpack.c.l.b16 %v4768_v9  ;;  %v4231_v34 = vor.u32 %v4230_v30, %v4226_v52  ;;  %v4001_v30 = vld [vmem:[#allocation2 + $0x84] sm:$0xf]  ;;  %v4772_v36 = vsel %vm12724_vm14, %v11098_v40, %v4771_v27 }
 0x245   : > { %v2192_v25 = vpop.f32.mrf.mxu2  ;;  %v4236_v9 = vrot.slane %v4234_v26, 5 }
 0x246   : > { %v2232_v22 = vadd.f32 %v2192_v25, %v15800_v37  ;;  %v3188_v15 = vpop.f32.mrf.mxu0  ;;  %v4887_v60 = vpack.c.b16 %v4862_v54, %v4861_v45  ;;  %v4232_v4 = vrot.slane %v4231_v34, 4  ;;  %v4242_v45 = vshll.u32 %v4001_v30, 16 }
 0x248   : > { %v2546_v19 = vadd.f32 %v2506_v21, %v2232_v22  ;;  %v4222_v21 = vrot.slane %v4221_v20, 4  ;;  %v4773_v22 = vrot.slane %v4771_v27, 4  ;;  %v4237_v2 = vsel %vm12472_vm11, %v4232_v4, %v4236_v9 }
 0x249   : > { %v2511_v61 = vpop.f32.mrf.mxu3  ;;  %v4440_v26 = vunpack.c.l.b16 %v4237_v2 }
 0x24a   : > { %3891 = vmatmul.bf16.gmra.mxu2 %v11759_v51  ;;  %v13350_v39 = vadd.f32 %v3188_v15, %v2546_v19  ;;  %v4227_v54 = vsel %vm12472_vm11, %v4222_v21, %v4226_v52  ;;  %v13362_v15 = vld [vmem:[#allocation2 + $0x88] sm:$0xf]  ;;  %v4239_v19 = vshrl.u32 %v4001_v30, 16  ;;  %v4775_v34 = vsel %vm12724_vm14, %v4773_v22, %v4774_v12 }
 0x24b   : > { %v4439_v52 = vunpack.c.l.b16 %v4227_v54  ;;  %v4863_v30 = vunpack.c.l.b16 %v4772_v36 }
 0x24c   : > { %15801 = vst [vmem:[#allocation25_spill] sm:$0xff] %v13350_v39 }
 0x24d   : > { %v2195_v11 = vpop.f32.mrf.mxu2  ;;  %v4463_v40 = vpack.c.b16 %v4440_v26, %v4439_v52 }
 0x24e   : > { %v2233_v25 = vadd.f32 %v2195_v11, %v15802_v32  ;;  %4578 = vmatmul.bf16.gmra.mxu3 %v4462_v38  ;;  %v3191_v37 = vpop.f32.mrf.mxu0  ;;  %v4252_v38 = vshrl.u32 %v13362_v15, 16  ;;  %v15804_v11 = vld [vmem:[#allocation29_spill] sm:$0xff] }
 0x24f   : > { %v11760_v32 = vld [vmem:[#allocation2 + $0x6c] sm:$0xff] }
 0x250   : > { %v2547_v59 = vadd.f32 %v2509_v3, %v2233_v25  ;;  %v4248_v3 = vshll.u32 %v13362_v15, 16  ;;  %v4244_v25 = vrot.slane %v4242_v45, 5  ;;  %v4254_v4 = vrot.slane %v4252_v38, 4  ;;  %v4664_v45 = vld [vmem:[#allocation2 + $0x78] sm:$0xe]  ;;  %v15806_v38 = vld [vmem:[#allocation30_spill] sm:$0xff] }
 0x251   : > { %v2514_v51 = vpop.f32.mrf.mxu3  ;;  %4999 = vmatmul.bf16.gmra.mxu0 %v4887_v60  ;;  %v4241_v60 = vrot.slane %v4239_v19, 4  ;;  %v11099_v26 = vrot.slane %v4664_v45, 9 }
 0x252   : > { %v13356_v46 = vadd.f32 %v3191_v37, %v2547_v59  ;;  %v4250_v21 = vrot.slane %v4248_v3, 5  ;;  %v13371_v37 = vld [vmem:[#allocation2 + $0x8c] sm:$0x1]  ;;  %v4778_v3 = vrot.slane %v13339_v18, 5 }
 0x253   : > { %v4245_v22 = vor.u32 %v4244_v25, %v4241_v60  ;;  %v4258_v54 = vshll.u32 %v13371_v37, 16  ;;  %v4781_v60 = vrot.slane %v13348_v10, 5 }
 0x254   : > { %15803 = vst [vmem:[#allocation26_spill] sm:$0xff] %v13356_v46  ;;  %v4864_v46 = vunpack.c.l.b16 %v4775_v34  ;;  %v4255_v12 = vor.u32 %v4254_v4, %v4250_v21  ;;  %v4004_v4 = vld [vmem:[#allocation2 + $0x90] sm:$0xf]  ;;  %v4779_v10 = vsel %vm12724_vm14, %v11099_v26, %v4778_v3 }
 0x255   : > { %v2197_v20 = vpop.f32.mrf.mxu2  ;;  %v4260_v34 = vrot.slane %v4258_v54, 5 }
 0x256   : > { %v2234_v31 = vadd.f32 %v2197_v20, %v15804_v11  ;;  %v3193_v9 = vpop.f32.mrf.mxu0  ;;  %v4888_v2 = vpack.c.b16 %v4864_v46, %v4863_v30  ;;  %v4256_v36 = vrot.slane %v4255_v12, 4  ;;  %v4266_v30 = vshll.u32 %v4004_v4, 16 }
 0x258   : > { %v2548_v59 = vadd.f32 %v2511_v61, %v2234_v31  ;;  %v4246_v61 = vrot.slane %v4245_v22, 4  ;;  %v4780_v31 = vrot.slane %v4778_v3, 4  ;;  %v4261_v18 = vsel %vm12472_vm11, %v4256_v36, %v4260_v34 }
 0x259   : > { %v2516_v27 = vpop.f32.mrf.mxu3  ;;  %v4442_v54 = vunpack.c.l.b16 %v4261_v18 }
 0x25a   : > { %3896 = vmatmul.bf16.gmra.mxu2 %v11760_v32  ;;  %v13373_v39 = vadd.f32 %v3193_v9, %v2548_v59  ;;  %v4251_v46 = vsel %vm12472_vm11, %v4246_v61, %v4250_v21  ;;  %v13385_v9 = vld [vmem:[#allocation2 + $0x94] sm:$0xf]  ;;  %v4263_v59 = vshrl.u32 %v4004_v4, 16  ;;  %v4782_v12 = vsel %vm12724_vm14, %v4780_v31, %v4781_v60 }
 0x25b   : > { %v4441_v21 = vunpack.c.l.b16 %v4251_v46  ;;  %v4865_v4 = vunpack.c.l.b16 %v4779_v10 }
 0x25c   : > { %15805 = vst [vmem:[#allocation27_spill] sm:$0xff] %v13373_v39 }
 0x25d   : > { %v2200_v19 = vpop.f32.mrf.mxu2  ;;  %v4464_v26 = vpack.c.b16 %v4442_v54, %v4441_v21 }
 0x25e   : > { %v2235_v20 = vadd.f32 %v2200_v19, %v15806_v38  ;;  %4583 = vmatmul.bf16.gmra.mxu3 %v4463_v40  ;;  %v3196_v11 = vpop.f32.mrf.mxu0  ;;  %v4276_v40 = vshrl.u32 %v13385_v9, 16  ;;  %v15808_v19 = vld [vmem:[#allocation31_spill] sm:$0xff] }
 0x25f   : > { %v11761_v38 = vld [vmem:[#allocation2 + $0x78] sm:$0xff] }
 0x260   : > { %v2549_v52 = vadd.f32 %v2514_v51, %v2235_v20  ;;  %v4272_v51 = vshll.u32 %v13385_v9, 16  ;;  %v4268_v20 = vrot.slane %v4266_v30, 5  ;;  %v4278_v36 = vrot.slane %v4276_v40, 4  ;;  %v4665_v30 = vld [vmem:[#allocation2 + $0x84] sm:$0xe] }
 0x261   : > { %v4544_v32 = vpop.f32.mrf.mxu3  ;;  %5004 = vmatmul.bf16.gmra.mxu0 %v4888_v2  ;;  %v4265_v2 = vrot.slane %v4263_v59, 4  ;;  %v11100_v54 = vrot.slane %v4665_v30, 9 }
 0x262   : > { %v13379_v25 = vadd.f32 %v3196_v11, %v2549_v52  ;;  %v4274_v61 = vrot.slane %v4272_v51, 5  ;;  %v13394_v11 = vld [vmem:[#allocation2 + $0x98] sm:$0x1]  ;;  %v4785_v51 = vrot.slane %v13362_v15, 5  ;;  %v4007_v15 = vld [vmem:[#allocation2 + $0x9c] sm:$0xf] }
 0x263   : > { %v4269_v31 = vor.u32 %v4268_v20, %v4265_v2  ;;  %v4282_v46 = vshll.u32 %v13394_v11, 16  ;;  %v4788_v2 = vrot.slane %v13371_v37, 5  ;;  %v13408_v20 = vld [vmem:[#allocation2 + $0xa0] sm:$0xf] }
 0x264   : > { %15807 = vst [vmem:[#allocation28_spill] sm:$0xff] %v13379_v25  ;;  %v4866_v25 = vunpack.c.l.b16 %v4782_v12  ;;  %v4279_v60 = vor.u32 %v4278_v36, %v4274_v61  ;;  %v4287_v36 = vshrl.u32 %v4007_v15, 16  ;;  %v4786_v37 = vsel %vm12724_vm14, %v11100_v54, %v4785_v51 }
 0x265   : > { %v2202_v22 = vpop.f32.mrf.mxu2 }
 0x266   : > { %v2236_v45 = vadd.f32 %v2202_v22, %v15808_v19  ;;  %v3198_v34 = vpop.f32.mrf.mxu0  ;;  %v4889_v18 = vpack.c.b16 %v4866_v25, %v4865_v4  ;;  %v4280_v10 = vrot.slane %v4279_v60, 4  ;;  %v4284_v22 = vrot.slane %v4282_v46, 5 }
 0x267   : > { %v4787_v19 = vrot.slane %v4785_v51, 4  ;;  %v4289_v60 = vrot.slane %v4287_v36, 4  ;;  %v4666_v36 = vld [vmem:[#allocation2 + $0x90] sm:$0xe] }
 0x268   : > { %v2550_v52 = vadd.f32 %v2516_v27, %v2236_v45  ;;  %v4270_v27 = vrot.slane %v4269_v31, 4 }
 0x269   : > { %v4546_v3 = vpop.f32.mrf.mxu3 }
 0x26a   : > { %3901 = vmatmul.bf16.gmra.mxu2 %v11761_v38  ;;  %v13396_v39 = vadd.f32 %v3198_v34, %v2550_v52  ;;  %v4275_v25 = vsel %vm12472_vm11, %v4270_v27, %v4274_v61  ;;  %v4290_v34 = vshll.u32 %v4007_v15, 16  ;;  %v4300_v52 = vshrl.u32 %v13408_v20, 16 }
 0x26b   : > { %v4443_v61 = vunpack.c.l.b16 %v4275_v25 }
 0x26c   : > { %15809 = vst [vmem:[#allocation29_spill] sm:$0xff] %v13396_v39 }
 0x26d   : > { %v3862_v59 = vpop.f32.mrf.mxu2 }
 0x26e   : > { %v3942_v40 = vadd.f32 %v3862_v59, %v12936_v47  ;;  %4588 = vmatmul.bf16.gmra.mxu3 %v4464_v26  ;;  %v4970_v12 = vpop.f32.mrf.mxu0  ;;  %v4285_v47 = vsel %vm12472_vm11, %v4280_v10, %v4284_v22  ;;  %v4789_v26 = vsel %vm12724_vm14, %v4787_v19, %v4788_v2  ;;  %v4292_v59 = vrot.slane %v4290_v34, 5  ;;  %v13417_v10 = vld [vmem:[#allocation2 + $0xa4] sm:$0x1] }
 0x26f   : > { %v4444_v31 = vunpack.c.l.b16 %v4285_v47  ;;  %v4306_v25 = vshll.u32 %v13417_v10, 16  ;;  %v4792_v34 = vrot.slane %v13385_v9, 5  ;;  %v4010_v9 = vld [vmem:[#allocation2 + $0xa8] sm:$0xf] }
 0x270   : > { %v4624_v21 = vadd.f32 %v4544_v32, %v3942_v40  ;;  %v4296_v32 = vshll.u32 %v13408_v20, 16  ;;  %v4302_v40 = vrot.slane %v4300_v52, 4  ;;  %v4293_v19 = vor.u32 %v4292_v59, %v4289_v60 }
 0x271   : > { %v4549_v45 = vpop.f32.mrf.mxu3  ;;  %5009 = vmatmul.bf16.gmra.mxu0 %v4889_v18  ;;  %v11762_v18 = vld [vmem:[#allocation2 + $0x84] sm:$0xff]  ;;  %v4465_v54 = vpack.c.b16 %v4444_v31, %v4443_v61  ;;  %v11101_v61 = vrot.slane %v4666_v36, 9  ;;  %v4794_v31 = vrot.slane %v4792_v34, 4  ;;  %v4795_v60 = vrot.slane %v13394_v11, 5 }
 0x272   : > { %v13402_v38 = vadd.f32 %v4970_v12, %v4624_v21  ;;  %v4298_v30 = vrot.slane %v4296_v32, 5  ;;  %v4867_v12 = vunpack.c.l.b16 %v4786_v37  ;;  %v4868_v21 = vunpack.c.l.b16 %v4789_v26 }
 0x273   : > { %v4308_v37 = vrot.slane %v4306_v25, 5  ;;  %v4793_v11 = vsel %vm12724_vm14, %v11101_v61, %v4792_v34 }
 0x274   : > { %15810 = vst [vmem:[#allocation30_spill] sm:$0xff] %v13402_v38  ;;  %v4303_v2 = vor.u32 %v4302_v40, %v4298_v30  ;;  %v13431_v40 = vld [vmem:[#allocation2 + $0xac] sm:$0xf] }
 0x275   : > { %v3864_v4 = vpop.f32.mrf.mxu2 }
 0x276   : > { %v3943_v46 = vadd.f32 %v3864_v4, %v12954_v16  ;;  %v4972_v27 = vpop.f32.mrf.mxu0  ;;  %v4890_v16 = vpack.c.b16 %v4868_v21, %v4867_v12  ;;  %v4304_v52 = vrot.slane %v4303_v2, 4  ;;  %v4324_v12 = vshrl.u32 %v13431_v40, 16 }
 0x278   : > { %v4625_v22 = vadd.f32 %v4546_v3, %v3943_v46  ;;  %v4294_v3 = vrot.slane %v4293_v19, 4 }
 0x279   : > { %v4551_v51 = vpop.f32.mrf.mxu3 }
 0x27a   : > { %v13419_v15 = vadd.f32 %v4972_v27, %v4625_v22  ;;  %3906 = vmatmul.bf16.gmra.mxu2 %v11762_v18  ;;  %v4299_v59 = vsel %vm12472_vm11, %v4294_v3, %v4298_v30  ;;  %v4311_v27 = vshrl.u32 %v4010_v9, 16  ;;  %v4314_v22 = vshll.u32 %v4010_v9, 16 }
 0x27b   : > { %v4445_v30 = vunpack.c.l.b16 %v4299_v59 }
 0x27c   : > { %15811 = vst [vmem:[#allocation31_spill] sm:$0xff] %v13419_v15  ;;  %v4313_v2 = vrot.slane %v4311_v27, 4  ;;  %v4667_v27 = vld [vmem:[#allocation2 + $0x9c] sm:$0xe] }
 0x27d   : > { %v3867_v47 = vpop.f32.mrf.mxu2 }
 0x27e   : > { %v3944_v32 = vadd.f32 %v3867_v47, %v12970_v8  ;;  %4593 = vmatmul.bf16.gmra.mxu3 %v4465_v54  ;;  %v4975_v4 = vpop.f32.mrf.mxu0  ;;  %v4309_v8 = vsel %vm12472_vm11, %v4304_v52, %v4308_v37  ;;  %v4796_v54 = vsel %vm12724_vm14, %v4794_v31, %v4795_v60  ;;  %v4316_v47 = vrot.slane %v4314_v22, 5  ;;  %v13440_v52 = vld [vmem:[#allocation2 + $0xb0] sm:$0x1] }
 0x27f   : > { %v4446_v19 = vunpack.c.l.b16 %v4309_v8  ;;  %v4330_v59 = vshll.u32 %v13440_v52, 16  ;;  %v4799_v22 = vrot.slane %v13408_v20, 5  ;;  %v4013_v20 = vld [vmem:[#allocation2 + $0xb4] sm:$0xf] }
 0x280   : > { %v4626_v26 = vadd.f32 %v4549_v45, %v3944_v32  ;;  %v4320_v45 = vshll.u32 %v13431_v40, 16  ;;  %v4326_v32 = vrot.slane %v4324_v12, 4  ;;  %v4317_v31 = vor.u32 %v4316_v47, %v4313_v2 }
 0x281   : > { %v4554_v46 = vpop.f32.mrf.mxu3  ;;  %5014 = vmatmul.bf16.gmra.mxu0 %v4890_v16  ;;  %v11763_v16 = vld [vmem:[#allocation2 + $0x90] sm:$0xff]  ;;  %v4466_v61 = vpack.c.b16 %v4446_v19, %v4445_v30  ;;  %v11102_v30 = vrot.slane %v4667_v27, 9  ;;  %v4801_v19 = vrot.slane %v4799_v22, 4  ;;  %v4802_v2 = vrot.slane %v13417_v10, 5 }
 0x282   : > { %v13425_v18 = vadd.f32 %v4975_v4, %v4626_v26  ;;  %v4322_v36 = vrot.slane %v4320_v45, 5  ;;  %v4869_v4 = vunpack.c.l.b16 %v4793_v11  ;;  %v4870_v26 = vunpack.c.l.b16 %v4796_v54 }
 0x283   : > { %v4332_v11 = vrot.slane %v4330_v59, 5  ;;  %v4800_v10 = vsel %vm12724_vm14, %v11102_v30, %v4799_v22 }
 0x284   : > { %15812 = vst [vmem:[#allocation33_spill] sm:$0xff] %v13425_v18  ;;  %v4327_v60 = vor.u32 %v4326_v32, %v4322_v36  ;;  %v13454_v32 = vld [vmem:[#allocation2 + $0xb8] sm:$0xf] }
 0x285   : > { %v3869_v21 = vpop.f32.mrf.mxu2 }
 0x286   : > { %v3945_v25 = vadd.f32 %v3869_v21, %v12989_v50  ;;  %v4977_v3 = vpop.f32.mrf.mxu0  ;;  %v4891_v50 = vpack.c.b16 %v4870_v26, %v4869_v4  ;;  %v4328_v12 = vrot.slane %v4327_v60, 4  ;;  %v4348_v4 = vshrl.u32 %v13454_v32, 16 }
 0x288   : > { %v4627_v37 = vadd.f32 %v4551_v51, %v3945_v25  ;;  %v4318_v51 = vrot.slane %v4317_v31, 4 }
 0x289   : > { %v4556_v34 = vpop.f32.mrf.mxu3 }
 0x28a   : > { %v13442_v9 = vadd.f32 %v4977_v3, %v4627_v37  ;;  %3911 = vmatmul.bf16.gmra.mxu2 %v11763_v16  ;;  %v4323_v47 = vsel %vm12472_vm11, %v4318_v51, %v4322_v36  ;;  %v4335_v3 = vshrl.u32 %v4013_v20, 16  ;;  %v4338_v37 = vshll.u32 %v4013_v20, 16 }
 0x28b   : > { %v4447_v36 = vunpack.c.l.b16 %v4323_v47 }
 0x28c   : > { %v4337_v60 = vrot.slane %v4335_v3, 4  ;;  %v4668_v3 = vld [vmem:[#allocation2 + $0xa8] sm:$0xe] }
 0x28d   : > { %v3872_v8 = vpop.f32.mrf.mxu2 }
 0x28e   : > { %v3946_v45 = vadd.f32 %v3872_v8, %v13005_v41  ;;  %4598 = vmatmul.bf16.gmra.mxu3 %v4466_v61  ;;  %v4980_v21 = vpop.f32.mrf.mxu0  ;;  %v4333_v41 = vsel %vm12472_vm11, %v4328_v12, %v4332_v11  ;;  %v4803_v61 = vsel %vm12724_vm14, %v4801_v19, %v4802_v2  ;;  %v4340_v8 = vrot.slane %v4338_v37, 5  ;;  %v13463_v12 = vld [vmem:[#allocation2 + $0xbc] sm:$0x1] }
 0x28f   : > { %v4448_v31 = vunpack.c.l.b16 %v4333_v41  ;;  %v4354_v47 = vshll.u32 %v13463_v12, 16  ;;  %v4806_v37 = vrot.slane %v13431_v40, 5  ;;  %v4016_v40 = vld [vmem:[#allocation2 + $0xc0] sm:$0xf] }
 0x290   : > { %v4628_v54 = vadd.f32 %v4554_v46, %v3946_v45  ;;  %v4344_v46 = vshll.u32 %v13454_v32, 16  ;;  %v4350_v45 = vrot.slane %v4348_v4, 4  ;;  %v4341_v19 = vor.u32 %v4340_v8, %v4337_v60 }
 0x291   : > { %v4559_v25 = vpop.f32.mrf.mxu3  ;;  %5019 = vmatmul.bf16.gmra.mxu0 %v4891_v50  ;;  %v11764_v50 = vld [vmem:[#allocation2 + $0x9c] sm:$0xff]  ;;  %v4467_v30 = vpack.c.b16 %v4448_v31, %v4447_v36  ;;  %v11103_v36 = vrot.slane %v4668_v3, 9  ;;  %v4808_v31 = vrot.slane %v4806_v37, 4 }
 0x292   : > { %v13448_v16 = vadd.f32 %v4980_v21, %v4628_v54  ;;  %v4346_v27 = vrot.slane %v4344_v46, 5  ;;  %v4871_v21 = vunpack.c.l.b16 %v4800_v10  ;;  %v4872_v54 = vunpack.c.l.b16 %v4803_v61 }
 0x293   : > { %v4356_v10 = vrot.slane %v4354_v47, 5 }
 0x294   : > { %v4351_v2 = vor.u32 %v4350_v45, %v4346_v27  ;;  %v13477_v45 = vld [vmem:[#allocation2 + $0xc4] sm:$0xf] }
 0x295   : > { %v3874_v26 = vpop.f32.mrf.mxu2 }
 0x296   : > { %v3947_v59 = vadd.f32 %v3874_v26, %v13025_v43  ;;  %v4982_v51 = vpop.f32.mrf.mxu0  ;;  %v4892_v43 = vpack.c.b16 %v4872_v54, %v4871_v21  ;;  %v4352_v4 = vrot.slane %v4351_v2, 4  ;;  %v4372_v21 = vshrl.u32 %v13477_v45, 16 }
 0x297   : > { %v4807_v54 = vsel %vm12724_vm14, %v11103_v36, %v4806_v37 }
 0x298   : > { %v4629_v11 = vadd.f32 %v4556_v34, %v3947_v59  ;;  %v4342_v34 = vrot.slane %v4341_v19, 4 }
 0x299   : > { %v4561_v22 = vpop.f32.mrf.mxu3 }
 0x29a   : > { %v13465_v20 = vadd.f32 %v4982_v51, %v4629_v11  ;;  %3916 = vmatmul.bf16.gmra.mxu2 %v11764_v50  ;;  %v4809_v50 = vrot.slane %v13440_v52, 5  ;;  %v4347_v8 = vsel %vm12472_vm11, %v4342_v34, %v4346_v27  ;;  %v4359_v51 = vshrl.u32 %v4016_v40, 16 }
 0x29b   : > { %v4362_v11 = vshll.u32 %v4016_v40, 16  ;;  %v4449_v52 = vunpack.c.l.b16 %v4347_v8 }
 0x29c   : > { %v4361_v2 = vrot.slane %v4359_v51, 4 }
 0x29d   : > { %v3877_v41 = vpop.f32.mrf.mxu2  ;;  %v4364_v27 = vrot.slane %v4362_v11, 5 }
 0x29e   : > { %v3948_v46 = vadd.f32 %v3877_v41, %v13047_v63  ;;  %4603 = vmatmul.bf16.gmra.mxu3 %v4467_v30  ;;  %v4985_v26 = vpop.f32.mrf.mxu0  ;;  %v4357_v63 = vsel %vm12472_vm11, %v4352_v4, %v4356_v10  ;;  %v4810_v41 = vsel %vm12724_vm14, %v4808_v31, %v4809_v50  ;;  %v13486_v4 = vld [vmem:[#allocation2 + $0xc8] sm:$0x1] }
 0x29f   : > { %v4450_v19 = vunpack.c.l.b16 %v4357_v63  ;;  %v4365_v8 = vor.u32 %v4364_v27, %v4361_v2  ;;  %v394_v63 = vld [vmem:[#allocation2 + $0xcc] sm:$0x1]  ;;  %v4378_v51 = vshll.u32 %v13486_v4, 16 }
 0x2a0   : > { %v4630_v61 = vadd.f32 %v4559_v25, %v3948_v46  ;;  %v4368_v25 = vshll.u32 %v13477_v45, 16  ;;  %v4374_v46 = vrot.slane %v4372_v21, 4  ;;  %v395_v31 = vsel %vm12416_vm3, 0, %v394_v63 }
 0x2a1   : > { %v4564_v59 = vpop.f32.mrf.mxu3  ;;  %5024 = vmatmul.bf16.gmra.mxu0 %v4892_v43  ;;  %v11765_v43 = vld [vmem:[#allocation2 + $0xa8] sm:$0xff]  ;;  %v4468_v36 = vpack.c.b16 %v4450_v19, %v4449_v52  ;;  %396 = vst [vmem:[#allocation2 + $0xcc] sm:$0x1] %v395_v31  ;;  %v4380_v19 = vrot.slane %v4378_v51, 5  ;;  %v11766_v51 = vld [vmem:[#allocation2 + $0xb4] sm:$0xff] }
 0x2a2   : > { %v13470_v60 = vadd.f32 %v4985_v26, %v4630_v61  ;;  %v4370_v3 = vrot.slane %v4368_v25, 5  ;;  %v4873_v26 = vunpack.c.l.b16 %v4807_v54  ;;  %v4874_v61 = vunpack.c.l.b16 %v4810_v41  ;;  %v450_v25 = vld [vmem:[#allocation2 + $0xd4] sm:$0x1]  ;;  %v4669_v54 = vld [vmem:[#allocation2 + $0xb4] sm:$0xe] }
 0x2a3   : > { %v451_v27 = vsel %vm12423_vm4, 0, %v450_v25 }
 0x2a4   : > { %v4893_v50 = vpack.c.b16 %v4874_v61, %v4873_v26  ;;  %452 = vst [vmem:[#allocation2 + $0xd4] sm:$0x1] %v451_v27  ;;  %v13506_v61 = vld [vmem:[#allocation2 + $0xd0] sm:$0xf] }
 0x2a5   : > { %v3879_v30 = vpop.f32.mrf.mxu2  ;;  %v4396_v63 = vshrl.u32 %v13506_v61, 16 }
 0x2a6   : > { %v3949_v47 = vadd.f32 %v3879_v30, %v13069_v48  ;;  %v4987_v34 = vpop.f32.mrf.mxu0  ;;  %v4375_v48 = vor.u32 %v4374_v46, %v4370_v3  ;;  %v4366_v30 = vrot.slane %v4365_v8, 4  ;;  %v4392_v8 = vshll.u32 %v13506_v61, 16 }
 0x2a8   : > { %v4631_v10 = vadd.f32 %v4561_v22, %v3949_v47  ;;  %v4813_v22 = vrot.slane %v13454_v32, 5  ;;  %v4376_v52 = vrot.slane %v4375_v48, 4  ;;  %v4816_v32 = vrot.slane %v13463_v12, 5  ;;  %v4019_v26 = vld [vmem:[#allocation2 + $0xcc] sm:$0xf] }
 0x2a9   : > { %v13488_v37 = vpop.f32.mrf.mxu3 }
 0x2aa   : > { %v13490_v40 = vadd.f32 %v4987_v34, %v4631_v10  ;;  %3921 = vmatmul.bf16.gmra.mxu2 %v11765_v43  ;;  %v11104_v43 = vrot.slane %v4669_v54, 9  ;;  %v4815_v41 = vrot.slane %v4813_v22, 4  ;;  %v4381_v10 = vsel %vm12472_vm11, %v4376_v52, %v4380_v19 }
 0x2ab   : > { %v4394_v54 = vrot.slane %v4392_v8, 5  ;;  %v4021_v52 = vld [vmem:[#allocation2 + $0xd4] sm:$0x1] }
 0x2ac   : > { %v4814_v12 = vsel %vm12724_vm14, %v11104_v43, %v4813_v22  ;;  %v4402_v43 = vshll.u32 %v4021_v52, 16 }
 0x2ad   : > { %v3882_v11 = vpop.f32.mrf.mxu2 }
 0x2ae   : > { %v3950_v21 = vadd.f32 %v3882_v11, %v13093_v33  ;;  %4608 = vmatmul.bf16.gmra.mxu3 %v4468_v36  ;;  %v4990_v2 = vpop.f32.mrf.mxu0  ;;  %v4371_v33 = vsel %vm12472_vm11, %v4366_v30, %v4370_v3  ;;  %v4383_v36 = vshrl.u32 %v4019_v26, 16  ;;  %v4817_v3 = vsel %vm12724_vm14, %v4815_v41, %v4816_v32 }
 0x2af   : > { %v4451_v31 = vunpack.c.l.b16 %v4371_v33  ;;  %v4398_v30 = vrot.slane %v4396_v63, 4  ;;  %v4876_v27 = vunpack.c.l.b16 %v4817_v3  ;;  %v4404_v63 = vrot.slane %v4402_v43, 5 }
 0x2b0   : > { %v4632_v47 = vadd.f32 %v4564_v59, %v3950_v21  ;;  %v4386_v59 = vshll.u32 %v4019_v26, 16  ;;  %v4385_v25 = vrot.slane %v4383_v36, 4  ;;  %v4820_v36 = vrot.slane %v13477_v45, 5  ;;  %v11767_v45 = vld [vmem:[#allocation2 + $0xc0] sm:$0xff] }
 0x2b1   : > { %v4569_v46 = vpop.f32.mrf.mxu3  ;;  %5029 = vmatmul.bf16.gmra.mxu0 %v4893_v50  ;;  %v4452_v50 = vunpack.c.l.b16 %v4381_v10  ;;  %v4399_v22 = vor.u32 %v4398_v30, %v4394_v54  ;;  %v4670_v10 = vld [vmem:[#allocation2 + $0xc0] sm:$0xe] }
 0x2b2   : > { %v13499_v34 = vadd.f32 %v4990_v2, %v4632_v47  ;;  %v4388_v21 = vrot.slane %v4386_v59, 5  ;;  %v4875_v2 = vunpack.c.l.b16 %v4814_v12  ;;  %v11105_v3 = vrot.slane %v4670_v10, 9  ;;  %v4671_v10 = vld [vmem:[#allocation2 + $0xcc] sm:$0xe] }
 0x2b3   : > { %v4469_v47 = vpack.c.b16 %v4452_v50, %v4451_v31  ;;  %v4400_v8 = vrot.slane %v4399_v22, 4  ;;  %v4822_v31 = vrot.slane %v4820_v36, 4  ;;  %v4823_v50 = vrot.slane %v13486_v4, 5 }
 0x2b4   : > { %v4389_v26 = vor.u32 %v4388_v21, %v4385_v25  ;;  %v4894_v41 = vpack.c.b16 %v4876_v27, %v4875_v2 }
 0x2b5   : > { %v13510_v48 = vpop.f32.mrf.mxu2  ;;  %v4824_v2 = vsel %vm12724_vm14, %v4822_v31, %v4823_v50  ;;  %v11768_v50 = vld [vmem:[#allocation2 + $0xcc] sm:$0xff] }
 0x2b6   : > { %v13516_v11 = vpop.f32.mrf.mxu0  ;;  %v4390_v59 = vrot.slane %v4389_v26, 4  ;;  %v4878_v27 = vunpack.c.l.b16 %v4824_v2 }
 0x2b9   : > { %v13518_v19 = vpop.f32.mrf.mxu3 }
 0x2ba   : > { %3926 = vmatmul.bf16.gmra.mxu2 %v11766_v51 }
 0x2bd   : > { %v3887_v6 = vpop.f32.mrf.mxu2 }
 0x2be   : > { %v3952_v32 = vadd.f32 %v3887_v6, %v13137_v44  ;;  %4613 = vmatmul.bf16.gmra.mxu3 %v4469_v47  ;;  %v4995_v33 = vpop.f32.mrf.mxu0  ;;  %v4395_v6 = vsel %vm12472_vm11, %v4390_v59, %v4394_v54  ;;  %v4405_v44 = vsel %vm12472_vm11, %v4400_v8, %v4404_v63  ;;  %v11106_v8 = vrot.slane %v4671_v10, 9 }
 0x2bf   : > { %v4453_v21 = vunpack.c.l.b16 %v4395_v6  ;;  %v4454_v30 = vunpack.c.l.b16 %v4405_v44 }
 0x2c0   : > { %v4634_v5 = vadd.f32 %v4569_v46, %v3952_v32  ;;  %v4827_v32 = vrot.slane %v13506_v61, 5 }
 0x2c1   : > { %v4574_v51 = vpop.f32.mrf.mxu3  ;;  %5034 = vmatmul.bf16.gmra.mxu0 %v4894_v41  ;;  %v4470_v47 = vpack.c.b16 %v4454_v30, %v4453_v21 }
 0x2c2   : > { %v13522_v12 = vadd.f32 %v4995_v33, %v4634_v5  ;;  %v4821_v5 = vsel %vm12724_vm14, %v11105_v3, %v4820_v36  ;;  %v4829_v63 = vrot.slane %v4827_v32, 4  ;;  %v4830_v3 = vrot.slane %v4021_v52, 5 }
 0x2c3   : > { %v4877_v54 = vunpack.c.l.b16 %v4821_v5 }
 0x2c4   : > { %v4831_v61 = vsel %vm12724_vm14, %v4829_v63, %v4830_v3  ;;  %v13571_v3 = vpop.f32.mrf.mxu1 }
 0x2c5   : > { %v13529_v25 = vpop.f32.mrf.mxu2  ;;  %v4895_v22 = vpack.c.b16 %v4878_v27, %v4877_v54 }
 0x2c6   : > { %v13531_v46 = vpop.f32.mrf.mxu0 }
 0x2c9   : > { %v13537_v4 = vpop.f32.mrf.mxu3 }
 0x2ca   : > { %3931 = vmatmul.bf16.gmra.mxu2 %v11767_v45  ;;  %v4880_v45 = vunpack.c.l.b16 %v4831_v61 }
 0x2cd   : > { %v3892_v26 = vpop.f32.mrf.mxu2 }
 0x2ce   : > { %v3954_v43 = vadd.f32 %v3892_v26, %v13173_v57  ;;  %4618 = vmatmul.bf16.gmra.mxu3 %v4470_v47  ;;  %v5000_v41 = vpop.f32.mrf.mxu0  ;;  %v4828_v57 = vsel %vm12724_vm14, %v11106_v8, %v4827_v32 }
 0x2cf   : > { %v4879_v44 = vunpack.c.l.b16 %v4828_v57 }
 0x2d0   : > { %v4636_v33 = vadd.f32 %v4574_v51, %v3954_v43 }
 0x2d1   : > { %v4579_v36 = vpop.f32.mrf.mxu3  ;;  %5039 = vmatmul.bf16.gmra.mxu0 %v4895_v22  ;;  %v4896_v30 = vpack.c.b16 %v4880_v45, %v4879_v44 }
 0x2d2   : > { %v13541_v59 = vadd.f32 %v5000_v41, %v4636_v33 }
 0x2d5   : > { %v13543_v31 = vpop.f32.mrf.mxu2 }
 0x2d6   : > { %v13545_v6 = vpop.f32.mrf.mxu0 }
 0x2d9   : > { %v13551_v51 = vpop.f32.mrf.mxu3 }
 0x2da   : > { %3936 = vmatmul.bf16.gmra.mxu2 %v11768_v50 }
 0x2dd   : > { %v3897_v21 = vpop.f32.mrf.mxu2 }
 0x2de   : > { %v3956_v52 = vadd.f32 %v3897_v21, %v13199_v13  ;;  %v5005_v5 = vpop.f32.mrf.mxu0 }
 0x2e0   : > { %v4638_v2 = vadd.f32 %v4579_v36, %v3956_v52 }
 0x2e1   : > { %v4584_v54 = vpop.f32.mrf.mxu3  ;;  %5044 = vmatmul.bf16.gmra.mxu0 %v4896_v30  ;;  %v13578_v30 = vpop.f32.mrf.mxu1 }
 0x2e2   : > { %v13554_v27 = vadd.f32 %v5005_v5, %v4638_v2 }
 0x2e5   : > { %v13556_v47 = vpop.f32.mrf.mxu2 }
 0x2e6   : > { %v13558_v26 = vpop.f32.mrf.mxu0 }
 0x2e9   : > { %v13560_v22 = vpop.f32.mrf.mxu3 }
 0x2ed   : > { %v3902_v43 = vpop.f32.mrf.mxu2 }
 0x2ee   : > { %v3958_v41 = vadd.f32 %v3902_v43, %v13224_v23  ;;  %v5010_v32 = vpop.f32.mrf.mxu0 }
 0x2f0   : > { %v4640_v33 = vadd.f32 %v4584_v54, %v3958_v41 }
 0x2f1   : > { %v4589_v10 = vpop.f32.mrf.mxu3 }
 0x2f2   : > { %v13563_v8 = vadd.f32 %v5010_v32, %v4640_v33  ;;  %v13585_v32 = vpop.f32.mrf.mxu1 }
 0x2f5   : > { %v13565_v13 = vpop.f32.mrf.mxu2 }
 0x2f6   : > { %v13567_v36 = vpop.f32.mrf.mxu0 }
 0x2f9   : > { %v13569_v63 = vpop.f32.mrf.mxu3 }
 0x2fd   : > { %v3907_v50 = vpop.f32.mrf.mxu2 }
 0x2fe   : > { %v3960_v57 = vadd.f32 %v3907_v50, %v13247_v0  ;;  %v5015_v61 = vpop.f32.mrf.mxu0 }
 0x300   : > { %v4642_v44 = vadd.f32 %v4589_v10, %v3960_v57 }
 0x301   : > { %v4594_v45 = vpop.f32.mrf.mxu3 }
 0x302   : > { %v13574_v23 = vadd.f32 %v5015_v61, %v4642_v44  ;;  %v13597_v61 = vpop.f32.mrf.mxu1 }
 0x305   : > { %v13576_v21 = vpop.f32.mrf.mxu2 }
 0x306   : > { %v13580_v52 = vpop.f32.mrf.mxu0 }
 0x309   : > { %v13582_v5 = vpop.f32.mrf.mxu3 }
 0x30d   : > { %v3912_v2 = vpop.f32.mrf.mxu2 }
 0x30e   : > { %v3962_v54 = vadd.f32 %v3912_v2, %v13272_v42  ;;  %v5020_v43 = vpop.f32.mrf.mxu0 }
 0x310   : > { %v4644_v41 = vadd.f32 %v4594_v45, %v3962_v54  ;;  %v13605_v45 = vpop.f32.mrf.mxu1 }
 0x311   : > { %v13587_v0 = vpop.f32.mrf.mxu3 }
 0x312   : > { %v13589_v33 = vadd.f32 %v5020_v43, %v4644_v41 }
 0x314   : > { %15813 = vst [vmem:[#allocation34_spill] sm:$0xff] %v13589_v33  ;;  %v5082_v33 = vadd.f32 %v13419_v15, %v13402_v38 }
 0x315   : > { %v13591_v10 = vpop.f32.mrf.mxu2 }
 0x316   : > { %v13593_v50 = vpop.f32.mrf.mxu0 }
 0x317   : > { %15814 = vst [vmem:[#allocation35_spill] sm:$0xff] %v13593_v50  ;;  %v5123_v50 = vmul.f32 %v13402_v38, %v13402_v38 }
 0x318   : > { %v13615_v56 = vpop.f32.mrf.mxu1 }
 0x319   : > { %v13595_v57 = vpop.f32.mrf.mxu3  ;;  %15821 = vst [vmem:[#allocation42_spill] sm:$0xff] %v13615_v56 }
 0x31a   : > { %15815 = vst [vmem:[#allocation36_spill] sm:$0xff] %v13595_v57  ;;  %v5124_v57 = vmul.f32 %v13419_v15, %v13419_v15 }
 0x31c   : > { %v5155_v15 = vadd.f32 %v5124_v57, %v5123_v50  ;;  %v3640_v50 = vadd.f32 %v13154_v1, %v13183_v53  ;;  %v3642_v53 = vadd.f32 %v13188_v24, %v13208_v29  ;;  %v5131_v29 = vmul.f32 %v13499_v34, %v13499_v34 }
 0x31d   : > { %v13599_v44 = vpop.f32.mrf.mxu2 }
 0x31e   : > { %v13601_v14 = vpop.f32.mrf.mxu0 }
 0x31f   : > { %15816 = vst [vmem:[#allocation37_spill] sm:$0xff] %v13601_v14  ;;  %v5083_v14 = vadd.f32 %v5082_v33, %v13425_v18 }
 0x321   : > { %v13603_v42 = vpop.f32.mrf.mxu3 }
 0x322   : > { %15817 = vst [vmem:[#allocation38_spill] sm:$0xff] %v13603_v42  ;;  %v3636_v42 = vadd.f32 %v13061_v35, %v13110_v55  ;;  %v15825_v35 = vld [vmem:[#allocation32_spill] sm:$0xff] }
 0x323   : > { %v3638_v55 = vadd.f32 %v15825_v35, %v13149_v7  ;;  %v5127_v7 = vmul.f32 %v13448_v16, %v13448_v16  ;;  %v5128_v35 = vmul.f32 %v13465_v20, %v13465_v20 }
 0x325   : > { %v13607_v2 = vpop.f32.mrf.mxu2 }
 0x326   : > { %v13609_v54 = vpop.f32.mrf.mxu0 }
 0x327   : > { %15818 = vst [vmem:[#allocation39_spill] sm:$0xff] %v13609_v54  ;;  %v5084_v54 = vadd.f32 %v5083_v14, %v13442_v9  ;;  %v5126_v14 = vmul.f32 %v13442_v9, %v13442_v9 }
 0x329   : > { %v13611_v43 = vpop.f32.mrf.mxu3  ;;  %v5085_v33 = vadd.f32 %v5084_v54, %v13448_v16 }
 0x32a   : > { %15819 = vst [vmem:[#allocation40_spill] sm:$0xff] %v13611_v43  ;;  %v3951_v43 = vadd.f32 %v13510_v48, %v3636_v42 }
 0x32b   : > { %v5086_v42 = vadd.f32 %v5085_v33, %v13465_v20 }
 0x32c   : > { %v4633_v38 = vadd.f32 %v13488_v37, %v3951_v43  ;;  %v5129_v43 = vmul.f32 %v13470_v60, %v13470_v60 }
 0x32d   : > { %v13613_v41 = vpop.f32.mrf.mxu2  ;;  %v5087_v57 = vadd.f32 %v5086_v42, %v13470_v60  ;;  %v3957_v42 = vadd.f32 %v13556_v47, %v3642_v53 }
 0x32e   : > { %15820 = vst [vmem:[#allocation41_spill] sm:$0xff] %v13613_v41  ;;  %v13617_v39 = vpop.f32.mrf.mxu0  ;;  %v13657_v37 = vadd.f32 %v13516_v11, %v4633_v38  ;;  %v5130_v38 = vmul.f32 %v13490_v40, %v13490_v40 }
 0x32f   : > { %15822 = vst [vmem:[#allocation43_spill] sm:$0xff] %v13617_v39  ;;  %v5125_v39 = vmul.f32 %v13425_v18, %v13425_v18  ;;  %v3953_v18 = vadd.f32 %v13529_v25, %v3638_v55  ;;  %v5088_v33 = vadd.f32 %v5087_v57, %v13490_v40  ;;  %v4639_v47 = vadd.f32 %v13551_v51, %v3957_v42  ;;  %v15826_v42 = vld [vmem:[#allocation20_spill] sm:$0xff] }
 0x331   : > { %v13634_v41 = vpop.f32.mrf.mxu3  ;;  %v4635_v25 = vadd.f32 %v13518_v19, %v3953_v18 }
 0x332   : > { %15824 = vst [vmem:[#allocation45_spill] sm:$0xff] %v13634_v41  ;;  %v5156_v41 = vadd.f32 %v5155_v15, %v5125_v39  ;;  %v3955_v39 = vadd.f32 %v13543_v31, %v3640_v50 }
 0x333   : > { %v13676_v31 = vadd.f32 %v13531_v46, %v4635_v25  ;;  %v5132_v46 = vmul.f32 %v13657_v37, %v13657_v37 }
 0x334   : > { %v5157_v54 = vadd.f32 %v5156_v41, %v5126_v14  ;;  %v5089_v41 = vadd.f32 %v5088_v33, %v13499_v34  ;;  %v4637_v14 = vadd.f32 %v13537_v4, %v3955_v39  ;;  %v3646_v39 = vadd.f32 %v13254_v28, %v13258_v17 }
 0x335   : > { %v13632_v56 = vpop.f32.mrf.mxu2  ;;  %v5135_v28 = vmul.f32 %v13541_v59, %v13541_v59 }
 0x336   : > { %15823 = vst [vmem:[#allocation44_spill] sm:$0xff] %v13632_v56  ;;  %v13641_v48 = vpop.f32.mrf.mxu0  ;;  %v13646_v56 = vpop.f32.mrf.mxu1  ;;  %v5158_v15 = vadd.f32 %v5157_v54, %v5127_v7  ;;  %v5090_v19 = vadd.f32 %v5089_v41, %v13657_v37  ;;  %v3644_v7 = vadd.f32 %v13220_v49, %v13233_v62  ;;  %v13691_v4 = vadd.f32 %v13545_v6, %v4637_v14 }
 0x337   : > { %v5133_v49 = vmul.f32 %v13522_v12, %v13522_v12  ;;  %v5134_v6 = vmul.f32 %v13676_v31, %v13676_v31 }
 0x338   : > { %v5159_v55 = vadd.f32 %v5158_v15, %v5128_v35  ;;  %v5091_v50 = vadd.f32 %v5090_v19, %v13522_v12  ;;  %v3959_v33 = vadd.f32 %v13565_v13, %v3644_v7  ;;  %v13708_v13 = vadd.f32 %v13558_v26, %v4639_v47 }
 0x339   : > { %v13672_v18 = vpop.f32.mrf.mxu3  ;;  %v3648_v19 = vadd.f32 %v13571_v3, %v13281_v58  ;;  %v5137_v3 = vmul.f32 %v13554_v27, %v13554_v27 }
 0x33a   : > { %v5160_v24 = vadd.f32 %v5159_v55, %v5129_v43  ;;  %v5092_v35 = vadd.f32 %v5091_v50, %v13676_v31  ;;  %v4641_v41 = vadd.f32 %v13560_v22, %v3959_v33  ;;  %v3961_v55 = vadd.f32 %v13576_v21, %v3646_v39 }
 0x33b   : > { %v5136_v22 = vmul.f32 %v13691_v4, %v13691_v4  ;;  %v3963_v50 = vadd.f32 %v13591_v10, %v3648_v19  ;;  %v15831_v19 = vld [vmem:[#allocation24_spill] sm:$0xff] }
 0x33c   : > { %v5161_v54 = vadd.f32 %v5160_v24, %v5130_v38  ;;  %v5093_v15 = vadd.f32 %v5092_v35, %v13541_v59  ;;  %v3649_v24 = vadd.f32 %v13578_v30, %v15826_v42  ;;  %v4643_v7 = vadd.f32 %v13569_v63, %v3961_v55  ;;  %v15827_v30 = vld [vmem:[#allocation21_spill] sm:$0xff] }
 0x33d   : > { %v13663_v1 = vpop.f32.mrf.mxu2  ;;  %v3650_v35 = vadd.f32 %v13585_v32, %v15827_v30  ;;  %v5138_v63 = vmul.f32 %v13708_v13, %v13708_v13  ;;  %v4645_v32 = vadd.f32 %v13582_v5, %v3963_v50  ;;  %v5141_v30 = vmul.f32 %v13574_v23, %v13574_v23 }
 0x33e   : > { %v13670_v11 = vpop.f32.mrf.mxu0  ;;  %v13685_v57 = vpop.f32.mrf.mxu1  ;;  %v5162_v25 = vadd.f32 %v5161_v54, %v5131_v29  ;;  %v5094_v51 = vadd.f32 %v5093_v15, %v13691_v4  ;;  %v13725_v29 = vadd.f32 %v13567_v36, %v4641_v41  ;;  %v3964_v33 = vadd.f32 %v13599_v44, %v3649_v24 }
 0x33f   : > { %v13743_v15 = vadd.f32 %v13580_v52, %v4643_v7  ;;  %v5139_v44 = vmul.f32 %v13563_v8, %v13563_v8  ;;  %v15832_v52 = vld [vmem:[#allocation42_spill] sm:$0xff]  ;;  %v15835_v7 = vld [vmem:[#allocation44_spill] sm:$0xff] }
 0x340   : > { %v5163_v43 = vadd.f32 %v5162_v25, %v5132_v46  ;;  %v5095_v14 = vadd.f32 %v5094_v51, %v13554_v27  ;;  %v15828_v25 = vld [vmem:[#allocation22_spill] sm:$0xff]  ;;  %v4646_v55 = vadd.f32 %v13587_v0, %v3964_v33  ;;  %v5140_v5 = vmul.f32 %v13725_v29, %v13725_v29  ;;  %v15836_v0 = vld [vmem:[#allocation25_spill] sm:$0xff] }
 0x341   : > { %v13714_v17 = vpop.f32.mrf.mxu3  ;;  %v3651_v36 = vadd.f32 %v13597_v61, %v15828_v25  ;;  %v15829_v61 = vld [vmem:[#allocation23_spill] sm:$0xff]  ;;  %v15838_v25 = vld [vmem:[#allocation37_spill] sm:$0xff] }
 0x342   : > { %v5164_v38 = vadd.f32 %v5163_v43, %v5133_v49  ;;  %v5096_v21 = vadd.f32 %v5095_v14, %v13708_v13  ;;  %v3965_v43 = vadd.f32 %v13607_v2, %v3650_v35  ;;  %v3652_v51 = vadd.f32 %v13605_v45, %v15829_v61  ;;  %v15834_v45 = vld [vmem:[#allocation36_spill] sm:$0xff] }
 0x343   : > { %v3653_v14 = vadd.f32 %v15832_v52, %v15831_v19 }
 0x344   : > { %v5165_v26 = vadd.f32 %v5164_v38, %v5134_v6  ;;  %v5097_v47 = vadd.f32 %v5096_v21, %v13563_v8  ;;  %v15830_v38 = vld [vmem:[#allocation41_spill] sm:$0xff]  ;;  %v4647_v21 = vadd.f32 %v15834_v45, %v3965_v43  ;;  %v3967_v50 = vadd.f32 %v15835_v7, %v3652_v51  ;;  %v15840_v43 = vld [vmem:[#allocation26_spill] sm:$0xff] }
 0x345   : > { %v13697_v62 = vpop.f32.mrf.mxu2  ;;  %v15845_v7 = vld [vmem:[#allocation45_spill] sm:$0xff] }
 0x346   : > { %v13704_v53 = vpop.f32.mrf.mxu0  ;;  %v3619_v54 = vpop.f32.mrf.mxu1  ;;  %v5166_v58 = vadd.f32 %v5165_v26, %v5135_v28  ;;  %v5098_v39 = vadd.f32 %v5097_v47, %v13725_v29  ;;  %v3966_v28 = vadd.f32 %v15830_v38, %v3651_v36  ;;  %v15833_v26 = vld [vmem:[#allocation35_spill] sm:$0xff]  ;;  %v15837_v47 = vld [vmem:[#allocation34_spill] sm:$0xff]  ;;  %v13770_v36 = vadd.f32 %v15838_v25, %v4646_v55  ;;  %v15842_v55 = vld [vmem:[#allocation40_spill] sm:$0xff] }
 0x347   : > { %v15841_v38 = vld [vmem:[#allocation39_spill] sm:$0xff]  ;;  %v4649_v52 = vadd.f32 %v15842_v55, %v3967_v50 }
 0x348   : > { %v5167_v49 = vadd.f32 %v5166_v58, %v5136_v22  ;;  %v5099_v41 = vadd.f32 %v5098_v39, %v13574_v23  ;;  %v13760_v22 = vadd.f32 %v15833_v26, %v4645_v32  ;;  %v3654_v58 = vadd.f32 %v13646_v56, %v15836_v0  ;;  %v11824_v32 = vld [vmem:[#allocation9 + $0x78] sm:$0xff]  ;;  %v15844_v26 = vld [vmem:[#allocation43_spill] sm:$0xff] }
 0x349   : > { %v4616_v2 = vpop.f32.mrf.mxu3  ;;  %v3968_v39 = vadd.f32 %v13663_v1, %v3653_v14  ;;  %v13780_v19 = vadd.f32 %v15841_v38, %v4647_v21  ;;  %6560 = vmatpush.bf16.msra.mxu1 %v11824_v32  ;;  %v11823_v1 = vld [vmem:[#allocation9 + $0x70] sm:$0xff]  ;;  %v15843_v14 = vld [vmem:[#allocation27_spill] sm:$0xff] }
 0x34a   : > { %v5168_v6 = vadd.f32 %v5167_v49, %v5137_v3  ;;  %v5100_v24 = vadd.f32 %v5099_v41, %v13743_v15  ;;  %v15839_v49 = vld [vmem:[#allocation38_spill] sm:$0xff] }
 0x34b   : > { %v4650_v21 = vadd.f32 %v15845_v7, %v3968_v39 }
 0x34c   : > { %v5169_v42 = vadd.f32 %v5168_v6, %v5138_v63  ;;  %v5101_v33 = vadd.f32 %v5100_v24, %v15837_v47  ;;  %v4648_v63 = vadd.f32 %v15839_v49, %v3966_v28  ;;  %v3655_v6 = vadd.f32 %v13685_v57, %v15840_v43  ;;  %v11822_v49 = vld [vmem:[#allocation9 + $0x68] sm:$0xff] }
 0x34d   : > { %v3932_v46 = vpop.f32.mrf.mxu2  ;;  %v3969_v28 = vadd.f32 %v13697_v62, %v3654_v58  ;;  %v5144_v62 = vmul.f32 %v13760_v22, %v13760_v22  ;;  %v13797_v58 = vadd.f32 %v13641_v48, %v4649_v52  ;;  %6561 = vmatpush.bf16.msra.mxu1 %v11823_v1 }
 0x34e   : > { %v13739_v10 = vpop.f32.mrf.mxu0  ;;  %v5170_v3 = vadd.f32 %v5169_v42, %v5139_v44  ;;  %v3622_v61 = vpop.f32.mrf.mxu1  ;;  %v5142_v44 = vmul.f32 %v13743_v15, %v13743_v15  ;;  %v5102_v41 = vadd.f32 %v5101_v33, %v13760_v22  ;;  %v3656_v42 = vadd.f32 %v3619_v54, %v15843_v14 }
 0x34f   : > { %v13789_v45 = vadd.f32 %v15844_v26, %v4648_v63  ;;  %v3970_v0 = vadd.f32 %v3932_v46, %v3655_v6  ;;  %v5145_v46 = vmul.f32 %v13770_v36, %v13770_v36  ;;  %v13804_v6 = vadd.f32 %v13670_v11, %v4650_v21 }
 0x350   : > { %v5171_v56 = vadd.f32 %v5170_v3, %v5140_v5  ;;  %v5143_v5 = vmul.f32 %v15837_v47, %v15837_v47  ;;  %v5103_v24 = vadd.f32 %v5102_v41, %v13770_v36  ;;  %v15846_v3 = vld [vmem:[#allocation28_spill] sm:$0xff] }
 0x351   : > { %v3657_v50 = vadd.f32 %v3622_v61, %v15846_v3  ;;  %v4619_v32 = vpop.f32.mrf.mxu3  ;;  %v4652_v61 = vadd.f32 %v13714_v17, %v3970_v0  ;;  %6562 = vmatpush.bf16.msra.mxu1 %v11822_v49  ;;  %v5147_v11 = vmul.f32 %v13789_v45, %v13789_v45  ;;  %v5149_v7 = vmul.f32 %v13804_v6, %v13804_v6 }
 0x352   : > { %v5172_v57 = vadd.f32 %v5171_v56, %v5141_v30  ;;  %v5104_v54 = vadd.f32 %v5103_v24, %v13780_v19  ;;  %v4651_v30 = vadd.f32 %v13672_v18, %v3969_v28  ;;  %v5146_v18 = vmul.f32 %v13780_v19, %v13780_v19 }
 0x353   : > { %v13817_v28 = vadd.f32 %v13739_v10, %v4652_v61 }
 0x354   : > { %v5173_v33 = vadd.f32 %v5172_v57, %v5142_v44  ;;  %v5105_v43 = vadd.f32 %v5104_v54, %v13789_v45  ;;  %v13811_v41 = vadd.f32 %v13704_v53, %v4651_v30  ;;  %v5148_v53 = vmul.f32 %v13797_v58, %v13797_v58 }
 0x355   : > { %v3934_v35 = vpop.f32.mrf.mxu2 }
 0x356   : > { %v5042_v51 = vpop.f32.mrf.mxu0  ;;  %v3971_v25 = vadd.f32 %v3934_v35, %v3656_v42  ;;  %v5174_v63 = vadd.f32 %v5173_v33, %v5143_v5  ;;  %v5106_v44 = vadd.f32 %v5105_v43, %v13797_v58  ;;  %v3624_v55 = vpop.f32.mrf.mxu1  ;;  %v15847_v42 = vld [vmem:[#allocation29_spill] sm:$0xff]  ;;  %v5150_v33 = vmul.f32 %v13811_v41, %v13811_v41 }
 0x357   : > { %v3658_v57 = vadd.f32 %v3624_v55, %v15847_v42  ;;  %v12244_v55 = vmov 1024.0  }
 0x358   : > { %v5175_v56 = vadd.f32 %v5174_v63, %v5144_v62  ;;  %v4653_v38 = vadd.f32 %v4616_v2, %v3971_v25  ;;  %v5107_v17 = vadd.f32 %v5106_v44, %v13804_v6  ;;  %v5151_v25 = vmul.f32 %v13817_v28, %v13817_v28  ;;  %v11821_v44 = vld [vmem:[#allocation9 + $0x60] sm:$0xff] }
 0x359   : > { %v4621_v3 = vpop.f32.mrf.mxu3  ;;  %6563 = vmatpush.bf16.msra.mxu1 %v11821_v44  ;;  %12018 = vrcp.f32 %v12244_v55  ;;  %v11812_v44 = vld [vmem:[#allocation9 + $0x18] sm:$0xff] }
 0x35a   : > { %v5176_v52 = vadd.f32 %v5175_v56, %v5145_v46  ;;  %v13822_v5 = vadd.f32 %v5042_v51, %v4653_v38  ;;  %v5108_v2 = vadd.f32 %v5107_v17, %v13811_v41  ;;  %v11820_v38 = vld [vmem:[#allocation9 + $0x58] sm:$0xff] }
 0x35c   : > { %v5177_v14 = vadd.f32 %v5176_v52, %v5146_v18  ;;  %v5109_v0 = vadd.f32 %v5108_v2, %v13817_v28 }
 0x35d   : > { %v3937_v39 = vpop.f32.mrf.mxu2  ;;  %6564 = vmatpush.bf16.msra.mxu1 %v11820_v38 }
 0x35e   : > { %v3972_v48 = vadd.f32 %v3937_v39, %v3657_v50  ;;  %v5045_v35 = vpop.f32.mrf.mxu0  ;;  %v5178_v24 = vadd.f32 %v5177_v14, %v5147_v11  ;;  %v5110_v51 = vadd.f32 %v5109_v0, %v13822_v5  ;;  %v5152_v39 = vmul.f32 %v13822_v5, %v13822_v5 }
 0x35f   : > { %v12019_v52 = vpop.eup %12018 }
 0x360   : > { %v4654_v1 = vadd.f32 %v4619_v32, %v3972_v48  ;;  %v5179_v50 = vadd.f32 %v5178_v24, %v5148_v53  ;;  %v5229_v14 = vmul.f32 1024.0, %v12019_v52  ;;  %vm5233_vm15 = vweird.f32 %v12019_v52 }
 0x362   : > { %v13827_v21 = vadd.f32 %v5045_v35, %v4654_v1  ;;  %v5180_v30 = vadd.f32 %v5179_v50, %v5149_v7  ;;  %v5230_v53 = vsub.f32 1.0, %v5229_v14 }
 0x364   : > { %v5111_v63 = vadd.f32 %v5110_v51, %v13827_v21  ;;  %v5181_v32 = vadd.f32 %v5180_v30, %v5150_v33  ;;  %v5153_v43 = vmul.f32 %v13827_v21, %v13827_v21  ;;  %v5231_v0 = vmul.f32 %v12019_v52, %v5230_v53  ;;  %v11819_v30 = vld [vmem:[#allocation9 + $0x50] sm:$0xff] }
 0x365   : > { %v3939_v26 = vpop.f32.mrf.mxu2  ;;  %6565 = vmatpush.bf16.msra.mxu1 %v11819_v30  ;;  %v11811_v53 = vld [vmem:[#allocation9 + $0x10] sm:$0xff]  ;;  %v11854_v30 = vld [vmem:[#allocation9 + $0xe8] sm:$0xff] }
 0x366   : > { %v3973_v10 = vadd.f32 %v3939_v26, %v3658_v57  ;;  %v5047_v54 = vpop.f32.mrf.mxu0  ;;  %v5182_v61 = vadd.f32 %v5181_v32, %v5151_v25  ;;  %v5232_v33 = vadd.f32 %v12019_v52, %v5231_v0  ;;  %v11818_v25 = vld [vmem:[#allocation9 + $0x48] sm:$0xff]  ;;  %v11817_v32 = vld [vmem:[#allocation9 + $0x40] sm:$0xff] }
 0x368   : > { %v4655_v62 = vadd.f32 %v4621_v3, %v3973_v10  ;;  %v5183_v56 = vadd.f32 %v5182_v61, %v5152_v39  ;;  %v11815_v39 = vld [vmem:[#allocation9 + $0x30] sm:$0xff]  ;;  %v11814_v61 = vld [vmem:[#allocation9 + $0x28] sm:$0xff] }
 0x369   : > { %6566 = vmatpush.bf16.msra.mxu1 %v11818_v25 }
 0x36a   : > { %v13835_v49 = vadd.f32 %v5047_v54, %v4655_v62  ;;  %v5184_v18 = vadd.f32 %v5183_v56, %v5153_v43  ;;  %v5234_v54 = vsel %vm5233_vm15, %v12019_v52, %v5232_v33  ;;  %v11831_v43 = vld [vmem:[#allocation9 + $0xb0] sm:$0xff]  ;;  %v11813_v56 = vld [vmem:[#allocation9 + $0x20] sm:$0xff] }
 0x36b   : > { %v5262_v33 = vld [vmem:[%s15714_s2] sm:$0x1] }
 0x36c   : > { %v5112_v46 = vadd.f32 %v5111_v63, %v13835_v49  ;;  %v5154_v48 = vmul.f32 %v13835_v49, %v13835_v49  ;;  %v11816_v63 = vld [vmem:[#allocation9 + $0x38] sm:$0xff] }
 0x36d   : > { %6793 = vmatpush.bf16.msrb.mxu2 %v11816_v63  ;;  %6567 = vmatpush.bf16.msra.mxu1 %v11817_v32  ;;  %v5265_v32 = vld [vmem:[%s15715_s3] sm:$0x1] }
 0x36e   : > { %5113 = vadd.xlane.f32.xlu0 %v5112_v46  ;;  %v5185_v35 = vadd.f32 %v5184_v18, %v5154_v48  ;;  %v11832_v46 = vld [vmem:[#allocation9 + $0xb8] sm:$0xff]  ;;  %v11830_v48 = vld [vmem:[#allocation9 + $0xa8] sm:$0xff]  ;;  %v11829_v18 = vld [vmem:[#allocation9 + $0xa0] sm:$0xff] }
 0x36f   : > { %7171 = vmatpush.bf16.msrb.mxu3 %v11832_v46  ;;  %v11809_v46 = vld [vmem:[#allocation9] sm:$0xff] }
 0x371   : > { %6794 = vmatpush.bf16.msrb.mxu2 %v11815_v39 }
 0x373   : > { %7172 = vmatpush.bf16.msrb.mxu3 %v11831_v43  ;;  %v11825_v43 = vld [vmem:[#allocation9 + $0x80] sm:$0xff] }
 0x375   : > { %6795 = vmatpush.bf16.msrb.mxu2 %v11814_v61  ;;  %v11853_v61 = vld [vmem:[#allocation9 + $0xe0] sm:$0xff] }
 0x376   : > { %5186 = vadd.xlane.f32.xlu0 %v5185_v35 }
 0x377   : > { %7173 = vmatpush.bf16.msrb.mxu3 %v11830_v48 }
 0x379   : > { %6796 = vmatpush.bf16.msrb.mxu2 %v11813_v56 }
 0x37b   : > { %7174 = vmatpush.bf16.msrb.mxu3 %v11829_v18 }
 0x37d   : > { %6797 = vmatpush.bf16.msrb.mxu2 %v11812_v44 }
 0x381   : > { %6798 = vmatpush.bf16.msrb.mxu2 %v11811_v53 }
 0x3e1   : > { %v5114_v11 = vpop.xlane.xlu0 %5113 }
 0x3e2   : > { %v5115_v17 = vrot.slane %v5114_v11, 4 }
 0x3e4   : > { %v5116_v1 = vadd.f32 %v5115_v17, %v5114_v11 }
 0x3e6   : > { %v5117_v42 = vrot.slane %v5116_v1, 2 }
 0x3e8   : > { %v5118_v57 = vadd.f32 %v5117_v42, %v5116_v1  ;;  %v11828_v42 = vld [vmem:[#allocation9 + $0x98] sm:$0xff] }
 0x3e9   : > { %v5187_v2 = vpop.xlane.xlu0 %5186  ;;  %7175 = vmatpush.bf16.msrb.mxu3 %v11828_v42 }
 0x3ea   : > { %v5188_v24 = vrot.slane %v5187_v2, 4  ;;  %v5119_v26 = vrot.slane %v5118_v57, 1 }
 0x3ec   : > { %v5189_v7 = vadd.f32 %v5188_v24, %v5187_v2  ;;  %v5120_v10 = vadd.f32 %v5119_v26, %v5118_v57  ;;  %v11856_v57 = vld [vmem:[#allocation9 + $0xf8] sm:$0xff]  ;;  %v5276_v2 = vld [vmem:[#allocation3] sm:$0x1] }
 0x3ed   : > { %7485 = vmatpush.bf16.msrb.mxu0 %v11856_v57  ;;  %v5277_v26 = vsel %vm12416_vm3, 0, %v5276_v2 }
 0x3ee   : > { %v5190_v3 = vrot.slane %v5189_v7, 2  ;;  %11930 = vpush %v5120_v10 }
 0x3ef   : > { %5278 = vst [vmem:[#allocation3] sm:$0x1] %v5277_v26 }
 0x3f0   : > { %v5191_v50 = vadd.f32 %v5190_v3, %v5189_v7  ;;  %v5330_v7 = vld [vmem:[#allocation3 + $0x8] sm:$0x1] }
 0x3f1   : > { %v5331_v0 = vsel %vm12423_vm4, 0, %v5330_v7  ;;  %v11827_v3 = vld [vmem:[#allocation9 + $0x90] sm:$0xff] }
 0x3f2   : > { %v5192_v62 = vrot.slane %v5191_v50, 1  ;;  %5332 = vst [vmem:[#allocation3 + $0x8] sm:$0x1] %v5331_v0  ;;  %7176 = vmatpush.bf16.msrb.mxu3 %v11827_v3 }
 0x3f4   : > { %v5193_v51 = vadd.f32 %v5192_v62, %v5191_v50  ;;  %v11855_v50 = vld [vmem:[#allocation9 + $0xf0] sm:$0xff]  ;;  %v11810_v62 = vld [vmem:[#allocation9 + $0x8] sm:$0xff] }
 0x3f5   : > { %7486 = vmatpush.bf16.msrb.mxu0 %v11855_v50  ;;  %6799 = vmatpush.bf16.msrb.mxu2 %v11810_v62 }
 0x3f6   : > { %11932 = vpush %v5193_v51  ;;  %v11793_v48 = vld [vmem:[#allocation3] sm:$0xff] }
 0x3f7   : > { %11934 = vpush %v5234_v54  ;;  %v11826_v54 = vld [vmem:[#allocation9 + $0x88] sm:$0xff] }
 0x3f8   : > { %7177 = vmatpush.bf16.msrb.mxu3 %v11826_v54  ;;  %v11851_v54 = vld [vmem:[#allocation9 + $0xd0] sm:$0xff] }
 0x3f9   : > { %7487 = vmatpush.bf16.msrb.mxu0 %v11854_v30  ;;  %6800 = vmatpush.bf16.msrb.mxu2 %v11809_v46  ;;  %v11864_v30 = vld [vmem:[#allocation9 + $0x138] sm:$0xff]  ;;  %v15850_v46 = vld [vmem:[#allocation30_spill] sm:$0xff] }
 0x3fa   : > { %8167 = vmatpush.bf16.msrb.mxu1 %v11864_v30 }
 0x3fc   : > { %7178 = vmatpush.bf16.msrb.mxu3 %v11825_v43  ;;  %6801 = vmatmul.bf16.vlgmr.msrb.gmra.mxu2 %v11793_v48 }
 0x3fd   : > { %7488 = vmatpush.bf16.msrb.mxu0 %v11853_v61  ;;  %v11849_v61 = vld [vmem:[#allocation9 + $0xc0] sm:$0xff] }
 0x41f   : > { %s11931_s30 = spop %11930 }
 0x427   : > { %s11933_s12 = spop %11932 }
 0x428   : > { %s13845_s18 = spop %11934 }
 0x429   : > { %s13848_s21 = smul.f32 %s13845_s18, %s11931_s30  ;;  %s10610_s30 = sshll.u32 %s12393_s14, 8 }
 0x42a   : > { %s5245_s29 = smul.f32 %s13845_s18, %s11933_s12 }
 0x42b   : > { %s5246_s23 = smul.f32 %s13848_s21, %s13848_s21  ;;  %v5266_v63 = vstv %s13848_s21 }
 0x42d   : > { %s5247_s15 = ssub.f32 %s5245_s29, %s5246_s23 }
 0x42f   : > { %s5248_s17 = smax.f32 %s12245_s16, %s5247_s15 }
 0x430   : > { %s5249_s11 = sadd.f32 1e-05, %s5248_s17 }
 0x432   : > { %v5250_v35 = vstv %s5249_s11 }
 0x433   : > { %12020 = vrsqrt.f32 %v5250_v35  ;;  %vm5257_vm1 = vweird.f32 %v5250_v35 }
 0x439   : > { %v12021_v38 = vpop.eup %12020 }
 0x43a   : > { %v5252_v55 = vmul.f32 %v12021_v38, %v5250_v35  ;;  %vm5258_vm0 = vweird.f32 %v12021_v38 }
 0x43b   : > { %vm5259_vm2 = vmor %vm5257_vm1, %vm5258_vm0 }
 0x43c   : > { %v5253_v52 = vmul.f32 %v12021_v38, %v5252_v55 }
 0x43e   : > { %v5254_v11 = vmul.f32 0.5, %v5253_v52 }
 0x440   : > { %v5255_v17 = vsub.f32 1.5, %v5254_v11  ;;  %v11852_v11 = vld [vmem:[#allocation9 + $0xd8] sm:$0xff] }
 0x441   : > { %7489 = vmatpush.bf16.msrb.mxu0 %v11852_v11 }
 0x442   : > { %v5256_v1 = vmul.f32 %v12021_v38, %v5255_v17 }
 0x444   : > { %v5260_v14 = vsel %vm5259_vm2, %v12021_v38, %v5256_v1 }
 0x445   : > { %11936 = vpush %v5260_v14  ;;  %7490 = vmatpush.bf16.msrb.mxu0 %v11851_v54 }
 0x476   : > { %s11937_s1 = spop %11936 }
 0x477   : > { %v5263_v51 = vstv %s11937_s1  ;;  %s12187_s1 = scalar_lea.hbm %s15719_s7, 512 }
 0x478   : > { %v5264_v25 = vmul.f32 %v5263_v51, %v5262_v33 }
 0x47a   : > { %v5267_v39 = vmul.f32 %v5266_v63, %v5264_v25  ;;  %v13865_v18 = vperm.slane %v5264_v25, 0  ;;  %v11850_v25 = vld [vmem:[#allocation9 + $0xc8] sm:$0xff] }
 0x47b   : > { %v5984_v63 = vld [vmem:[#allocation3 + $0x4] sm:$0xf]  ;;  %7491 = vmatpush.bf16.msrb.mxu0 %v11850_v25 }
 0x47c   : > { %v5268_v56 = vsub.f32 %v5265_v32, %v5267_v39  ;;  %v5432_v44 = vmul.f32 %v13865_v18, %v13691_v4  ;;  %v5433_v38 = vmul.f32 %v13865_v18, %v13554_v27  ;;  %v5434_v55 = vmul.f32 %v13865_v18, %v13708_v13  ;;  %v15851_v32 = vld [vmem:[#allocation33_spill] sm:$0xff] }
 0x47d   : > { %v5435_v52 = vmul.f32 %v13865_v18, %v13563_v8  ;;  %v5436_v17 = vmul.f32 %v13865_v18, %v13725_v29  ;;  %v5437_v1 = vmul.f32 %v13865_v18, %v13574_v23  ;;  %v5438_v14 = vmul.f32 %v13865_v18, %v13743_v15 }
 0x47e   : > { %v13867_v35 = vperm.slane %v5268_v56, 0  ;;  %v5439_v4 = vmul.f32 %v13865_v18, %v15837_v47  ;;  %v5440_v27 = vmul.f32 %v13865_v18, %v13760_v22  ;;  %v5441_v13 = vmul.f32 %v13865_v18, %v13770_v36 }
 0x47f   : > { %v5442_v8 = vmul.f32 %v13865_v18, %v13780_v19  ;;  %v5443_v29 = vmul.f32 %v13865_v18, %v13789_v45  ;;  %v5444_v23 = vmul.f32 %v13865_v18, %v13797_v58  ;;  %v5445_v15 = vmul.f32 %v13865_v18, %v13804_v6  ;;  %7492 = vmatpush.bf16.msrb.mxu0 %v11849_v61 }
 0x480   : > { %v5446_v47 = vmul.f32 %v13865_v18, %v13811_v41  ;;  %v5447_v22 = vmul.f32 %v13865_v18, %v13817_v28  ;;  %v5448_v36 = vmul.f32 %v13865_v18, %v13822_v5  ;;  %v5449_v19 = vmul.f32 %v13865_v18, %v13827_v21 }
 0x481   : > { %v5450_v45 = vmul.f32 %v13865_v18, %v13835_v49  ;;  %v13908_v58 = vadd.f32 %v13867_v35, %v5432_v44  ;;  %v13911_v6 = vadd.f32 %v13867_v35, %v5433_v38  ;;  %v13914_v41 = vadd.f32 %v13867_v35, %v5434_v55  ;;  %v15852_v38 = vld [vmem:[#allocation31_spill] sm:$0xff] }
 0x482   : > { %v13917_v28 = vadd.f32 %v13867_v35, %v5435_v52  ;;  %v13920_v5 = vadd.f32 %v13867_v35, %v5436_v17  ;;  %v13923_v21 = vadd.f32 %v13867_v35, %v5437_v1  ;;  %v13926_v49 = vadd.f32 %v13867_v35, %v5438_v14  ;;  %v6031_v1 = vld [vmem:[#allocation3 + $0x8] sm:$0x1]  ;;  %v6882_v14 = vld [vmem:[#allocation3] sm:$0xe] }
 0x483   : > { %v13929_v42 = vadd.f32 %v13867_v35, %v5439_v4  ;;  %v13932_v57 = vadd.f32 %v13867_v35, %v5440_v27  ;;  %v13935_v53 = vadd.f32 %v13867_v35, %v5441_v13  ;;  %v13938_v2 = vadd.f32 %v13867_v35, %v5442_v8 }
 0x484   : > { %v13941_v26 = vadd.f32 %v13867_v35, %v5443_v29  ;;  %v13944_v7 = vadd.f32 %v13867_v35, %v5444_v23  ;;  %v13947_v0 = vadd.f32 %v13867_v35, %v5445_v15  ;;  %v13950_v3 = vadd.f32 %v13867_v35, %v5446_v47 }
 0x485   : > { %v13953_v50 = vadd.f32 %v13867_v35, %v5447_v22  ;;  %v13956_v33 = vadd.f32 %v13867_v35, %v5448_v36  ;;  %v13959_v62 = vadd.f32 %v13867_v35, %v5449_v19  ;;  %v13962_v51 = vadd.f32 %v13867_v35, %v5450_v45  ;;  %v5983_v22 = vld [vmem:[#allocation3] sm:$0xf] }
 0x486   : > { %v5419_v39 = vmul.f32 %v13865_v18, %v15850_v46  ;;  %v5421_v43 = vmul.f32 %v13865_v18, %v15851_v32  ;;  %v6932_v44 = vrot.slane %v5984_v63, 5  ;;  %v5420_v55 = vmul.f32 %v13865_v18, %v15852_v38 }
 0x487   : > { %v5422_v52 = vmul.f32 %v13865_v18, %v13442_v9  ;;  %v5423_v11 = vmul.f32 %v13865_v18, %v13448_v16  ;;  %v5424_v17 = vmul.f32 %v13865_v18, %v13465_v20  ;;  %v5425_v9 = vmul.f32 %v13865_v18, %v13470_v60 }
 0x488   : > { %v5454_v48 = vadd.f32 %v13867_v35, %v5419_v39  ;;  %v5456_v56 = vadd.f32 %v13867_v35, %v5421_v43  ;;  %v5455_v4 = vadd.f32 %v13867_v35, %v5420_v55  ;;  %v11267_v16 = vrot.slane %v6882_v14, 9 }
 0x489   : > { %v5457_v27 = vadd.f32 %v13867_v35, %v5422_v52  ;;  %v5458_v13 = vadd.f32 %v13867_v35, %v5423_v11  ;;  %v5459_v8 = vadd.f32 %v13867_v35, %v5424_v17  ;;  %v6934_v15 = vrot.slane %v6932_v44, 4  ;;  %v5279_v52 = vld [vmem:[#allocation3 + $0xc] sm:$0x1] }
 0x48a   : > { %v5486_v29 = vmax.f32 %v5454_v48, 0.0  ;;  %v5488_v23 = vmax.f32 %v5456_v56, 0.0  ;;  %v6935_v47 = vrot.slane %v6031_v1, 5  ;;  %v13985_v20 = vadd.f32 %v13867_v35, %v5425_v9  ;;  %v5333_v9 = vld [vmem:[#allocation3 + $0x14] sm:$0x1] }
 0x48b   : > { %v5487_v36 = vmax.f32 %v5455_v4, 0.0  ;;  %v5489_v19 = vmax.f32 %v5457_v27, 0.0  ;;  %v5490_v45 = vmax.f32 %v5458_v13, 0.0  ;;  %v5491_v54 = vmax.f32 %v5459_v8, 0.0 }
 0x48c   : > { %v5518_v30 = vpack.c.bf16 %v5486_v29, %v5486_v29  ;;  %v13987_v25 = vpack.c.bf16 %v5488_v23, %v5488_v23  ;;  %v6933_v39 = vsel %vm12724_vm14, %v11267_v16, %v6932_v44  ;;  %v6936_v60 = vsel %vm12724_vm14, %v6934_v15, %v6935_v47  ;;  %v5282_v15 = vld [vmem:[#allocation3 + $0x18] sm:$0x1] }
 0x48d   : > { %v6048_v32 = vshrl.u32 %v5983_v22, 16  ;;  %v5426_v43 = vmul.f32 %v13865_v18, %v13490_v40  ;;  %v5492_v61 = vmax.f32 %v13985_v20, 0.0  ;;  %v5519_v48 = vpack.c.bf16 %v5487_v36, %v5487_v36 }
 0x48e   : > { %v5521_v56 = vpack.c.bf16 %v5489_v19, %v5489_v19  ;;  %v13996_v38 = vpack.c.bf16 %v5490_v45, %v5490_v45  ;;  %v13998_v55 = vpack.c.bf16 %v5491_v54, %v5491_v54  ;;  %v5554_v11 = vshll.u32 %v5518_v30, 16 }
 0x48f   : > { %v5571_v17 = vshll.u32 %v13987_v25, 16  ;;  %v7059_v44 = vunpack.c.l.b16 %v6933_v39  ;;  %v7060_v14 = vunpack.c.l.b16 %v6936_v60  ;;  %v6050_v4 = vrot.slane %v6048_v32, 4 }
 0x490   : > { %v6051_v27 = vshll.u32 %v5983_v22, 16  ;;  %v6057_v13 = vshll.u32 %v5984_v63, 16  ;;  %v6061_v8 = vshrl.u32 %v5984_v63, 16  ;;  %v6067_v29 = vshll.u32 %v6031_v1, 16  ;;  %v5336_v22 = vld [vmem:[#allocation3 + $0x20] sm:$0x1] }
 0x491   : > { %v7091_v40 = vpack.c.b16 %v7060_v14, %v7059_v44  ;;  %v5280_v23 = vsel %vm12416_vm3, 0, %v5279_v52  ;;  %v5551_v16 = vshrl.u32 %v5518_v30, 16  ;;  %v5559_v45 = vshrl.u32 %v5519_v48, 16  ;;  %v5285_v52 = vld [vmem:[#allocation3 + $0x24] sm:$0x1] }
 0x492   : > { %v6053_v47 = vrot.slane %v6051_v27, 5  ;;  %v6059_v36 = vrot.slane %v6057_v13, 5  ;;  %v6063_v19 = vrot.slane %v6061_v8, 4  ;;  %5281 = vst [vmem:[#allocation3 + $0xc] sm:$0x1] %v5280_v23  ;;  %v6069_v54 = vrot.slane %v6067_v29, 5 }
 0x493   : > { %7179 = vmatmul.bf16.vlgmr.msrb.gmra.mxu3 %v7091_v40  ;;  %v5553_v39 = vrot.slane %v5551_v16, 7  ;;  %v5562_v60 = vshll.u32 %v5519_v48, 16  ;;  %v5334_v63 = vsel %vm12423_vm4, 0, %v5333_v9  ;;  %v5561_v44 = vrot.slane %v5559_v45, 7 }
 0x494   : > { %v6054_v32 = vor.u32 %v6053_v47, %v6050_v4  ;;  %v6064_v1 = vor.u32 %v6063_v19, %v6059_v36  ;;  %5335 = vst [vmem:[#allocation3 + $0x14] sm:$0x1] %v5334_v63  ;;  %v5283_v30 = vsel %vm12416_vm3, 0, %v5282_v15  ;;  %v5568_v13 = vshrl.u32 %v13987_v25, 16 }
 0x495   : > { %v5556_v14 = vor.u32 %v5554_v11, %v5553_v39  ;;  %v5557_v27 = vrot.slane %v5553_v39, 4  ;;  %5284 = vst [vmem:[#allocation3 + $0x18] sm:$0x1] %v5283_v30  ;;  %v5576_v8 = vshrl.u32 %v5521_v56, 16  ;;  %v5564_v29 = vor.u32 %v5562_v60, %v5561_v44 }
 0x496   : > { %v6055_v40 = vrot.slane %v6054_v32, 4  ;;  %v6065_v48 = vrot.slane %v6064_v1, 4  ;;  %v5566_v23 = vrot.slane %v5561_v44, 4  ;;  %v5570_v9 = vrot.slane %v5568_v13, 7 }
 0x497   : > { %v5578_v16 = vrot.slane %v5576_v8, 7  ;;  %v5579_v4 = vshll.u32 %v5521_v56, 16  ;;  %v5337_v47 = vsel %vm12423_vm4, 0, %v5336_v22  ;;  %v5565_v25 = vsel %vm12439_vm7, %v5557_v27, %v5564_v29  ;;  %v5339_v27 = vld [vmem:[#allocation3 + $0x2c] sm:$0x1] }
 0x498   : > { %v6060_v15 = vsel %vm12472_vm11, %v6055_v40, %v6059_v36  ;;  %v6070_v11 = vsel %vm12472_vm11, %v6065_v48, %v6069_v54  ;;  %5338 = vst [vmem:[#allocation3 + $0x20] sm:$0x1] %v5337_v47  ;;  %v5286_v39 = vsel %vm12416_vm3, 0, %v5285_v52  ;;  %v5573_v56 = vor.u32 %v5571_v17, %v5570_v9 }
 0x499   : > { %v6448_v60 = vunpack.c.l.b16 %v6060_v15  ;;  %v6449_v63 = vunpack.c.l.b16 %v6070_v11  ;;  %v5871_v32 = vld [vmem:[#allocation3 + $0xc] sm:$0xf]  ;;  %5874 = vst [vmem:[#allocation3 + $0x10] sm:$0xf] %v5565_v25  ;;  %v5574_v1 = vrot.slane %v5570_v9, 4  ;;  %v5461_v22 = vadd.f32 %v13867_v35, %v5426_v43 }
 0x49a   : > { %v5872_v36 = vsel %vm12447_vm10, %v5556_v14, %v5871_v32  ;;  %v5581_v30 = vor.u32 %v5579_v4, %v5578_v16  ;;  %5287 = vst [vmem:[#allocation3 + $0x24] sm:$0x1] %v5286_v39  ;;  %v5585_v54 = vshrl.u32 %v13996_v38, 16  ;;  %v14025_v52 = vpack.c.bf16 %v5492_v61, %v5492_v61  ;;  %v14032_v9 = vld [vmem:[#allocation3 + $0x30] sm:$0x1] }
 0x49b   : > { %v6480_v13 = vpack.c.b16 %v6449_v63, %v6448_v60  ;;  %5873 = vst [vmem:[#allocation3 + $0xc] sm:$0xf] %v5872_v36  ;;  %v5875_v8 = vld [vmem:[#allocation3 + $0x14] sm:$0x1]  ;;  %v5593_v17 = vshrl.u32 %v13998_v55, 16  ;;  %v5583_v40 = vrot.slane %v5578_v16, 4  ;;  %v5427_v47 = vmul.f32 %v13865_v18, %v13499_v34 }
 0x49c   : > { %v5876_v43 = vsel %vm12416_vm3, %v5566_v23, %v5875_v8  ;;  %v5582_v14 = vsel %vm12439_vm7, %v5574_v1, %v5581_v30  ;;  %v5878_v48 = vld [vmem:[#allocation3 + $0x18] sm:$0xf]  ;;  %v5587_v29 = vrot.slane %v5585_v54, 7  ;;  %v5596_v4 = vshll.u32 %v13998_v55, 16 }
 0x49d   : > { %6568 = vmatmul.bf16.vlgmr.msra.gmra.mxu1 %v6480_v13  ;;  %5877 = vst [vmem:[#allocation3 + $0x14] sm:$0x1] %v5876_v43  ;;  %v5879_v20 = vsel %vm12447_vm10, %v5573_v56, %v5878_v48  ;;  %v14036_v61 = vrot.slane %v5593_v17, 7  ;;  %v5340_v23 = vsel %vm12423_vm4, 0, %v5339_v27  ;;  %v5493_v16 = vmax.f32 %v5461_v22, 0.0  ;;  %v11863_v22 = vld [vmem:[#allocation9 + $0x130] sm:$0xff] }
 0x49e   : > { %5880 = vst [vmem:[#allocation3 + $0x18] sm:$0xf] %v5879_v20  ;;  %v5591_v15 = vrot.slane %v5587_v29, 4  ;;  %v5428_v11 = vmul.f32 %v13865_v18, %v13657_v37  ;;  %v5429_v25 = vmul.f32 %v13865_v18, %v13522_v12  ;;  %v5588_v39 = vshll.u32 %v13996_v38, 16  ;;  %v5342_v43 = vld [vmem:[#allocation3 + $0x38] sm:$0x1]  ;;  %8168 = vmatpush.bf16.msrb.mxu1 %v11863_v22 }
 0x49f   : > { %5881 = vst [vmem:[#allocation3 + $0x1c] sm:$0xf] %v5582_v14  ;;  %v5882_v60 = vld [vmem:[#allocation3 + $0x20] sm:$0x1]  ;;  %v5598_v55 = vor.u32 %v5596_v4, %v14036_v61  ;;  %v5430_v63 = vmul.f32 %v13865_v18, %v13676_v31  ;;  %v5289_v37 = vsel %vm12416_vm3, 0, %v14032_v9  ;;  %v5602_v12 = vshrl.u32 %v14025_v52, 16 }
 0x4a0   : > { %v5986_v32 = vld [vmem:[#allocation3 + $0x10] sm:$0xf]  ;;  %v5883_v34 = vsel %vm12416_vm3, %v5583_v40, %v5882_v60  ;;  %5341 = vst [vmem:[#allocation3 + $0x2c] sm:$0x1] %v5340_v23  ;;  %v14061_v31 = vmul.f32 %v13865_v18, %v13541_v59  ;;  %v14064_v30 = vadd.f32 %v13867_v35, %v5427_v47  ;;  %v14066_v54 = vpack.c.bf16 %v5493_v16, %v5493_v16 }
 0x4a1   : > { %v6939_v56 = vrot.slane %v5986_v32, 5  ;;  %v6081_v38 = vshll.u32 %v5986_v32, 16  ;;  %v6085_v1 = vshrl.u32 %v5986_v32, 16  ;;  %5884 = vst [vmem:[#allocation3 + $0x20] sm:$0x1] %v5883_v34  ;;  %v5599_v36 = vsel %vm12439_vm7, %v5591_v15, %v5598_v55 }
 0x4a2   : > { %v11794_v27 = vld [vmem:[#allocation3 + $0xc] sm:$0xff]  ;;  %v5590_v17 = vor.u32 %v5588_v39, %v5587_v29  ;;  %5888 = vst [vmem:[#allocation3 + $0x28] sm:$0xf] %v5599_v36  ;;  %v14069_v59 = vadd.f32 %v13867_v35, %v5428_v11  ;;  %v14072_v18 = vadd.f32 %v13867_v35, %v5429_v25  ;;  %v5885_v29 = vld [vmem:[#allocation3 + $0x24] sm:$0xf] }
 0x4a3   : > { %v11833_v13 = vld [vmem:[#allocation3 + $0xc] sm:$0xff]  ;;  %v6941_v40 = vrot.slane %v6939_v56, 4  ;;  %v6083_v9 = vrot.slane %v6081_v38, 5  ;;  %v6087_v20 = vrot.slane %v6085_v1, 4  ;;  %6806 = vmatmul.bf16.gmra.mxu2 %v11794_v27  ;;  %v5610_v38 = vshrl.u32 %v14066_v54, 16 }
 0x4a4   : > { %v6883_v8 = vld [vmem:[#allocation3 + $0xc] sm:$0xe]  ;;  %7493 = vmatmul.bf16.vlgmr.msrb.gmra.mxu0 %v11833_v13  ;;  %v6032_v4 = vld [vmem:[#allocation3 + $0x14] sm:$0x1]  ;;  %v5886_v25 = vsel %vm12447_vm10, %v5590_v17, %v5885_v29  ;;  %5290 = vst [vmem:[#allocation3 + $0x30] sm:$0x1] %v5289_v37 }
 0x4a5   : > { %v11268_v14 = vrot.slane %v6883_v8, 9  ;;  %v5985_v48 = vld [vmem:[#allocation3 + $0xc] sm:$0xf]  ;;  %v6942_v15 = vrot.slane %v6032_v4, 5  ;;  %v6088_v39 = vor.u32 %v6087_v20, %v6083_v9  ;;  %v6091_v60 = vshll.u32 %v6032_v4, 16 }
 0x4a6   : > { %v6072_v23 = vshrl.u32 %v5985_v48, 16  ;;  %v6075_v47 = vshll.u32 %v5985_v48, 16  ;;  %v5987_v55 = vld [vmem:[#allocation3 + $0x18] sm:$0xf]  ;;  %v14076_v11 = vld [vmem:[#allocation3 + $0x1c] sm:$0xf] }
 0x4a7   : > { %v6940_v16 = vsel %vm12724_vm14, %v11268_v14, %v6939_v56  ;;  %v6943_v1 = vsel %vm12724_vm14, %v6941_v40, %v6942_v15  ;;  %v6089_v22 = vrot.slane %v6088_v39, 4  ;;  %v6093_v36 = vrot.slane %v6091_v60, 5  ;;  %5887 = vst [vmem:[#allocation3 + $0x24] sm:$0xf] %v5886_v25 }
 0x4a8   : > { %v6074_v32 = vrot.slane %v6072_v23, 4  ;;  %v6077_v34 = vrot.slane %v6075_v47, 5  ;;  %v5343_v56 = vsel %vm12423_vm4, 0, %v5342_v43  ;;  %v7061_v27 = vunpack.c.l.b16 %v6940_v16  ;;  %v5889_v43 = vld [vmem:[#allocation3 + $0x2c] sm:$0x1] }
 0x4a9   : > { %v7062_v13 = vunpack.c.l.b16 %v6943_v1  ;;  %v6096_v14 = vshrl.u32 %v5987_v55, 16  ;;  %v6094_v48 = vsel %vm12472_vm11, %v6089_v22, %v6093_v36  ;;  %v6099_v20 = vshll.u32 %v5987_v55, 16  ;;  %5344 = vst [vmem:[#allocation3 + $0x38] sm:$0x1] %v5343_v56  ;;  %v6033_v1 = vld [vmem:[#allocation3 + $0x20] sm:$0x1] }
 0x4aa   : > { %v6078_v8 = vor.u32 %v6077_v34, %v6074_v32  ;;  %v6105_v17 = vshll.u32 %v14076_v11, 16  ;;  %v5600_v4 = vrot.slane %v14036_v61, 4  ;;  %v14090_v40 = vadd.f32 %v13867_v35, %v5430_v63  ;;  %v6884_v61 = vld [vmem:[#allocation3 + $0x18] sm:$0xe] }
 0x4ab   : > { %v7092_v23 = vpack.c.b16 %v7062_v13, %v7061_v27  ;;  %v6946_v29 = vrot.slane %v14076_v11, 5  ;;  %v5494_v16 = vmax.f32 %v14064_v30, 0.0  ;;  %v6451_v15 = vunpack.c.l.b16 %v6094_v48 }
 0x4ac   : > { %v6079_v47 = vrot.slane %v6078_v8, 4  ;;  %v6098_v39 = vrot.slane %v6096_v14, 4  ;;  %v6101_v60 = vrot.slane %v6099_v20, 5  ;;  %v14096_v32 = vrot.slane %v6105_v17, 5 }
 0x4ad   : > { %7184 = vmatmul.bf16.gmra.mxu3 %v7092_v23  ;;  %v6109_v63 = vshrl.u32 %v14076_v11, 16  ;;  %v5604_v34 = vrot.slane %v5602_v12, 7  ;;  %v5495_v37 = vmax.f32 %v14069_v59, 0.0  ;;  %v5605_v30 = vshll.u32 %v14025_v52, 16  ;;  %v11795_v23 = vld [vmem:[#allocation3 + $0x18] sm:$0xff] }
 0x4ae   : > { %v6084_v55 = vsel %vm12472_vm11, %v6079_v47, %v6083_v9  ;;  %v5890_v22 = vsel %vm12416_vm3, %v5600_v4, %v5889_v43  ;;  %v6948_v36 = vrot.slane %v6946_v29, 4  ;;  %v6102_v56 = vor.u32 %v6101_v60, %v6098_v39  ;;  %v5892_v4 = vld [vmem:[#allocation3 + $0x30] sm:$0xf]  ;;  %v11834_v47 = vld [vmem:[#allocation3 + $0x18] sm:$0xff] }
 0x4af   : > { %v6450_v25 = vunpack.c.l.b16 %v6084_v55  ;;  %v6111_v9 = vrot.slane %v6109_v63, 4  ;;  %5891 = vst [vmem:[#allocation3 + $0x2c] sm:$0x1] %v5890_v22  ;;  %v5612_v27 = vrot.slane %v5610_v38, 7  ;;  %v5496_v13 = vmax.f32 %v14072_v18, 0.0 }
 0x4b0   : > { %v14106_v11 = vpack.c.bf16 %v5494_v16, %v5494_v16  ;;  %v11269_v12 = vrot.slane %v6884_v61, 9  ;;  %v6949_v14 = vrot.slane %v6033_v1, 5  ;;  %v5607_v52 = vor.u32 %v5605_v30, %v5604_v34  ;;  %v5291_v38 = vld [vmem:[#allocation3 + $0x3c] sm:$0x1]  ;;  %v5896_v55 = vld [vmem:[#allocation3 + $0x38] sm:$0x1] }
 0x4b1   : > { %v6481_v8 = vpack.c.b16 %v6451_v15, %v6450_v25  ;;  %v6112_v59 = vor.u32 %v6111_v9, %v14096_v32  ;;  %v5613_v48 = vshll.u32 %v14066_v54, 16  ;;  %v14112_v20 = vadd.f32 %v13867_v35, %v14061_v31  ;;  %v5989_v15 = vld [vmem:[#allocation3 + $0x24] sm:$0xf]  ;;  %v14122_v61 = vld [vmem:[#allocation3 + $0x28] sm:$0xf] }
 0x4b2   : > { %v6115_v17 = vshll.u32 %v6033_v1, 16  ;;  %v5497_v18 = vmax.f32 %v14090_v40, 0.0  ;;  %v6950_v43 = vsel %vm12724_vm14, %v6948_v36, %v6949_v14  ;;  %v6103_v16 = vrot.slane %v6102_v56, 4 }
 0x4b3   : > { %6573 = vmatmul.bf16.gmra.mxu1 %v6481_v8  ;;  %v5615_v39 = vor.u32 %v5613_v48, %v5612_v27  ;;  %v5527_v60 = vpack.c.bf16 %v5495_v37, %v5495_v37  ;;  %v14117_v54 = vpack.c.bf16 %v5496_v13, %v5496_v13  ;;  %v5622_v35 = vshll.u32 %v14106_v11, 16  ;;  %6811 = vmatmul.bf16.gmra.mxu2 %v11795_v23 }
 0x4b4   : > { %v6947_v31 = vsel %vm12724_vm14, %v11269_v12, %v6946_v29  ;;  %7498 = vmatmul.bf16.gmra.mxu0 %v11834_v47  ;;  %v6113_v40 = vrot.slane %v6112_v59, 4  ;;  %v5608_v63 = vrot.slane %v5604_v34, 4  ;;  %v5617_v30 = vrot.slane %v5612_v27, 4  ;;  %v5345_v27 = vld [vmem:[#allocation3 + $0x44] sm:$0x1] }
 0x4b5   : > { %v5893_v25 = vsel %vm12447_vm10, %v5607_v52, %v5892_v4  ;;  %v7064_v1 = vunpack.c.l.b16 %v6950_v43  ;;  %v6117_v37 = vrot.slane %v6115_v17, 5  ;;  %v6120_v22 = vshrl.u32 %v5989_v15, 16  ;;  %v5294_v59 = vld [vmem:[#allocation3 + $0x48] sm:$0x1] }
 0x4b6   : > { %5894 = vst [vmem:[#allocation3 + $0x30] sm:$0xf] %v5893_v25  ;;  %v5292_v36 = vsel %vm12416_vm3, 0, %v5291_v38  ;;  %v6108_v29 = vsel %vm12472_vm11, %v6103_v16, %v14096_v32  ;;  %v6123_v56 = vshll.u32 %v5989_v15, 16  ;;  %v5616_v9 = vsel %vm12439_vm7, %v5608_v63, %v5615_v39  ;;  %v6885_v39 = vld [vmem:[#allocation3 + $0x24] sm:$0xe] }
 0x4b7   : > { %v5897_v34 = vsel %vm12416_vm3, %v5617_v30, %v5896_v55  ;;  %5293 = vst [vmem:[#allocation3 + $0x3c] sm:$0x1] %v5292_v36  ;;  %v14135_v13 = vpack.c.bf16 %v5497_v18, %v5497_v18  ;;  %v7063_v8 = vunpack.c.l.b16 %v6947_v31  ;;  %v6953_v12 = vrot.slane %v14122_v61, 5 }
 0x4b8   : > { %5895 = vst [vmem:[#allocation3 + $0x34] sm:$0xf] %v5616_v9  ;;  %v5619_v14 = vshrl.u32 %v14106_v11, 16  ;;  %v6118_v32 = vsel %vm12472_vm11, %v6113_v40, %v6117_v37  ;;  %v6129_v52 = vshll.u32 %v14122_v61, 16  ;;  %v6133_v48 = vshrl.u32 %v14122_v61, 16 }
 0x4b9   : > { %5898 = vst [vmem:[#allocation3 + $0x38] sm:$0x1] %v5897_v34  ;;  %v5627_v17 = vshrl.u32 %v5527_v60, 16  ;;  %v7093_v4 = vpack.c.b16 %v7064_v1, %v7063_v8  ;;  %v6452_v38 = vunpack.c.l.b16 %v6108_v29  ;;  %v6122_v18 = vrot.slane %v6120_v22, 4  ;;  %v6034_v37 = vld [vmem:[#allocation3 + $0x2c] sm:$0x1] }
 0x4ba   : > { %v5621_v23 = vrot.slane %v5619_v14, 7  ;;  %v6125_v47 = vrot.slane %v6123_v56, 5  ;;  %v5630_v16 = vshll.u32 %v5527_v60, 16  ;;  %v5346_v11 = vsel %vm12423_vm4, 0, %v5345_v27 }
 0x4bb   : > { %v5629_v43 = vrot.slane %v5627_v17, 7  ;;  %v6453_v15 = vunpack.c.l.b16 %v6118_v32  ;;  %5347 = vst [vmem:[#allocation3 + $0x44] sm:$0x1] %v5346_v11  ;;  %v5295_v40 = vsel %vm12416_vm3, 0, %v5294_v59  ;;  %v14147_v61 = vrot.slane %v6129_v52, 5  ;;  %v11796_v32 = vld [vmem:[#allocation3 + $0x24] sm:$0xff] }
 0x4bc   : > { %v5624_v31 = vor.u32 %v5622_v35, %v5621_v23  ;;  %v5625_v55 = vrot.slane %v5621_v23, 4  ;;  %v6135_v63 = vrot.slane %v6133_v48, 4  ;;  %v5636_v25 = vshrl.u32 %v14117_v54, 16  ;;  %5296 = vst [vmem:[#allocation3 + $0x48] sm:$0x1] %v5295_v40  ;;  %v11862_v48 = vld [vmem:[#allocation9 + $0x128] sm:$0xff] }
 0x4bd   : > { %7189 = vmatmul.bf16.gmra.mxu3 %v7093_v4  ;;  %v5632_v30 = vor.u32 %v5630_v16, %v5629_v43  ;;  %v5498_v60 = vmax.f32 %v14112_v20, 0.0  ;;  %v11270_v22 = vrot.slane %v6885_v39, 9  ;;  %v6482_v29 = vpack.c.b16 %v6453_v15, %v6452_v38  ;;  %v5348_v20 = vld [vmem:[#allocation3 + $0x50] sm:$0x1]  ;;  %v11835_v17 = vld [vmem:[#allocation3 + $0x24] sm:$0xff]  ;;  %8169 = vmatpush.bf16.msrb.mxu1 %v11862_v48 }
 0x4be   : > { %v5899_v1 = vld [vmem:[#allocation3 + $0x3c] sm:$0xf]  ;;  %v6955_v56 = vrot.slane %v6953_v12, 4  ;;  %v6126_v9 = vor.u32 %v6125_v47, %v6122_v18  ;;  %v5634_v34 = vrot.slane %v5629_v43, 4  ;;  %v6136_v27 = vor.u32 %v6135_v63, %v14147_v61  ;;  %v5991_v18 = vld [vmem:[#allocation3 + $0x30] sm:$0xf] }
 0x4bf   : > { %v5633_v35 = vsel %vm12439_vm7, %v5625_v55, %v5632_v30  ;;  %v5900_v36 = vsel %vm12447_vm10, %v5624_v31, %v5899_v1  ;;  %v5638_v8 = vrot.slane %v5636_v25, 7  ;;  %v5644_v14 = vshrl.u32 %v14135_v13, 16  ;;  %v14162_v16 = vld [vmem:[#allocation3 + $0x34] sm:$0xf] }
 0x4c0   : > { %5901 = vst [vmem:[#allocation3 + $0x3c] sm:$0xf] %v5900_v36  ;;  %v5639_v59 = vshll.u32 %v14117_v54, 16  ;;  %v6956_v52 = vrot.slane %v6034_v37, 5  ;;  %v6954_v4 = vsel %vm12724_vm14, %v11270_v22, %v6953_v12  ;;  %v6139_v38 = vshll.u32 %v6034_v37, 16 }
 0x4c1   : > { %5902 = vst [vmem:[#allocation3 + $0x40] sm:$0xf] %v5633_v35  ;;  %v6127_v43 = vrot.slane %v6126_v9, 4  ;;  %v5297_v15 = vld [vmem:[#allocation3 + $0x54] sm:$0x1]  ;;  %v6137_v39 = vrot.slane %v6136_v27, 4  ;;  %v5530_v37 = vpack.c.bf16 %v5498_v60, %v5498_v60 }
 0x4c2   : > { %v5903_v23 = vld [vmem:[#allocation3 + $0x44] sm:$0x1]  ;;  %v6957_v47 = vsel %vm12724_vm14, %v6955_v56, %v6956_v52  ;;  %v5641_v11 = vor.u32 %v5639_v59, %v5638_v8  ;;  %v5642_v12 = vrot.slane %v5638_v8, 4  ;;  %v5646_v31 = vrot.slane %v5644_v14, 7 }
 0x4c3   : > { %6578 = vmatmul.bf16.gmra.mxu1 %v6482_v29  ;;  %v5904_v54 = vsel %vm12416_vm3, %v5634_v34, %v5903_v23  ;;  %6816 = vmatmul.bf16.gmra.mxu2 %v11796_v32  ;;  %v5647_v55 = vshll.u32 %v14135_v13, 16  ;;  %v5499_v40 = vmax.f32 %v13908_v58, 0.0  ;;  %v6144_v63 = vshrl.u32 %v5991_v18, 16  ;;  %v5906_v25 = vld [vmem:[#allocation3 + $0x48] sm:$0xf] }
 0x4c4   : > { %7503 = vmatmul.bf16.gmra.mxu0 %v11835_v17  ;;  %5905 = vst [vmem:[#allocation3 + $0x44] sm:$0x1] %v5904_v54  ;;  %v6147_v30 = vshll.u32 %v5991_v18, 16  ;;  %v5349_v1 = vsel %vm12423_vm4, 0, %v5348_v20  ;;  %v7066_v22 = vunpack.c.l.b16 %v6957_v47  ;;  %v6141_v35 = vrot.slane %v6139_v38, 5 }
 0x4c5   : > { %v5649_v36 = vor.u32 %v5647_v55, %v5646_v31  ;;  %5350 = vst [vmem:[#allocation3 + $0x50] sm:$0x1] %v5349_v1  ;;  %v7065_v29 = vunpack.c.l.b16 %v6954_v4  ;;  %v6153_v56 = vshll.u32 %v14162_v16, 16  ;;  %v6157_v9 = vshrl.u32 %v14162_v16, 16  ;;  %v6886_v4 = vld [vmem:[#allocation3 + $0x30] sm:$0xe] }
 0x4c6   : > { %v5907_v13 = vsel %vm12447_vm10, %v5641_v11, %v5906_v25  ;;  %v6132_v58 = vsel %vm12472_vm11, %v6127_v43, %v14147_v61  ;;  %v6142_v34 = vsel %vm12472_vm11, %v6137_v39, %v6141_v35  ;;  %v5298_v27 = vsel %vm12416_vm3, 0, %v5297_v15  ;;  %v6035_v47 = vld [vmem:[#allocation3 + $0x38] sm:$0x1]  ;;  %v5351_v43 = vld [vmem:[#allocation3 + $0x5c] sm:$0x1] }
 0x4c7   : > { %v5650_v60 = vsel %vm12439_vm7, %v5642_v12, %v5649_v36  ;;  %v5531_v8 = vpack.c.bf16 %v5499_v40, %v5499_v40  ;;  %v6960_v14 = vrot.slane %v14162_v16, 5  ;;  %v6146_v20 = vrot.slane %v6144_v63, 4  ;;  %5908 = vst [vmem:[#allocation3 + $0x48] sm:$0xf] %v5907_v13  ;;  %v5300_v39 = vld [vmem:[#allocation3 + $0x60] sm:$0x1] }
 0x4c8   : > { %v6149_v59 = vrot.slane %v6147_v30, 5  ;;  %v7094_v32 = vpack.c.b16 %v7066_v22, %v7065_v29  ;;  %v5651_v52 = vrot.slane %v5646_v31, 4  ;;  %5909 = vst [vmem:[#allocation3 + $0x4c] sm:$0xf] %v5650_v60  ;;  %v5653_v48 = vshrl.u32 %v5530_v37, 16  ;;  %v11797_v29 = vld [vmem:[#allocation3 + $0x30] sm:$0xff] }
 0x4c9   : > { %v6454_v61 = vunpack.c.l.b16 %v6132_v58  ;;  %v6455_v17 = vunpack.c.l.b16 %v6142_v34  ;;  %v14184_v38 = vrot.slane %v6153_v56, 5  ;;  %v6159_v18 = vrot.slane %v6157_v9, 4  ;;  %5299 = vst [vmem:[#allocation3 + $0x54] sm:$0x1] %v5298_v27  ;;  %v11836_v56 = vld [vmem:[#allocation3 + $0x30] sm:$0xff] }
 0x4ca   : > { %v5500_v23 = vmax.f32 %v13911_v6, 0.0  ;;  %v6962_v16 = vrot.slane %v6960_v14, 4  ;;  %v6150_v54 = vor.u32 %v6149_v59, %v6146_v20  ;;  %v5661_v15 = vshrl.u32 %v5531_v8, 16  ;;  %v5993_v34 = vld [vmem:[#allocation3 + $0x3c] sm:$0xf] }
 0x4cb   : > { %v5501_v12 = vmax.f32 %v13914_v41, 0.0  ;;  %v11271_v31 = vrot.slane %v6886_v4, 9  ;;  %v5655_v40 = vrot.slane %v5653_v48, 7  ;;  %v6483_v63 = vpack.c.b16 %v6455_v17, %v6454_v61  ;;  %v14204_v17 = vld [vmem:[#allocation3 + $0x40] sm:$0xf] }
 0x4cc   : > { %v5910_v11 = vld [vmem:[#allocation3 + $0x50] sm:$0x1]  ;;  %v6963_v30 = vrot.slane %v6035_v47, 5  ;;  %v6160_v25 = vor.u32 %v6159_v18, %v14184_v38  ;;  %v5352_v6 = vsel %vm12423_vm4, 0, %v5351_v43  ;;  %v14193_v1 = vpack.c.bf16 %v5500_v23, %v5500_v23 }
 0x4cd   : > { %7194 = vmatmul.bf16.gmra.mxu3 %v7094_v32  ;;  %v5911_v55 = vsel %vm12416_vm3, %v5651_v52, %v5910_v11  ;;  %v5656_v22 = vshll.u32 %v5530_v37, 16  ;;  %v5663_v35 = vrot.slane %v5661_v15, 7  ;;  %v5301_v41 = vsel %vm12416_vm3, 0, %v5300_v39  ;;  %5353 = vst [vmem:[#allocation3 + $0x5c] sm:$0x1] %v5352_v6 }
 0x4ce   : > { %5912 = vst [vmem:[#allocation3 + $0x50] sm:$0x1] %v5911_v55  ;;  %v5502_v36 = vmax.f32 %v13917_v28, 0.0  ;;  %v6964_v9 = vsel %vm12724_vm14, %v6962_v16, %v6963_v30  ;;  %v6151_v13 = vrot.slane %v6150_v54, 4  ;;  %v6163_v58 = vshll.u32 %v6035_v47, 16 }
 0x4cf   : > { %v5658_v60 = vor.u32 %v5656_v22, %v5655_v40  ;;  %v5659_v27 = vrot.slane %v5655_v40, 4  ;;  %v5664_v20 = vshll.u32 %v5531_v8, 16  ;;  %v5503_v37 = vmax.f32 %v13920_v5, 0.0  ;;  %5302 = vst [vmem:[#allocation3 + $0x60] sm:$0x1] %v5301_v41 }
 0x4d0   : > { %v6961_v59 = vsel %vm12724_vm14, %v11271_v31, %v6960_v14  ;;  %v6161_v32 = vrot.slane %v6160_v25, 4  ;;  %v5913_v28 = vld [vmem:[#allocation3 + $0x54] sm:$0xf]  ;;  %v5533_v52 = vpack.c.bf16 %v5501_v12, %v5501_v12  ;;  %v5673_v48 = vshll.u32 %v14193_v1, 16  ;;  %v5354_v14 = vld [vmem:[#allocation3 + $0x68] sm:$0x1] }
 0x4d1   : > { %v7068_v61 = vunpack.c.l.b16 %v6964_v9  ;;  %v5666_v4 = vor.u32 %v5664_v20, %v5663_v35  ;;  %v6156_v8 = vsel %vm12472_vm11, %v6151_v13, %v14184_v38  ;;  %v6165_v5 = vrot.slane %v6163_v58, 5  ;;  %v6887_v55 = vld [vmem:[#allocation3 + $0x3c] sm:$0xe]  ;;  %v5303_v41 = vld [vmem:[#allocation3 + $0x6c] sm:$0x1] }
 0x4d2   : > { %v6168_v18 = vshrl.u32 %v5993_v34, 16  ;;  %v6171_v23 = vshll.u32 %v5993_v34, 16  ;;  %v7067_v47 = vunpack.c.l.b16 %v6961_v59  ;;  %v5668_v16 = vrot.slane %v5663_v35, 4  ;;  %v6036_v59 = vld [vmem:[#allocation3 + $0x44] sm:$0x1] }
 0x4d3   : > { %6583 = vmatmul.bf16.gmra.mxu1 %v6483_v63  ;;  %6821 = vmatmul.bf16.gmra.mxu2 %v11797_v29  ;;  %v5667_v43 = vsel %vm12439_vm7, %v5659_v27, %v5666_v4  ;;  %v5914_v54 = vsel %vm12447_vm10, %v5658_v60, %v5913_v28  ;;  %v6166_v11 = vsel %vm12472_vm11, %v6161_v32, %v6165_v5  ;;  %v6177_v15 = vshll.u32 %v14204_v17, 16 }
 0x4d4   : > { %7508 = vmatmul.bf16.gmra.mxu0 %v11836_v56  ;;  %v6181_v39 = vshrl.u32 %v14204_v17, 16  ;;  %5915 = vst [vmem:[#allocation3 + $0x54] sm:$0xf] %v5914_v54  ;;  %v5670_v38 = vshrl.u32 %v14193_v1, 16  ;;  %v7095_v12 = vpack.c.b16 %v7068_v61, %v7067_v47  ;;  %v6456_v31 = vunpack.c.l.b16 %v6156_v8  ;;  %v5917_v22 = vld [vmem:[#allocation3 + $0x5c] sm:$0x1] }
 0x4d5   : > { %5916 = vst [vmem:[#allocation3 + $0x58] sm:$0xf] %v5667_v43  ;;  %v5678_v40 = vshrl.u32 %v5533_v52, 16  ;;  %v5355_v63 = vsel %vm12423_vm4, 0, %v5354_v14  ;;  %v6967_v30 = vrot.slane %v14204_v17, 5  ;;  %v6170_v25 = vrot.slane %v6168_v18, 4 }
 0x4d6   : > { %v6173_v6 = vrot.slane %v6171_v23, 5  ;;  %v5672_v35 = vrot.slane %v5670_v38, 7  ;;  %v6457_v29 = vunpack.c.l.b16 %v6166_v11  ;;  %v5918_v56 = vsel %vm12416_vm3, %v5668_v16, %v5917_v22  ;;  %v5920_v13 = vld [vmem:[#allocation3 + $0x60] sm:$0xf]  ;;  %5356 = vst [vmem:[#allocation3 + $0x68] sm:$0x1] %v5355_v63 }
 0x4d7   : > { %v5680_v1 = vrot.slane %v5678_v40, 7  ;;  %v5681_v9 = vshll.u32 %v5533_v52, 16  ;;  %v14223_v58 = vrot.slane %v6177_v15, 5  ;;  %v6183_v34 = vrot.slane %v6181_v39, 4  ;;  %5919 = vst [vmem:[#allocation3 + $0x5c] sm:$0x1] %v5918_v56 }
 0x4d8   : > { %v5675_v60 = vor.u32 %v5673_v48, %v5672_v35  ;;  %v5676_v27 = vrot.slane %v5672_v35, 4  ;;  %v5534_v20 = vpack.c.bf16 %v5502_v36, %v5502_v36  ;;  %v5504_v28 = vmax.f32 %v13923_v21, 0.0  ;;  %v5995_v21 = vld [vmem:[#allocation3 + $0x48] sm:$0xf]  ;;  %v11861_v43 = vld [vmem:[#allocation9 + $0x120] sm:$0xff] }
 0x4d9   : > { %v5683_v32 = vor.u32 %v5681_v9, %v5680_v1  ;;  %v5535_v61 = vpack.c.bf16 %v5503_v37, %v5503_v37  ;;  %v11272_v17 = vrot.slane %v6887_v55, 9  ;;  %v6484_v52 = vpack.c.b16 %v6457_v29, %v6456_v31  ;;  %v11798_v11 = vld [vmem:[#allocation3 + $0x3c] sm:$0xff]  ;;  %8170 = vmatpush.bf16.msrb.mxu1 %v11861_v43  ;;  %v14238_v40 = vld [vmem:[#allocation3 + $0x4c] sm:$0xf] }
 0x4da   : > { %v5921_v4 = vsel %vm12447_vm10, %v5675_v60, %v5920_v13  ;;  %v6174_v8 = vor.u32 %v6173_v6, %v6170_v25  ;;  %v5304_v48 = vsel %vm12416_vm3, 0, %v5303_v41  ;;  %v6969_v36 = vrot.slane %v6967_v30, 4  ;;  %v11837_v15 = vld [vmem:[#allocation3 + $0x3c] sm:$0xff] }
 0x4db   : > { %v5684_v5 = vsel %vm12439_vm7, %v5676_v27, %v5683_v32  ;;  %5922 = vst [vmem:[#allocation3 + $0x60] sm:$0xf] %v5921_v4  ;;  %v6970_v18 = vrot.slane %v6036_v59, 5  ;;  %v6184_v23 = vor.u32 %v6183_v34, %v14223_v58  ;;  %v6187_v14 = vshll.u32 %v6036_v59, 16 }
 0x4dc   : > { %v5685_v37 = vrot.slane %v5680_v1, 4  ;;  %5923 = vst [vmem:[#allocation3 + $0x64] sm:$0xf] %v5684_v5  ;;  %v5687_v47 = vshrl.u32 %v5534_v20, 16  ;;  %v5695_v54 = vshrl.u32 %v5535_v61, 16  ;;  %v6175_v39 = vrot.slane %v6174_v8, 4 }
 0x4dd   : > { %7199 = vmatmul.bf16.gmra.mxu3 %v7095_v12  ;;  %v5924_v16 = vld [vmem:[#allocation3 + $0x68] sm:$0x1]  ;;  %5305 = vst [vmem:[#allocation3 + $0x6c] sm:$0x1] %v5304_v48  ;;  %v5505_v38 = vmax.f32 %v13926_v49, 0.0  ;;  %v6968_v12 = vsel %vm12724_vm14, %v11272_v17, %v6967_v30  ;;  %v6971_v31 = vsel %vm12724_vm14, %v6969_v36, %v6970_v18  ;;  %v6185_v55 = vrot.slane %v6184_v23, 4 }
 0x4de   : > { %v6192_v63 = vshrl.u32 %v5995_v21, 16  ;;  %v6195_v25 = vshll.u32 %v5995_v21, 16  ;;  %v5925_v6 = vsel %vm12416_vm3, %v5685_v37, %v5924_v16  ;;  %v5689_v22 = vrot.slane %v5687_v47, 7  ;;  %v6037_v47 = vld [vmem:[#allocation3 + $0x50] sm:$0x1] }
 0x4df   : > { %v5506_v49 = vmax.f32 %v13929_v42, 0.0  ;;  %v14243_v35 = vpack.c.bf16 %v5504_v28, %v5504_v28  ;;  %v6189_v30 = vrot.slane %v6187_v14, 5  ;;  %5926 = vst [vmem:[#allocation3 + $0x68] sm:$0x1] %v5925_v6  ;;  %v14245_v41 = vrot.slane %v5695_v54, 7 }
 0x4e0   : > { %v5690_v29 = vshll.u32 %v5534_v20, 16  ;;  %v7069_v56 = vunpack.c.l.b16 %v6968_v12  ;;  %v7070_v1 = vunpack.c.l.b16 %v6971_v31  ;;  %v6180_v9 = vsel %vm12472_vm11, %v6175_v39, %v14223_v58  ;;  %v5360_v39 = vld [vmem:[#allocation3 + $0x80] sm:$0x1] }
 0x4e1   : > { %v6190_v13 = vsel %vm12472_vm11, %v6185_v55, %v6189_v30  ;;  %v6201_v34 = vshll.u32 %v14238_v40, 16  ;;  %v6205_v42 = vshrl.u32 %v14238_v40, 16  ;;  %v5698_v60 = vshll.u32 %v5535_v61, 16  ;;  %v5357_v61 = vld [vmem:[#allocation3 + $0x74] sm:$0x1]  ;;  %v11799_v30 = vld [vmem:[#allocation3 + $0x48] sm:$0xff] }
 0x4e2   : > { %v6974_v27 = vrot.slane %v14238_v40, 5  ;;  %v6194_v59 = vrot.slane %v6192_v63, 4  ;;  %v6197_v32 = vrot.slane %v6195_v25, 5  ;;  %v5692_v28 = vor.u32 %v5690_v29, %v5689_v22 }
 0x4e3   : > { %6588 = vmatmul.bf16.gmra.mxu1 %v6484_v52  ;;  %6826 = vmatmul.bf16.gmra.mxu2 %v11798_v11  ;;  %v5507_v20 = vmax.f32 %v13932_v57, 0.0  ;;  %v5508_v17 = vmax.f32 %v13935_v53, 0.0  ;;  %v5537_v4 = vpack.c.bf16 %v5505_v38, %v5505_v38  ;;  %v6888_v52 = vld [vmem:[#allocation3 + $0x48] sm:$0xe]  ;;  %v5700_v58 = vor.u32 %v5698_v60, %v14245_v41  ;;  %v5306_v57 = vld [vmem:[#allocation3 + $0x78] sm:$0x1] }
 0x4e4   : > { %7513 = vmatmul.bf16.gmra.mxu0 %v11837_v15  ;;  %v5927_v8 = vld [vmem:[#allocation3 + $0x6c] sm:$0xf]  ;;  %v14258_v5 = vpack.c.bf16 %v5506_v49, %v5506_v49  ;;  %v7096_v48 = vpack.c.b16 %v7070_v1, %v7069_v56  ;;  %v6458_v36 = vunpack.c.l.b16 %v6180_v9  ;;  %v6459_v18 = vunpack.c.l.b16 %v6190_v13  ;;  %v5309_v38 = vld [vmem:[#allocation3 + $0x84] sm:$0x1]  ;;  %v5997_v13 = vld [vmem:[#allocation3 + $0x54] sm:$0xf] }
 0x4e5   : > { %v5707_v23 = vshll.u32 %v14243_v35, 16  ;;  %v14261_v14 = vrot.slane %v6201_v34, 5  ;;  %v6207_v21 = vrot.slane %v6205_v42, 4  ;;  %v5693_v37 = vrot.slane %v5689_v22, 4  ;;  %v11838_v1 = vld [vmem:[#allocation3 + $0x48] sm:$0xff] }
 0x4e6   : > { %v11273_v43 = vrot.slane %v6888_v52, 9  ;;  %v6976_v16 = vrot.slane %v6974_v27, 4  ;;  %v6198_v54 = vor.u32 %v6197_v32, %v6194_v59  ;;  %v5928_v11 = vsel %vm12447_vm10, %v5692_v28, %v5927_v8  ;;  %v14280_v32 = vld [vmem:[#allocation3 + $0x58] sm:$0xf] }
 0x4e7   : > { %v5701_v15 = vsel %vm12439_vm7, %v5693_v37, %v5700_v58  ;;  %5929 = vst [vmem:[#allocation3 + $0x6c] sm:$0xf] %v5928_v11  ;;  %v6485_v12 = vpack.c.b16 %v6459_v18, %v6458_v36  ;;  %v5358_v31 = vsel %vm12423_vm4, 0, %v5357_v61  ;;  %v5307_v55 = vsel %vm12416_vm3, 0, %v5306_v57  ;;  %v5312_v11 = vld [vmem:[#allocation3 + $0x90] sm:$0x1] }
 0x4e8   : > { %5930 = vst [vmem:[#allocation3 + $0x70] sm:$0xf] %v5701_v15  ;;  %v5704_v40 = vshrl.u32 %v14243_v35, 16  ;;  %v6977_v63 = vrot.slane %v6037_v47, 5  ;;  %v6208_v25 = vor.u32 %v6207_v21, %v14261_v14  ;;  %v6211_v6 = vshll.u32 %v6037_v47, 16 }
 0x4e9   : > { %5359 = vst [vmem:[#allocation3 + $0x74] sm:$0x1] %v5358_v31  ;;  %v5712_v22 = vshrl.u32 %v5537_v4, 16  ;;  %v5724_v49 = vshll.u32 %v14258_v5, 16  ;;  %v6199_v29 = vrot.slane %v6198_v54, 4  ;;  %v5715_v35 = vshll.u32 %v5537_v4, 16 }
 0x4ea   : > { %5308 = vst [vmem:[#allocation3 + $0x78] sm:$0x1] %v5307_v55  ;;  %v5706_v56 = vrot.slane %v5704_v40, 7  ;;  %v6978_v9 = vsel %vm12724_vm14, %v6976_v16, %v6977_v63  ;;  %v5361_v42 = vsel %vm12423_vm4, 0, %v5360_v39  ;;  %v5539_v60 = vpack.c.bf16 %v5507_v20, %v5507_v20 }
 0x4eb   : > { %v5714_v34 = vrot.slane %v5712_v22, 7  ;;  %v6975_v59 = vsel %vm12724_vm14, %v11273_v43, %v6974_v27  ;;  %5362 = vst [vmem:[#allocation3 + $0x80] sm:$0x1] %v5361_v42  ;;  %v5310_v52 = vsel %vm12416_vm3, 0, %v5309_v38  ;;  %v6209_v58 = vrot.slane %v6208_v25, 4 }
 0x4ec   : > { %v5710_v28 = vrot.slane %v5706_v56, 4  ;;  %v6213_v8 = vrot.slane %v6211_v6, 5  ;;  %5311 = vst [vmem:[#allocation3 + $0x84] sm:$0x1] %v5310_v52  ;;  %v7072_v4 = vunpack.c.l.b16 %v6978_v9  ;;  %v6204_v27 = vsel %vm12472_vm11, %v6199_v29, %v14261_v14 }
 0x4ed   : > { %7204 = vmatmul.bf16.gmra.mxu3 %v7096_v48  ;;  %v5702_v48 = vrot.slane %v14245_v41, 4  ;;  %v5717_v36 = vor.u32 %v5715_v35, %v5714_v34  ;;  %v6216_v20 = vshrl.u32 %v5997_v13, 16  ;;  %v6219_v18 = vshll.u32 %v5997_v13, 16  ;;  %v5363_v41 = vld [vmem:[#allocation3 + $0x8c] sm:$0x1] }
 0x4ee   : > { %v6225_v61 = vshll.u32 %v14280_v32, 16  ;;  %v5709_v21 = vor.u32 %v5707_v23, %v5706_v56  ;;  %v5721_v57 = vshrl.u32 %v14258_v5, 16  ;;  %v7071_v47 = vunpack.c.l.b16 %v6975_v59 }
 0x4ef   : > { %v5718_v37 = vsel %vm12439_vm7, %v5710_v28, %v5717_v36  ;;  %v5719_v16 = vrot.slane %v5714_v34, 4  ;;  %v5729_v54 = vshrl.u32 %v5539_v60, 16  ;;  %v6214_v15 = vsel %vm12472_vm11, %v6209_v58, %v6213_v8  ;;  %v6889_v28 = vld [vmem:[#allocation3 + $0x54] sm:$0xe]  ;;  %v6038_v58 = vld [vmem:[#allocation3 + $0x5c] sm:$0x1] }
 0x4f0   : > { %v5931_v43 = vld [vmem:[#allocation3 + $0x74] sm:$0x1]  ;;  %v6460_v14 = vunpack.c.l.b16 %v6204_v27  ;;  %v6229_v39 = vshrl.u32 %v14280_v32, 16  ;;  %5937 = vst [vmem:[#allocation3 + $0x7c] sm:$0xf] %v5718_v37  ;;  %v6981_v31 = vrot.slane %v14280_v32, 5  ;;  %v6461_v29 = vunpack.c.l.b16 %v6214_v15 }
 0x4f1   : > { %v5932_v23 = vsel %vm12416_vm3, %v5702_v48, %v5931_v43  ;;  %v5934_v38 = vld [vmem:[#allocation3 + $0x78] sm:$0xf]  ;;  %v6218_v55 = vrot.slane %v6216_v20, 4  ;;  %v6221_v40 = vrot.slane %v6219_v18, 5  ;;  %v14298_v63 = vrot.slane %v6225_v61, 5 }
 0x4f2   : > { %5933 = vst [vmem:[#allocation3 + $0x74] sm:$0x1] %v5932_v23  ;;  %v5935_v25 = vsel %vm12447_vm10, %v5709_v21, %v5934_v38  ;;  %v5938_v6 = vld [vmem:[#allocation3 + $0x80] sm:$0x1]  ;;  %v5723_v22 = vrot.slane %v5721_v57, 7  ;;  %v5364_v13 = vsel %vm12423_vm4, 0, %v5363_v41  ;;  %v5540_v32 = vpack.c.bf16 %v5508_v17, %v5508_v17 }
 0x4f3   : > { %6593 = vmatmul.bf16.gmra.mxu1 %v6485_v12  ;;  %6831 = vmatmul.bf16.gmra.mxu2 %v11799_v30  ;;  %v7097_v12 = vpack.c.b16 %v7072_v4, %v7071_v47  ;;  %v5732_v30 = vshll.u32 %v5539_v60, 16  ;;  %5936 = vst [vmem:[#allocation3 + $0x78] sm:$0xf] %v5935_v25  ;;  %v5939_v56 = vsel %vm12416_vm3, %v5719_v16, %v5938_v6  ;;  %v5941_v9 = vld [vmem:[#allocation3 + $0x84] sm:$0xf]  ;;  %v6231_v34 = vrot.slane %v6229_v39, 4 }
 0x4f4   : > { %7518 = vmatmul.bf16.gmra.mxu0 %v11838_v1  ;;  %v5731_v1 = vrot.slane %v5729_v54, 7  ;;  %5940 = vst [vmem:[#allocation3 + $0x80] sm:$0x1] %v5939_v56  ;;  %v5726_v35 = vor.u32 %v5724_v49, %v5723_v22  ;;  %v5727_v42 = vrot.slane %v5723_v22, 4  ;;  %v5313_v59 = vsel %vm12416_vm3, 0, %v5312_v11  ;;  %v11800_v61 = vld [vmem:[#allocation3 + $0x54] sm:$0xff] }
 0x4f5   : > { %5365 = vst [vmem:[#allocation3 + $0x8c] sm:$0x1] %v5364_v13  ;;  %v5366_v49 = vld [vmem:[#allocation3 + $0x98] sm:$0x1]  ;;  %v6486_v8 = vpack.c.b16 %v6461_v29, %v6460_v14  ;;  %v6983_v48 = vrot.slane %v6981_v31, 4  ;;  %v6222_v36 = vor.u32 %v6221_v40, %v6218_v55  ;;  %v6232_v4 = vor.u32 %v6231_v34, %v14298_v63  ;;  %v11860_v23 = vld [vmem:[#allocation9 + $0x118] sm:$0xff] }
 0x4f6   : > { %v5734_v60 = vor.u32 %v5732_v30, %v5731_v1  ;;  %v5942_v52 = vsel %vm12447_vm10, %v5726_v35, %v5941_v9  ;;  %5314 = vst [vmem:[#allocation3 + $0x90] sm:$0x1] %v5313_v59  ;;  %v5509_v53 = vmax.f32 %v13938_v2, 0.0  ;;  %v11274_v17 = vrot.slane %v6889_v28, 9  ;;  %v11839_v21 = vld [vmem:[#allocation3 + $0x54] sm:$0xff]  ;;  %8171 = vmatpush.bf16.msrb.mxu1 %v11860_v23 }
 0x4f7   : > { %5943 = vst [vmem:[#allocation3 + $0x84] sm:$0xf] %v5942_v52  ;;  %v6984_v27 = vrot.slane %v6038_v58, 5  ;;  %v5738_v20 = vshrl.u32 %v5540_v32, 16  ;;  %v5367_v18 = vsel %vm12423_vm4, 0, %v5366_v49  ;;  %v6235_v37 = vshll.u32 %v6038_v58, 16 }
 0x4f8   : > { %v5735_v5 = vsel %vm12439_vm7, %v5727_v42, %v5734_v60  ;;  %v6223_v41 = vrot.slane %v6222_v36, 4  ;;  %v6233_v47 = vrot.slane %v6232_v4, 4  ;;  %v5999_v43 = vld [vmem:[#allocation3 + $0x60] sm:$0xf]  ;;  %v5736_v16 = vrot.slane %v5731_v1, 4 }
 0x4f9   : > { %5944 = vst [vmem:[#allocation3 + $0x88] sm:$0xf] %v5735_v5  ;;  %v6985_v57 = vsel %vm12724_vm14, %v6983_v48, %v6984_v27  ;;  %v5541_v54 = vpack.c.bf16 %v5509_v53, %v5509_v53  ;;  %v14323_v2 = vld [vmem:[#allocation3 + $0x64] sm:$0xf]  ;;  %v5510_v15 = vmax.f32 %v13941_v26, 0.0  ;;  %v5511_v14 = vmax.f32 %v13944_v7, 0.0 }
 0x4fa   : > { %5368 = vst [vmem:[#allocation3 + $0x98] sm:$0x1] %v5367_v18  ;;  %v6982_v39 = vsel %vm12724_vm14, %v11274_v17, %v6981_v31  ;;  %v5740_v38 = vrot.slane %v5738_v20, 7  ;;  %v7074_v55 = vunpack.c.l.b16 %v6985_v57  ;;  %v6237_v40 = vrot.slane %v6235_v37, 5  ;;  %v6039_v4 = vld [vmem:[#allocation3 + $0x68] sm:$0x1] }
 0x4fb   : > { %v6240_v25 = vshrl.u32 %v5999_v43, 16  ;;  %v6228_v6 = vsel %vm12472_vm11, %v6223_v41, %v14298_v63  ;;  %v6243_v22 = vshll.u32 %v5999_v43, 16  ;;  %v6249_v30 = vshll.u32 %v14323_v2, 16  ;;  %v6890_v53 = vld [vmem:[#allocation3 + $0x60] sm:$0xe] }
 0x4fc   : > { %v5945_v11 = vld [vmem:[#allocation3 + $0x8c] sm:$0x1]  ;;  %v7073_v7 = vunpack.c.l.b16 %v6982_v39  ;;  %v6238_v31 = vsel %vm12472_vm11, %v6233_v47, %v6237_v40  ;;  %v6253_v29 = vshrl.u32 %v14323_v2, 16  ;;  %v5746_v56 = vshrl.u32 %v5541_v54, 16  ;;  %v11801_v43 = vld [vmem:[#allocation3 + $0x60] sm:$0xff] }
 0x4fd   : > { %7209 = vmatmul.bf16.gmra.mxu3 %v7097_v12  ;;  %v5741_v12 = vshll.u32 %v5540_v32, 16  ;;  %v5946_v26 = vsel %vm12416_vm3, %v5736_v16, %v5945_v11  ;;  %v5512_v1 = vmax.f32 %v13947_v0, 0.0  ;;  %v5513_v9 = vmax.f32 %v13950_v3, 0.0  ;;  %v5948_v60 = vld [vmem:[#allocation3 + $0x90] sm:$0xf]  ;;  %v11840_v16 = vld [vmem:[#allocation3 + $0x60] sm:$0xff] }
 0x4fe   : > { %5947 = vst [vmem:[#allocation3 + $0x8c] sm:$0x1] %v5946_v26  ;;  %v5542_v63 = vpack.c.bf16 %v5510_v15, %v5510_v15  ;;  %v5543_v34 = vpack.c.bf16 %v5511_v14, %v5511_v14  ;;  %v7098_v35 = vpack.c.b16 %v7074_v55, %v7073_v7  ;;  %v6462_v42 = vunpack.c.l.b16 %v6228_v6  ;;  %v5315_v32 = vld [vmem:[#allocation3 + $0x9c] sm:$0x1]  ;;  %v6001_v55 = vld [vmem:[#allocation3 + $0x6c] sm:$0xf] }
 0x4ff   : > { %v5743_v13 = vor.u32 %v5741_v12, %v5740_v38  ;;  %v6988_v59 = vrot.slane %v14323_v2, 5  ;;  %v6463_v28 = vunpack.c.l.b16 %v6238_v31  ;;  %v6242_v52 = vrot.slane %v6240_v25, 4  ;;  %v14354_v31 = vld [vmem:[#allocation3 + $0x70] sm:$0xf]  ;;  %v6893_v44 = vld [vmem:[#allocation3 + $0x84] sm:$0xe] }
 0x500   : > { %v6245_v58 = vrot.slane %v6243_v22, 5  ;;  %v14341_v5 = vrot.slane %v6249_v30, 5  ;;  %v6255_v49 = vrot.slane %v6253_v29, 4  ;;  %v5748_v0 = vrot.slane %v5746_v56, 7 }
 0x501   : > { %v5749_v48 = vshll.u32 %v5541_v54, 16  ;;  %v5758_v36 = vshll.u32 %v5542_v63, 16  ;;  %v5949_v17 = vsel %vm12447_vm10, %v5743_v13, %v5948_v60  ;;  %v5316_v27 = vsel %vm12416_vm3, 0, %v5315_v32 }
 0x502   : > { %v5753_v18 = vrot.slane %v5748_v0, 4  ;;  %5950 = vst [vmem:[#allocation3 + $0x90] sm:$0xf] %v5949_v17  ;;  %v6487_v37 = vpack.c.b16 %v6463_v28, %v6462_v42  ;;  %v6990_v57 = vrot.slane %v6988_v59, 4  ;;  %v6246_v41 = vor.u32 %v6245_v58, %v6242_v52  ;;  %v5318_v42 = vld [vmem:[#allocation3 + $0xa8] sm:$0x1] }
 0x503   : > { %6598 = vmatmul.bf16.gmra.mxu1 %v6486_v8  ;;  %6836 = vmatmul.bf16.gmra.mxu2 %v11800_v61  ;;  %v5744_v8 = vrot.slane %v5740_v38, 4  ;;  %v5751_v20 = vor.u32 %v5749_v48, %v5748_v0  ;;  %v5952_v61 = vld [vmem:[#allocation3 + $0x98] sm:$0x1]  ;;  %5317 = vst [vmem:[#allocation3 + $0x9c] sm:$0x1] %v5316_v27  ;;  %v5763_v47 = vshrl.u32 %v5543_v34, 16  ;;  %v6256_v11 = vor.u32 %v6255_v49, %v14341_v5 }
 0x504   : > { %7523 = vmatmul.bf16.gmra.mxu0 %v11839_v21  ;;  %v5755_v21 = vshrl.u32 %v5542_v63, 16  ;;  %v11275_v54 = vrot.slane %v6890_v53, 9  ;;  %v6991_v2 = vrot.slane %v6039_v4, 5  ;;  %v5953_v14 = vsel %vm12416_vm3, %v5753_v18, %v5952_v61  ;;  %v5369_v38 = vld [vmem:[#allocation3 + $0xa4] sm:$0x1]  ;;  %v6802_v63 = vpop.f32.mrf.mxu2 }
 0x505   : > { %v5752_v15 = vsel %vm12439_vm7, %v5744_v8, %v5751_v20  ;;  %v5765_v23 = vrot.slane %v5763_v47, 7  ;;  %v6259_v12 = vshll.u32 %v6039_v4, 16  ;;  %5954 = vst [vmem:[#allocation3 + $0x98] sm:$0x1] %v5953_v14  ;;  %v5766_v40 = vshll.u32 %v5543_v34, 16 }
 0x506   : > { %5951 = vst [vmem:[#allocation3 + $0x94] sm:$0xf] %v5752_v15  ;;  %v5757_v39 = vrot.slane %v5755_v21, 7  ;;  %v6992_v25 = vsel %vm12724_vm14, %v6990_v57, %v6991_v2  ;;  %v6247_v6 = vrot.slane %v6246_v41, 4  ;;  %v5544_v26 = vpack.c.bf16 %v5512_v1, %v5512_v1  ;;  %v6891_v47 = vld [vmem:[#allocation3 + $0x6c] sm:$0xe] }
 0x507   : > { %v6257_v7 = vrot.slane %v6256_v11, 4  ;;  %v5768_v29 = vor.u32 %v5766_v40, %v5765_v23  ;;  %v5370_v56 = vsel %vm12423_vm4, 0, %v5369_v38  ;;  %v6989_v13 = vsel %vm12724_vm14, %v11275_v54, %v6988_v59  ;;  %v6040_v11 = vld [vmem:[#allocation3 + $0x74] sm:$0x1] }
 0x508   : > { %v5760_v22 = vor.u32 %v5758_v36, %v5757_v39  ;;  %v5761_v30 = vrot.slane %v5757_v39, 4  ;;  %v6264_v34 = vshrl.u32 %v6001_v55, 16  ;;  %5371 = vst [vmem:[#allocation3 + $0xa4] sm:$0x1] %v5370_v56  ;;  %v14363_v1 = vpack.c.bf16 %v5513_v9, %v5513_v9 }
 0x509   : > { %v7076_v60 = vunpack.c.l.b16 %v6992_v25  ;;  %v6261_v32 = vrot.slane %v6259_v12, 5  ;;  %v6252_v58 = vsel %vm12472_vm11, %v6247_v6, %v14341_v5  ;;  %v6273_v59 = vshll.u32 %v14354_v31, 16 }
 0x50a   : > { %v5769_v28 = vsel %vm12439_vm7, %v5761_v30, %v5768_v29  ;;  %v5955_v52 = vld [vmem:[#allocation3 + $0x9c] sm:$0xf]  ;;  %v6277_v49 = vshrl.u32 %v14354_v31, 16  ;;  %v7075_v8 = vunpack.c.l.b16 %v6989_v13  ;;  %v5319_v48 = vsel %vm12416_vm3, 0, %v5318_v42  ;;  %v11802_v29 = vld [vmem:[#allocation3 + $0x6c] sm:$0xff] }
 0x50b   : > { %v5956_v3 = vsel %vm12447_vm10, %v5760_v22, %v5955_v52  ;;  %5958 = vst [vmem:[#allocation3 + $0xa0] sm:$0xf] %v5769_v28  ;;  %v6262_v0 = vsel %vm12472_vm11, %v6257_v7, %v6261_v32  ;;  %v5772_v36 = vshrl.u32 %v5544_v26, 16  ;;  %v6266_v4 = vrot.slane %v6264_v34, 4  ;;  %v14396_v32 = vld [vmem:[#allocation3 + $0x7c] sm:$0xf] }
 0x50c   : > { %v5770_v5 = vrot.slane %v5765_v23, 4  ;;  %v7099_v27 = vpack.c.b16 %v7076_v60, %v7075_v8  ;;  %v6464_v20 = vunpack.c.l.b16 %v6252_v58  ;;  %v6995_v18 = vrot.slane %v14354_v31, 5  ;;  %5957 = vst [vmem:[#allocation3 + $0x9c] sm:$0xf] %v5956_v3 }
 0x50d   : > { %7214 = vmatmul.bf16.gmra.mxu3 %v7098_v35  ;;  %v6267_v35 = vshll.u32 %v6001_v55, 16  ;;  %v5780_v61 = vshrl.u32 %v14363_v1, 16  ;;  %v14380_v57 = vrot.slane %v6273_v59, 5  ;;  %v6279_v41 = vrot.slane %v6277_v49, 4  ;;  %5320 = vst [vmem:[#allocation3 + $0xa8] sm:$0x1] %v5319_v48  ;;  %v6804_v55 = vpop.f32.mrf.mxu2 }
 0x50e   : > { %v5514_v54 = vmax.f32 %v13953_v50, 0.0  ;;  %v5775_v39 = vshll.u32 %v5544_v26, 16  ;;  %v6997_v23 = vrot.slane %v6995_v18, 4  ;;  %v5515_v12 = vmax.f32 %v13956_v33, 0.0  ;;  %v5372_v48 = vld [vmem:[#allocation3 + $0xb0] sm:$0x1] }
 0x50f   : > { %v6269_v53 = vrot.slane %v6267_v35, 5  ;;  %v14385_v38 = vrot.slane %v5780_v61, 7  ;;  %v11276_v25 = vrot.slane %v6891_v47, 9  ;;  %v6280_v6 = vor.u32 %v6279_v41, %v14380_v57  ;;  %v11841_v35 = vld [vmem:[#allocation3 + $0x6c] sm:$0xff] }
 0x510   : > { %v6998_v22 = vrot.slane %v6040_v11, 5  ;;  %v5783_v7 = vshll.u32 %v14363_v1, 16  ;;  %v14390_v31 = vpack.c.bf16 %v5514_v54, %v5514_v54  ;;  %v6283_v60 = vshll.u32 %v6040_v11, 16  ;;  %v5324_v54 = vld [vmem:[#allocation3 + $0xc0] sm:$0x1] }
 0x511   : > { %v6270_v15 = vor.u32 %v6269_v53, %v6266_v4  ;;  %v5516_v52 = vmax.f32 %v13959_v62, 0.0  ;;  %v5517_v58 = vmax.f32 %v13962_v51, 0.0  ;;  %v6996_v49 = vsel %vm12724_vm14, %v11276_v25, %v6995_v18 }
 0x512   : > { %v6999_v42 = vsel %vm12724_vm14, %v6997_v23, %v6998_v22  ;;  %v5785_v1 = vor.u32 %v5783_v7, %v14385_v38  ;;  %v5547_v3 = vpack.c.bf16 %v5515_v12, %v5515_v12  ;;  %v5792_v62 = vshll.u32 %v14390_v31, 16  ;;  %v6892_v12 = vld [vmem:[#allocation3 + $0x78] sm:$0xe] }
 0x513   : > { %6603 = vmatmul.bf16.gmra.mxu1 %v6487_v37  ;;  %6841 = vmatmul.bf16.gmra.mxu2 %v11801_v43  ;;  %v6465_v37 = vunpack.c.l.b16 %v6262_v0  ;;  %v5959_v43 = vld [vmem:[#allocation3 + $0xa4] sm:$0x1]  ;;  %v6271_v56 = vrot.slane %v6270_v15, 4  ;;  %v7078_v53 = vunpack.c.l.b16 %v6999_v42  ;;  %v6285_v18 = vrot.slane %v6283_v60, 5 }
 0x514   : > { %7528 = vmatmul.bf16.gmra.mxu0 %v11840_v16  ;;  %v5774_v16 = vrot.slane %v5772_v36, 7  ;;  %v5960_v14 = vsel %vm12416_vm3, %v5770_v5, %v5959_v43  ;;  %v5962_v28 = vld [vmem:[#allocation3 + $0xa8] sm:$0xf]  ;;  %v5321_v36 = vld [vmem:[#allocation3 + $0xb4] sm:$0x1]  ;;  %v7002_v5 = vrot.slane %v14396_v32, 5  ;;  %v5548_v42 = vpack.c.bf16 %v5516_v52, %v5516_v52 }
 0x515   : > { %5961 = vst [vmem:[#allocation3 + $0xa4] sm:$0x1] %v5960_v14  ;;  %v6488_v40 = vpack.c.b16 %v6465_v37, %v6464_v20  ;;  %v6276_v20 = vsel %vm12472_vm11, %v6271_v56, %v14380_v57  ;;  %v6297_v61 = vshll.u32 %v14396_v32, 16  ;;  %v6301_v41 = vshrl.u32 %v14396_v32, 16 }
 0x516   : > { %v7180_v9 = vpop.f32.mrf.mxu3  ;;  %v5777_v50 = vor.u32 %v5775_v39, %v5774_v16  ;;  %v5778_v30 = vrot.slane %v5774_v16, 4  ;;  %v5373_v47 = vsel %vm12423_vm4, 0, %v5372_v48  ;;  %v5322_v43 = vsel %vm12416_vm3, 0, %v5321_v36 }
 0x517   : > { %v5789_v16 = vshrl.u32 %v14390_v31, 16  ;;  %5374 = vst [vmem:[#allocation3 + $0xb0] sm:$0x1] %v5373_v47  ;;  %v5797_v15 = vshrl.u32 %v5547_v3, 16  ;;  %v6466_v23 = vunpack.c.l.b16 %v6276_v20  ;;  %v5800_v22 = vshll.u32 %v5547_v3, 16 }
 0x518   : > { %v5786_v8 = vsel %vm12439_vm7, %v5778_v30, %v5785_v1  ;;  %v5963_v0 = vsel %vm12447_vm10, %v5777_v50, %v5962_v28  ;;  %5323 = vst [vmem:[#allocation3 + $0xb4] sm:$0x1] %v5322_v43  ;;  %v5325_v50 = vsel %vm12416_vm3, 0, %v5324_v54  ;;  %v14427_v7 = vrot.slane %v6297_v61, 5  ;;  %v11842_v61 = vld [vmem:[#allocation3 + $0x78] sm:$0xff] }
 0x519   : > { %5964 = vst [vmem:[#allocation3 + $0xa8] sm:$0xf] %v5963_v0  ;;  %v6303_v31 = vrot.slane %v6301_v41, 4  ;;  %v7004_v1 = vrot.slane %v7002_v5, 4  ;;  %v5806_v43 = vshrl.u32 %v5548_v42, 16  ;;  %v5809_v54 = vshll.u32 %v5548_v42, 16 }
 0x51a   : > { %v6569_v17 = vpop.f32.mrf.mxu1  ;;  %5965 = vst [vmem:[#allocation3 + $0xac] sm:$0xf] %v5786_v8 }
 0x51b   : > { %v6803_v21 = vadd.f32 %v6802_v63, %v6569_v17  ;;  %v11859_v63 = vld [vmem:[#allocation9 + $0x110] sm:$0xff]  ;;  %v6003_v17 = vld [vmem:[#allocation3 + $0x78] sm:$0xf]  ;;  %5326 = vst [vmem:[#allocation3 + $0xc0] sm:$0x1] %v5325_v50 }
 0x51c   : > { %8172 = vmatpush.bf16.msrb.mxu1 %v11859_v63  ;;  %v6291_v11 = vshll.u32 %v6003_v17, 16  ;;  %v5787_v63 = vrot.slane %v14385_v38, 4 }
 0x51d   : > { %7219 = vmatmul.bf16.gmra.mxu3 %v7099_v27  ;;  %v7260_v2 = vadd.f32 %v7180_v9, %v6803_v21  ;;  %v6281_v9 = vrot.slane %v6280_v6, 4  ;;  %v7077_v27 = vunpack.c.l.b16 %v6996_v49  ;;  %v5375_v21 = vld [vmem:[#allocation3 + $0xbc] sm:$0x1]  ;;  %v5799_v6 = vrot.slane %v5797_v15, 7 }
 0x51e   : > { %v7182_v34 = vpop.f32.mrf.mxu3  ;;  %v6293_v56 = vrot.slane %v6291_v11, 5  ;;  %v5549_v49 = vpack.c.bf16 %v5517_v58, %v5517_v58  ;;  %v5966_v48 = vld [vmem:[#allocation3 + $0xb0] sm:$0x1]  ;;  %v5808_v11 = vrot.slane %v5806_v43, 7 }
 0x51f   : > { %v6286_v57 = vsel %vm12472_vm11, %v6281_v9, %v6285_v18  ;;  %v7100_v39 = vpack.c.b16 %v7078_v53, %v7077_v27  ;;  %v5969_v53 = vld [vmem:[#allocation3 + $0xb4] sm:$0xf]  ;;  %v11803_v18 = vld [vmem:[#allocation3 + $0x78] sm:$0xff] }
 0x520   : > { %v6467_v30 = vunpack.c.l.b16 %v6286_v57  ;;  %v5812_v50 = vrot.slane %v5808_v11, 4 }
 0x521   : > { %v7494_v26 = vpop.f32.mrf.mxu0 }
 0x522   : > { %v6571_v13 = vpop.f32.mrf.mxu1  ;;  %v14392_v33 = vadd.f32 %v7494_v26, %v7260_v2  ;;  %v6288_v2 = vshrl.u32 %v6003_v17, 16  ;;  %v6489_v8 = vpack.c.b16 %v6467_v30, %v6466_v23  ;;  %v5817_v23 = vshll.u32 %v5549_v49, 16 }
 0x523   : > { %6608 = vmatmul.bf16.gmra.mxu1 %v6488_v40  ;;  %v6805_v59 = vadd.f32 %v6804_v55, %v6571_v13  ;;  %6846 = vmatmul.bf16.gmra.mxu2 %v11802_v29  ;;  %v5791_v55 = vrot.slane %v5789_v16, 7  ;;  %v5376_v40 = vsel %vm12423_vm4, 0, %v5375_v21  ;;  %v5802_v13 = vor.u32 %v5800_v22, %v5799_v6  ;;  %v14452_v16 = vld [vmem:[#allocation3 + $0x88] sm:$0xf] }
 0x524   : > { %7533 = vmatmul.bf16.gmra.mxu0 %v11841_v35  ;;  %5377 = vst [vmem:[#allocation3 + $0xbc] sm:$0x1] %v5376_v40  ;;  %v6290_v29 = vrot.slane %v6288_v2, 4  ;;  %v11277_v35 = vrot.slane %v6892_v12, 9  ;;  %v5976_v12 = vld [vmem:[#allocation3 + $0xc0] sm:$0xf]  ;;  %v5811_v22 = vor.u32 %v5809_v54, %v5808_v11 }
 0x525   : > { %v7261_v4 = vadd.f32 %v7182_v34, %v6805_v59  ;;  %v5795_v26 = vrot.slane %v5791_v55, 4  ;;  %v6041_v34 = vld [vmem:[#allocation3 + $0x80] sm:$0x1]  ;;  %v5794_v28 = vor.u32 %v5792_v62, %v5791_v55  ;;  %v5804_v59 = vrot.slane %v5799_v6, 4  ;;  %v6008_v11 = vld [vmem:[#allocation3 + $0x94] sm:$0xf] }
 0x526   : > { %v6807_v37 = vpop.f32.mrf.mxu2  ;;  %v7005_v36 = vrot.slane %v6041_v34, 5  ;;  %v6294_v52 = vor.u32 %v6293_v56, %v6290_v29  ;;  %v5967_v62 = vsel %vm12416_vm3, %v5787_v63, %v5966_v48  ;;  %v7003_v17 = vsel %vm12724_vm14, %v11277_v35, %v7002_v5 }
 0x527   : > { %v5803_v38 = vsel %vm12439_vm7, %v5795_v26, %v5802_v13  ;;  %v6307_v27 = vshll.u32 %v6041_v34, 16  ;;  %5968 = vst [vmem:[#allocation3 + $0xb0] sm:$0x1] %v5967_v62  ;;  %v5970_v41 = vsel %vm12447_vm10, %v5794_v28, %v5969_v53  ;;  %v5814_v5 = vshrl.u32 %v5549_v49, 16 }
 0x528   : > { %5972 = vst [vmem:[#allocation3 + $0xb8] sm:$0xf] %v5803_v38  ;;  %v7006_v21 = vsel %vm12724_vm14, %v7004_v1, %v7005_v36  ;;  %v6295_v57 = vrot.slane %v6294_v52, 4  ;;  %v7079_v15 = vunpack.c.l.b16 %v7003_v17  ;;  %v6321_v56 = vshll.u32 %v14452_v16, 16  ;;  %v6042_v52 = vld [vmem:[#allocation3 + $0x8c] sm:$0x1] }
 0x529   : > { %v7496_v14 = vpop.f32.mrf.mxu0  ;;  %5971 = vst [vmem:[#allocation3 + $0xb4] sm:$0xf] %v5970_v41  ;;  %v6309_v40 = vrot.slane %v6307_v27, 5  ;;  %v6325_v35 = vshrl.u32 %v14452_v16, 16  ;;  %v5977_v42 = vsel %vm12447_vm10, %v5811_v22, %v5976_v12  ;;  %v11843_v41 = vld [vmem:[#allocation3 + $0x84] sm:$0xff] }
 0x52a   : > { %v14423_v25 = vadd.f32 %v7496_v14, %v7261_v4  ;;  %v6304_v4 = vor.u32 %v6303_v31, %v14427_v7  ;;  %v7080_v14 = vunpack.c.l.b16 %v7006_v21  ;;  %v6300_v13 = vsel %vm12472_vm11, %v6295_v57, %v14427_v7  ;;  %5978 = vst [vmem:[#allocation3 + $0xc0] sm:$0xf] %v5977_v42  ;;  %v11858_v21 = vld [vmem:[#allocation9 + $0x108] sm:$0xff] }
 0x52b   : > { %v5973_v20 = vld [vmem:[#allocation3 + $0xbc] sm:$0x1]  ;;  %v7009_v7 = vrot.slane %v14452_v16, 5  ;;  %v6323_v48 = vrot.slane %v6321_v56, 5  ;;  %v6327_v38 = vrot.slane %v6325_v35, 4  ;;  %8173 = vmatpush.bf16.msrb.mxu1 %v11858_v21 }
 0x52c   : > { %v5974_v47 = vsel %vm12416_vm3, %v5804_v59, %v5973_v20  ;;  %v6305_v2 = vrot.slane %v6304_v4, 4  ;;  %v7101_v59 = vpack.c.b16 %v7080_v14, %v7079_v15  ;;  %v14487_v21 = vld [vmem:[#allocation3 + $0xa0] sm:$0xf] }
 0x52d   : > { %7224 = vmatmul.bf16.gmra.mxu3 %v7100_v39  ;;  %5975 = vst [vmem:[#allocation3 + $0xbc] sm:$0x1] %v5974_v47  ;;  %v14454_v39 = vrot.slane %v5814_v5, 7  ;;  %v6328_v27 = vor.u32 %v6327_v38, %v6323_v48  ;;  %v6331_v47 = vshll.u32 %v6042_v52, 16  ;;  %v6007_v5 = vld [vmem:[#allocation3 + $0x90] sm:$0xf] }
 0x52e   : > { %v6809_v0 = vpop.f32.mrf.mxu2  ;;  %v6310_v34 = vsel %vm12472_vm11, %v6305_v2, %v6309_v40  ;;  %v6336_v12 = vshrl.u32 %v6007_v5, 16 }
 0x52f   : > { %v5819_v63 = vor.u32 %v5817_v23, %v14454_v39  ;;  %v6329_v2 = vrot.slane %v6328_v27, 4  ;;  %v6333_v23 = vrot.slane %v6331_v47, 5  ;;  %v11844_v27 = vld [vmem:[#allocation3 + $0x90] sm:$0xff] }
 0x530   : > { %v6574_v60 = vpop.f32.mrf.mxu1  ;;  %v7185_v9 = vpop.f32.mrf.mxu3 }
 0x531   : > { %v6808_v3 = vadd.f32 %v6807_v37, %v6574_v60  ;;  %v7499_v58 = vpop.f32.mrf.mxu0  ;;  %v6005_v37 = vld [vmem:[#allocation3 + $0x84] sm:$0xf]  ;;  %v5820_v28 = vsel %vm12439_vm7, %v5812_v50, %v5819_v63 }
 0x532   : > { %v6312_v6 = vshrl.u32 %v6005_v37, 16  ;;  %v6315_v29 = vshll.u32 %v6005_v37, 16  ;;  %5979 = vst [vmem:[#allocation3 + $0xc4] sm:$0xf] %v5820_v28  ;;  %v11804_v37 = vld [vmem:[#allocation3 + $0x84] sm:$0xff]  ;;  %v7016_v28 = vrot.slane %v6008_v11, 5 }
 0x533   : > { %v7262_v51 = vadd.f32 %v7185_v9, %v6808_v3  ;;  %6613 = vmatmul.bf16.gmra.mxu1 %v6489_v8  ;;  %6851 = vmatmul.bf16.gmra.mxu2 %v11803_v18  ;;  %v6468_v3 = vunpack.c.l.b16 %v6300_v13  ;;  %v6469_v9 = vunpack.c.l.b16 %v6310_v34  ;;  %v6338_v34 = vrot.slane %v6336_v12, 4 }
 0x534   : > { %7538 = vmatmul.bf16.gmra.mxu0 %v11842_v61  ;;  %v6314_v8 = vrot.slane %v6312_v6, 4  ;;  %v7012_v61 = vrot.slane %v6042_v52, 5  ;;  %v7018_v52 = vrot.slane %v7016_v28, 4 }
 0x535   : > { %v14450_v32 = vadd.f32 %v7499_v58, %v7262_v51  ;;  %v6490_v62 = vpack.c.b16 %v6469_v9, %v6468_v3  ;;  %v7011_v51 = vrot.slane %v7009_v7, 4  ;;  %v11278_v58 = vrot.slane %v6893_v44, 9 }
 0x536   : > { %v6812_v26 = vpop.f32.mrf.mxu2 }
 0x537   : > { %v7013_v16 = vsel %vm12724_vm14, %v7011_v51, %v7012_v61  ;;  %v7010_v54 = vsel %vm12724_vm14, %v11278_v58, %v7009_v7  ;;  %v6043_v7 = vld [vmem:[#allocation3 + $0x98] sm:$0x1] }
 0x538   : > { %v6576_v55 = vpop.f32.mrf.mxu1  ;;  %v7187_v31 = vpop.f32.mrf.mxu3  ;;  %v7082_v14 = vunpack.c.l.b16 %v7013_v16  ;;  %v7081_v50 = vunpack.c.l.b16 %v7010_v54  ;;  %v7019_v51 = vrot.slane %v6043_v7, 5  ;;  %v6355_v58 = vshll.u32 %v6043_v7, 16 }
 0x539   : > { %v6810_v30 = vadd.f32 %v6809_v0, %v6576_v55  ;;  %v7501_v1 = vpop.f32.mrf.mxu0  ;;  %v6317_v0 = vrot.slane %v6315_v29, 5  ;;  %v6339_v55 = vshll.u32 %v6007_v5, 16  ;;  %v6349_v29 = vshrl.u32 %v6008_v11, 16 }
 0x53a   : > { %v7102_v13 = vpack.c.b16 %v7082_v14, %v7081_v50  ;;  %v7020_v61 = vsel %vm12724_vm14, %v7018_v52, %v7019_v51  ;;  %v6357_v16 = vrot.slane %v6355_v58, 5  ;;  %v11870_v52 = vld [vmem:[#allocation9 + $0x168] sm:$0xff]  ;;  %v11857_v58 = vld [vmem:[#allocation9 + $0x100] sm:$0xff] }
 0x53b   : > { %v7263_v60 = vadd.f32 %v7187_v31, %v6810_v30  ;;  %v6318_v17 = vor.u32 %v6317_v0, %v6314_v8  ;;  %v6334_v31 = vsel %vm12472_vm11, %v6329_v2, %v6333_v23  ;;  %v6341_v35 = vrot.slane %v6339_v55, 5  ;;  %v6894_v8 = vld [vmem:[#allocation3 + $0x90] sm:$0xe]  ;;  %8174 = vmatpush.bf16.msrb.mxu1 %v11857_v58 }
 0x53c   : > { %v6351_v3 = vrot.slane %v6349_v29, 4  ;;  %v7084_v54 = vunpack.c.l.b16 %v7020_v61  ;;  %v6369_v2 = vshll.u32 %v14487_v21, 16  ;;  %v7023_v29 = vrot.slane %v14487_v21, 5  ;;  %v11892_v58 = vld [vmem:[#allocation9 + $0x198] sm:$0xff] }
 0x53d   : > { %v14468_v49 = vadd.f32 %v7501_v1, %v7263_v60  ;;  %7229 = vmatmul.bf16.gmra.mxu3 %v7101_v59  ;;  %v6319_v57 = vrot.slane %v6318_v17, 4  ;;  %v6471_v1 = vunpack.c.l.b16 %v6334_v31  ;;  %v6342_v0 = vor.u32 %v6341_v35, %v6338_v34  ;;  %v11805_v17 = vld [vmem:[#allocation3 + $0x90] sm:$0xff] }
 0x53e   : > { %v6814_v53 = vpop.f32.mrf.mxu2 }
 0x53f   : > { %v6324_v30 = vsel %vm12472_vm11, %v6319_v57, %v6323_v48 }
 0x540   : > { %v6579_v36 = vpop.f32.mrf.mxu1  ;;  %v7190_v45 = vpop.f32.mrf.mxu3  ;;  %v6470_v60 = vunpack.c.l.b16 %v6324_v30 }
 0x541   : > { %v6813_v4 = vadd.f32 %v6812_v26, %v6579_v36  ;;  %v7504_v18 = vpop.f32.mrf.mxu0  ;;  %v6345_v26 = vshll.u32 %v6008_v11, 16  ;;  %v6373_v11 = vshrl.u32 %v14487_v21, 16 }
 0x542   : > { %v6491_v44 = vpack.c.b16 %v6471_v1, %v6470_v60  ;;  %v11871_v1 = vld [vmem:[#allocation9 + $0x170] sm:$0xff] }
 0x543   : > { %v7264_v20 = vadd.f32 %v7190_v45, %v6813_v4  ;;  %6618 = vmatmul.bf16.gmra.mxu1 %v6490_v62  ;;  %6856 = vmatmul.bf16.gmra.mxu2 %v11804_v37  ;;  %v6347_v59 = vrot.slane %v6345_v26, 5 }
 0x544   : > { %7543 = vmatmul.bf16.gmra.mxu0 %v11843_v41  ;;  %v6009_v41 = vld [vmem:[#allocation3 + $0x9c] sm:$0xf] }
 0x545   : > { %v14471_v43 = vadd.f32 %v7504_v18, %v7264_v20  ;;  %v6352_v4 = vor.u32 %v6351_v3, %v6347_v59  ;;  %v6343_v20 = vrot.slane %v6342_v0, 4  ;;  %v6360_v12 = vshrl.u32 %v6009_v41, 16  ;;  %v6895_v3 = vld [vmem:[#allocation3 + $0x9c] sm:$0xe] }
 0x546   : > { %v6817_v22 = vpop.f32.mrf.mxu2  ;;  %v6363_v55 = vshll.u32 %v6009_v41, 16 }
 0x547   : > { %v6353_v37 = vrot.slane %v6352_v4, 4  ;;  %v6348_v57 = vsel %vm12472_vm11, %v6343_v20, %v6347_v59  ;;  %v6362_v35 = vrot.slane %v6360_v12, 4  ;;  %v11845_v20 = vld [vmem:[#allocation3 + $0x9c] sm:$0xff] }
 0x548   : > { %v6581_v15 = vpop.f32.mrf.mxu1  ;;  %v7192_v6 = vpop.f32.mrf.mxu3  ;;  %v6472_v31 = vunpack.c.l.b16 %v6348_v57  ;;  %v6365_v60 = vrot.slane %v6363_v55, 5  ;;  %v14509_v57 = vld [vmem:[#allocation3 + $0xac] sm:$0xf] }
 0x549   : > { %v6815_v40 = vadd.f32 %v6814_v53, %v6581_v15  ;;  %v7506_v63 = vpop.f32.mrf.mxu0  ;;  %v11279_v53 = vrot.slane %v6894_v8, 9 }
 0x54b   : > { %v7265_v56 = vadd.f32 %v7192_v6, %v6815_v40  ;;  %v7017_v47 = vsel %vm12724_vm14, %v11279_v53, %v7016_v28  ;;  %v11872_v40 = vld [vmem:[#allocation9 + $0x178] sm:$0xff]  ;;  %v6044_v28 = vld [vmem:[#allocation3 + $0xa4] sm:$0x1]  ;;  %v11280_v53 = vrot.slane %v6895_v3, 9 }
 0x54c   : > { %v7083_v6 = vunpack.c.l.b16 %v7017_v47  ;;  %8593 = vmatpush.bf16.msra.mxu2 %v11872_v40  ;;  %v6379_v4 = vshll.u32 %v6044_v28, 16  ;;  %v7026_v51 = vrot.slane %v6044_v28, 5  ;;  %v11869_v47 = vld [vmem:[#allocation9 + $0x160] sm:$0xff] }
 0x54d   : > { %v14481_v42 = vadd.f32 %v7506_v63, %v7265_v56  ;;  %7234 = vmatmul.bf16.gmra.mxu3 %v7102_v13  ;;  %v14498_v56 = vrot.slane %v6369_v2, 5  ;;  %v6375_v63 = vrot.slane %v6373_v11, 4 }
 0x54e   : > { %v6819_v36 = vpop.f32.mrf.mxu2  ;;  %v7103_v26 = vpack.c.b16 %v7084_v54, %v7083_v6  ;;  %v7024_v54 = vsel %vm12724_vm14, %v11280_v53, %v7023_v29 }
 0x550   : > { %v6584_v9 = vpop.f32.mrf.mxu1  ;;  %v7195_v38 = vpop.f32.mrf.mxu3  ;;  %8594 = vmatpush.bf16.msra.mxu2 %v11871_v1 }
 0x551   : > { %v6818_v48 = vadd.f32 %v6817_v22, %v6584_v9  ;;  %v7509_v62 = vpop.f32.mrf.mxu0  ;;  %v6358_v22 = vsel %vm12472_vm11, %v6353_v37, %v6357_v16  ;;  %v6376_v9 = vor.u32 %v6375_v63, %v14498_v56  ;;  %v6381_v16 = vrot.slane %v6379_v4, 5 }
 0x552   : > { %v6473_v34 = vunpack.c.l.b16 %v6358_v22  ;;  %v11894_v22 = vld [vmem:[#allocation9 + $0x1a8] sm:$0xff] }
 0x553   : > { %v7266_v45 = vadd.f32 %v7195_v38, %v6818_v48  ;;  %6623 = vmatmul.bf16.gmra.mxu1 %v6491_v44  ;;  %6861 = vmatmul.bf16.gmra.mxu2 %v11805_v17  ;;  %v7025_v38 = vrot.slane %v7023_v29, 4  ;;  %v6366_v44 = vor.u32 %v6365_v60, %v6362_v35  ;;  %v11895_v17 = vld [vmem:[#allocation9 + $0x1b0] sm:$0xff]  ;;  %v6377_v61 = vrot.slane %v6376_v9, 4  ;;  %v11893_v35 = vld [vmem:[#allocation9 + $0x1a0] sm:$0xff] }
 0x554   : > { %7548 = vmatmul.bf16.gmra.mxu0 %v11844_v27  ;;  %v6492_v0 = vpack.c.b16 %v6473_v34, %v6472_v31  ;;  %v11806_v27 = vld [vmem:[#allocation3 + $0x9c] sm:$0xff]  ;;  %8595 = vmatpush.bf16.msra.mxu2 %v11870_v52  ;;  %v7085_v31 = vunpack.c.l.b16 %v7024_v54  ;;  %v6397_v29 = vshrl.u32 %v14509_v57, 16  ;;  %v11846_v54 = vld [vmem:[#allocation3 + $0xa8] sm:$0xff] }
 0x555   : > { %v14483_v18 = vadd.f32 %v7509_v62, %v7266_v45  ;;  %v7027_v37 = vsel %vm12724_vm14, %v7025_v38, %v7026_v51  ;;  %v6367_v41 = vrot.slane %v6366_v44, 4  ;;  %v6045_v44 = vld [vmem:[#allocation3 + $0xb0] sm:$0x1] }
 0x556   : > { %v6822_v23 = vpop.f32.mrf.mxu2  ;;  %v7086_v11 = vunpack.c.l.b16 %v7027_v37 }
 0x557   : > { %v6372_v55 = vsel %vm12472_vm11, %v6367_v41, %v14498_v56 }
 0x558   : > { %v6586_v5 = vpop.f32.mrf.mxu1  ;;  %v7197_v14 = vpop.f32.mrf.mxu3  ;;  %8596 = vmatpush.bf16.msra.mxu2 %v11869_v47  ;;  %v7104_v60 = vpack.c.b16 %v7086_v11, %v7085_v31  ;;  %v6474_v1 = vunpack.c.l.b16 %v6372_v55  ;;  %v7033_v47 = vrot.slane %v6045_v44, 5  ;;  %v14528_v55 = vld [vmem:[#allocation3 + $0xb8] sm:$0xf] }
 0x559   : > { %v6820_v15 = vadd.f32 %v6819_v36, %v6586_v5  ;;  %v7511_v30 = vpop.f32.mrf.mxu0  ;;  %v11896_v36 = vld [vmem:[#allocation9 + $0x1b8] sm:$0xff]  ;;  %v6011_v5 = vld [vmem:[#allocation3 + $0xa8] sm:$0xf] }
 0x55a   : > { %8908 = vmatpush.bf16.msra.mxu3 %v11896_v36  ;;  %v6384_v40 = vshrl.u32 %v6011_v5, 16  ;;  %v6387_v6 = vshll.u32 %v6011_v5, 16  ;;  %v6896_v36 = vld [vmem:[#allocation3 + $0xa8] sm:$0xe] }
 0x55b   : > { %v7267_v50 = vadd.f32 %v7197_v14, %v6820_v15  ;;  %v6382_v15 = vsel %vm12472_vm11, %v6377_v61, %v6381_v16  ;;  %v11281_v41 = vrot.slane %v6896_v36, 9  ;;  %v11891_v16 = vld [vmem:[#allocation9 + $0x190] sm:$0xff] }
 0x55c   : > { %v6475_v28 = vunpack.c.l.b16 %v6382_v15  ;;  %v6386_v3 = vrot.slane %v6384_v40, 4  ;;  %v6389_v9 = vrot.slane %v6387_v6, 5  ;;  %v11807_v5 = vld [vmem:[#allocation3 + $0xa8] sm:$0xff]  ;;  %v6013_v6 = vld [vmem:[#allocation3 + $0xb4] sm:$0xf] }
 0x55d   : > { %v14500_v13 = vadd.f32 %v7511_v30, %v7267_v50  ;;  %7239 = vmatmul.bf16.gmra.mxu3 %v7103_v26  ;;  %v11868_v50 = vld [vmem:[#allocation9 + $0x158] sm:$0xff]  ;;  %v6393_v26 = vshll.u32 %v14509_v57, 16 }
 0x55e   : > { %v6824_v48 = vpop.f32.mrf.mxu2  ;;  %8909 = vmatpush.bf16.msra.mxu3 %v11895_v17  ;;  %v11904_v30 = vld [vmem:[#allocation9 + $0x1f8] sm:$0xff]  ;;  %8597 = vmatpush.bf16.msra.mxu2 %v11868_v50  ;;  %v6390_v51 = vor.u32 %v6389_v9, %v6386_v3  ;;  %v11866_v17 = vld [vmem:[#allocation9 + $0x148] sm:$0xff]  ;;  %v6408_v3 = vshrl.u32 %v6013_v6, 16  ;;  %v6411_v9 = vshll.u32 %v6013_v6, 16 }
 0x55f   : > { %9590 = vmatpush.bf16.msra.mxu0 %v11904_v30  ;;  %v11808_v6 = vld [vmem:[#allocation3 + $0xb4] sm:$0xff] }
 0x560   : > { %v6589_v59 = vpop.f32.mrf.mxu1  ;;  %v7200_v8 = vpop.f32.mrf.mxu3  ;;  %v6391_v15 = vrot.slane %v6390_v51, 4  ;;  %v6413_v51 = vrot.slane %v6411_v9, 5 }
 0x561   : > { %v6823_v7 = vadd.f32 %v6822_v23, %v6589_v59  ;;  %v7514_v62 = vpop.f32.mrf.mxu0  ;;  %v7030_v59 = vrot.slane %v14509_v57, 5  ;;  %v6403_v57 = vshll.u32 %v6045_v44, 16 }
 0x562   : > { %8910 = vmatpush.bf16.msra.mxu3 %v11894_v22 }
 0x563   : > { %v7268_v45 = vadd.f32 %v7200_v8, %v6823_v7  ;;  %6628 = vmatmul.bf16.gmra.mxu1 %v6492_v0  ;;  %6866 = vmatmul.bf16.gmra.mxu2 %v11806_v27  ;;  %v11867_v7 = vld [vmem:[#allocation9 + $0x150] sm:$0xff]  ;;  %v14521_v0 = vrot.slane %v6393_v26, 5  ;;  %v7032_v53 = vrot.slane %v7030_v59, 4  ;;  %v11902_v27 = vld [vmem:[#allocation9 + $0x1e8] sm:$0xff]  ;;  %v7031_v40 = vsel %vm12724_vm14, %v11281_v41, %v7030_v59 }
 0x564   : > { %7553 = vmatmul.bf16.gmra.mxu0 %v11845_v20  ;;  %v11903_v8 = vld [vmem:[#allocation9 + $0x1f0] sm:$0xff]  ;;  %8598 = vmatpush.bf16.msra.mxu2 %v11867_v7  ;;  %v6405_v30 = vrot.slane %v6403_v57, 5 }
 0x565   : > { %v14503_v21 = vadd.f32 %v7514_v62, %v7268_v45  ;;  %9591 = vmatpush.bf16.msra.mxu0 %v11903_v8  ;;  %v6493_v45 = vpack.c.b16 %v6475_v28, %v6474_v1  ;;  %v7034_v11 = vsel %vm12724_vm14, %v7032_v53, %v7033_v47  ;;  %v11900_v1 = vld [vmem:[#allocation9 + $0x1d8] sm:$0xff]  ;;  %v7087_v28 = vunpack.c.l.b16 %v7031_v40 }
 0x566   : > { %v6827_v12 = vpop.f32.mrf.mxu2  ;;  %8911 = vmatpush.bf16.msra.mxu3 %v11893_v35  ;;  %v7088_v50 = vunpack.c.l.b16 %v7034_v11  ;;  %v6421_v35 = vshrl.u32 %v14528_v55, 16  ;;  %v6410_v53 = vrot.slane %v6408_v3, 4  ;;  %v11912_v40 = vld [vmem:[#allocation9 + $0x238] sm:$0xff] }
 0x567   : > { %10016 = vmatpush.bf16.msra.mxu1 %v11912_v40  ;;  %v7608_v3 = vld [vmem:[#allocation3 + $0x14] sm:$0x1] }
 0x568   : > { %v6591_v2 = vpop.f32.mrf.mxu1  ;;  %v7202_v23 = vpop.f32.mrf.mxu3  ;;  %8599 = vmatpush.bf16.msra.mxu2 %v11866_v17  ;;  %v6897_v17 = vld [vmem:[#allocation3 + $0xb4] sm:$0xe] }
 0x569   : > { %v6825_v14 = vadd.f32 %v6824_v48, %v6591_v2  ;;  %v7516_v34 = vpop.f32.mrf.mxu0  ;;  %v6399_v48 = vrot.slane %v6397_v29, 4  ;;  %9592 = vmatpush.bf16.msra.mxu0 %v11902_v27  ;;  %v11282_v57 = vrot.slane %v6897_v17, 9 }
 0x56a   : > { %8912 = vmatpush.bf16.msra.mxu3 %v11892_v58  ;;  %v6046_v58 = vld [vmem:[#allocation3 + $0xbc] sm:$0x1] }
 0x56b   : > { %v7269_v63 = vadd.f32 %v7202_v23, %v6825_v14  ;;  %v6400_v20 = vor.u32 %v6399_v48, %v14521_v0  ;;  %v11865_v14 = vld [vmem:[#allocation9 + $0x140] sm:$0xff]  ;;  %v7040_v11 = vrot.slane %v6046_v58, 5 }
 0x56c   : > { %v11901_v23 = vld [vmem:[#allocation9 + $0x1e0] sm:$0xff]  ;;  %8600 = vmatpush.bf16.msra.mxu2 %v11865_v14 }
 0x56d   : > { %v14518_v56 = vadd.f32 %v7516_v34, %v7269_v63  ;;  %7244 = vmatmul.bf16.gmra.mxu3 %v7104_v60  ;;  %9593 = vmatpush.bf16.msra.mxu0 %v11901_v23  ;;  %v6396_v63 = vsel %vm12472_vm11, %v6391_v15, %v14521_v0  ;;  %v6417_v34 = vshll.u32 %v14528_v55, 16  ;;  %v11890_v60 = vld [vmem:[#allocation9 + $0x188] sm:$0xff]  ;;  %v11889_v48 = vld [vmem:[#allocation9 + $0x180] sm:$0xff]  ;;  %v7037_v0 = vrot.slane %v14528_v55, 5  ;;  %v7606_v55 = vld [vmem:[#allocation3 + $0xc] sm:$0xf] }
 0x56e   : > { %v6829_v62 = vpop.f32.mrf.mxu2  ;;  %8913 = vmatpush.bf16.msra.mxu3 %v11891_v16  ;;  %v6476_v44 = vunpack.c.l.b16 %v6396_v63  ;;  %v6414_v15 = vor.u32 %v6413_v51, %v6410_v53  ;;  %v9029_v53 = vld [vmem:[#allocation3 + $0x18] sm:$0xf] }
 0x56f   : > { %v7038_v63 = vsel %vm12724_vm14, %v11282_v57, %v7037_v0  ;;  %v9078_v57 = vshrl.u32 %v9029_v53, 16 }
 0x570   : > { %v6594_v38 = vpop.f32.mrf.mxu1  ;;  %v7205_v4 = vpop.f32.mrf.mxu3 }
 0x571   : > { %v6828_v52 = vadd.f32 %v6827_v12, %v6594_v38  ;;  %v7519_v37 = vpop.f32.mrf.mxu0  ;;  %v6401_v12 = vrot.slane %v6400_v20, 4  ;;  %v7105_v38 = vpack.c.b16 %v7088_v50, %v7087_v28  ;;  %9594 = vmatpush.bf16.msra.mxu0 %v11900_v1  ;;  %v7039_v20 = vrot.slane %v7037_v0, 4 }
 0x572   : > { %8914 = vmatpush.bf16.msra.mxu3 %v11890_v60  ;;  %v7655_v60 = vshrl.u32 %v7606_v55, 16  ;;  %v7658_v1 = vshll.u32 %v7606_v55, 16 }
 0x573   : > { %v7270_v61 = vadd.f32 %v7205_v4, %v6828_v52  ;;  %6633 = vmatmul.bf16.gmra.mxu1 %v6493_v45  ;;  %6871 = vmatmul.bf16.gmra.mxu2 %v11807_v5  ;;  %v6406_v59 = vsel %vm12472_vm11, %v6401_v12, %v6405_v30  ;;  %v14542_v4 = vrot.slane %v6417_v34, 5  ;;  %v6423_v45 = vrot.slane %v6421_v35, 4  ;;  %v14545_v5 = vld [vmem:[#allocation3 + $0x10] sm:$0xf]  ;;  %v8288_v35 = vld [vmem:[#allocation3 + $0xc] sm:$0xe] }
 0x574   : > { %7558 = vmatmul.bf16.gmra.mxu0 %v11846_v54  ;;  %v6477_v52 = vunpack.c.l.b16 %v6406_v59  ;;  %v11898_v54 = vld [vmem:[#allocation9 + $0x1c8] sm:$0xff]  ;;  %v6427_v12 = vshll.u32 %v6046_v58, 16  ;;  %v7041_v50 = vsel %vm12724_vm14, %v7039_v20, %v7040_v11  ;;  %v8354_v30 = vrot.slane %v14545_v5, 5  ;;  %v9030_v20 = vld [vmem:[#allocation3 + $0x1c] sm:$0xf] }
 0x575   : > { %v14524_v2 = vadd.f32 %v7519_v37, %v7270_v61  ;;  %v6424_v16 = vor.u32 %v6423_v45, %v14542_v4  ;;  %v6415_v34 = vrot.slane %v6414_v15, 4  ;;  %v7090_v28 = vunpack.c.l.b16 %v7041_v50 }
 0x576   : > { %v6832_v29 = vpop.f32.mrf.mxu2  ;;  %8915 = vmatpush.bf16.msra.mxu3 %v11889_v48  ;;  %v6494_v41 = vpack.c.b16 %v6477_v52, %v6476_v44  ;;  %v6429_v59 = vrot.slane %v6427_v12, 5  ;;  %v7664_v9 = vshll.u32 %v14545_v5, 16  ;;  %v8356_v48 = vrot.slane %v8354_v30, 4 }
 0x577   : > { %v7089_v45 = vunpack.c.l.b16 %v7038_v63  ;;  %v6420_v51 = vsel %vm12472_vm11, %v6415_v34, %v14542_v4  ;;  %v8357_v58 = vrot.slane %v7608_v3, 5  ;;  %v7657_v17 = vrot.slane %v7655_v60, 4 }
 0x578   : > { %v6596_v22 = vpop.f32.mrf.mxu1  ;;  %v7207_v26 = vpop.f32.mrf.mxu3  ;;  %v9081_v11 = vshll.u32 %v9029_v53, 16  ;;  %v9091_v4 = vshrl.u32 %v9030_v20, 16  ;;  %v7674_v50 = vshll.u32 %v7608_v3, 16 }
 0x579   : > { %v6830_v31 = vadd.f32 %v6829_v62, %v6596_v22  ;;  %v7521_v8 = vpop.f32.mrf.mxu0  ;;  %v11899_v62 = vld [vmem:[#allocation9 + $0x1d0] sm:$0xff]  ;;  %v11847_v22 = vld [vmem:[#allocation3 + $0xb4] sm:$0xff] }
 0x57a   : > { %9595 = vmatpush.bf16.msra.mxu0 %v11899_v62  ;;  %v11443_v62 = vrot.slane %v8288_v35, 9  ;;  %v7676_v53 = vrot.slane %v7674_v50, 5 }
 0x57b   : > { %v7271_v7 = vadd.f32 %v7207_v26, %v6830_v31  ;;  %v6425_v26 = vrot.slane %v6424_v16, 4 }
 0x57c   : > { %v8355_v55 = vsel %vm12724_vm14, %v11443_v62, %v8354_v30 }
 0x57d   : > { %v14540_v36 = vadd.f32 %v7521_v8, %v7271_v7  ;;  %7249 = vmatmul.bf16.gmra.mxu3 %v7105_v38  ;;  %v7668_v7 = vshrl.u32 %v14545_v5, 16  ;;  %v6430_v0 = vsel %vm12472_vm11, %v6425_v26, %v6429_v59  ;;  %v9080_v26 = vrot.slane %v9078_v57, 4 }
 0x57e   : > { %v6834_v47 = vpop.f32.mrf.mxu2  ;;  %9596 = vmatpush.bf16.msra.mxu0 %v11898_v54  ;;  %v6479_v5 = vunpack.c.l.b16 %v6430_v0  ;;  %v8358_v54 = vsel %vm12724_vm14, %v8356_v48, %v8357_v58  ;;  %v9093_v59 = vrot.slane %v9091_v4, 4 }
 0x57f   : > { %v7670_v16 = vrot.slane %v7668_v7, 4 }
 0x580   : > { %v6599_v27 = vpop.f32.mrf.mxu1  ;;  %v7210_v37 = vpop.f32.mrf.mxu3 }
 0x581   : > { %v6833_v61 = vadd.f32 %v6832_v29, %v6599_v27  ;;  %v7524_v23 = vpop.f32.mrf.mxu0  ;;  %v11897_v29 = vld [vmem:[#allocation9 + $0x1c0] sm:$0xff]  ;;  %v7660_v27 = vrot.slane %v7658_v1, 5 }
 0x582   : > { %9597 = vmatpush.bf16.msra.mxu0 %v11897_v29  ;;  %v9083_v29 = vrot.slane %v9081_v11, 5  ;;  %v14567_v1 = vld [vmem:[#allocation3 + $0x1c] sm:$0xf] }
 0x583   : > { %v7272_v14 = vadd.f32 %v7210_v37, %v6833_v61  ;;  %6638 = vmatmul.bf16.gmra.mxu1 %v6494_v41  ;;  %6876 = vmatmul.bf16.gmra.mxu2 %v11808_v6  ;;  %v7106_v41 = vpack.c.b16 %v7090_v28, %v7089_v45  ;;  %v7661_v12 = vor.u32 %v7660_v27, %v7657_v17  ;;  %v8361_v45 = vrot.slane %v14567_v1, 5  ;;  %v14577_v17 = vld [vmem:[#allocation3 + $0x20] sm:$0x1]  ;;  %v8289_v27 = vld [vmem:[#allocation3 + $0x18] sm:$0xe] }
 0x584   : > { %7563 = vmatmul.bf16.gmra.mxu0 %v11847_v22  ;;  %v8482_v22 = vunpack.c.l.b16 %v8358_v54  ;;  %v9084_v0 = vor.u32 %v9083_v29, %v9080_v26  ;;  %v9033_v29 = vld [vmem:[#allocation3 + $0x28] sm:$0xf] }
 0x585   : > { %v14550_v31 = vadd.f32 %v7524_v23, %v7272_v14  ;;  %v6478_v14 = vunpack.c.l.b16 %v6420_v51  ;;  %v9087_v23 = vshll.u32 %v9030_v20, 16  ;;  %v7662_v7 = vrot.slane %v7661_v12, 4 }
 0x586   : > { %v6837_v52 = vpop.f32.mrf.mxu2  ;;  %v8363_v57 = vrot.slane %v8361_v45, 4  ;;  %v9085_v11 = vrot.slane %v9084_v0, 4  ;;  %v8364_v12 = vrot.slane %v14577_v17, 5 }
 0x587   : > { %v6495_v35 = vpack.c.b16 %v6479_v5, %v6478_v14  ;;  %v14569_v28 = vrot.slane %v9087_v23, 5  ;;  %v7692_v5 = vshrl.u32 %v14567_v1, 16 }
 0x588   : > { %v6601_v8 = vpop.f32.mrf.mxu1  ;;  %v7212_v44 = vpop.f32.mrf.mxu3 }
 0x589   : > { %v6835_v38 = vadd.f32 %v6834_v47, %v6601_v8  ;;  %v7526_v37 = vpop.f32.mrf.mxu0  ;;  %v7666_v47 = vrot.slane %v7664_v9, 5  ;;  %v8481_v9 = vunpack.c.l.b16 %v8355_v55  ;;  %v9094_v51 = vor.u32 %v9093_v59, %v14569_v28 }
 0x58a   : > { %v7694_v59 = vrot.slane %v7692_v5, 4 }
 0x58b   : > { %v7273_v61 = vadd.f32 %v7212_v44, %v6835_v38  ;;  %v7671_v40 = vor.u32 %v7670_v16, %v7666_v47  ;;  %v7609_v38 = vld [vmem:[#allocation3 + $0x18] sm:$0xf]  ;;  %v11848_v44 = vld [vmem:[#allocation3 + $0xc0] sm:$0xff]  ;;  %v8513_v3 = vpack.c.b16 %v8482_v22, %v8481_v9  ;;  %v7667_v58 = vsel %vm12472_vm11, %v7662_v7, %v7666_v47 }
 0x58c   : > { %v7679_v20 = vshrl.u32 %v7609_v38, 16  ;;  %v7688_v16 = vshll.u32 %v14567_v1, 16  ;;  %v11444_v47 = vrot.slane %v8289_v27, 9  ;;  %v9095_v55 = vrot.slane %v9094_v51, 4  ;;  %v11873_v9 = vld [vmem:[#allocation3 + $0x18] sm:$0xff] }
 0x58d   : > { %v14563_v15 = vadd.f32 %v7526_v37, %v7273_v61  ;;  %7254 = vmatmul.bf16.gmra.mxu3 %v7106_v41  ;;  %v7672_v48 = vrot.slane %v7671_v40, 4  ;;  %v7682_v61 = vshll.u32 %v7609_v38, 16  ;;  %v9032_v40 = vld [vmem:[#allocation3 + $0x24] sm:$0xf]  ;;  %v9090_v7 = vsel %vm12472_vm11, %v9085_v11, %v14569_v28 }
 0x58e   : > { %v6839_v60 = vpop.f32.mrf.mxu2  ;;  %v7681_v50 = vrot.slane %v7679_v20, 4  ;;  %v14584_v1 = vrot.slane %v7688_v16, 5  ;;  %v9478_v28 = vunpack.c.l.b16 %v9090_v7 }
 0x58f   : > { %v7677_v37 = vsel %vm12472_vm11, %v7672_v48, %v7676_v53  ;;  %v7684_v26 = vrot.slane %v7682_v61, 5  ;;  %v8362_v53 = vsel %vm12724_vm14, %v11444_v47, %v8361_v45 }
 0x590   : > { %v6604_v6 = vpop.f32.mrf.mxu1  ;;  %v7215_v34 = vpop.f32.mrf.mxu3  ;;  %v8056_v22 = vunpack.c.l.b16 %v7677_v37 }
 0x591   : > { %v6838_v63 = vadd.f32 %v6837_v52, %v6604_v6  ;;  %v7529_v30 = vpop.f32.mrf.mxu0  ;;  %v9031_v52 = vld [vmem:[#allocation3 + $0x20] sm:$0x1]  ;;  %v8055_v6 = vunpack.c.l.b16 %v7667_v58  ;;  %v7695_v58 = vor.u32 %v7694_v59, %v14584_v1  ;;  %v14610_v59 = vld [vmem:[#allocation3 + $0x2c] sm:$0x1] }
 0x592   : > { %v9097_v41 = vshll.u32 %v9031_v52, 16  ;;  %v7685_v52 = vor.u32 %v7684_v26, %v7681_v50  ;;  %v9034_v26 = vld [vmem:[#allocation3 + $0x2c] sm:$0x1] }
 0x593   : > { %v7274_v8 = vadd.f32 %v7215_v34, %v6838_v63  ;;  %6643 = vmatmul.bf16.gmra.mxu1 %v6495_v35  ;;  %8601 = vmatmul.bf16.vlgmr.msra.gmra.mxu2 %v8513_v3  ;;  %v9115_v3 = vshrl.u32 %v9033_v29, 16  ;;  %v8087_v0 = vpack.c.b16 %v8056_v22, %v8055_v6  ;;  %v11911_v6 = vld [vmem:[#allocation9 + $0x230] sm:$0xff] }
 0x594   : > { %7568 = vmatmul.bf16.gmra.mxu0 %v11848_v44  ;;  %v9099_v35 = vrot.slane %v9097_v41, 5  ;;  %v9111_v44 = vshll.u32 %v9033_v29, 16  ;;  %v7686_v45 = vrot.slane %v7685_v52, 4  ;;  %10017 = vmatpush.bf16.msra.mxu1 %v11911_v6 }
 0x595   : > { %v14572_v62 = vadd.f32 %v7529_v30, %v7274_v8  ;;  %v9102_v8 = vshrl.u32 %v9032_v40, 16  ;;  %v9105_v30 = vshll.u32 %v9032_v40, 16  ;;  %v7612_v40 = vld [vmem:[#allocation3 + $0x24] sm:$0xf] }
 0x596   : > { %v6842_v4 = vpop.f32.mrf.mxu2  ;;  %v9100_v38 = vsel %vm12472_vm11, %v9095_v55, %v9099_v35  ;;  %v14601_v11 = vrot.slane %v9111_v44, 5  ;;  %v7696_v55 = vrot.slane %v7695_v58, 4  ;;  %v7691_v35 = vsel %vm12472_vm11, %v7686_v45, %v14584_v1 }
 0x597   : > { %v9479_v20 = vunpack.c.l.b16 %v9100_v38  ;;  %v9104_v61 = vrot.slane %v9102_v8, 4  ;;  %v9107_v37 = vrot.slane %v9105_v30, 5  ;;  %v7706_v7 = vshll.u32 %v7612_v40, 16 }
 0x598   : > { %v6606_v54 = vpop.f32.mrf.mxu1  ;;  %v7217_v23 = vpop.f32.mrf.mxu3  ;;  %v9121_v30 = vshll.u32 %v9034_v26, 16 }
 0x599   : > { %v6840_v14 = vadd.f32 %v6839_v60, %v6606_v54  ;;  %v7531_v34 = vpop.f32.mrf.mxu0  ;;  %v8365_v60 = vsel %vm12724_vm14, %v8363_v57, %v8364_v12  ;;  %v7698_v54 = vshll.u32 %v14577_v17, 16  ;;  %v14599_v57 = vld [vmem:[#allocation3 + $0x28] sm:$0xf]  ;;  %v9510_v50 = vpack.c.b16 %v9479_v20, %v9478_v28  ;;  %v9035_v20 = vld [vmem:[#allocation3 + $0x30] sm:$0xf] }
 0x59a   : > { %v8484_v51 = vunpack.c.l.b16 %v8365_v60  ;;  %v9108_v29 = vor.u32 %v9107_v37, %v9104_v61  ;;  %v7703_v60 = vshrl.u32 %v7612_v40, 16  ;;  %v7712_v38 = vshll.u32 %v14599_v57, 16 }
 0x59b   : > { %v7275_v63 = vadd.f32 %v7217_v23, %v6840_v14  ;;  %v9117_v14 = vrot.slane %v9115_v3, 4  ;;  %v8483_v23 = vunpack.c.l.b16 %v8362_v53  ;;  %v7716_v44 = vshrl.u32 %v14599_v57, 16 }
 0x59c   : > { %v8057_v61 = vunpack.c.l.b16 %v7691_v35  ;;  %v9123_v45 = vrot.slane %v9121_v30, 5  ;;  %v9126_v40 = vshrl.u32 %v9035_v20, 16  ;;  %v9129_v6 = vshll.u32 %v9035_v20, 16 }
 0x59d   : > { %v14591_v48 = vadd.f32 %v7531_v34, %v7275_v63  ;;  %8916 = vmatmul.bf16.vlgmr.msra.gmra.mxu3 %v11873_v9  ;;  %v8514_v22 = vpack.c.b16 %v8484_v51, %v8483_v23  ;;  %v7700_v63 = vrot.slane %v7698_v54, 5  ;;  %v9118_v34 = vor.u32 %v9117_v14, %v14601_v11  ;;  %v8290_v9 = vld [vmem:[#allocation3 + $0x24] sm:$0xe]  ;;  %v9036_v54 = vld [vmem:[#allocation3 + $0x34] sm:$0xf] }
 0x59e   : > { %v6844_v5 = vpop.f32.mrf.mxu2  ;;  %v11445_v1 = vrot.slane %v8290_v9, 9  ;;  %v9135_v26 = vshll.u32 %v9036_v54, 16  ;;  %v9128_v30 = vrot.slane %v9126_v40, 4 }
 0x59f   : > { %v7701_v8 = vsel %vm12472_vm11, %v7696_v55, %v7700_v63  ;;  %v9119_v28 = vrot.slane %v9118_v34, 4 }
 0x5a0   : > { %v6609_v27 = vpop.f32.mrf.mxu1  ;;  %v7220_v16 = vpop.f32.mrf.mxu3  ;;  %v8058_v37 = vunpack.c.l.b16 %v7701_v8 }
 0x5a1   : > { %v6843_v41 = vadd.f32 %v6842_v4, %v6609_v27  ;;  %v7534_v12 = vpop.f32.mrf.mxu0  ;;  %v8368_v4 = vrot.slane %v14599_v57, 5  ;;  %v8371_v27 = vrot.slane %v14610_v59, 5  ;;  %v14617_v57 = vrot.slane %v7712_v38, 5 }
 0x5a2   : > { %v8088_v34 = vpack.c.b16 %v8058_v37, %v8057_v61  ;;  %v9131_v38 = vrot.slane %v9129_v6, 5  ;;  %v7615_v37 = vld [vmem:[#allocation3 + $0x30] sm:$0xf] }
 0x5a3   : > { %v7276_v47 = vadd.f32 %v7220_v16, %v6843_v41  ;;  %8175 = vmatmul.bf16.vlgmr.msrb.gmra.mxu1 %v8087_v0  ;;  %8606 = vmatmul.bf16.gmra.mxu2 %v8514_v22  ;;  %v8370_v52 = vrot.slane %v8368_v4, 4  ;;  %v9109_v0 = vrot.slane %v9108_v29, 4  ;;  %v7705_v41 = vrot.slane %v7703_v60, 4 }
 0x5a4   : > { %9598 = vmatmul.bf16.vlgmr.msra.gmra.mxu0 %v9510_v50  ;;  %v7708_v16 = vrot.slane %v7706_v7, 5  ;;  %v9124_v50 = vsel %vm12472_vm11, %v9119_v28, %v9123_v45  ;;  %v9139_v29 = vshrl.u32 %v9036_v54, 16  ;;  %v8369_v35 = vsel %vm12724_vm14, %v11445_v1, %v8368_v4  ;;  %v9037_v54 = vld [vmem:[#allocation3 + $0x38] sm:$0x1] }
 0x5a5   : > { %v14604_v17 = vadd.f32 %v7534_v12, %v7276_v47  ;;  %v7718_v47 = vrot.slane %v7716_v44, 4  ;;  %v11874_v12 = vld [vmem:[#allocation3 + $0x24] sm:$0xff]  ;;  %v9114_v55 = vsel %vm12472_vm11, %v9109_v0, %v14601_v11  ;;  %v9481_v8 = vunpack.c.l.b16 %v9124_v50 }
 0x5a6   : > { %v6847_v58 = vpop.f32.mrf.mxu2  ;;  %v7709_v63 = vor.u32 %v7708_v16, %v7705_v41  ;;  %v9480_v11 = vunpack.c.l.b16 %v9114_v55  ;;  %v7722_v0 = vshll.u32 %v14610_v59, 16  ;;  %v8485_v28 = vunpack.c.l.b16 %v8369_v35 }
 0x5a7   : > { %v7719_v60 = vor.u32 %v7718_v47, %v14617_v57  ;;  %v7727_v55 = vshrl.u32 %v7615_v37, 16  ;;  %v7730_v40 = vshll.u32 %v7615_v37, 16  ;;  %v9145_v50 = vshll.u32 %v9037_v54, 16 }
 0x5a8   : > { %v6611_v3 = vpop.f32.mrf.mxu1  ;;  %v7222_v51 = vpop.f32.mrf.mxu3  ;;  %v7710_v4 = vrot.slane %v7709_v63, 4  ;;  %v9511_v16 = vpack.c.b16 %v9481_v8, %v9480_v11  ;;  %v7724_v59 = vrot.slane %v7722_v0, 5 }
 0x5a9   : > { %v6845_v53 = vadd.f32 %v6844_v5, %v6611_v3  ;;  %v7536_v23 = vpop.f32.mrf.mxu0  ;;  %v8372_v5 = vsel %vm12724_vm14, %v8370_v52, %v8371_v27  ;;  %v9141_v27 = vrot.slane %v9139_v29, 4  ;;  %v7720_v61 = vrot.slane %v7719_v60, 4 }
 0x5aa   : > { %v8486_v9 = vunpack.c.l.b16 %v8372_v5  ;;  %v7715_v47 = vsel %vm12472_vm11, %v7710_v4, %v14617_v57  ;;  %v8291_v5 = vld [vmem:[#allocation3 + $0x30] sm:$0xe]  ;;  %v7732_v0 = vrot.slane %v7730_v40, 5 }
 0x5ab   : > { %v7277_v14 = vadd.f32 %v7222_v51, %v6845_v53  ;;  %v14632_v53 = vld [vmem:[#allocation3 + $0x34] sm:$0xf]  ;;  %v14634_v51 = vrot.slane %v9135_v26, 5  ;;  %v7725_v6 = vsel %vm12472_vm11, %v7720_v61, %v7724_v59  ;;  %v11446_v57 = vrot.slane %v8291_v5, 9 }
 0x5ac   : > { %v8515_v41 = vpack.c.b16 %v8486_v9, %v8485_v28  ;;  %v7736_v26 = vshll.u32 %v14632_v53, 16  ;;  %v7740_v29 = vshrl.u32 %v14632_v53, 16  ;;  %v11875_v61 = vld [vmem:[#allocation3 + $0x30] sm:$0xff] }
 0x5ad   : > { %v14624_v22 = vadd.f32 %v7536_v23, %v7277_v14  ;;  %8921 = vmatmul.bf16.gmra.mxu3 %v11874_v12  ;;  %v9132_v14 = vor.u32 %v9131_v38, %v9128_v30  ;;  %v9142_v45 = vor.u32 %v9141_v27, %v14634_v51  ;;  %v14643_v12 = vld [vmem:[#allocation3 + $0x38] sm:$0x1]  ;;  %v9038_v30 = vld [vmem:[#allocation3 + $0x3c] sm:$0xf]  ;;  %v8059_v38 = vunpack.c.l.b16 %v7715_v47  ;;  %v9039_v27 = vld [vmem:[#allocation3 + $0x40] sm:$0xf] }
 0x5ae   : > { %v6849_v52 = vpop.f32.mrf.mxu2  ;;  %v8378_v11 = vrot.slane %v14643_v12, 5  ;;  %v9159_v59 = vshll.u32 %v9039_v27, 16 }
 0x5af   : > { %v9133_v35 = vrot.slane %v9132_v14, 4  ;;  %v9143_v8 = vrot.slane %v9142_v45, 4  ;;  %v9163_v45 = vshrl.u32 %v9039_v27, 16  ;;  %v9040_v27 = vld [vmem:[#allocation3 + $0x44] sm:$0x1] }
 0x5b0   : > { %v6614_v7 = vpop.f32.mrf.mxu1  ;;  %v7225_v3 = vpop.f32.mrf.mxu3 }
 0x5b1   : > { %v6848_v44 = vadd.f32 %v6847_v58, %v6614_v7  ;;  %v7539_v20 = vpop.f32.mrf.mxu0  ;;  %v8375_v58 = vrot.slane %v14632_v53, 5  ;;  %v14650_v53 = vrot.slane %v7736_v26, 5  ;;  %v9138_v37 = vsel %vm12472_vm11, %v9133_v35, %v14634_v51 }
 0x5b2   : > { %v9482_v26 = vunpack.c.l.b16 %v9138_v37 }
 0x5b3   : > { %v7278_v1 = vadd.f32 %v7225_v3, %v6848_v44  ;;  %8180 = vmatmul.bf16.gmra.mxu1 %v8088_v34  ;;  %8611 = vmatmul.bf16.gmra.mxu2 %v8515_v41  ;;  %v8377_v34 = vrot.slane %v8375_v58, 4  ;;  %v8060_v44 = vunpack.c.l.b16 %v7725_v6  ;;  %v7729_v3 = vrot.slane %v7727_v55, 4 }
 0x5b4   : > { %9603 = vmatmul.bf16.gmra.mxu0 %v9511_v16  ;;  %v9150_v41 = vshrl.u32 %v9038_v30, 16  ;;  %v9153_v16 = vshll.u32 %v9038_v30, 16  ;;  %v8376_v55 = vsel %vm12724_vm14, %v11446_v57, %v8375_v58  ;;  %v9165_v30 = vrot.slane %v9163_v45, 4 }
 0x5b5   : > { %v14637_v23 = vadd.f32 %v7539_v20, %v7278_v1  ;;  %v9147_v1 = vrot.slane %v9145_v50, 5  ;;  %v7742_v20 = vrot.slane %v7740_v29, 4  ;;  %v7733_v47 = vor.u32 %v7732_v0, %v7729_v3  ;;  %v14664_v50 = vld [vmem:[#allocation3 + $0x40] sm:$0xf] }
 0x5b6   : > { %v6852_v7 = vpop.f32.mrf.mxu2  ;;  %v8089_v5 = vpack.c.b16 %v8060_v44, %v8059_v38  ;;  %v8487_v38 = vunpack.c.l.b16 %v8376_v55  ;;  %v8382_v57 = vrot.slane %v14664_v50, 5  ;;  %v7760_v55 = vshll.u32 %v14664_v50, 16 }
 0x5b7   : > { %v9148_v14 = vsel %vm12472_vm11, %v9143_v8, %v9147_v1  ;;  %v7743_v6 = vor.u32 %v7742_v20, %v14650_v53  ;;  %v14667_v8 = vrot.slane %v9159_v59, 5  ;;  %v7734_v58 = vrot.slane %v7733_v47, 4  ;;  %v7618_v20 = vld [vmem:[#allocation3 + $0x3c] sm:$0xf] }
 0x5b8   : > { %v6616_v63 = vpop.f32.mrf.mxu1  ;;  %v7227_v60 = vpop.f32.mrf.mxu3  ;;  %v9483_v29 = vunpack.c.l.b16 %v9148_v14  ;;  %v8384_v14 = vrot.slane %v8382_v57, 4  ;;  %v9169_v59 = vshll.u32 %v9040_v27, 16  ;;  %v7751_v47 = vshrl.u32 %v7618_v20, 16 }
 0x5b9   : > { %v6850_v9 = vadd.f32 %v6849_v52, %v6616_v63  ;;  %v7541_v4 = vpop.f32.mrf.mxu0  ;;  %v8379_v52 = vsel %vm12724_vm14, %v8377_v34, %v8378_v11  ;;  %v9152_v63 = vrot.slane %v9150_v41, 4  ;;  %v9155_v34 = vrot.slane %v9153_v16, 5  ;;  %v8292_v16 = vld [vmem:[#allocation3 + $0x3c] sm:$0xe] }
 0x5ba   : > { %v8488_v40 = vunpack.c.l.b16 %v8379_v52  ;;  %v7746_v11 = vshll.u32 %v14643_v12, 16  ;;  %v7744_v0 = vrot.slane %v7743_v6, 4  ;;  %v9512_v1 = vpack.c.b16 %v9483_v29, %v9482_v26  ;;  %v14672_v52 = vld [vmem:[#allocation3 + $0x44] sm:$0x1] }
 0x5bb   : > { %v7279_v28 = vadd.f32 %v7227_v60, %v6850_v9  ;;  %v9166_v37 = vor.u32 %v9165_v30, %v14667_v8  ;;  %v7739_v41 = vsel %vm12472_vm11, %v7734_v58, %v14650_v53  ;;  %v8385_v6 = vrot.slane %v14672_v52, 5 }
 0x5bc   : > { %v7748_v12 = vrot.slane %v7746_v11, 5  ;;  %v7764_v26 = vshrl.u32 %v14664_v50, 16  ;;  %v11447_v53 = vrot.slane %v8292_v16, 9  ;;  %v8061_v11 = vunpack.c.l.b16 %v7739_v41  ;;  %v11876_v50 = vld [vmem:[#allocation3 + $0x3c] sm:$0xff] }
 0x5bd   : > { %v14657_v54 = vadd.f32 %v7541_v4, %v7279_v28  ;;  %8926 = vmatmul.bf16.gmra.mxu3 %v11875_v61  ;;  %v11910_v28 = vld [vmem:[#allocation9 + $0x228] sm:$0xff]  ;;  %v8516_v4 = vpack.c.b16 %v8488_v40, %v8487_v38  ;;  %v8386_v38 = vsel %vm12724_vm14, %v8384_v14, %v8385_v6  ;;  %v9171_v58 = vrot.slane %v9169_v59, 5 }
 0x5be   : > { %v6854_v60 = vpop.f32.mrf.mxu2  ;;  %10018 = vmatpush.bf16.msra.mxu1 %v11910_v28  ;;  %v7749_v45 = vsel %vm12472_vm11, %v7744_v0, %v7748_v12  ;;  %v7753_v27 = vrot.slane %v7751_v47, 4  ;;  %v8383_v59 = vsel %vm12724_vm14, %v11447_v53, %v8382_v57  ;;  %v7770_v53 = vshll.u32 %v14672_v52, 16 }
 0x5bf   : > { %v8062_v30 = vunpack.c.l.b16 %v7749_v45  ;;  %v8490_v45 = vunpack.c.l.b16 %v8386_v38  ;;  %v9043_v38 = vld [vmem:[#allocation3 + $0x50] sm:$0x1] }
 0x5c0   : > { %v6619_v51 = vpop.f32.mrf.mxu1  ;;  %v7230_v9 = vpop.f32.mrf.mxu3 }
 0x5c1   : > { %v6853_v35 = vadd.f32 %v6852_v7, %v6619_v51  ;;  %v7544_v3 = vpop.f32.mrf.mxu0  ;;  %v9156_v7 = vor.u32 %v9155_v34, %v9152_v63  ;;  %v8090_v14 = vpack.c.b16 %v8062_v30, %v8061_v11  ;;  %v8489_v30 = vunpack.c.l.b16 %v8383_v59 }
 0x5c3   : > { %v7280_v44 = vadd.f32 %v7230_v9, %v6853_v35  ;;  %8185 = vmatmul.bf16.gmra.mxu1 %v8089_v5  ;;  %8616 = vmatmul.bf16.gmra.mxu2 %v8516_v4  ;;  %v7754_v5 = vshll.u32 %v7618_v20, 16  ;;  %v9157_v51 = vrot.slane %v9156_v7, 4  ;;  %v9167_v35 = vrot.slane %v9166_v37, 4  ;;  %v9041_v9 = vld [vmem:[#allocation3 + $0x48] sm:$0xf] }
 0x5c4   : > { %9608 = vmatmul.bf16.gmra.mxu0 %v9512_v1  ;;  %v14685_v4 = vrot.slane %v7760_v55, 5  ;;  %v7766_v1 = vrot.slane %v7764_v26, 4  ;;  %v9174_v7 = vshrl.u32 %v9041_v9, 16  ;;  %v9177_v20 = vshll.u32 %v9041_v9, 16 }
 0x5c5   : > { %v14670_v61 = vadd.f32 %v7544_v3, %v7280_v44  ;;  %v9042_v44 = vld [vmem:[#allocation3 + $0x4c] sm:$0xf]  ;;  %v7756_v28 = vrot.slane %v7754_v5, 5  ;;  %v9172_v37 = vsel %vm12472_vm11, %v9167_v35, %v9171_v58 }
 0x5c6   : > { %v6857_v34 = vpop.f32.mrf.mxu2  ;;  %v9183_v41 = vshll.u32 %v9042_v44, 16  ;;  %v9187_v16 = vshrl.u32 %v9042_v44, 16  ;;  %v9179_v6 = vrot.slane %v9177_v20, 5  ;;  %v14697_v35 = vld [vmem:[#allocation3 + $0x4c] sm:$0xf] }
 0x5c7   : > { %v7757_v47 = vor.u32 %v7756_v28, %v7753_v27  ;;  %v7621_v44 = vld [vmem:[#allocation3 + $0x48] sm:$0xf]  ;;  %v7788_v59 = vshrl.u32 %v14697_v35, 16 }
 0x5c8   : > { %v6621_v40 = vpop.f32.mrf.mxu1  ;;  %v7232_v63 = vpop.f32.mrf.mxu3  ;;  %v14699_v9 = vrot.slane %v9183_v41, 5  ;;  %v9189_v11 = vrot.slane %v9187_v16, 4  ;;  %v7775_v52 = vshrl.u32 %v7621_v44, 16  ;;  %v7778_v41 = vshll.u32 %v7621_v44, 16 }
 0x5c9   : > { %v6855_v29 = vadd.f32 %v6854_v60, %v6621_v40  ;;  %v7546_v0 = vpop.f32.mrf.mxu0  ;;  %v9162_v60 = vsel %vm12472_vm11, %v9157_v51, %v14667_v8  ;;  %v9485_v8 = vunpack.c.l.b16 %v9172_v37  ;;  %v9176_v40 = vrot.slane %v9174_v7, 4  ;;  %v8293_v7 = vld [vmem:[#allocation3 + $0x48] sm:$0xe] }
 0x5ca   : > { %v9484_v55 = vunpack.c.l.b16 %v9162_v60  ;;  %v9190_v20 = vor.u32 %v9189_v11, %v14699_v9  ;;  %v9193_v37 = vshll.u32 %v9043_v38, 16  ;;  %v7784_v16 = vshll.u32 %v14697_v35, 16  ;;  %v9045_v38 = vld [vmem:[#allocation3 + $0x58] sm:$0xf] }
 0x5cb   : > { %v7281_v3 = vadd.f32 %v7232_v63, %v6855_v29  ;;  %v7767_v63 = vor.u32 %v7766_v1, %v14685_v4  ;;  %v9180_v27 = vor.u32 %v9179_v6, %v9176_v40  ;;  %v14705_v1 = vld [vmem:[#allocation3 + $0x50] sm:$0x1]  ;;  %v9044_v40 = vld [vmem:[#allocation3 + $0x54] sm:$0xf] }
 0x5cd   : > { %v14690_v12 = vadd.f32 %v7546_v0, %v7281_v3  ;;  %8931 = vmatmul.bf16.gmra.mxu3 %v11876_v50  ;;  %v8517_v3 = vpack.c.b16 %v8490_v45, %v8489_v30  ;;  %v9513_v0 = vpack.c.b16 %v9485_v8, %v9484_v55  ;;  %v7758_v50 = vrot.slane %v7757_v47, 4 }
 0x5ce   : > { %v6859_v29 = vpop.f32.mrf.mxu2  ;;  %v7768_v60 = vrot.slane %v7767_v63, 4  ;;  %v8392_v47 = vrot.slane %v14705_v1, 5  ;;  %v9181_v8 = vrot.slane %v9180_v27, 4  ;;  %v9191_v30 = vrot.slane %v9190_v20, 4 }
 0x5cf   : > { %v7763_v63 = vsel %vm12472_vm11, %v7758_v50, %v14685_v4  ;;  %v9201_v27 = vshll.u32 %v9044_v40, 16 }
 0x5d0   : > { %v6624_v5 = vpop.f32.mrf.mxu1  ;;  %v7235_v26 = vpop.f32.mrf.mxu3  ;;  %v9186_v50 = vsel %vm12472_vm11, %v9181_v8, %v14699_v9 }
 0x5d1   : > { %v6858_v51 = vadd.f32 %v6857_v34, %v6624_v5  ;;  %v7549_v57 = vpop.f32.mrf.mxu0  ;;  %v8389_v34 = vrot.slane %v14697_v35, 5  ;;  %v11448_v5 = vrot.slane %v8293_v7, 9  ;;  %v7777_v35 = vrot.slane %v7775_v52, 4  ;;  %v11877_v7 = vld [vmem:[#allocation3 + $0x48] sm:$0xff] }
 0x5d2   : > { %v9211_v52 = vshrl.u32 %v9045_v38, 16 }
 0x5d3   : > { %v7282_v58 = vadd.f32 %v7235_v26, %v6858_v51  ;;  %8190 = vmatmul.bf16.gmra.mxu1 %v8090_v14  ;;  %8621 = vmatmul.bf16.gmra.mxu2 %v8517_v3  ;;  %v7772_v14 = vrot.slane %v7770_v53, 5  ;;  %v8391_v55 = vrot.slane %v8389_v34, 4  ;;  %v14716_v53 = vrot.slane %v7784_v16, 5 }
 0x5d4   : > { %9613 = vmatmul.bf16.gmra.mxu0 %v9513_v0  ;;  %v7790_v0 = vrot.slane %v7788_v59, 4  ;;  %v8390_v16 = vsel %vm12724_vm14, %v11448_v5, %v8389_v34  ;;  %v14730_v59 = vld [vmem:[#allocation3 + $0x58] sm:$0xf] }
 0x5d5   : > { %v14703_v28 = vadd.f32 %v7549_v57, %v7282_v58  ;;  %v7773_v11 = vsel %vm12472_vm11, %v7768_v60, %v7772_v14  ;;  %v9195_v58 = vrot.slane %v9193_v37, 5  ;;  %v7780_v57 = vrot.slane %v7778_v41, 5 }
 0x5d6   : > { %v6862_v26 = vpop.f32.mrf.mxu2  ;;  %v8393_v4 = vsel %vm12724_vm14, %v8391_v55, %v8392_v47  ;;  %v9207_v37 = vshll.u32 %v9045_v38, 16  ;;  %v7791_v14 = vor.u32 %v7790_v0, %v14716_v53  ;;  %v9203_v47 = vrot.slane %v9201_v27, 5  ;;  %v8294_v38 = vld [vmem:[#allocation3 + $0x54] sm:$0xe] }
 0x5d7   : > { %15857 = vst [vmem:[#allocation32_spill] sm:$0xff] %v14703_v28  ;;  %v8064_v28 = vunpack.c.l.b16 %v7773_v11  ;;  %v9196_v20 = vsel %vm12472_vm11, %v9191_v30, %v9195_v58  ;;  %v7781_v41 = vor.u32 %v7780_v57, %v7777_v35  ;;  %v8492_v8 = vunpack.c.l.b16 %v8393_v4  ;;  %v7624_v4 = vld [vmem:[#allocation3 + $0x54] sm:$0xf] }
 0x5d8   : > { %v6626_v45 = vpop.f32.mrf.mxu1  ;;  %v7237_v51 = vpop.f32.mrf.mxu3  ;;  %v7794_v58 = vshll.u32 %v14705_v1, 16  ;;  %v14733_v35 = vrot.slane %v9207_v37, 5  ;;  %v9213_v57 = vrot.slane %v9211_v52, 4  ;;  %v8491_v34 = vunpack.c.l.b16 %v8390_v16 }
 0x5d9   : > { %v6860_v6 = vadd.f32 %v6859_v29, %v6626_v45  ;;  %v7551_v3 = vpop.f32.mrf.mxu0  ;;  %v9198_v29 = vshrl.u32 %v9044_v40, 16  ;;  %v8063_v45 = vunpack.c.l.b16 %v7763_v63  ;;  %v7782_v5 = vrot.slane %v7781_v41, 4 }
 0x5da   : > { %v7796_v1 = vrot.slane %v7794_v58, 5  ;;  %v11449_v37 = vrot.slane %v8294_v38, 9  ;;  %v9214_v52 = vor.u32 %v9213_v57, %v14733_v35 }
 0x5db   : > { %v7283_v44 = vadd.f32 %v7237_v51, %v6860_v6  ;;  %v9200_v55 = vrot.slane %v9198_v29, 4  ;;  %v8091_v9 = vpack.c.b16 %v8064_v28, %v8063_v45  ;;  %v9486_v6 = vunpack.c.l.b16 %v9186_v50  ;;  %v9046_v29 = vld [vmem:[#allocation3 + $0x5c] sm:$0x1] }
 0x5dc   : > { %v9487_v51 = vunpack.c.l.b16 %v9196_v20  ;;  %v7792_v28 = vrot.slane %v7791_v14, 4  ;;  %v14738_v20 = vld [vmem:[#allocation3 + $0x5c] sm:$0x1]  ;;  %v7787_v41 = vsel %vm12472_vm11, %v7782_v5, %v14716_v53  ;;  %v9217_v14 = vshll.u32 %v9046_v29, 16  ;;  %v9047_v5 = vld [vmem:[#allocation3 + $0x60] sm:$0xf] }
 0x5dd   : > { %v14723_v60 = vadd.f32 %v7551_v3, %v7283_v44  ;;  %8936 = vmatmul.bf16.gmra.mxu3 %v11877_v7  ;;  %v8396_v44 = vrot.slane %v14730_v59, 5  ;;  %v9204_v27 = vor.u32 %v9203_v47, %v9200_v55  ;;  %v11909_v7 = vld [vmem:[#allocation9 + $0x220] sm:$0xff]  ;;  %v8065_v38 = vunpack.c.l.b16 %v7787_v41  ;;  %v9048_v29 = vld [vmem:[#allocation3 + $0x64] sm:$0xf] }
 0x5de   : > { %v6864_v30 = vpop.f32.mrf.mxu2  ;;  %v9514_v45 = vpack.c.b16 %v9487_v51, %v9486_v6  ;;  %10019 = vmatpush.bf16.msra.mxu1 %v11909_v7  ;;  %v7797_v55 = vsel %vm12472_vm11, %v7792_v28, %v7796_v1  ;;  %v8399_v6 = vrot.slane %v14738_v20, 5  ;;  %v7808_v51 = vshll.u32 %v14730_v59, 16  ;;  %v14758_v1 = vld [vmem:[#allocation3 + $0x64] sm:$0xf] }
 0x5df   : > { %15858 = vst [vmem:[#allocation20_spill] sm:$0xff] %v14723_v60  ;;  %v8398_v16 = vrot.slane %v8396_v44, 4  ;;  %v9205_v47 = vrot.slane %v9204_v27, 4  ;;  %v8397_v53 = vsel %vm12724_vm14, %v11449_v37, %v8396_v44  ;;  %v9219_v28 = vrot.slane %v9217_v14, 5 }
 0x5e0   : > { %v6629_v40 = vpop.f32.mrf.mxu1  ;;  %v7240_v11 = vpop.f32.mrf.mxu3  ;;  %v9222_v37 = vshrl.u32 %v9047_v5, 16  ;;  %v9231_v14 = vshll.u32 %v9048_v29, 16 }
 0x5e1   : > { %v6863_v63 = vadd.f32 %v6862_v26, %v6629_v40  ;;  %v7554_v0 = vpop.f32.mrf.mxu0  ;;  %v8518_v26 = vpack.c.b16 %v8492_v8, %v8491_v34  ;;  %v7799_v40 = vshrl.u32 %v7624_v4, 16  ;;  %v9215_v34 = vrot.slane %v9214_v52, 4 }
 0x5e2   : > { %v9225_v52 = vshll.u32 %v9047_v5, 16 }
 0x5e3   : > { %v7284_v3 = vadd.f32 %v7240_v11, %v6863_v63  ;;  %8195 = vmatmul.bf16.gmra.mxu1 %v8091_v9  ;;  %8626 = vmatmul.bf16.gmra.mxu2 %v8518_v26  ;;  %v7802_v9 = vshll.u32 %v7624_v4, 16  ;;  %v7812_v63 = vshrl.u32 %v14730_v59, 16  ;;  %v11878_v26 = vld [vmem:[#allocation3 + $0x54] sm:$0xff]  ;;  %v9210_v59 = vsel %vm12472_vm11, %v9205_v47, %v14733_v35 }
 0x5e4   : > { %9618 = vmatmul.bf16.gmra.mxu0 %v9514_v45  ;;  %v14756_v4 = vrot.slane %v7808_v51, 5  ;;  %v9488_v35 = vunpack.c.l.b16 %v9210_v59 }
 0x5e5   : > { %v14736_v50 = vadd.f32 %v7554_v0, %v7284_v3  ;;  %v8066_v3 = vunpack.c.l.b16 %v7797_v55  ;;  %v8400_v0 = vsel %vm12724_vm14, %v8398_v16, %v8399_v6  ;;  %v7804_v45 = vrot.slane %v7802_v9, 5 }
 0x5e6   : > { %v6867_v57 = vpop.f32.mrf.mxu2  ;;  %v7814_v44 = vrot.slane %v7812_v63, 4  ;;  %v9220_v16 = vsel %vm12472_vm11, %v9215_v34, %v9219_v28  ;;  %v9235_v55 = vshrl.u32 %v9048_v29, 16  ;;  %v8494_v6 = vunpack.c.l.b16 %v8400_v0  ;;  %v9049_v0 = vld [vmem:[#allocation3 + $0x68] sm:$0x1] }
 0x5e7   : > { %15859 = vst [vmem:[#allocation21_spill] sm:$0xff] %v14736_v50  ;;  %v9489_v51 = vunpack.c.l.b16 %v9220_v16  ;;  %v14766_v34 = vrot.slane %v9231_v14, 5  ;;  %v9241_v14 = vshll.u32 %v9049_v0, 16 }
 0x5e8   : > { %v6631_v8 = vpop.f32.mrf.mxu1  ;;  %v7242_v58 = vpop.f32.mrf.mxu3  ;;  %v7815_v63 = vor.u32 %v7814_v44, %v14756_v4  ;;  %v9237_v28 = vrot.slane %v9235_v55, 4  ;;  %v7627_v44 = vld [vmem:[#allocation3 + $0x60] sm:$0xf] }
 0x5e9   : > { %v6865_v11 = vadd.f32 %v6864_v30, %v6631_v8  ;;  %v7556_v7 = vpop.f32.mrf.mxu0  ;;  %v7801_v30 = vrot.slane %v7799_v40, 4  ;;  %v8493_v8 = vunpack.c.l.b16 %v8397_v53  ;;  %v8403_v40 = vrot.slane %v14758_v1, 5 }
 0x5ea   : > { %v7818_v53 = vshll.u32 %v14738_v20, 16  ;;  %v7823_v55 = vshrl.u32 %v7627_v44, 16 }
 0x5eb   : > { %v7285_v27 = vadd.f32 %v7242_v58, %v6865_v11  ;;  %v7805_v47 = vor.u32 %v7804_v45, %v7801_v30  ;;  %v9224_v11 = vrot.slane %v9222_v37, 4  ;;  %v9227_v58 = vrot.slane %v9225_v52, 5  ;;  %v14769_v45 = vld [vmem:[#allocation3 + $0x68] sm:$0x1] }
 0x5ec   : > { %v8519_v59 = vpack.c.b16 %v8494_v6, %v8493_v8  ;;  %v9515_v37 = vpack.c.b16 %v9489_v51, %v9488_v35  ;;  %v7816_v52 = vrot.slane %v7815_v63, 4  ;;  %v8405_v16 = vrot.slane %v8403_v40, 4 }
 0x5ed   : > { %v14760_v41 = vadd.f32 %v7556_v7, %v7285_v27  ;;  %8941 = vmatmul.bf16.gmra.mxu3 %v11878_v26  ;;  %v7806_v30 = vrot.slane %v7805_v47, 4  ;;  %v7820_v20 = vrot.slane %v7818_v53, 5  ;;  %v7826_v8 = vshll.u32 %v7627_v44, 16  ;;  %v9050_v47 = vld [vmem:[#allocation3 + $0x6c] sm:$0xf] }
 0x5ee   : > { %v6869_v7 = vpop.f32.mrf.mxu2  ;;  %v7825_v44 = vrot.slane %v7823_v55, 4 }
 0x5ef   : > { %15860 = vst [vmem:[#allocation22_spill] sm:$0xff] %v14760_v41  ;;  %v8092_v41 = vpack.c.b16 %v8066_v3, %v8065_v38  ;;  %v9238_v3 = vor.u32 %v9237_v28, %v14766_v34  ;;  %v7811_v35 = vsel %vm12472_vm11, %v7806_v30, %v14756_v4  ;;  %v7821_v51 = vsel %vm12472_vm11, %v7816_v52, %v7820_v20 }
 0x5f0   : > { %v6634_v9 = vpop.f32.mrf.mxu1  ;;  %v7245_v27 = vpop.f32.mrf.mxu3  ;;  %v7836_v4 = vshrl.u32 %v14758_v1, 16  ;;  %v9246_v30 = vshrl.u32 %v9050_v47, 16  ;;  %v9249_v20 = vshll.u32 %v9050_v47, 16  ;;  %v8068_v55 = vunpack.c.l.b16 %v7821_v51  ;;  %v14795_v47 = vld [vmem:[#allocation3 + $0x70] sm:$0xf] }
 0x5f1   : > { %v6868_v5 = vadd.f32 %v6867_v57, %v6634_v9  ;;  %v7559_v26 = vpop.f32.mrf.mxu0  ;;  %v8295_v57 = vld [vmem:[#allocation3 + $0x60] sm:$0xe]  ;;  %v9228_v9 = vor.u32 %v9227_v58, %v9224_v11  ;;  %v9051_v58 = vld [vmem:[#allocation3 + $0x70] sm:$0xf]  ;;  %v9239_v0 = vrot.slane %v9238_v3, 4 }
 0x5f2   : > { %v11450_v6 = vrot.slane %v8295_v57, 9 }
 0x5f3   : > { %v7286_v29 = vadd.f32 %v7245_v27, %v6868_v5  ;;  %8200 = vmatmul.bf16.gmra.mxu1 %v8092_v41  ;;  %8631 = vmatmul.bf16.gmra.mxu2 %v8519_v59  ;;  %v8406_v41 = vrot.slane %v14769_v45, 5  ;;  %v9229_v11 = vrot.slane %v9228_v9, 4  ;;  %v5378_v59 = vld [vmem:[#allocation3 + $0xc8] sm:$0x1]  ;;  %v11879_v9 = vld [vmem:[#allocation3 + $0x60] sm:$0xff] }
 0x5f4   : > { %9623 = vmatmul.bf16.gmra.mxu0 %v9515_v37  ;;  %v7828_v37 = vrot.slane %v7826_v8, 5  ;;  %v5379_v3 = vsel %vm12423_vm4, 0, %v5378_v59 }
 0x5f5   : > { %v14771_v38 = vadd.f32 %v7559_v26, %v7286_v29  ;;  %v8407_v63 = vsel %vm12724_vm14, %v8405_v16, %v8406_v41  ;;  %v9243_v29 = vrot.slane %v9241_v14, 5  ;;  %v7832_v26 = vshll.u32 %v14758_v1, 16  ;;  %5380 = vst [vmem:[#allocation3 + $0xc8] sm:$0x1] %v5379_v3 }
 0x5f6   : > { %v6872_v53 = vpop.f32.mrf.mxu2  ;;  %v9259_v16 = vshrl.u32 %v9051_v58, 16  ;;  %v8067_v41 = vunpack.c.l.b16 %v7811_v35  ;;  %v9234_v1 = vsel %vm12472_vm11, %v9229_v11, %v14766_v34  ;;  %v7829_v35 = vor.u32 %v7828_v37, %v7825_v44  ;;  %v8296_v44 = vld [vmem:[#allocation3 + $0x6c] sm:$0xe] }
 0x5f7   : > { %15861 = vst [vmem:[#allocation23_spill] sm:$0xff] %v14771_v38  ;;  %v9255_v38 = vshll.u32 %v9051_v58, 16  ;;  %v9244_v8 = vsel %vm12472_vm11, %v9239_v0, %v9243_v29  ;;  %v9248_v58 = vrot.slane %v9246_v30, 4  ;;  %v8410_v11 = vrot.slane %v14795_v47, 5 }
 0x5f8   : > { %v6636_v5 = vpop.f32.mrf.mxu1  ;;  %v7247_v28 = vpop.f32.mrf.mxu3  ;;  %v9261_v51 = vrot.slane %v9259_v16, 4  ;;  %v9491_v34 = vunpack.c.l.b16 %v9244_v8  ;;  %v5821_v0 = vrot.slane %v14454_v39, 4  ;;  %v14801_v16 = vld [vmem:[#allocation3 + $0x74] sm:$0x1]  ;;  %v7842_v39 = vshll.u32 %v14769_v45, 16 }
 0x5f9   : > { %v6870_v27 = vadd.f32 %v6869_v7, %v6636_v5  ;;  %v7561_v52 = vpop.f32.mrf.mxu0  ;;  %v8404_v7 = vsel %vm12724_vm14, %v11450_v6, %v8403_v40  ;;  %v8496_v5 = vunpack.c.l.b16 %v8407_v63  ;;  %v7834_v40 = vrot.slane %v7832_v26, 5 }
 0x5fa   : > { %v7838_v6 = vrot.slane %v7836_v4, 4  ;;  %v8093_v63 = vpack.c.b16 %v8068_v55, %v8067_v41  ;;  %v9052_v4 = vld [vmem:[#allocation3 + $0x74] sm:$0x1] }
 0x5fb   : > { %v7287_v57 = vadd.f32 %v7247_v28, %v6870_v27  ;;  %v9251_v27 = vrot.slane %v9249_v20, 5  ;;  %v14797_v28 = vrot.slane %v9255_v38, 5  ;;  %v7830_v20 = vrot.slane %v7829_v35, 4 }
 0x5fc   : > { %v7839_v37 = vor.u32 %v7838_v6, %v7834_v40  ;;  %v9265_v55 = vshll.u32 %v9052_v4, 16 }
 0x5fd   : > { %v14788_v14 = vadd.f32 %v7561_v52, %v7287_v57  ;;  %8946 = vmatmul.bf16.gmra.mxu3 %v11879_v9  ;;  %v8495_v57 = vunpack.c.l.b16 %v8404_v7  ;;  %v9490_v52 = vunpack.c.l.b16 %v9234_v1  ;;  %v9252_v7 = vor.u32 %v9251_v27, %v9248_v58  ;;  %v7630_v27 = vld [vmem:[#allocation3 + $0x6c] sm:$0xf] }
 0x5fe   : > { %v6874_v9 = vpop.f32.mrf.mxu2  ;;  %v9262_v1 = vor.u32 %v9261_v51, %v14797_v28  ;;  %v7840_v35 = vrot.slane %v7839_v37, 4  ;;  %v8413_v58 = vrot.slane %v14801_v16, 5  ;;  %v7835_v45 = vsel %vm12472_vm11, %v7830_v20, %v7834_v40 }
 0x5ff   : > { %15862 = vst [vmem:[#allocation41_spill] sm:$0xff] %v14788_v14  ;;  %v8520_v26 = vpack.c.b16 %v8496_v5, %v8495_v57  ;;  %v9516_v8 = vpack.c.b16 %v9491_v34, %v9490_v52  ;;  %v5980_v14 = vld [vmem:[#allocation3 + $0xc8] sm:$0x1]  ;;  %v11908_v5 = vld [vmem:[#allocation9 + $0x218] sm:$0xff]  ;;  %v9253_v51 = vrot.slane %v9252_v7, 4  ;;  %v7844_v34 = vrot.slane %v7842_v39, 5 }
 0x600   : > { %v6639_v59 = vpop.f32.mrf.mxu1  ;;  %v7250_v3 = vpop.f32.mrf.mxu3  ;;  %v5981_v6 = vsel %vm12416_vm3, %v5821_v0, %v5980_v14  ;;  %v9263_v57 = vrot.slane %v9262_v1, 4  ;;  %10020 = vmatpush.bf16.msra.mxu1 %v11908_v5  ;;  %v9053_v0 = vld [vmem:[#allocation3 + $0x78] sm:$0xf]  ;;  %v7847_v37 = vshrl.u32 %v7630_v27, 16  ;;  %v7850_v4 = vshll.u32 %v7630_v27, 16 }
 0x601   : > { %v6873_v29 = vadd.f32 %v6872_v53, %v6639_v59  ;;  %v7564_v38 = vpop.f32.mrf.mxu0  ;;  %v11451_v53 = vrot.slane %v8296_v44, 9  ;;  %v8412_v59 = vrot.slane %v8410_v11, 4  ;;  %5982 = vst [vmem:[#allocation3 + $0xc8] sm:$0x1] %v5981_v6  ;;  %v7845_v40 = vsel %vm12472_vm11, %v7840_v35, %v7844_v34 }
 0x602   : > { %v7856_v20 = vshll.u32 %v14795_v47, 16  ;;  %v7860_v7 = vshrl.u32 %v14795_v47, 16  ;;  %v7849_v27 = vrot.slane %v7847_v37, 4  ;;  %v7852_v47 = vrot.slane %v7850_v4, 5 }
 0x603   : > { %v7288_v30 = vadd.f32 %v7250_v3, %v6873_v29  ;;  %8205 = vmatmul.bf16.gmra.mxu1 %v8093_v63  ;;  %8636 = vmatmul.bf16.gmra.mxu2 %v8520_v26  ;;  %v8411_v29 = vsel %vm12724_vm14, %v11451_v53, %v8410_v11  ;;  %v8414_v14 = vsel %vm12724_vm14, %v8412_v59, %v8413_v58  ;;  %v9267_v26 = vrot.slane %v9265_v55, 5  ;;  %v11880_v53 = vld [vmem:[#allocation3 + $0x6c] sm:$0xff] }
 0x604   : > { %9628 = vmatmul.bf16.gmra.mxu0 %v9516_v8  ;;  %v8498_v8 = vunpack.c.l.b16 %v8414_v14  ;;  %v9270_v59 = vshrl.u32 %v9053_v0, 16  ;;  %v9273_v55 = vshll.u32 %v9053_v0, 16  ;;  %v8070_v58 = vunpack.c.l.b16 %v7845_v40 }
 0x605   : > { %v14805_v41 = vadd.f32 %v7564_v38, %v7288_v30  ;;  %v9054_v30 = vld [vmem:[#allocation3 + $0x7c] sm:$0xf]  ;;  %v8069_v38 = vunpack.c.l.b16 %v7835_v45  ;;  %v9268_v39 = vsel %vm12472_vm11, %v9263_v57, %v9267_v26  ;;  %v14827_v45 = vrot.slane %v7856_v20, 5 }
 0x606   : > { %v6877_v44 = vpop.f32.mrf.mxu2  ;;  %v9279_v5 = vshll.u32 %v9054_v30, 16  ;;  %v9283_v6 = vshrl.u32 %v9054_v30, 16  ;;  %v8497_v34 = vunpack.c.l.b16 %v8411_v29  ;;  %v9275_v26 = vrot.slane %v9273_v55, 5 }
 0x607   : > { %15863 = vst [vmem:[#allocation24_spill] sm:$0xff] %v14805_v41  ;;  %v8094_v4 = vpack.c.b16 %v8070_v58, %v8069_v38  ;;  %v7853_v20 = vor.u32 %v7852_v47, %v7849_v27  ;;  %v7866_v29 = vshll.u32 %v14801_v16, 16 }
 0x608   : > { %v6641_v52 = vpop.f32.mrf.mxu1  ;;  %v7252_v63 = vpop.f32.mrf.mxu3  ;;  %v14829_v0 = vrot.slane %v9279_v5, 5  ;;  %v9285_v30 = vrot.slane %v9283_v6, 4  ;;  %v14833_v5 = vld [vmem:[#allocation3 + $0x80] sm:$0x1] }
 0x609   : > { %v6875_v3 = vadd.f32 %v6874_v9, %v6641_v52  ;;  %v7566_v1 = vpop.f32.mrf.mxu0  ;;  %v9258_v9 = vsel %vm12472_vm11, %v9253_v51, %v14797_v28  ;;  %v7862_v52 = vrot.slane %v7860_v7, 4  ;;  %v9493_v28 = vunpack.c.l.b16 %v9268_v39  ;;  %v7634_v51 = vld [vmem:[#allocation3 + $0x7c] sm:$0xf]  ;;  %v9055_v6 = vld [vmem:[#allocation3 + $0x80] sm:$0x1] }
 0x60a   : > { %v9492_v14 = vunpack.c.l.b16 %v9258_v9  ;;  %v8417_v39 = vrot.slane %v7634_v51, 5  ;;  %v9286_v38 = vor.u32 %v9285_v30, %v14829_v0  ;;  %v7884_v58 = vshrl.u32 %v7634_v51, 16  ;;  %v9057_v30 = vld [vmem:[#allocation3 + $0x88] sm:$0xf] }
 0x60b   : > { %v7289_v11 = vadd.f32 %v7252_v63, %v6875_v3  ;;  %v8297_v3 = vld [vmem:[#allocation3 + $0x78] sm:$0xe]  ;;  %v9272_v63 = vrot.slane %v9270_v59, 4  ;;  %v7863_v7 = vor.u32 %v7862_v52, %v14827_v45  ;;  %v7854_v47 = vrot.slane %v7853_v20, 4 }
 0x60c   : > { %v11452_v9 = vrot.slane %v8297_v3, 9  ;;  %v9517_v55 = vpack.c.b16 %v9493_v28, %v9492_v14  ;;  %v7868_v52 = vrot.slane %v7866_v29, 5  ;;  %v9289_v14 = vshll.u32 %v9055_v6, 16  ;;  %v9056_v28 = vld [vmem:[#allocation3 + $0x84] sm:$0xf] }
 0x60d   : > { %v14825_v35 = vadd.f32 %v7566_v1, %v7289_v11  ;;  %8951 = vmatmul.bf16.gmra.mxu3 %v11880_v53  ;;  %v7633_v11 = vld [vmem:[#allocation3 + $0x78] sm:$0xf]  ;;  %v8521_v53 = vpack.c.b16 %v8498_v8, %v8497_v34  ;;  %v7880_v8 = vshll.u32 %v7634_v51, 16  ;;  %v7864_v16 = vrot.slane %v7863_v7, 4 }
 0x60e   : > { %v6879_v37 = vpop.f32.mrf.mxu2  ;;  %v7871_v41 = vshrl.u32 %v7633_v11, 16  ;;  %v8420_v34 = vrot.slane %v14833_v5, 5  ;;  %v8418_v3 = vsel %vm12724_vm14, %v11452_v9, %v8417_v39  ;;  %v9294_v9 = vshrl.u32 %v9056_v28, 16 }
 0x60f   : > { %15864 = vst [vmem:[#allocation42_spill] sm:$0xff] %v14825_v35  ;;  %v9303_v6 = vshll.u32 %v9057_v30, 16 }
 0x610   : > { %v6644_v57 = vpop.f32.mrf.mxu1  ;;  %v7255_v40 = vpop.f32.mrf.mxu3 }
 0x611   : > { %v6878_v1 = vadd.f32 %v6877_v44, %v6644_v57  ;;  %v7569_v59 = vpop.f32.mrf.mxu0  ;;  %v7874_v44 = vshll.u32 %v7633_v11, 16  ;;  %v9276_v57 = vor.u32 %v9275_v26, %v9272_v63  ;;  %v8419_v11 = vrot.slane %v8417_v39, 4 }
 0x612   : > { %v7873_v63 = vrot.slane %v7871_v41, 4  ;;  %v9297_v39 = vshll.u32 %v9056_v28, 16  ;;  %v7869_v41 = vsel %vm12472_vm11, %v7864_v16, %v7868_v52  ;;  %v9296_v28 = vrot.slane %v9294_v9, 4 }
 0x613   : > { %v7290_v35 = vadd.f32 %v7255_v40, %v6878_v1  ;;  %8210 = vmatmul.bf16.gmra.mxu1 %v8094_v4  ;;  %8641 = vmatmul.bf16.gmra.mxu2 %v8521_v53  ;;  %v7876_v26 = vrot.slane %v7874_v44, 5  ;;  %v9277_v51 = vrot.slane %v9276_v57, 4  ;;  %v14841_v40 = vrot.slane %v7880_v8, 5  ;;  %v14843_v53 = vld [vmem:[#allocation3 + $0x88] sm:$0xf] }
 0x614   : > { %9633 = vmatmul.bf16.gmra.mxu0 %v9517_v55  ;;  %v7886_v4 = vrot.slane %v7884_v58, 4  ;;  %v9291_v55 = vrot.slane %v9289_v14, 5  ;;  %v9307_v44 = vshrl.u32 %v9057_v30, 16  ;;  %v8421_v8 = vsel %vm12724_vm14, %v8419_v11, %v8420_v34 }
 0x615   : > { %v14836_v27 = vadd.f32 %v7569_v59, %v7290_v35  ;;  %v9287_v35 = vrot.slane %v9286_v38, 4  ;;  %v7859_v59 = vsel %vm12472_vm11, %v7854_v47, %v14827_v45  ;;  %v8424_v58 = vrot.slane %v14843_v53, 5 }
 0x616   : > { %v8602_v29 = vpop.f32.mrf.mxu2  ;;  %v9282_v45 = vsel %vm12472_vm11, %v9277_v51, %v14829_v0  ;;  %v7887_v16 = vor.u32 %v7886_v4, %v14841_v40  ;;  %v8072_v14 = vunpack.c.l.b16 %v7869_v41  ;;  %v9299_v30 = vrot.slane %v9297_v39, 5 }
 0x617   : > { %15865 = vst [vmem:[#allocation35_spill] sm:$0xff] %v14836_v27  ;;  %v8071_v27 = vunpack.c.l.b16 %v7859_v59  ;;  %v9292_v47 = vsel %vm12472_vm11, %v9287_v35, %v9291_v55  ;;  %v8500_v34 = vunpack.c.l.b16 %v8421_v8  ;;  %v7890_v11 = vshll.u32 %v14833_v5, 16  ;;  %v8298_v35 = vld [vmem:[#allocation3 + $0x84] sm:$0xe]  ;;  %v9058_v8 = vld [vmem:[#allocation3 + $0x8c] sm:$0x1] }
 0x618   : > { %v6646_v1 = vpop.f32.mrf.mxu1  ;;  %v7257_v7 = vpop.f32.mrf.mxu3  ;;  %v9494_v0 = vunpack.c.l.b16 %v9282_v45  ;;  %v9495_v51 = vunpack.c.l.b16 %v9292_v47  ;;  %v8426_v59 = vrot.slane %v8424_v58, 4  ;;  %v8499_v55 = vunpack.c.l.b16 %v8418_v3 }
 0x619   : > { %v6880_v20 = vadd.f32 %v6879_v37, %v6646_v1  ;;  %v7571_v38 = vpop.f32.mrf.mxu0  ;;  %v7877_v37 = vor.u32 %v7876_v26, %v7873_v63  ;;  %v11881_v1 = vld [vmem:[#allocation3 + $0x78] sm:$0xff]  ;;  %v14862_v63 = vld [vmem:[#allocation3 + $0x8c] sm:$0x1]  ;;  %v14864_v26 = vrot.slane %v9303_v6, 5  ;;  %v8095_v41 = vpack.c.b16 %v8072_v14, %v8071_v27  ;;  %v7636_v6 = vld [vmem:[#allocation3 + $0x84] sm:$0xf] }
 0x61a   : > { %v8427_v5 = vrot.slane %v14862_v63, 5  ;;  %v11453_v45 = vrot.slane %v8298_v35, 9  ;;  %v9518_v3 = vpack.c.b16 %v9495_v51, %v9494_v0  ;;  %v9313_v14 = vshll.u32 %v9058_v8, 16  ;;  %v11907_v0 = vld [vmem:[#allocation9 + $0x210] sm:$0xff] }
 0x61b   : > { %v7291_v57 = vadd.f32 %v7257_v7, %v6880_v20  ;;  %v9309_v20 = vrot.slane %v9307_v44, 4  ;;  %v7878_v7 = vrot.slane %v7877_v37, 4  ;;  %v7892_v44 = vrot.slane %v7890_v11, 5  ;;  %10021 = vmatpush.bf16.msra.mxu1 %v11907_v0 }
 0x61c   : > { %v8428_v27 = vsel %vm12724_vm14, %v8426_v59, %v8427_v5  ;;  %v8425_v35 = vsel %vm12724_vm14, %v11453_v45, %v8424_v58 }
 0x61d   : > { %v14859_v52 = vadd.f32 %v7571_v38, %v7291_v57  ;;  %8956 = vmatmul.bf16.gmra.mxu3 %v11881_v1  ;;  %v7888_v57 = vrot.slane %v7887_v16, 4  ;;  %v9300_v1 = vor.u32 %v9299_v30, %v9296_v28  ;;  %v9310_v37 = vor.u32 %v9309_v20, %v14864_v26 }
 0x61e   : > { %v8604_v38 = vpop.f32.mrf.mxu2  ;;  %v7895_v28 = vshrl.u32 %v7636_v6, 16  ;;  %v7898_v30 = vshll.u32 %v7636_v6, 16  ;;  %v7908_v20 = vshrl.u32 %v14843_v53, 16  ;;  %v8502_v59 = vunpack.c.l.b16 %v8428_v27 }
 0x61f   : > { %15866 = vst [vmem:[#allocation36_spill] sm:$0xff] %v14859_v52  ;;  %v8522_v52 = vpack.c.b16 %v8500_v34, %v8499_v55  ;;  %v7893_v16 = vsel %vm12472_vm11, %v7888_v57, %v7892_v44  ;;  %v9301_v11 = vrot.slane %v9300_v1, 4  ;;  %v9311_v51 = vrot.slane %v9310_v37, 4 }
 0x620   : > { %v8176_v4 = vpop.f32.mrf.mxu1  ;;  %v8917_v39 = vpop.f32.mrf.mxu3  ;;  %v8074_v57 = vunpack.c.l.b16 %v7893_v16  ;;  %v7910_v58 = vrot.slane %v7908_v20, 4  ;;  %v8501_v6 = vunpack.c.l.b16 %v8425_v35  ;;  %v9724_v16 = vld [vmem:[#allocation3 + $0xb4] sm:$0xe] }
 0x621   : > { %v8256_v9 = vadd.f32 %v8176_v4, %v14392_v33  ;;  %v9599_v50 = vpop.f32.mrf.mxu0  ;;  %v7883_v33 = vsel %vm12472_vm11, %v7878_v7, %v14841_v40  ;;  %v9059_v4 = vld [vmem:[#allocation3 + $0x90] sm:$0xf]  ;;  %v14900_v35 = vld [vmem:[#allocation3 + $0x94] sm:$0xf] }
 0x622   : > { %v14880_v7 = vunpack.c.l.b16 %v7883_v33  ;;  %v9318_v45 = vshrl.u32 %v9059_v4, 16  ;;  %v9321_v37 = vshll.u32 %v9059_v4, 16 }
 0x623   : > { %v8682_v47 = vadd.f32 %v8602_v29, %v8256_v9  ;;  %8215 = vmatmul.bf16.gmra.mxu1 %v8095_v41  ;;  %v7904_v29 = vshll.u32 %v14843_v53, 16  ;;  %8646 = vmatmul.bf16.gmra.mxu2 %v8522_v52  ;;  %v9315_v9 = vrot.slane %v9313_v14, 5  ;;  %v7900_v41 = vrot.slane %v7898_v30, 5  ;;  %v9060_v53 = vld [vmem:[#allocation3 + $0x94] sm:$0xf]  ;;  %v11882_v14 = vld [vmem:[#allocation3 + $0x84] sm:$0xff] }
 0x624   : > { %9638 = vmatmul.bf16.gmra.mxu0 %v9518_v3  ;;  %v9327_v33 = vshll.u32 %v9060_v53, 16  ;;  %v9331_v27 = vshrl.u32 %v9060_v53, 16  ;;  %v9320_v4 = vrot.slane %v9318_v45, 4 }
 0x625   : > { %v8997_v34 = vadd.f32 %v8917_v39, %v8682_v47  ;;  %v7897_v39 = vrot.slane %v7895_v28, 4  ;;  %v14888_v1 = vrot.slane %v7904_v29, 5  ;;  %v9316_v44 = vsel %vm12472_vm11, %v9311_v51, %v9315_v9  ;;  %v14896_v51 = vld [vmem:[#allocation3 + $0xbc] sm:$0x1] }
 0x626   : > { %v8607_v8 = vpop.f32.mrf.mxu2  ;;  %v8096_v28 = vpack.c.b16 %v8074_v57, %v14880_v7  ;;  %v9497_v29 = vunpack.c.l.b16 %v9316_v44  ;;  %v11632_v9 = vrot.slane %v9724_v16, 9  ;;  %v14905_v57 = vrot.slane %v9327_v33, 5 }
 0x627   : > { %v14878_v40 = vadd.f32 %v9599_v50, %v8997_v34  ;;  %v9306_v50 = vsel %vm12472_vm11, %v9301_v11, %v14864_v26  ;;  %v8523_v26 = vpack.c.b16 %v8502_v59, %v8501_v6  ;;  %v9725_v34 = vld [vmem:[#allocation3 + $0xc0] sm:$0xe]  ;;  %v7901_v20 = vor.u32 %v7900_v41, %v7897_v39  ;;  %v14907_v39 = vld [vmem:[#allocation3 + $0xc8] sm:$0x1] }
 0x628   : > { %v8178_v55 = vpop.f32.mrf.mxu1  ;;  %v8919_v5 = vpop.f32.mrf.mxu3  ;;  %v9496_v30 = vunpack.c.l.b16 %v9306_v50  ;;  %v7911_v0 = vor.u32 %v7910_v58, %v14888_v1  ;;  %v9333_v53 = vrot.slane %v9331_v27, 4  ;;  %v11633_v41 = vrot.slane %v9725_v34, 9 }
 0x629   : > { %15867 = vst [vmem:[#allocation44_spill] sm:$0xff] %v14878_v40  ;;  %v8257_v52 = vadd.f32 %v8178_v55, %v14423_v25  ;;  %v9601_v3 = vpop.f32.mrf.mxu0  ;;  %v14892_v25 = vld [vmem:[#allocation3 + $0xb8] sm:$0xf]  ;;  %v9323_v55 = vrot.slane %v9321_v37, 5  ;;  %v9871_v58 = vrot.slane %v14896_v51, 5  ;;  %v9878_v34 = vrot.slane %v14907_v39, 5 }
 0x62a   : > { %v9868_v7 = vrot.slane %v14892_v25, 5  ;;  %v9334_v33 = vor.u32 %v9333_v53, %v14905_v57 }
 0x62b   : > { %v8683_v47 = vadd.f32 %v8604_v38, %v8257_v52  ;;  %v14898_v38 = vld [vmem:[#allocation3 + $0xc4] sm:$0xf]  ;;  %v9324_v40 = vor.u32 %v9323_v55, %v9320_v4  ;;  %v7932_v4 = vshrl.u32 %v14900_v35, 16 }
 0x62c   : > { %v9870_v50 = vrot.slane %v9868_v7, 4  ;;  %v9875_v6 = vrot.slane %v14898_v38, 5 }
 0x62d   : > { %v8998_v11 = vadd.f32 %v8919_v5, %v8683_v47  ;;  %8961 = vmatmul.bf16.gmra.mxu3 %v11882_v14  ;;  %v9869_v5 = vsel %vm12724_vm14, %v11632_v9, %v9868_v7  ;;  %v7902_v47 = vrot.slane %v7901_v20, 4  ;;  %v7639_v7 = vld [vmem:[#allocation3 + $0x90] sm:$0xf] }
 0x62e   : > { %v8609_v37 = vpop.f32.mrf.mxu2  ;;  %v9872_v27 = vsel %vm12724_vm14, %v9870_v50, %v9871_v58  ;;  %v9876_v16 = vsel %vm12724_vm14, %v11633_v41, %v9875_v6  ;;  %v9877_v14 = vrot.slane %v9875_v6, 4  ;;  %v14924_v41 = vld [vmem:[#allocation3 + $0x98] sm:$0x1]  ;;  %v8299_v6 = vld [vmem:[#allocation3 + $0x90] sm:$0xe] }
 0x62f   : > { %v14903_v59 = vadd.f32 %v9601_v3, %v8998_v11  ;;  %v7914_v3 = vshll.u32 %v14862_v63, 16  ;;  %v9931_v20 = vunpack.c.l.b16 %v9872_v27  ;;  %v9061_v63 = vld [vmem:[#allocation3 + $0x98] sm:$0x1]  ;;  %v11454_v27 = vrot.slane %v8299_v6, 9 }
 0x630   : > { %v8181_v52 = vpop.f32.mrf.mxu1  ;;  %v8922_v45 = vpop.f32.mrf.mxu3  ;;  %v9879_v50 = vsel %vm12724_vm14, %v9877_v14, %v9878_v34  ;;  %v15872_v14 = vrot.slane %v14900_v35, 5  ;;  %v9325_v34 = vrot.slane %v9324_v40, 4  ;;  %v7934_v6 = vrot.slane %v7932_v4, 4 }
 0x631   : > { %15868 = vst [vmem:[#allocation25_spill] sm:$0xff] %v14903_v59  ;;  %v8258_v44 = vadd.f32 %v8181_v52, %v14450_v32  ;;  %v9604_v9 = vpop.f32.mrf.mxu0  ;;  %v9519_v32 = vpack.c.b16 %v9497_v29, %v9496_v30  ;;  %v9930_v52 = vunpack.c.l.b16 %v9869_v5  ;;  %v7912_v59 = vrot.slane %v7911_v0, 4 }
 0x632   : > { %v7919_v30 = vshrl.u32 %v7639_v7, 16  ;;  %v7922_v29 = vshll.u32 %v7639_v7, 16  ;;  %v7928_v0 = vshll.u32 %v14900_v35, 16  ;;  %v7916_v53 = vrot.slane %v7914_v3, 5 }
 0x633   : > { %v8684_v11 = vadd.f32 %v8607_v8, %v8258_v44  ;;  %8220 = vmatmul.bf16.gmra.mxu1 %v8096_v28  ;;  %v14926_v60 = vpack.c.b16 %v9931_v20, %v9930_v52  ;;  %v9932_v8 = vunpack.c.l.b16 %v9876_v16  ;;  %v9933_v28 = vunpack.c.l.b16 %v9879_v50  ;;  %8651 = vmatmul.bf16.gmra.mxu2 %v8523_v26 }
 0x634   : > { %9643 = vmatmul.bf16.gmra.mxu0 %v9519_v32  ;;  %v9337_v5 = vshll.u32 %v9061_v63, 16  ;;  %v8433_v16 = vrot.slane %v15872_v14, 4  ;;  %v8434_v26 = vrot.slane %v14924_v41, 5  ;;  %v7907_v3 = vsel %vm12472_vm11, %v7902_v47, %v14888_v1 }
 0x635   : > { %v8999_v58 = vadd.f32 %v8922_v45, %v8684_v11  ;;  %15869 = vst [vmem:[#allocation34_spill] sm:$0xff] %v14926_v60  ;;  %v14932_v44 = vpack.c.b16 %v9933_v28, %v9932_v8  ;;  %v9062_v11 = vld [vmem:[#allocation3 + $0x9c] sm:$0xf]  ;;  %v9335_v20 = vrot.slane %v9334_v33, 4  ;;  %v7921_v63 = vrot.slane %v7919_v30, 4 }
 0x636   : > { %v8612_v52 = vpop.f32.mrf.mxu2  ;;  %v7924_v50 = vrot.slane %v7922_v29, 5  ;;  %v9063_v8 = vld [vmem:[#allocation3 + $0xa0] sm:$0xf]  ;;  %v9339_v14 = vrot.slane %v9337_v5, 5  ;;  %v8075_v60 = vunpack.c.l.b16 %v7907_v3  ;;  %v8435_v1 = vsel %vm12724_vm14, %v8433_v16, %v8434_v26 }
 0x637   : > { %v14930_v55 = vadd.f32 %v9604_v9, %v8999_v58  ;;  %15871 = vst [vmem:[#allocation38_spill] sm:$0xff] %v14932_v44  ;;  %v7917_v9 = vsel %vm12472_vm11, %v7912_v59, %v7916_v53  ;;  %v14943_v58 = vrot.slane %v7928_v0, 5  ;;  %v11883_v44 = vld [vmem:[#allocation3 + $0x90] sm:$0xff]  ;;  %v9330_v59 = vsel %vm12472_vm11, %v9325_v34, %v14905_v57  ;;  %v14959_v16 = vld [vmem:[#allocation3 + $0xa0] sm:$0xf] }
 0x638   : > { %v8183_v45 = vpop.f32.mrf.mxu1  ;;  %v8924_v7 = vpop.f32.mrf.mxu3  ;;  %v9340_v33 = vsel %vm12472_vm11, %v9335_v20, %v9339_v14  ;;  %v9351_v30 = vshll.u32 %v9063_v8, 16  ;;  %v7925_v29 = vor.u32 %v7924_v50, %v7921_v63  ;;  %v15873_v53 = vrot.slane %v14900_v35, 5 }
 0x639   : > { %15870 = vst [vmem:[#allocation37_spill] sm:$0xff] %v14930_v55  ;;  %v8259_v32 = vadd.f32 %v8183_v45, %v14468_v49  ;;  %v9606_v28 = vpop.f32.mrf.mxu0  ;;  %v9342_v49 = vshrl.u32 %v9062_v11, 16  ;;  %v9345_v45 = vshll.u32 %v9062_v11, 16  ;;  %v8076_v55 = vunpack.c.l.b16 %v7917_v9 }
 0x63a   : > { %v7935_v0 = vor.u32 %v7934_v6, %v14943_v58  ;;  %v8432_v5 = vsel %vm12724_vm14, %v11454_v27, %v15873_v53  ;;  %v8504_v11 = vunpack.c.l.b16 %v8435_v1  ;;  %v14963_v50 = vrot.slane %v9351_v30, 5 }
 0x63b   : > { %v8685_v40 = vadd.f32 %v8609_v37, %v8259_v32  ;;  %v9355_v37 = vshrl.u32 %v9063_v8, 16  ;;  %v9344_v57 = vrot.slane %v9342_v49, 4  ;;  %v9347_v26 = vrot.slane %v9345_v45, 5  ;;  %v9064_v49 = vld [vmem:[#allocation3 + $0xa4] sm:$0x1] }
 0x63c   : > { %v9498_v32 = vunpack.c.l.b16 %v9330_v59  ;;  %v8097_v20 = vpack.c.b16 %v8076_v55, %v8075_v60  ;;  %v8503_v6 = vunpack.c.l.b16 %v8432_v5  ;;  %v7926_v27 = vrot.slane %v7925_v29, 4  ;;  %v14966_v60 = vld [vmem:[#allocation3 + $0xa4] sm:$0x1] }
 0x63d   : > { %v9000_v47 = vadd.f32 %v8924_v7, %v8685_v40  ;;  %8966 = vmatmul.bf16.gmra.mxu3 %v11883_v44  ;;  %v9499_v7 = vunpack.c.l.b16 %v9340_v33  ;;  %v7938_v44 = vshll.u32 %v14924_v41, 16  ;;  %v9357_v35 = vrot.slane %v9355_v37, 4  ;;  %v11906_v33 = vld [vmem:[#allocation9 + $0x208] sm:$0xff]  ;;  %v8300_v37 = vld [vmem:[#allocation3 + $0x9c] sm:$0xe] }
 0x63e   : > { %v8614_v63 = vpop.f32.mrf.mxu2  ;;  %v7936_v8 = vrot.slane %v7935_v0, 4  ;;  %v8438_v40 = vrot.slane %v14959_v16, 5  ;;  %v9348_v45 = vor.u32 %v9347_v26, %v9344_v57  ;;  %v8524_v1 = vpack.c.b16 %v8504_v11, %v8503_v6  ;;  %10022 = vmatpush.bf16.msra.mxu1 %v11906_v33 }
 0x63f   : > { %v14953_v4 = vadd.f32 %v9606_v28, %v9000_v47  ;;  %v9520_v41 = vpack.c.b16 %v9499_v7, %v9498_v32  ;;  %v7940_v59 = vrot.slane %v7938_v44, 5  ;;  %v9358_v55 = vor.u32 %v9357_v35, %v14963_v50  ;;  %v9065_v35 = vld [vmem:[#allocation3 + $0xa8] sm:$0xf] }
 0x640   : > { %v8186_v34 = vpop.f32.mrf.mxu1  ;;  %v8927_v9 = vpop.f32.mrf.mxu3  ;;  %v8440_v29 = vrot.slane %v8438_v40, 4  ;;  %v9361_v0 = vshll.u32 %v9064_v49, 16  ;;  %v9349_v5 = vrot.slane %v9348_v45, 4  ;;  %v8441_v11 = vrot.slane %v14966_v60, 5 }
 0x641   : > { %v8260_v3 = vadd.f32 %v8186_v34, %v14471_v43  ;;  %v9609_v14 = vpop.f32.mrf.mxu0  ;;  %v7642_v43 = vld [vmem:[#allocation3 + $0x9c] sm:$0xf]  ;;  %v7941_v30 = vsel %vm12472_vm11, %v7936_v8, %v7940_v59  ;;  %v7952_v32 = vshll.u32 %v14959_v16, 16  ;;  %v7956_v7 = vshrl.u32 %v14959_v16, 16 }
 0x642   : > { %v7943_v57 = vshrl.u32 %v7642_v43, 16  ;;  %v7946_v26 = vshll.u32 %v7642_v43, 16  ;;  %v8442_v8 = vsel %vm12724_vm14, %v8440_v29, %v8441_v11  ;;  %v9354_v16 = vsel %vm12472_vm11, %v9349_v5, %v14963_v50  ;;  %v14993_v11 = vld [vmem:[#allocation3 + $0xac] sm:$0xf] }
 0x643   : > { %v8686_v28 = vadd.f32 %v8612_v52, %v8260_v3  ;;  %8225 = vmatmul.bf16.gmra.mxu1 %v8097_v20  ;;  %8656 = vmatmul.bf16.gmra.mxu2 %v8524_v1  ;;  %v7931_v52 = vsel %vm12472_vm11, %v7926_v27, %v14943_v58  ;;  %v9359_v20 = vrot.slane %v9358_v55, 4  ;;  %v8078_v27 = vunpack.c.l.b16 %v7941_v30 }
 0x644   : > { %9648 = vmatmul.bf16.gmra.mxu0 %v9520_v41  ;;  %v8077_v6 = vunpack.c.l.b16 %v7931_v52  ;;  %v7945_v1 = vrot.slane %v7943_v57, 4  ;;  %v11884_v41 = vld [vmem:[#allocation3 + $0x9c] sm:$0xff]  ;;  %v14985_v59 = vrot.slane %v7952_v32, 5  ;;  %v7958_v43 = vrot.slane %v7956_v7, 4 }
 0x645   : > { %v9001_v47 = vadd.f32 %v8927_v9, %v8686_v28  ;;  %v11455_v9 = vrot.slane %v8300_v37, 9  ;;  %v9363_v28 = vrot.slane %v9361_v0, 5  ;;  %v9369_v55 = vshll.u32 %v9065_v35, 16 }
 0x646   : > { %v8617_v3 = vpop.f32.mrf.mxu2  ;;  %v8098_v50 = vpack.c.b16 %v8078_v27, %v8077_v6  ;;  %v8506_v0 = vunpack.c.l.b16 %v8442_v8  ;;  %v9500_v5 = vunpack.c.l.b16 %v9354_v16  ;;  %v7962_v8 = vshll.u32 %v14966_v60, 16 }
 0x647   : > { %v14974_v53 = vadd.f32 %v9609_v14, %v9001_v47  ;;  %v9066_v14 = vld [vmem:[#allocation3 + $0xac] sm:$0xf]  ;;  %v9366_v47 = vshrl.u32 %v9065_v35, 16  ;;  %v9364_v52 = vsel %vm12472_vm11, %v9359_v20, %v9363_v28  ;;  %v9371_v7 = vrot.slane %v9369_v55, 5 }
 0x648   : > { %v8188_v34 = vpop.f32.mrf.mxu1  ;;  %v8929_v44 = vpop.f32.mrf.mxu3  ;;  %v9375_v30 = vshll.u32 %v9066_v14, 16  ;;  %v9379_v37 = vshrl.u32 %v9066_v14, 16  ;;  %v7959_v35 = vor.u32 %v7958_v43, %v14985_v59  ;;  %v8445_v14 = vrot.slane %v14993_v11, 5 }
 0x649   : > { %v8261_v58 = vadd.f32 %v8188_v34, %v14481_v42  ;;  %v9611_v45 = vpop.f32.mrf.mxu0  ;;  %v7948_v42 = vrot.slane %v7946_v26, 5  ;;  %v9501_v26 = vunpack.c.l.b16 %v9364_v52  ;;  %v9368_v32 = vrot.slane %v9366_v47, 4  ;;  %v8301_v47 = vld [vmem:[#allocation3 + $0xa8] sm:$0xe] }
 0x64a   : > { %v14997_v28 = vrot.slane %v9375_v30, 5  ;;  %v7960_v43 = vrot.slane %v7959_v35, 4  ;;  %v7976_v52 = vshll.u32 %v14993_v11, 16  ;;  %v7980_v30 = vshrl.u32 %v14993_v11, 16 }
 0x64b   : > { %v8687_v49 = vadd.f32 %v8614_v63, %v8261_v58  ;;  %v8439_v63 = vsel %vm12724_vm14, %v11455_v9, %v8438_v40  ;;  %v7949_v34 = vor.u32 %v7948_v42, %v7945_v1  ;;  %v9381_v40 = vrot.slane %v9379_v37, 4 }
 0x64c   : > { %v8505_v9 = vunpack.c.l.b16 %v8439_v63  ;;  %v9521_v16 = vpack.c.b16 %v9501_v26, %v9500_v5  ;;  %v9372_v42 = vor.u32 %v9371_v7, %v9368_v32  ;;  %v7964_v63 = vrot.slane %v7962_v8, 5 }
 0x64d   : > { %v9002_v33 = vadd.f32 %v8929_v44, %v8687_v49  ;;  %8971 = vmatmul.bf16.gmra.mxu3 %v11884_v41  ;;  %v7645_v49 = vld [vmem:[#allocation3 + $0xa8] sm:$0xf]  ;;  %v7950_v1 = vrot.slane %v7949_v34, 4  ;;  %v9382_v55 = vor.u32 %v9381_v40, %v14997_v28  ;;  %v11456_v26 = vrot.slane %v8301_v47, 9  ;;  %v9068_v40 = vld [vmem:[#allocation3 + $0xb4] sm:$0xf] }
 0x64e   : > { %v8619_v20 = vpop.f32.mrf.mxu2  ;;  %v7970_v60 = vshll.u32 %v7645_v49, 16  ;;  %v9373_v34 = vrot.slane %v9372_v42, 4  ;;  %v7965_v11 = vsel %vm12472_vm11, %v7960_v43, %v7964_v63  ;;  %v7982_v8 = vrot.slane %v7980_v30, 4 }
 0x64f   : > { %v14991_v29 = vadd.f32 %v9611_v45, %v9002_v33  ;;  %v8525_v45 = vpack.c.b16 %v8506_v0, %v8505_v9  ;;  %v7967_v33 = vshrl.u32 %v7645_v49, 16  ;;  %v9383_v35 = vrot.slane %v9382_v55, 4 }
 0x650   : > { %v8191_v57 = vpop.f32.mrf.mxu1  ;;  %v8932_v44 = vpop.f32.mrf.mxu3  ;;  %v8080_v42 = vunpack.c.l.b16 %v7965_v11  ;;  %v9390_v43 = vshrl.u32 %v9068_v40, 16  ;;  %v9393_v47 = vshll.u32 %v9068_v40, 16 }
 0x651   : > { %v8262_v58 = vadd.f32 %v8191_v57, %v14483_v18  ;;  %v9614_v27 = vpop.f32.mrf.mxu0  ;;  %v15001_v18 = vld [vmem:[#allocation3 + $0xb0] sm:$0x1]  ;;  %v7955_v57 = vsel %vm12472_vm11, %v7950_v1, %v14985_v59  ;;  %v7969_v9 = vrot.slane %v7967_v33, 4  ;;  %v11885_v1 = vld [vmem:[#allocation3 + $0xa8] sm:$0xff] }
 0x652   : > { %v9385_v0 = vshll.u32 %v15001_v18, 16  ;;  %v9395_v11 = vrot.slane %v9393_v47, 5  ;;  %v15041_v47 = vld [vmem:[#allocation3 + $0xbc] sm:$0x1] }
 0x653   : > { %v8688_v6 = vadd.f32 %v8617_v3, %v8262_v58  ;;  %8230 = vmatmul.bf16.gmra.mxu1 %v8098_v50  ;;  %8661 = vmatmul.bf16.gmra.mxu2 %v8525_v45  ;;  %v15004_v3 = vld [vmem:[#allocation3 + $0xb0] sm:$0x1]  ;;  %v8447_v50 = vrot.slane %v8445_v14, 4  ;;  %v8079_v45 = vunpack.c.l.b16 %v7955_v57 }
 0x654   : > { %9653 = vmatmul.bf16.gmra.mxu0 %v9521_v16  ;;  %v9387_v16 = vrot.slane %v9385_v0, 5  ;;  %v7986_v0 = vshll.u32 %v15004_v3, 16 }
 0x655   : > { %v9003_v41 = vadd.f32 %v8932_v44, %v8688_v6  ;;  %v8448_v44 = vrot.slane %v15004_v3, 5  ;;  %v7972_v6 = vrot.slane %v7970_v60, 5  ;;  %v9403_v60 = vshrl.u32 %v14892_v25, 16 }
 0x656   : > { %v8622_v58 = vpop.f32.mrf.mxu2  ;;  %v9388_v33 = vsel %vm12472_vm11, %v9383_v35, %v9387_v16  ;;  %v8099_v35 = vpack.c.b16 %v8080_v42, %v8079_v45  ;;  %v11905_v42 = vld [vmem:[#allocation9 + $0x200] sm:$0xff] }
 0x657   : > { %v15008_v37 = vadd.f32 %v9614_v27, %v9003_v41  ;;  %v15018_v27 = vrot.slane %v7976_v52, 5  ;;  %v9378_v41 = vsel %vm12472_vm11, %v9373_v34, %v14997_v28  ;;  %v7973_v52 = vor.u32 %v7972_v6, %v7969_v9  ;;  %10023 = vmatpush.bf16.msra.mxu1 %v11905_v42 }
 0x658   : > { %v8193_v5 = vpop.f32.mrf.mxu1  ;;  %v8934_v7 = vpop.f32.mrf.mxu3  ;;  %v9502_v34 = vunpack.c.l.b16 %v9378_v41  ;;  %v9405_v6 = vrot.slane %v9403_v60, 4  ;;  %v9409_v60 = vshll.u32 %v14896_v51, 16  ;;  %v9071_v51 = vld [vmem:[#allocation3 + $0xc0] sm:$0xf]  ;;  %v9423_v42 = vshll.u32 %v14898_v38, 16 }
 0x659   : > { %v8263_v32 = vadd.f32 %v8193_v5, %v14500_v13  ;;  %v9616_v59 = vpop.f32.mrf.mxu0  ;;  %v8449_v13 = vsel %vm12724_vm14, %v8447_v50, %v8448_v44  ;;  %v7983_v30 = vor.u32 %v7982_v8, %v15018_v27  ;;  %v8446_v50 = vsel %vm12724_vm14, %v11456_v26, %v8445_v14  ;;  %v15035_v5 = vld [vmem:[#allocation3 + $0xb8] sm:$0xf] }
 0x65a   : > { %v8508_v28 = vunpack.c.l.b16 %v8449_v13  ;;  %v8507_v8 = vunpack.c.l.b16 %v8446_v50  ;;  %v7974_v14 = vrot.slane %v7973_v52, 4  ;;  %v8452_v3 = vrot.slane %v15035_v5, 5 }
 0x65b   : > { %v8689_v49 = vadd.f32 %v8619_v20, %v8263_v32  ;;  %v9399_v20 = vshll.u32 %v14892_v25, 16  ;;  %v9503_v32 = vunpack.c.l.b16 %v9388_v33  ;;  %v7984_v26 = vrot.slane %v7983_v30, 4  ;;  %v8302_v33 = vld [vmem:[#allocation3 + $0xb4] sm:$0xe] }
 0x65c   : > { %v8526_v13 = vpack.c.b16 %v8508_v28, %v8507_v8  ;;  %v8000_v28 = vshll.u32 %v15035_v5, 16 }
 0x65d   : > { %v9004_v55 = vadd.f32 %v8934_v7, %v8689_v49  ;;  %8976 = vmatmul.bf16.gmra.mxu3 %v11885_v1  ;;  %v9392_v7 = vrot.slane %v9390_v43, 4  ;;  %v15038_v9 = vrot.slane %v9399_v20, 5  ;;  %v9522_v16 = vpack.c.b16 %v9503_v32, %v9502_v34  ;;  %v7648_v43 = vld [vmem:[#allocation3 + $0xb4] sm:$0xf] }
 0x65e   : > { %v8624_v40 = vpop.f32.mrf.mxu2  ;;  %v7988_v1 = vrot.slane %v7986_v0, 5  ;;  %v8454_v20 = vrot.slane %v8452_v3, 4  ;;  %v7991_v30 = vshrl.u32 %v7648_v43, 16  ;;  %v7994_v50 = vshll.u32 %v7648_v43, 16 }
 0x65f   : > { %v15030_v63 = vadd.f32 %v9616_v59, %v9004_v55  ;;  %v9396_v41 = vor.u32 %v9395_v11, %v9392_v7  ;;  %v9406_v45 = vor.u32 %v9405_v6, %v15038_v9  ;;  %v7979_v55 = vsel %vm12472_vm11, %v7974_v14, %v15018_v27 }
 0x660   : > { %v8196_v57 = vpop.f32.mrf.mxu1  ;;  %v8937_v44 = vpop.f32.mrf.mxu3  ;;  %v8004_v27 = vshrl.u32 %v15035_v5, 16  ;;  %v9411_v14 = vrot.slane %v9409_v60, 5  ;;  %v11886_v5 = vld [vmem:[#allocation3 + $0xb4] sm:$0xff]  ;;  %v9417_v43 = vshll.u32 %v9071_v51, 16 }
 0x661   : > { %v8264_v25 = vadd.f32 %v8196_v57, %v14503_v21  ;;  %v9619_v59 = vpop.f32.mrf.mxu0  ;;  %v8455_v57 = vrot.slane %v15041_v47, 5  ;;  %v9397_v34 = vrot.slane %v9396_v41, 4  ;;  %v9414_v41 = vshrl.u32 %v9071_v51, 16 }
 0x662   : > { %v8010_v51 = vshll.u32 %v15041_v47, 16  ;;  %v9433_v47 = vshll.u32 %v14907_v39, 16 }
 0x663   : > { %v8690_v49 = vadd.f32 %v8622_v58, %v8264_v25  ;;  %8235 = vmatmul.bf16.gmra.mxu1 %v8099_v35  ;;  %8666 = vmatmul.bf16.gmra.mxu2 %v8526_v13  ;;  %v7989_v58 = vsel %vm12472_vm11, %v7984_v26, %v7988_v1  ;;  %v11457_v25 = vrot.slane %v8302_v33, 9  ;;  %v8081_v35 = vunpack.c.l.b16 %v7979_v55 }
 0x664   : > { %9658 = vmatmul.bf16.gmra.mxu0 %v9522_v16  ;;  %v8082_v6 = vunpack.c.l.b16 %v7989_v58  ;;  %v8456_v8 = vsel %vm12724_vm14, %v8454_v20, %v8455_v57  ;;  %v7996_v13 = vrot.slane %v7994_v50, 5  ;;  %v15058_v16 = vrot.slane %v8000_v28, 5  ;;  %v15071_v28 = vld [vmem:[#allocation3 + $0xc4] sm:$0xf] }
 0x665   : > { %v9005_v21 = vadd.f32 %v8937_v44, %v8690_v49  ;;  %v9407_v44 = vrot.slane %v9406_v45, 4  ;;  %v8006_v1 = vrot.slane %v8004_v27, 4  ;;  %v8453_v55 = vsel %vm12724_vm14, %v11457_v25, %v8452_v3  ;;  %v5327_v25 = vld [vmem:[#allocation3 + $0xcc] sm:$0x1] }
 0x666   : > { %v8627_v11 = vpop.f32.mrf.mxu2  ;;  %v8100_v33 = vpack.c.b16 %v8082_v6, %v8081_v35  ;;  %v8510_v20 = vunpack.c.l.b16 %v8456_v8  ;;  %v9419_v57 = vrot.slane %v9417_v43, 5  ;;  %v5328_v35 = vsel %vm12416_vm3, 0, %v5327_v25 }
 0x667   : > { %v15050_v52 = vadd.f32 %v9619_v59, %v9005_v21  ;;  %v7993_v59 = vrot.slane %v7991_v30, 4  ;;  %v9412_v45 = vsel %vm12472_vm11, %v9407_v44, %v9411_v14  ;;  %v8509_v44 = vunpack.c.l.b16 %v8453_v55  ;;  %5329 = vst [vmem:[#allocation3 + $0xcc] sm:$0x1] %v5328_v35 }
 0x668   : > { %v8198_v0 = vpop.f32.mrf.mxu1  ;;  %v8939_v7 = vpop.f32.mrf.mxu3  ;;  %v9505_v50 = vunpack.c.l.b16 %v9412_v45  ;;  %v8012_v24 = vrot.slane %v8010_v51, 5 }
 0x669   : > { %v8265_v32 = vadd.f32 %v8198_v0, %v14518_v56  ;;  %v9621_v49 = vpop.f32.mrf.mxu0  ;;  %v9402_v56 = vsel %vm12472_vm11, %v9397_v34, %v15038_v9  ;;  %v7997_v9 = vor.u32 %v7996_v13, %v7993_v59  ;;  %v9416_v0 = vrot.slane %v9414_v41, 4  ;;  %v8303_v59 = vld [vmem:[#allocation3 + $0xc0] sm:$0xe] }
 0x66a   : > { %v9504_v30 = vunpack.c.l.b16 %v9402_v56  ;;  %v7651_v41 = vld [vmem:[#allocation3 + $0xc0] sm:$0xf]  ;;  %v11458_v45 = vrot.slane %v8303_v59, 9 }
 0x66b   : > { %v8691_v26 = vadd.f32 %v8624_v40, %v8265_v32  ;;  %v9427_v40 = vshrl.u32 %v14898_v38, 16  ;;  %v8007_v32 = vor.u32 %v8006_v1, %v15058_v16  ;;  %v7998_v14 = vrot.slane %v7997_v9, 4 }
 0x66c   : > { %v9420_v13 = vor.u32 %v9419_v57, %v9416_v0  ;;  %v8024_v9 = vshll.u32 %v15071_v28, 16  ;;  %v5381_v57 = vld [vmem:[#allocation3 + $0xd4] sm:$0x1] }
 0x66d   : > { %v9006_v21 = vadd.f32 %v8939_v7, %v8691_v26  ;;  %8981 = vmatmul.bf16.gmra.mxu3 %v11886_v5  ;;  %v15075_v7 = vrot.slane %v9423_v42, 5  ;;  %v9429_v3 = vrot.slane %v9427_v40, 4  ;;  %v8527_v26 = vpack.c.b16 %v8510_v20, %v8509_v44 }
 0x66e   : > { %v8629_v38 = vpop.f32.mrf.mxu2  ;;  %v8008_v56 = vrot.slane %v8007_v32, 4  ;;  %v8003_v43 = vsel %vm12472_vm11, %v7998_v14, %v15058_v16  ;;  %v9421_v55 = vrot.slane %v9420_v13, 4  ;;  %v8018_v20 = vshll.u32 %v7651_v41, 16  ;;  %v9074_v25 = vld [vmem:[#allocation3 + $0xcc] sm:$0xf] }
 0x66f   : > { %v15069_v58 = vadd.f32 %v9621_v49, %v9006_v21  ;;  %v9523_v49 = vpack.c.b16 %v9505_v50, %v9504_v30  ;;  %v9430_v1 = vor.u32 %v9429_v3, %v15075_v7  ;;  %v15088_v21 = vld [vmem:[#allocation3 + $0xc8] sm:$0x1]  ;;  %v8028_v16 = vshrl.u32 %v15071_v28, 16 }
 0x670   : > { %v8201_v60 = vpop.f32.mrf.mxu1  ;;  %v8942_v27 = vpop.f32.mrf.mxu3  ;;  %v8013_v50 = vsel %vm12472_vm11, %v8008_v56, %v8012_v24  ;;  %v9435_v32 = vrot.slane %v9433_v47, 5  ;;  %v5382_v3 = vsel %vm12423_vm4, 0, %v5381_v57  ;;  %v9438_v35 = vshrl.u32 %v9074_v25, 16 }
 0x671   : > { %v8266_v34 = vadd.f32 %v8201_v60, %v14524_v2  ;;  %v9624_v8 = vpop.f32.mrf.mxu0  ;;  %v8459_v2 = vrot.slane %v15071_v28, 5  ;;  %v9431_v0 = vrot.slane %v9430_v1, 4  ;;  %5383 = vst [vmem:[#allocation3 + $0xd4] sm:$0x1] %v5382_v3  ;;  %v11887_v28 = vld [vmem:[#allocation3 + $0xc0] sm:$0xff]  ;;  %v8083_v14 = vunpack.c.l.b16 %v8003_v43 }
 0x672   : > { %v8020_v56 = vrot.slane %v8018_v20, 5  ;;  %v8026_v1 = vrot.slane %v8024_v9, 5 }
 0x673   : > { %v8692_v6 = vadd.f32 %v8627_v11, %v8266_v34  ;;  %8240 = vmatmul.bf16.gmra.mxu1 %v8100_v33  ;;  %8671 = vmatmul.bf16.gmra.mxu2 %v8527_v26  ;;  %v8461_v42 = vrot.slane %v8459_v2, 4  ;;  %v8015_v33 = vshrl.u32 %v7651_v41, 16  ;;  %v15095_v34 = vld [vmem:[#allocation3 + $0xd0] sm:$0xf]  ;;  %v8084_v26 = vunpack.c.l.b16 %v8013_v50 }
 0x674   : > { %9663 = vmatmul.bf16.gmra.mxu0 %v9523_v49  ;;  %v8460_v49 = vsel %vm12724_vm14, %v11458_v45, %v8459_v2  ;;  %v8030_v41 = vrot.slane %v8028_v16, 4  ;;  %v9440_v2 = vrot.slane %v9438_v35, 4 }
 0x675   : > { %v9007_v5 = vadd.f32 %v8942_v27, %v8692_v6  ;;  %v8462_v27 = vrot.slane %v15088_v21, 5  ;;  %v9441_v6 = vshll.u32 %v9074_v25, 16  ;;  %v8017_v59 = vrot.slane %v8015_v33, 4 }
 0x676   : > { %v8632_v39 = vpop.f32.mrf.mxu2  ;;  %v8031_v20 = vor.u32 %v8030_v41, %v8026_v1 }
 0x677   : > { %v15083_v11 = vadd.f32 %v9624_v8, %v9007_v5  ;;  %v9451_v8 = vshrl.u32 %v15095_v34, 16  ;;  %v8463_v10 = vsel %vm12724_vm14, %v8461_v42, %v8462_v27  ;;  %v9436_v5 = vsel %vm12472_vm11, %v9431_v0, %v9435_v32 }
 0x678   : > { %v8203_v40 = vpop.f32.mrf.mxu1  ;;  %v8944_v30 = vpop.f32.mrf.mxu3  ;;  %v9443_v43 = vrot.slane %v9441_v6, 5  ;;  %v8512_v33 = vunpack.c.l.b16 %v8463_v10  ;;  %v8511_v0 = vunpack.c.l.b16 %v8460_v49  ;;  %v8021_v57 = vor.u32 %v8020_v56, %v8017_v59  ;;  %v15114_v9 = vld [vmem:[#allocation3 + $0xd4] sm:$0x1] }
 0x679   : > { %v8267_v60 = vadd.f32 %v8203_v40, %v14540_v36  ;;  %v9447_v36 = vshll.u32 %v15095_v34, 16  ;;  %v9626_v51 = vpop.f32.mrf.mxu0  ;;  %v9453_v45 = vrot.slane %v9451_v8, 4  ;;  %v9457_v25 = vshll.u32 %v15114_v9, 16 }
 0x67a   : > { %v9444_v32 = vor.u32 %v9443_v43, %v9440_v2  ;;  %v8022_v35 = vrot.slane %v8021_v57, 4  ;;  %v8032_v6 = vrot.slane %v8031_v20, 4  ;;  %v12052_v57 = vld [vmem:[#allocation3 + $0x1c] sm:$0xf] }
 0x67b   : > { %v8693_v44 = vadd.f32 %v8629_v38, %v8267_v60  ;;  %v9426_v38 = vsel %vm12472_vm11, %v9421_v55, %v15075_v7  ;;  %v9449_v24 = vrot.slane %v9447_v36, 5  ;;  %v9507_v60 = vunpack.c.l.b16 %v9436_v5 }
 0x67c   : > { %v9506_v42 = vunpack.c.l.b16 %v9426_v38  ;;  %v8101_v55 = vpack.c.b16 %v8084_v26, %v8083_v14  ;;  %v8528_v36 = vpack.c.b16 %v8512_v33, %v8511_v0  ;;  %v11888_v38 = vld [vmem:[#allocation3 + $0xcc] sm:$0xff] }
 0x67d   : > { %v9008_v13 = vadd.f32 %v8944_v30, %v8693_v44  ;;  %8986 = vmatmul.bf16.gmra.mxu3 %v11887_v28  ;;  %v9454_v3 = vor.u32 %v9453_v45, %v9449_v24  ;;  %v9445_v28 = vrot.slane %v9444_v32, 4 }
 0x67e   : > { %v8634_v50 = vpop.f32.mrf.mxu2  ;;  %v9524_v44 = vpack.c.b16 %v9507_v60, %v9506_v42 }
 0x67f   : > { %v15111_v47 = vadd.f32 %v9626_v51, %v9008_v13  ;;  %v8034_v51 = vshll.u32 %v15088_v21, 16  ;;  %v9455_v14 = vrot.slane %v9454_v3, 4  ;;  %v8027_v21 = vsel %vm12472_vm11, %v8022_v35, %v8026_v1 }
 0x680   : > { %v8206_v40 = vpop.f32.mrf.mxu1  ;;  %v8947_v7 = vpop.f32.mrf.mxu3  ;;  %v9450_v2 = vsel %vm12472_vm11, %v9445_v28, %v9449_v24  ;;  %v9777_v24 = vrot.slane %v12052_v57, 5 }
 0x681   : > { %v8268_v30 = vadd.f32 %v8206_v40, %v14550_v31  ;;  %v9629_v27 = vpop.f32.mrf.mxu0  ;;  %v8036_v49 = vrot.slane %v8034_v51, 5  ;;  %v8085_v40 = vunpack.c.l.b16 %v8027_v21  ;;  %v9508_v33 = vunpack.c.l.b16 %v9450_v2 }
 0x682   : > { %v9779_v32 = vrot.slane %v9777_v24, 4 }
 0x683   : > { %v8694_v16 = vadd.f32 %v8632_v39, %v8268_v30  ;;  %8245 = vmatmul.bf16.gmra.mxu1 %v8101_v55  ;;  %8676 = vmatmul.bf16.gmra.mxu2 %v8528_v36  ;;  %v9459_v39 = vrot.slane %v9457_v25, 5  ;;  %v8037_v5 = vsel %vm12472_vm11, %v8032_v6, %v8036_v49 }
 0x684   : > { %9668 = vmatmul.bf16.gmra.mxu0 %v9524_v44  ;;  %v12053_v44 = vld [vmem:[#allocation3 + $0x20] sm:$0x1] }
 0x685   : > { %v9009_v31 = vadd.f32 %v8947_v7, %v8694_v16  ;;  %v9460_v43 = vsel %vm12472_vm11, %v9455_v14, %v9459_v39  ;;  %v9780_v51 = vrot.slane %v12053_v44, 5 }
 0x686   : > { %v8637_v10 = vpop.f32.mrf.mxu2  ;;  %v9509_v42 = vunpack.c.l.b16 %v9460_v43 }
 0x687   : > { %v15118_v8 = vadd.f32 %v9629_v27, %v9009_v31  ;;  %v9711_v27 = vld [vmem:[#allocation3 + $0x18] sm:$0xe]  ;;  %v9781_v6 = vsel %vm12724_vm14, %v9779_v32, %v9780_v51  ;;  %v12056_v51 = vld [vmem:[#allocation3 + $0x34] sm:$0xf] }
 0x688   : > { %v8208_v26 = vpop.f32.mrf.mxu1  ;;  %v8949_v13 = vpop.f32.mrf.mxu3  ;;  %v9525_v0 = vpack.c.b16 %v9509_v42, %v9508_v33  ;;  %v11619_v36 = vrot.slane %v9711_v27, 9  ;;  %v9905_v49 = vunpack.c.l.b16 %v9781_v6 }
 0x689   : > { %v8269_v59 = vadd.f32 %v8208_v26, %v14563_v15  ;;  %v9631_v41 = vpop.f32.mrf.mxu0  ;;  %v8086_v15 = vunpack.c.l.b16 %v8037_v5  ;;  %v12054_v5 = vld [vmem:[#allocation3 + $0x28] sm:$0xf] }
 0x68a   : > { %v9778_v39 = vsel %vm12724_vm14, %v11619_v36, %v9777_v24 }
 0x68b   : > { %v8695_v56 = vadd.f32 %v8634_v50, %v8269_v59  ;;  %v8102_v55 = vpack.c.b16 %v8086_v15, %v8085_v40  ;;  %v9712_v40 = vld [vmem:[#allocation3 + $0x24] sm:$0xe] }
 0x68d   : > { %v9010_v45 = vadd.f32 %v8949_v13, %v8695_v56  ;;  %8991 = vmatmul.bf16.gmra.mxu3 %v11888_v38  ;;  %v9904_v13 = vunpack.c.l.b16 %v9778_v39  ;;  %v9784_v56 = vrot.slane %v12054_v5, 5 }
 0x68e   : > { %v8639_v50 = vpop.f32.mrf.mxu2 }
 0x68f   : > { %v15129_v60 = vadd.f32 %v9631_v41, %v9010_v45  ;;  %v9786_v15 = vrot.slane %v9784_v56, 4 }
 0x690   : > { %v8211_v1 = vpop.f32.mrf.mxu1  ;;  %v8952_v7 = vpop.f32.mrf.mxu3 }
 0x691   : > { %v8270_v30 = vadd.f32 %v8211_v1, %v14572_v62  ;;  %v9634_v19 = vpop.f32.mrf.mxu0  ;;  %v11620_v1 = vrot.slane %v9712_v40, 9 }
 0x693   : > { %v8696_v20 = vadd.f32 %v8637_v10, %v8270_v30  ;;  %8250 = vmatmul.bf16.gmra.mxu1 %v8102_v55  ;;  %v12055_v30 = vld [vmem:[#allocation3 + $0x2c] sm:$0x1]  ;;  %v9785_v24 = vsel %vm12724_vm14, %v11620_v1, %v9784_v56 }
 0x694   : > { %9673 = vmatmul.bf16.gmra.mxu0 %v9525_v0  ;;  %v9906_v32 = vunpack.c.l.b16 %v9785_v24 }
 0x695   : > { %v9011_v16 = vadd.f32 %v8952_v7, %v8696_v20  ;;  %v9787_v7 = vrot.slane %v12055_v30, 5 }
 0x696   : > { %v8642_v35 = vpop.f32.mrf.mxu2 }
 0x697   : > { %v15132_v3 = vadd.f32 %v9634_v19, %v9011_v16 }
 0x698   : > { %v8213_v25 = vpop.f32.mrf.mxu1  ;;  %v8954_v31 = vpop.f32.mrf.mxu3 }
 0x699   : > { %v8271_v62 = vadd.f32 %v8213_v25, %v14591_v48  ;;  %v9636_v14 = vpop.f32.mrf.mxu0  ;;  %v9936_v48 = vpack.c.b16 %v9905_v49, %v9904_v13 }
 0x69b   : > { %v8697_v28 = vadd.f32 %v8639_v50, %v8271_v62  ;;  %v9788_v50 = vsel %vm12724_vm14, %v9786_v15, %v9787_v7  ;;  %v9791_v62 = vrot.slane %v12056_v51, 5 }
 0x69c   : > { %v9907_v19 = vunpack.c.l.b16 %v9788_v50 }
 0x69d   : > { %v9012_v26 = vadd.f32 %v8954_v31, %v8697_v28  ;;  %v9713_v28 = vld [vmem:[#allocation3 + $0x30] sm:$0xe] }
 0x69e   : > { %v8644_v43 = vpop.f32.mrf.mxu2  ;;  %v11621_v13 = vrot.slane %v9713_v28, 9  ;;  %v12060_v28 = vld [vmem:[#allocation3 + $0x4c] sm:$0xf] }
 0x69f   : > { %v15139_v59 = vadd.f32 %v9636_v14, %v9012_v26  ;;  %v9793_v14 = vrot.slane %v9791_v62, 4 }
 0x6a0   : > { %v8216_v10 = vpop.f32.mrf.mxu1  ;;  %v8957_v21 = vpop.f32.mrf.mxu3 }
 0x6a1   : > { %v8272_v38 = vadd.f32 %v8216_v10, %v14604_v17  ;;  %v9639_v2 = vpop.f32.mrf.mxu0  ;;  %v12057_v10 = vld [vmem:[#allocation3 + $0x38] sm:$0x1] }
 0x6a3   : > { %v8698_v41 = vadd.f32 %v8642_v35, %v8272_v38  ;;  %10024 = vmatmul.bf16.vlgmr.msra.gmra.mxu1 %v9936_v48  ;;  %v9794_v38 = vrot.slane %v12057_v10, 5  ;;  %v12061_v10 = vld [vmem:[#allocation3 + $0x50] sm:$0x1] }
 0x6a5   : > { %v9013_v45 = vadd.f32 %v8957_v21, %v8698_v41  ;;  %v9795_v48 = vsel %vm12724_vm14, %v9793_v14, %v9794_v38  ;;  %v9792_v41 = vsel %vm12724_vm14, %v11621_v13, %v9791_v62  ;;  %v9805_v14 = vrot.slane %v12060_v28, 5 }
 0x6a6   : > { %v8647_v16 = vpop.f32.mrf.mxu2  ;;  %v9908_v40 = vunpack.c.l.b16 %v9792_v41  ;;  %v9808_v38 = vrot.slane %v12061_v10, 5 }
 0x6a7   : > { %v15142_v33 = vadd.f32 %v9639_v2, %v9013_v45 }
 0x6a8   : > { %v8218_v42 = vpop.f32.mrf.mxu1  ;;  %v8959_v17 = vpop.f32.mrf.mxu3 }
 0x6a9   : > { %v8273_v55 = vadd.f32 %v8218_v42, %v14624_v22  ;;  %v9641_v57 = vpop.f32.mrf.mxu0  ;;  %v9937_v22 = vpack.c.b16 %v9907_v19, %v9906_v32  ;;  %v12059_v32 = vld [vmem:[#allocation3 + $0x44] sm:$0x1] }
 0x6ab   : > { %v8699_v0 = vadd.f32 %v8644_v43, %v8273_v55  ;;  %v9909_v43 = vunpack.c.l.b16 %v9795_v48 }
 0x6ad   : > { %v9014_v20 = vadd.f32 %v8959_v17, %v8699_v0  ;;  %v9938_v1 = vpack.c.b16 %v9909_v43, %v9908_v40  ;;  %v9714_v0 = vld [vmem:[#allocation3 + $0x3c] sm:$0xe]  ;;  %v15876_v43 = vld [vmem:[#allocation21_spill] sm:$0xff] }
 0x6ae   : > { %v8649_v26 = vpop.f32.mrf.mxu2 }
 0x6af   : > { %v15149_v27 = vadd.f32 %v9641_v57, %v9014_v20 }
 0x6b0   : > { %v8221_v25 = vpop.f32.mrf.mxu1  ;;  %v8962_v44 = vpop.f32.mrf.mxu3 }
 0x6b1   : > { %v8274_v36 = vadd.f32 %v8221_v25, %v14637_v23  ;;  %v9644_v35 = vpop.f32.mrf.mxu0  ;;  %v9801_v25 = vrot.slane %v12059_v32, 5 }
 0x6b3   : > { %v8700_v31 = vadd.f32 %v8647_v16, %v8274_v36  ;;  %10029 = vmatmul.bf16.gmra.mxu1 %v9937_v22  ;;  %v11622_v16 = vrot.slane %v9714_v0, 9  ;;  %v15877_v0 = vld [vmem:[#allocation22_spill] sm:$0xff] }
 0x6b5   : > { %v9015_v6 = vadd.f32 %v8962_v44, %v8700_v31  ;;  %v15874_v31 = vld [vmem:[#allocation32_spill] sm:$0xff] }
 0x6b6   : > { %v8652_v30 = vpop.f32.mrf.mxu2 }
 0x6b7   : > { %v15152_v39 = vadd.f32 %v9644_v35, %v9015_v6 }
 0x6b8   : > { %v8223_v49 = vpop.f32.mrf.mxu1  ;;  %v8964_v23 = vpop.f32.mrf.mxu3 }
 0x6b9   : > { %v8275_v21 = vadd.f32 %v8223_v49, %v14657_v54  ;;  %v9646_v56 = vpop.f32.mrf.mxu0  ;;  %v12058_v54 = vld [vmem:[#allocation3 + $0x40] sm:$0xf]  ;;  %v9807_v49 = vrot.slane %v9805_v14, 4 }
 0x6ba   : > { %v9798_v7 = vrot.slane %v12058_v54, 5 }
 0x6bb   : > { %v8701_v5 = vadd.f32 %v8649_v26, %v8275_v21  ;;  %v9715_v26 = vld [vmem:[#allocation3 + $0x48] sm:$0xe]  ;;  %v9809_v48 = vsel %vm12724_vm14, %v9807_v49, %v9808_v38 }
 0x6bc   : > { %v9800_v24 = vrot.slane %v9798_v7, 4  ;;  %v9799_v44 = vsel %vm12724_vm14, %v11622_v16, %v9798_v7  ;;  %v11623_v13 = vrot.slane %v9715_v26, 9  ;;  %v15875_v21 = vld [vmem:[#allocation20_spill] sm:$0xff] }
 0x6bd   : > { %v9016_v2 = vadd.f32 %v8964_v23, %v8701_v5  ;;  %v9910_v51 = vunpack.c.l.b16 %v9799_v44  ;;  %v12065_v26 = vld [vmem:[#allocation3 + $0x68] sm:$0x1] }
 0x6be   : > { %v9806_v5 = vsel %vm12724_vm14, %v11623_v13, %v9805_v14  ;;  %v9822_v49 = vrot.slane %v12065_v26, 5  ;;  %v12069_v26 = vld [vmem:[#allocation3 + $0x80] sm:$0x1] }
 0x6bf   : > { %v15159_v45 = vadd.f32 %v9646_v56, %v9016_v2  ;;  %v9913_v56 = vunpack.c.l.b16 %v9809_v48  ;;  %v9912_v41 = vunpack.c.l.b16 %v9806_v5 }
 0x6c0   : > { %v8226_v15 = vpop.f32.mrf.mxu1  ;;  %v8967_v17 = vpop.f32.mrf.mxu3 }
 0x6c1   : > { %v8276_v42 = vadd.f32 %v8226_v15, %v14670_v61  ;;  %v9649_v57 = vpop.f32.mrf.mxu0  ;;  %v9802_v61 = vsel %vm12724_vm14, %v9800_v24, %v9801_v25  ;;  %v9940_v15 = vpack.c.b16 %v9913_v56, %v9912_v41  ;;  %v15880_v56 = vld [vmem:[#allocation24_spill] sm:$0xff] }
 0x6c2   : > { %v9911_v22 = vunpack.c.l.b16 %v9802_v61  ;;  %v15878_v61 = vld [vmem:[#allocation23_spill] sm:$0xff] }
 0x6c3   : > { %v8702_v55 = vadd.f32 %v8652_v30, %v8276_v42  ;;  %10034 = vmatmul.bf16.gmra.mxu1 %v9938_v1  ;;  %v12062_v42 = vld [vmem:[#allocation3 + $0x58] sm:$0xf]  ;;  %v9716_v30 = vld [vmem:[#allocation3 + $0x54] sm:$0xe] }
 0x6c4   : > { %v9939_v6 = vpack.c.b16 %v9911_v22, %v9910_v51  ;;  %v9812_v1 = vrot.slane %v12062_v42, 5  ;;  %v12064_v51 = vld [vmem:[#allocation3 + $0x64] sm:$0xf]  ;;  %v9718_v42 = vld [vmem:[#allocation3 + $0x6c] sm:$0xe] }
 0x6c5   : > { %v9017_v50 = vadd.f32 %v8967_v17, %v8702_v55  ;;  %v11624_v55 = vrot.slane %v9716_v30, 9  ;;  %v12063_v17 = vld [vmem:[#allocation3 + $0x5c] sm:$0x1] }
 0x6c6   : > { %v9814_v54 = vrot.slane %v9812_v1, 4 }
 0x6c7   : > { %v15162_v20 = vadd.f32 %v9649_v57, %v9017_v50  ;;  %v9815_v50 = vrot.slane %v12063_v17, 5  ;;  %v15881_v17 = vld [vmem:[#allocation42_spill] sm:$0xff] }
 0x6c8   : > { %v8228_v19 = vpop.f32.mrf.mxu1 }
 0x6c9   : > { %v15165_v36 = vadd.f32 %v8228_v19, %v14690_v12  ;;  %v9816_v24 = vsel %vm12724_vm14, %v9814_v54, %v9815_v50  ;;  %v9813_v19 = vsel %vm12724_vm14, %v11624_v55, %v9812_v1  ;;  %v11626_v54 = vrot.slane %v9718_v42, 9  ;;  %v12070_v42 = vld [vmem:[#allocation3 + $0x88] sm:$0xf] }
 0x6ca   : > { %v9915_v16 = vunpack.c.l.b16 %v9816_v24  ;;  %v9914_v32 = vunpack.c.l.b16 %v9813_v19 }
 0x6cc   : > { %v9941_v22 = vpack.c.b16 %v9915_v16, %v9914_v32 }
 0x6d0   : > { %v8231_v62 = vpop.f32.mrf.mxu1 }
 0x6d1   : > { %v15172_v35 = vadd.f32 %v8231_v62, %v15874_v31  ;;  %v9819_v62 = vrot.slane %v12064_v51, 5  ;;  %v9717_v31 = vld [vmem:[#allocation3 + $0x60] sm:$0xe]  ;;  %v12068_v51 = vld [vmem:[#allocation3 + $0x7c] sm:$0xf] }
 0x6d2   : > { %v11625_v14 = vrot.slane %v9717_v31, 9  ;;  %v9719_v31 = vld [vmem:[#allocation3 + $0x78] sm:$0xe] }
 0x6d3   : > { %10039 = vmatmul.bf16.gmra.mxu1 %v9939_v6  ;;  %v9821_v6 = vrot.slane %v9819_v62, 4 }
 0x6d4   : > { %v9820_v38 = vsel %vm12724_vm14, %v11625_v14, %v9819_v62  ;;  %v9833_v62 = vrot.slane %v12068_v51, 5  ;;  %v11627_v14 = vrot.slane %v9719_v31, 9 }
 0x6d5   : > { %v9823_v10 = vsel %vm12724_vm14, %v9821_v6, %v9822_v49  ;;  %v9916_v48 = vunpack.c.l.b16 %v9820_v38  ;;  %v9836_v49 = vrot.slane %v12069_v26, 5  ;;  %v9721_v26 = vld [vmem:[#allocation3 + $0x90] sm:$0xe] }
 0x6d6   : > { %v9835_v6 = vrot.slane %v9833_v62, 4 }
 0x6d8   : > { %v8233_v12 = vpop.f32.mrf.mxu1  ;;  %v9837_v38 = vsel %vm12724_vm14, %v9835_v6, %v9836_v49 }
 0x6d9   : > { %v15175_v23 = vadd.f32 %v8233_v12, %v15875_v21  ;;  %v15879_v12 = vld [vmem:[#allocation41_spill] sm:$0xff]  ;;  %v9917_v21 = vunpack.c.l.b16 %v9823_v10 }
 0x6e0   : > { %v8236_v2 = vpop.f32.mrf.mxu1 }
 0x6e1   : > { %v15182_v40 = vadd.f32 %v8236_v2, %v15876_v43  ;;  %v9942_v2 = vpack.c.b16 %v9917_v21, %v9916_v48  ;;  %v12066_v43 = vld [vmem:[#allocation3 + $0x70] sm:$0xf]  ;;  %v9834_v21 = vsel %vm12724_vm14, %v11627_v14, %v9833_v62  ;;  %v9921_v48 = vunpack.c.l.b16 %v9837_v38 }
 0x6e2   : > { %v15890_v62 = vld [vmem:[#allocation37_spill] sm:$0xff]  ;;  %v11629_v38 = vrot.slane %v9721_v26, 9  ;;  %v12076_v26 = vld [vmem:[#allocation3 + $0xac] sm:$0xf] }
 0x6e3   : > { %10044 = vmatmul.bf16.gmra.mxu1 %v9940_v15  ;;  %v9826_v15 = vrot.slane %v12066_v43, 5 }
 0x6e5   : > { %v9828_v1 = vrot.slane %v9826_v15, 4  ;;  %v9827_v24 = vsel %vm12724_vm14, %v11626_v54, %v9826_v15 }
 0x6e6   : > { %v9918_v16 = vunpack.c.l.b16 %v9827_v24  ;;  %v15888_v24 = vld [vmem:[#allocation25_spill] sm:$0xff] }
 0x6e8   : > { %v8238_v7 = vpop.f32.mrf.mxu1 }
 0x6e9   : > { %v15185_v57 = vadd.f32 %v8238_v7, %v15877_v0  ;;  %v12067_v7 = vld [vmem:[#allocation3 + $0x74] sm:$0x1] }
 0x6ea   : > { %v9829_v55 = vrot.slane %v12067_v7, 5 }
 0x6ec   : > { %v9830_v0 = vsel %vm12724_vm14, %v9828_v1, %v9829_v55  ;;  %v9840_v1 = vrot.slane %v12070_v42, 5 }
 0x6ed   : > { %v9919_v19 = vunpack.c.l.b16 %v9830_v0 }
 0x6ee   : > { %v9842_v54 = vrot.slane %v9840_v1, 4 }
 0x6f0   : > { %v8241_v25 = vpop.f32.mrf.mxu1 }
 0x6f1   : > { %v15192_v44 = vadd.f32 %v8241_v25, %v15878_v61  ;;  %v15882_v25 = vld [vmem:[#allocation35_spill] sm:$0xff] }
 0x6f3   : > { %10049 = vmatmul.bf16.gmra.mxu1 %v9941_v22  ;;  %v9943_v22 = vpack.c.b16 %v9919_v19, %v9918_v16 }
 0x6f8   : > { %v8243_v28 = vpop.f32.mrf.mxu1 }
 0x6f9   : > { %v15195_v13 = vadd.f32 %v8243_v28, %v15879_v12  ;;  %v15884_v12 = vld [vmem:[#allocation36_spill] sm:$0xff] }
 0x700   : > { %v8246_v5 = vpop.f32.mrf.mxu1 }
 0x701   : > { %v15202_v41 = vadd.f32 %v8246_v5, %v15880_v56  ;;  %v9920_v5 = vunpack.c.l.b16 %v9834_v21  ;;  %v12073_v21 = vld [vmem:[#allocation3 + $0x98] sm:$0x1] }
 0x703   : > { %10054 = vmatmul.bf16.gmra.mxu1 %v9942_v2  ;;  %v15886_v2 = vld [vmem:[#allocation44_spill] sm:$0xff]  ;;  %v9944_v15 = vpack.c.b16 %v9921_v48, %v9920_v5  ;;  %v9850_v48 = vrot.slane %v12073_v21, 5 }
 0x708   : > { %v8248_v30 = vpop.f32.mrf.mxu1 }
 0x709   : > { %v15205_v50 = vadd.f32 %v8248_v30, %v15881_v17  ;;  %v9720_v30 = vld [vmem:[#allocation3 + $0x84] sm:$0xe]  ;;  %v12071_v17 = vld [vmem:[#allocation3 + $0x8c] sm:$0x1] }
 0x70a   : > { %v11628_v55 = vrot.slane %v9720_v30, 9  ;;  %v9843_v0 = vrot.slane %v12071_v17, 5  ;;  %v9722_v17 = vld [vmem:[#allocation3 + $0x9c] sm:$0xe] }
 0x70c   : > { %v9844_v16 = vsel %vm12724_vm14, %v9842_v54, %v9843_v0 }
 0x710   : > { %v8251_v32 = vpop.f32.mrf.mxu1 }
 0x711   : > { %v15212_v61 = vadd.f32 %v8251_v32, %v15882_v25  ;;  %v9841_v32 = vsel %vm12724_vm14, %v11628_v55, %v9840_v1  ;;  %v9923_v25 = vunpack.c.l.b16 %v9844_v16  ;;  %v12075_v16 = vld [vmem:[#allocation3 + $0xa4] sm:$0x1] }
 0x713   : > { %15883 = vst [vmem:[#allocation26_spill] sm:$0xff] %v15212_v61  ;;  %10059 = vmatmul.bf16.gmra.mxu1 %v9943_v22  ;;  %v9922_v22 = vunpack.c.l.b16 %v9841_v32  ;;  %v9857_v32 = vrot.slane %v12075_v16, 5 }
 0x715   : > { %v9945_v6 = vpack.c.b16 %v9923_v25, %v9922_v22 }
 0x718   : > { %v8253_v28 = vpop.f32.mrf.mxu1 }
 0x719   : > { %v15215_v10 = vadd.f32 %v8253_v28, %v15884_v12  ;;  %v12072_v28 = vld [vmem:[#allocation3 + $0x94] sm:$0xf] }
 0x71a   : > { %v9847_v14 = vrot.slane %v12072_v28, 5 }
 0x71b   : > { %15885 = vst [vmem:[#allocation39_spill] sm:$0xff] %v15215_v10 }
 0x71c   : > { %v9849_v49 = vrot.slane %v9847_v14, 4 }
 0x720   : > { %v10025_v56 = vpop.f32.mrf.mxu1 }
 0x721   : > { %v15222_v43 = vadd.f32 %v10025_v56, %v15886_v2  ;;  %v9851_v56 = vsel %vm12724_vm14, %v9849_v49, %v9850_v48  ;;  %v9848_v2 = vsel %vm12724_vm14, %v11629_v38, %v9847_v14  ;;  %v9861_v49 = vrot.slane %v12076_v26, 5 }
 0x722   : > { %v9924_v42 = vunpack.c.l.b16 %v9848_v2  ;;  %v9864_v48 = vrot.slane %v15001_v18, 5 }
 0x723   : > { %15887 = vst [vmem:[#allocation40_spill] sm:$0xff] %v15222_v43  ;;  %10064 = vmatmul.bf16.gmra.mxu1 %v9944_v15  ;;  %v9925_v15 = vunpack.c.l.b16 %v9851_v56  ;;  %v9863_v38 = vrot.slane %v9861_v49, 4 }
 0x725   : > { %v9946_v54 = vpack.c.b16 %v9925_v15, %v9924_v42  ;;  %v9865_v2 = vsel %vm12724_vm14, %v9863_v38, %v9864_v48  ;;  %v15297_v48 = vpop.f32.mrf.mxu2 }
 0x726   : > { %v9929_v15 = vunpack.c.l.b16 %v9865_v2  ;;  %v15302_v2 = vpop.f32.mrf.mxu3 }
 0x728   : > { %v10027_v7 = vpop.f32.mrf.mxu1 }
 0x729   : > { %v15225_v19 = vadd.f32 %v10027_v7, %v15888_v24  ;;  %v12074_v7 = vld [vmem:[#allocation3 + $0xa0] sm:$0xf]  ;;  %v11630_v24 = vrot.slane %v9722_v17, 9 }
 0x72a   : > { %v9854_v55 = vrot.slane %v12074_v7, 5 }
 0x72b   : > { %15889 = vst [vmem:[#allocation27_spill] sm:$0xff] %v15225_v19 }
 0x72c   : > { %v9856_v0 = vrot.slane %v9854_v55, 4 }
 0x72e   : > { %v9858_v22 = vsel %vm12724_vm14, %v9856_v0, %v9857_v32  ;;  %v15898_v0 = vld [vmem:[#allocation34_spill] sm:$0xff] }
 0x730   : > { %v10030_v51 = vpop.f32.mrf.mxu1 }
 0x731   : > { %v15232_v31 = vadd.f32 %v10030_v51, %v15890_v62  ;;  %v9927_v51 = vunpack.c.l.b16 %v9858_v22  ;;  %v9726_v22 = vld [vmem:[#allocation3 + $0xcc] sm:$0xe] }
 0x733   : > { %15891 = vst [vmem:[#allocation43_spill] sm:$0xff] %v15232_v31  ;;  %10069 = vmatmul.bf16.gmra.mxu1 %v9945_v6 }
 0x738   : > { %v10032_v12 = vpop.f32.mrf.mxu1 }
 0x739   : > { %v15235_v5 = vadd.f32 %v10032_v12, %v14953_v4  ;;  %v9723_v12 = vld [vmem:[#allocation3 + $0xa8] sm:$0xe] }
 0x73a   : > { %v11631_v21 = vrot.slane %v9723_v12, 9 }
 0x73b   : > { %15892 = vst [vmem:[#allocation45_spill] sm:$0xff] %v15235_v5 }
 0x740   : > { %v10035_v1 = vpop.f32.mrf.mxu1 }
 0x741   : > { %v15242_v30 = vadd.f32 %v10035_v1, %v14974_v53  ;;  %v9855_v53 = vsel %vm12724_vm14, %v11630_v24, %v9854_v55 }
 0x742   : > { %v9926_v62 = vunpack.c.l.b16 %v9855_v53  ;;  %v15900_v53 = vld [vmem:[#allocation38_spill] sm:$0xff] }
 0x743   : > { %10074 = vmatmul.bf16.gmra.mxu1 %v9946_v54  ;;  %v10182_v61 = vmul.f32 %v15242_v30, %v15242_v30 }
 0x744   : > { %v9947_v14 = vpack.c.b16 %v9927_v51, %v9926_v62 }
 0x748   : > { %v10037_v4 = vpop.f32.mrf.mxu1 }
 0x749   : > { %v15245_v25 = vadd.f32 %v10037_v4, %v14991_v29 }
 0x74b   : > { %15893 = vst [vmem:[#allocation28_spill] sm:$0xff] %v15245_v25 }
 0x750   : > { %v10040_v6 = vpop.f32.mrf.mxu1 }
 0x751   : > { %v15252_v28 = vadd.f32 %v10040_v6, %v15008_v37  ;;  %v9862_v37 = vsel %vm12724_vm14, %v11631_v21, %v9861_v49 }
 0x752   : > { %v9928_v42 = vunpack.c.l.b16 %v9862_v37 }
 0x753   : > { %15894 = vst [vmem:[#allocation29_spill] sm:$0xff] %v15252_v28  ;;  %10079 = vmatmul.bf16.gmra.mxu1 %v9947_v14 }
 0x754   : > { %v9948_v7 = vpack.c.b16 %v9929_v15, %v9928_v42  ;;  %v15307_v15 = vpop.f32.mrf.mxu0  ;;  %v15311_v42 = vpop.f32.mrf.mxu3 }
 0x758   : > { %v10042_v29 = vpop.f32.mrf.mxu1 }
 0x759   : > { %v15256_v56 = vadd.f32 %v10042_v29, %v15030_v63 }
 0x75b   : > { %15895 = vst [vmem:[#allocation14_spill] sm:$0xff] %v15256_v56 }
 0x760   : > { %v10045_v1 = vpop.f32.mrf.mxu1 }
 0x761   : > { %v15263_v54 = vadd.f32 %v10045_v1, %v15050_v52  ;;  %v9882_v52 = vrot.slane %v15095_v34, 5 }
 0x763   : > { %15896 = vst [vmem:[#allocation15_spill] sm:$0xff] %v15263_v54  ;;  %10084 = vmatmul.bf16.gmra.mxu1 %v9948_v7  ;;  %v9884_v51 = vrot.slane %v9882_v52, 4  ;;  %v15316_v7 = vpop.f32.mrf.mxu0 }
 0x768   : > { %v10047_v55 = vpop.f32.mrf.mxu1 }
 0x769   : > { %v15266_v18 = vadd.f32 %v10047_v55, %v15069_v58  ;;  %v11634_v58 = vrot.slane %v9726_v22, 9 }
 0x76b   : > { %v9883_v6 = vsel %vm12724_vm14, %v11634_v58, %v9882_v52 }
 0x76c   : > { %v9934_v34 = vunpack.c.l.b16 %v9883_v6  ;;  %v10137_v6 = vadd.f32 %v15225_v19, %v15222_v43 }
 0x770   : > { %v10050_v63 = vpop.f32.mrf.mxu1 }
 0x771   : > { %v15269_v17 = vadd.f32 %v10050_v63, %v15083_v11  ;;  %v9885_v11 = vrot.slane %v15114_v9, 5  ;;  %v15320_v63 = vpop.f32.mrf.mxu3 }
 0x773   : > { %15897 = vst [vmem:[#allocation30_spill] sm:$0xff] %v15269_v17  ;;  %10089 = vmatmul.bf16.gmra.mxu1 %v15898_v0  ;;  %v15325_v0 = vpop.f32.mrf.mxu0 }
 0x778   : > { %v10052_v4 = vpop.f32.mrf.mxu1 }
 0x779   : > { %v15273_v24 = vadd.f32 %v10052_v4, %v15111_v47  ;;  %v9886_v47 = vsel %vm12724_vm14, %v9884_v51, %v9885_v11  ;;  %v15331_v52 = vpop.f32.mrf.mxu3 }
 0x77b   : > { %15899 = vst [vmem:[#allocation33_spill] sm:$0xff] %v15273_v24 }
 0x780   : > { %v10055_v16 = vpop.f32.mrf.mxu1 }
 0x781   : > { %v15277_v32 = vadd.f32 %v10055_v16, %v15118_v8  ;;  %v9935_v8 = vunpack.c.l.b16 %v9886_v47  ;;  %v15339_v58 = vpop.f32.mrf.mxu3 }
 0x783   : > { %10094 = vmatmul.bf16.gmra.mxu1 %v15900_v53  ;;  %v9951_v26 = vpack.c.b16 %v9935_v8, %v9934_v34  ;;  %v10138_v34 = vadd.f32 %v10137_v6, %v15232_v31  ;;  %v10179_v8 = vmul.f32 %v15225_v19, %v15225_v19 }
 0x788   : > { %v10057_v62 = vpop.f32.mrf.mxu1 }
 0x789   : > { %v15286_v14 = vadd.f32 %v10057_v62, %v15129_v60  ;;  %v15347_v62 = vpop.f32.mrf.mxu3 }
 0x790   : > { %v10060_v49 = vpop.f32.mrf.mxu1 }
 0x791   : > { %v15289_v12 = vadd.f32 %v10060_v49, %v15132_v3 }
 0x793   : > { %10099 = vmatmul.bf16.gmra.mxu1 %v9951_v26  ;;  %v10139_v26 = vadd.f32 %v10138_v34, %v15235_v5  ;;  %v15371_v34 = vpop.f32.mrf.mxu3 }
 0x798   : > { %v10062_v38 = vpop.f32.mrf.mxu1 }
 0x799   : > { %v15292_v9 = vadd.f32 %v10062_v38, %v15139_v59  ;;  %v15309_v59 = vpop.f32.mrf.mxu2 }
 0x7a0   : > { %v10065_v29 = vpop.f32.mrf.mxu1 }
 0x7a1   : > { %v15295_v21 = vadd.f32 %v10065_v29, %v15142_v33  ;;  %v10178_v29 = vmul.f32 %v15222_v43, %v15222_v43 }
 0x7a8   : > { %v10067_v46 = vpop.f32.mrf.mxu1 }
 0x7a9   : > { %v15300_v60 = vadd.f32 %v10067_v46, %v15149_v27  ;;  %v15318_v27 = vpop.f32.mrf.mxu2  ;;  %v10180_v46 = vmul.f32 %v15232_v31, %v15232_v31 }
 0x7b0   : > { %v10070_v37 = vpop.f32.mrf.mxu1 }
 0x7b1   : > { %v15305_v3 = vadd.f32 %v10070_v37, %v15152_v39  ;;  %v15327_v4 = vpop.f32.mrf.mxu2  ;;  %v10140_v37 = vadd.f32 %v10139_v26, %v15242_v30  ;;  %v10183_v26 = vmul.f32 %v15245_v25, %v15245_v25 }
 0x7b3   : > { %v10141_v6 = vadd.f32 %v10140_v37, %v15245_v25  ;;  %v10184_v37 = vmul.f32 %v15252_v28, %v15252_v28 }
 0x7b5   : > { %v10142_v43 = vadd.f32 %v10141_v6, %v15252_v28  ;;  %v10185_v6 = vmul.f32 %v15256_v56, %v15256_v56  ;;  %v10187_v28 = vmul.f32 %v15266_v18, %v15266_v18 }
 0x7b8   : > { %v10072_v33 = vpop.f32.mrf.mxu1 }
 0x7b9   : > { %v15314_v1 = vadd.f32 %v10072_v33, %v15159_v45  ;;  %v15333_v45 = vpop.f32.mrf.mxu0  ;;  %v15337_v53 = vpop.f32.mrf.mxu2  ;;  %v10210_v33 = vadd.f32 %v10179_v8, %v10178_v29  ;;  %v10143_v8 = vadd.f32 %v10142_v43, %v15256_v56 }
 0x7bb   : > { %v10211_v10 = vadd.f32 %v10210_v33, %v10180_v46 }
 0x7c0   : > { %v10075_v55 = vpop.f32.mrf.mxu1 }
 0x7c1   : > { %v15323_v39 = vadd.f32 %v10075_v55, %v15162_v20  ;;  %v15343_v20 = vpop.f32.mrf.mxu0  ;;  %v15345_v11 = vpop.f32.mrf.mxu2  ;;  %v10181_v55 = vmul.f32 %v15235_v5, %v15235_v5  ;;  %v10144_v5 = vadd.f32 %v10143_v8, %v15263_v54 }
 0x7c8   : > { %v15329_v16 = vpop.f32.mrf.mxu1 }
 0x7c9   : > { %v15357_v49 = vpop.f32.mrf.mxu0  ;;  %v15359_v38 = vpop.f32.mrf.mxu2 }
 0x7ca   : > { %15901 = vst [vmem:[#allocation31_spill] sm:$0xff] %v15357_v49  ;;  %v10212_v49 = vadd.f32 %v10211_v10, %v10181_v55  ;;  %v10145_v10 = vadd.f32 %v10144_v5, %v15266_v18  ;;  %v10188_v5 = vmul.f32 %v15269_v17, %v15269_v17 }
 0x7cc   : > { %v10213_v29 = vadd.f32 %v10212_v49, %v10182_v61  ;;  %v10186_v61 = vmul.f32 %v15263_v54, %v15263_v54  ;;  %v10146_v43 = vadd.f32 %v10145_v10, %v15269_v17  ;;  %v15394_v49 = vpop.f32.mrf.mxu3  ;;  %v8705_v17 = vadd.f32 %v15318_v27, %v15175_v23 }
 0x7cd   : > { %v8707_v27 = vadd.f32 %v15337_v53, %v15185_v57  ;;  %v10195_v53 = vmul.f32 %v15300_v60, %v15300_v60 }
 0x7ce   : > { %v10214_v33 = vadd.f32 %v10213_v29, %v10183_v26  ;;  %v10147_v26 = vadd.f32 %v10146_v43, %v15273_v24 }
 0x7d0   : > { %v15335_v22 = vpop.f32.mrf.mxu1  ;;  %v10215_v25 = vadd.f32 %v10214_v33, %v10184_v37  ;;  %v10148_v56 = vadd.f32 %v10147_v26, %v15277_v32  ;;  %v10189_v33 = vmul.f32 %v15273_v24, %v15273_v24 }
 0x7d1   : > { %v15382_v31 = vpop.f32.mrf.mxu0  ;;  %v15384_v46 = vpop.f32.mrf.mxu2 }
 0x7d2   : > { %v10216_v8 = vadd.f32 %v10215_v25, %v10185_v6  ;;  %v10149_v10 = vadd.f32 %v10148_v56, %v15286_v14  ;;  %v8703_v6 = vadd.f32 %v15297_v48, %v15165_v36  ;;  %v10191_v56 = vmul.f32 %v15286_v14, %v15286_v14 }
 0x7d4   : > { %v10217_v29 = vadd.f32 %v10216_v8, %v10186_v61  ;;  %v10190_v8 = vmul.f32 %v15277_v32, %v15277_v32  ;;  %v10150_v26 = vadd.f32 %v10149_v10, %v15289_v12  ;;  %v9018_v36 = vadd.f32 %v15302_v2, %v8703_v6  ;;  %v8989_v48 = vpop.f32.mrf.mxu3 }
 0x7d5   : > { %v9020_v2 = vadd.f32 %v15320_v63, %v8705_v17  ;;  %v8708_v17 = vadd.f32 %v15345_v11, %v15192_v44  ;;  %v10196_v11 = vmul.f32 %v15305_v3, %v15305_v3 }
 0x7d6   : > { %v10218_v37 = vadd.f32 %v10217_v29, %v10187_v28  ;;  %v8704_v28 = vadd.f32 %v15309_v59, %v15172_v35  ;;  %v10151_v24 = vadd.f32 %v10150_v26, %v15292_v9  ;;  %v8706_v59 = vadd.f32 %v15327_v4, %v15182_v40 }
 0x7d8   : > { %v15341_v51 = vpop.f32.mrf.mxu1  ;;  %v10219_v61 = vadd.f32 %v10218_v37, %v10188_v5  ;;  %v10192_v37 = vmul.f32 %v15289_v12, %v15289_v12  ;;  %v10152_v10 = vadd.f32 %v10151_v24, %v15295_v21  ;;  %v9019_v35 = vadd.f32 %v15311_v42, %v8704_v28 }
 0x7d9   : > { %v15405_v54 = vpop.f32.mrf.mxu0  ;;  %v8674_v43 = vpop.f32.mrf.mxu2  ;;  %v9700_v24 = vadd.f32 %v15307_v15, %v9018_v36  ;;  %v10194_v42 = vmul.f32 %v15295_v21, %v15295_v21  ;;  %v9021_v26 = vadd.f32 %v15331_v52, %v8706_v59  ;;  %v8709_v52 = vadd.f32 %v15359_v38, %v15195_v13 }
 0x7da   : > { %v10220_v29 = vadd.f32 %v10219_v61, %v10189_v33  ;;  %v10193_v61 = vmul.f32 %v15292_v9, %v15292_v9  ;;  %v10153_v23 = vadd.f32 %v10152_v10, %v15300_v60  ;;  %v9701_v4 = vadd.f32 %v15316_v7, %v9019_v35 }
 0x7db   : > { %v9022_v7 = vadd.f32 %v15339_v58, %v8707_v27  ;;  %v9023_v10 = vadd.f32 %v15347_v62, %v8708_v17  ;;  %v10197_v13 = vmul.f32 %v15314_v1, %v15314_v1  ;;  %v15903_v27 = vld [vmem:[#allocation26_spill] sm:$0xff] }
 0x7dc   : > { %v10221_v5 = vadd.f32 %v10220_v29, %v10190_v8  ;;  %v10154_v40 = vadd.f32 %v10153_v23, %v15305_v3  ;;  %v15448_v29 = vadd.f32 %v15329_v16, %v9700_v24  ;;  %v8992_v36 = vpop.f32.mrf.mxu3  ;;  %v9703_v16 = vadd.f32 %v15333_v45, %v9021_v26  ;;  %v15902_v23 = vld [vmem:[#allocation31_spill] sm:$0xff] }
 0x7dd   : > { %v9704_v59 = vadd.f32 %v15343_v20, %v9022_v7  ;;  %v8711_v45 = vadd.f32 %v8674_v43, %v15205_v50 }
 0x7de   : > { %v10222_v33 = vadd.f32 %v10221_v5, %v10191_v56  ;;  %v10155_v15 = vadd.f32 %v10154_v40, %v15314_v1  ;;  %v9702_v56 = vadd.f32 %v15325_v0, %v9020_v2  ;;  %v8710_v0 = vadd.f32 %v15384_v46, %v15202_v41 }
 0x7df   : > { %v10198_v41 = vmul.f32 %v15323_v39, %v15323_v39  ;;  %v9705_v2 = vadd.f32 %v15902_v23, %v9023_v10  ;;  %v10199_v50 = vmul.f32 %v15448_v29, %v15448_v29 }
 0x7e0   : > { %v15351_v47 = vpop.f32.mrf.mxu1  ;;  %v10223_v8 = vadd.f32 %v10222_v33, %v10192_v37  ;;  %v10156_v5 = vadd.f32 %v10155_v15, %v15323_v39  ;;  %v15458_v37 = vadd.f32 %v15335_v22, %v9701_v4  ;;  %v15468_v35 = vadd.f32 %v15341_v51, %v9702_v56 }
 0x7e1   : > { %v9671_v63 = vpop.f32.mrf.mxu0  ;;  %v8677_v28 = vpop.f32.mrf.mxu2  ;;  %v9024_v22 = vadd.f32 %v15371_v34, %v8709_v52  ;;  %v9025_v51 = vadd.f32 %v15394_v49, %v8710_v0 }
 0x7e2   : > { %v10224_v57 = vadd.f32 %v10223_v8, %v10193_v61  ;;  %v10157_v38 = vadd.f32 %v10156_v5, %v15448_v29  ;;  %v15477_v61 = vadd.f32 %v15351_v47, %v9703_v16  ;;  %v8712_v20 = vadd.f32 %v8677_v28, %v15903_v27 }
 0x7e3   : > { %v9026_v47 = vadd.f32 %v8989_v48, %v8711_v45  ;;  %v10200_v49 = vmul.f32 %v15458_v37, %v15458_v37  ;;  %v9707_v28 = vadd.f32 %v15405_v54, %v9025_v51 }
 0x7e4   : > { %v10225_v44 = vadd.f32 %v10224_v57, %v10194_v42  ;;  %v10158_v46 = vadd.f32 %v10157_v38, %v15458_v37  ;;  %v9706_v42 = vadd.f32 %v15382_v31, %v9024_v22  ;;  %v9027_v57 = vadd.f32 %v8992_v36, %v8712_v20 }
 0x7e5   : > { %v10201_v31 = vmul.f32 %v15468_v35, %v15468_v35  ;;  %v9708_v52 = vadd.f32 %v9671_v63, %v9026_v47 }
 0x7e6   : > { %v10226_v58 = vadd.f32 %v10225_v44, %v10195_v53  ;;  %v10159_v43 = vadd.f32 %v10158_v46, %v15468_v35  ;;  %v15904_v53 = vld [vmem:[#allocation39_spill] sm:$0xff] }
 0x7e8   : > { %v15369_v19 = vpop.f32.mrf.mxu1  ;;  %v10227_v62 = vadd.f32 %v10226_v58, %v10196_v11  ;;  %v10160_v26 = vadd.f32 %v10159_v43, %v15477_v61 }
 0x7e9   : > { %v9674_v24 = vpop.f32.mrf.mxu0  ;;  %v15486_v8 = vadd.f32 %v15369_v19, %v9704_v59  ;;  %v8679_v40 = vpop.f32.mrf.mxu2 }
 0x7ea   : > { %v10228_v34 = vadd.f32 %v10227_v62, %v10197_v13  ;;  %v8713_v15 = vadd.f32 %v8679_v40, %v15904_v53  ;;  %v8994_v19 = vpop.f32.mrf.mxu3  ;;  %v9709_v5 = vadd.f32 %v9674_v24, %v9027_v57 }
 0x7eb   : > { %v10161_v48 = vadd.f32 %v10160_v26, %v15486_v8  ;;  %v10203_v0 = vmul.f32 %v15486_v8, %v15486_v8 }
 0x7ec   : > { %v10229_v4 = vadd.f32 %v10228_v34, %v10198_v41  ;;  %v9028_v16 = vadd.f32 %v8994_v19, %v8713_v15 }
 0x7ee   : > { %v10230_v56 = vadd.f32 %v10229_v4, %v10199_v50 }
 0x7f0   : > { %v15389_v55 = vpop.f32.mrf.mxu1  ;;  %v10231_v11 = vadd.f32 %v10230_v56, %v10200_v49 }
 0x7f1   : > { %v15493_v17 = vadd.f32 %v15389_v55, %v9705_v2  ;;  %v10202_v55 = vmul.f32 %v15477_v61, %v15477_v61  ;;  %v9676_v63 = vpop.f32.mrf.mxu0 }
 0x7f2   : > { %v10232_v10 = vadd.f32 %v10231_v11, %v10201_v31 }
 0x7f3   : > { %v10162_v54 = vadd.f32 %v10161_v48, %v15493_v17  ;;  %v10204_v38 = vmul.f32 %v15493_v17, %v15493_v17 }
 0x7f4   : > { %v10233_v13 = vadd.f32 %v10232_v10, %v10202_v55 }
 0x7f6   : > { %v10234_v45 = vadd.f32 %v10233_v13, %v10203_v0  ;;  %v10317_v13 = vld [vmem:[%s15717_s5] sm:$0x1] }
 0x7f8   : > { %v15407_v25 = vpop.f32.mrf.mxu1  ;;  %v10235_v23 = vadd.f32 %v10234_v45, %v10204_v38 }
 0x7f9   : > { %v15501_v7 = vadd.f32 %v15407_v25, %v9706_v42 }
 0x7fb   : > { %v10163_v25 = vadd.f32 %v10162_v54, %v15501_v7  ;;  %v10205_v62 = vmul.f32 %v15501_v7, %v15501_v7 }
 0x7fd   : > { %v10236_v27 = vadd.f32 %v10235_v23, %v10205_v62  ;;  %v10320_v62 = vld [vmem:[%s15718_s6] sm:$0x1] }
 0x800   : > { %v15434_v6 = vpop.f32.mrf.mxu1 }
 0x801   : > { %v15507_v36 = vadd.f32 %v15434_v6, %v9707_v28  ;;  %v9710_v6 = vadd.f32 %v9676_v63, %v9028_v16 }
 0x803   : > { %v10164_v59 = vadd.f32 %v10163_v25, %v15507_v36 }
 0x808   : > { %v10097_v33 = vpop.f32.mrf.mxu1 }
 0x809   : > { %v15512_v58 = vadd.f32 %v10097_v33, %v9708_v52  ;;  %v10206_v33 = vmul.f32 %v15507_v36, %v15507_v36 }
 0x80b   : > { %v10165_v41 = vadd.f32 %v10164_v59, %v15512_v58  ;;  %v10207_v20 = vmul.f32 %v15512_v58, %v15512_v58  ;;  %v10237_v34 = vadd.f32 %v10236_v27, %v10206_v33  ;;  %v15905_v33 = vld [vmem:[#allocation40_spill] sm:$0xff]  ;;  %v15906_v27 = vld [vmem:[#allocation27_spill] sm:$0xff] }
 0x80d   : > { %v10238_v42 = vadd.f32 %v10237_v34, %v10207_v20 }
 0x810   : > { %v10100_v44 = vpop.f32.mrf.mxu1 }
 0x811   : > { %v15517_v22 = vadd.f32 %v10100_v44, %v9709_v5 }
 0x813   : > { %v10166_v51 = vadd.f32 %v10165_v41, %v15517_v22  ;;  %v10208_v50 = vmul.f32 %v15517_v22, %v15517_v22 }
 0x815   : > { %v10239_v47 = vadd.f32 %v10238_v42, %v10208_v50  ;;  %v15908_v50 = vld [vmem:[#allocation45_spill] sm:$0xff] }
 0x818   : > { %v10102_v46 = vpop.f32.mrf.mxu1 }
 0x819   : > { %v15524_v2 = vadd.f32 %v10102_v46, %v9710_v6 }
 0x81b   : > { %v10167_v24 = vadd.f32 %v10166_v51, %v15524_v2  ;;  %v10209_v43 = vmul.f32 %v15524_v2, %v15524_v2 }
 0x81d   : > { %10168 = vadd.xlane.f32.xlu1 %v10167_v24  ;;  %v10240_v40 = vadd.f32 %v10239_v47, %v10209_v43  ;;  %v15907_v24 = vld [vmem:[#allocation43_spill] sm:$0xff] }
 0x825   : > { %10241 = vadd.xlane.f32.xlu1 %v10240_v40 }
 0x890   : > { %v10169_v4 = vpop.xlane.xlu1 %10168 }
 0x891   : > { %v10170_v49 = vrot.slane %v10169_v4, 4 }
 0x893   : > { %v10171_v26 = vadd.f32 %v10170_v49, %v10169_v4  ;;  %v15909_v4 = vld [vmem:[#allocation28_spill] sm:$0xff] }
 0x895   : > { %v10172_v28 = vrot.slane %v10171_v26, 2 }
 0x897   : > { %v10173_v57 = vadd.f32 %v10172_v28, %v10171_v26 }
 0x898   : > { %v10242_v53 = vpop.xlane.xlu1 %10241 }
 0x899   : > { %v10243_v15 = vrot.slane %v10242_v53, 4  ;;  %v10174_v19 = vrot.slane %v10173_v57, 1 }
 0x89b   : > { %v10244_v56 = vadd.f32 %v10243_v15, %v10242_v53  ;;  %v10175_v31 = vadd.f32 %v10174_v19, %v10173_v57  ;;  %v15910_v57 = vld [vmem:[#allocation29_spill] sm:$0xff]  ;;  %v15911_v19 = vld [vmem:[#allocation14_spill] sm:$0xff] }
 0x89d   : > { %v10245_v48 = vrot.slane %v10244_v56, 2  ;;  %11938 = vpush %v10175_v31  ;;  %v15912_v31 = vld [vmem:[#allocation15_spill] sm:$0xff] }
 0x89f   : > { %v10246_v52 = vadd.f32 %v10245_v48, %v10244_v56 }
 0x8a1   : > { %v10247_v44 = vrot.slane %v10246_v52, 1 }
 0x8a3   : > { %v10248_v11 = vadd.f32 %v10247_v44, %v10246_v52 }
 0x8a5   : > { %11940 = vpush %v10248_v11 }
 0x8ce   : > { %s11939_s12 = spop %11938 }
 0x8cf   : > { %s10291_s21 = smul.f32 %s11939_s12, %s13845_s18  ;;  %s15579_s12 = scalar_lea.vmem [#allocation10], %s10610_s30 }
 0x8d1   : > { %s10301_s29 = smul.f32 %s10291_s21, %s10291_s21  ;;  %v10321_v6 = vstv %s10291_s21  ;;  %s11913_s21 = sshll.u32 %s12309_s28, 8 }
 0x8d6   : > { %s11941_s23 = spop %11940 }
 0x8d7   : > { %s10300_s15 = smul.f32 %s11941_s23, %s13845_s18  ;;  %s10502_s23 = scalar_lea.hbm %s15719_s7, %s11913_s21 }
 0x8d9   : > { %s10302_s17 = ssub.f32 %s10300_s15, %s10301_s29  ;;  %s10503_s15 = sshll.u32 %s15579_s12, 4  ;;  %s10504_s15 = int_to_ptr.vmem [resolvable:$true] %s10503_s15 }
 0x8db   : > { %s10303_s11 = smax.f32 %s12245_s16, %s10302_s17  ;;  %s10505_s17 = sshll.u32 %s10502_s23, 4  ;;  %s10506_s17 = int_to_ptr.hbm [resolvable:$true] %s10505_s17 }
 0x8dc   : > { %s10304_s20 = sadd.f32 1e-05, %s10303_s11  ;;  %s10491_s11 = scalar_lea.sflag [#allocation6], %s12393_s14 }
 0x8de   : > { %v10305_v55 = vstv %s10304_s20  ;;  %s12181_s20 = sshra.s32 %s10506_s17, 4  ;;  %s12182_s20 = int_to_ptr.hbm [resolvable:$true] %s12181_s20 }
 0x8df   : > { %12022 = vrsqrt.f32 %v10305_v55  ;;  %vm10312_vm4 = vweird.f32 %v10305_v55  ;;  %s12183_s19 = scalar_lea.hbm %s12182_s20, 256  ;;  %p12188_p11 = scmp.lt.s32.totalorder %s12182_s20, %s15719_s7 }
 0x8e0   : > { %p12184_p1 = scmp.ne.s32.totalorder %s12182_s20, %s12183_s19  ;;  %p12189_p2 = scmp.lt.s32.totalorder %s12187_s1, %s12183_s19 }
 0x8e2   : > { %p12185_p4 = pnand %p12184_p1, %p12360_p3  ;;  %p12190_p9 = por %p12189_p2, %p12188_p11 }
 0x8e4   : > { %p12186_p8 = pneg %p12185_p4 }
 0x8e5   : > { %v12023_v54 = vpop.eup %12022 }
 0x8e6   : > { %v10307_v5 = vmul.f32 %v12023_v54, %v10305_v55  ;;  %vm10313_vm3 = vweird.f32 %v12023_v54  ;;  %p12191_p10 = pnand %p12190_p9, %p12186_p8 }
 0x8e7   : > { %vm10314_vm5 = vmor %vm10312_vm4, %vm10313_vm3 }
 0x8e8   : > { %v10308_v16 = vmul.f32 %v12023_v54, %v10307_v5 }
 0x8ea   : > { %v10309_v10 = vmul.f32 0.5, %v10308_v16 }
 0x8ec   : > { %v10310_v0 = vsub.f32 1.5, %v10309_v10  ;;  %v15913_v10 = vld [vmem:[#allocation30_spill] sm:$0xff] }
 0x8ee   : > { %v10311_v25 = vmul.f32 %v12023_v54, %v10310_v0 }
 0x8f0   : > { %v10315_v63 = vsel %vm10314_vm5, %v12023_v54, %v10311_v25 }
 0x8f1   : > { %11942 = vpush %v10315_v63 }
 0x922   : > { %s11943_s16 = spop %11942 }
 0x923   : > { %v10318_v38 = vstv %s11943_s16 }
 0x924   : > { %v10319_v59 = vmul.f32 %v10318_v38, %v10317_v13  ;;  %v15914_v13 = vld [vmem:[#allocation33_spill] sm:$0xff] }
 0x926   : > { %v10322_v45 = vmul.f32 %v10321_v6, %v10319_v59  ;;  %v15543_v46 = vperm.slane %v10319_v59, 0 }
 0x928   : > { %v10323_v41 = vsub.f32 %v10320_v62, %v10322_v45  ;;  %v10359_v51 = vmul.f32 %v15543_v46, %v15905_v33  ;;  %v10360_v20 = vmul.f32 %v15543_v46, %v15906_v27  ;;  %v10361_v34 = vmul.f32 %v15543_v46, %v15907_v24 }
 0x929   : > { %v10362_v43 = vmul.f32 %v15543_v46, %v15908_v50  ;;  %v10363_v42 = vmul.f32 %v15543_v46, %v15242_v30  ;;  %v10364_v49 = vmul.f32 %v15543_v46, %v15909_v4  ;;  %v10365_v53 = vmul.f32 %v15543_v46, %v15910_v57 }
 0x92a   : > { %v15545_v23 = vperm.slane %v10323_v41, 0  ;;  %v10366_v56 = vmul.f32 %v15543_v46, %v15911_v19  ;;  %v10367_v48 = vmul.f32 %v15543_v46, %v15912_v31  ;;  %v10368_v55 = vmul.f32 %v15543_v46, %v15266_v18 }
 0x92b   : > { %v10369_v0 = vmul.f32 %v15543_v46, %v15913_v10  ;;  %v10370_v18 = vmul.f32 %v15543_v46, %v15914_v13  ;;  %v10371_v6 = vmul.f32 %v15543_v46, %v15277_v32  ;;  %v10372_v41 = vmul.f32 %v15543_v46, %v15286_v14 }
 0x92c   : > { %v10394_v47 = vadd.f32 %v15545_v23, %v10359_v51  ;;  %v10395_v40 = vadd.f32 %v15545_v23, %v10360_v20  ;;  %v10396_v26 = vadd.f32 %v15545_v23, %v10361_v34  ;;  %v10397_v28 = vadd.f32 %v15545_v23, %v10362_v43 }
 0x92d   : > { %v10398_v15 = vadd.f32 %v15545_v23, %v10363_v42  ;;  %v10399_v30 = vadd.f32 %v15545_v23, %v10364_v49  ;;  %v10400_v52 = vadd.f32 %v15545_v23, %v10365_v53  ;;  %v10401_v54 = vadd.f32 %v15545_v23, %v10366_v56 }
 0x92e   : > { %v10426_v44 = vmax.f32 %v10394_v47, 0.0  ;;  %v10427_v11 = vmax.f32 %v10395_v40, 0.0  ;;  %v10428_v5 = vmax.f32 %v10396_v26, 0.0  ;;  %v10429_v16 = vmax.f32 %v10397_v28, 0.0 }
 0x92f   : > { %v10402_v25 = vadd.f32 %v15545_v23, %v10367_v48  ;;  %v10430_v63 = vmax.f32 %v10398_v15, 0.0  ;;  %v10403_v38 = vadd.f32 %v15545_v23, %v10368_v55  ;;  %v10431_v59 = vmax.f32 %v10399_v30, 0.0 }
 0x930   : > { %10458 = vst [vmem:[%s15579_s12] sm:$0xff] %v10426_v44  ;;  %v10404_v45 = vadd.f32 %v15545_v23, %v10369_v0  ;;  %v10432_v62 = vmax.f32 %v10400_v52, 0.0  ;;  %v10405_v33 = vadd.f32 %v15545_v23, %v10370_v18  ;;  %v10433_v51 = vmax.f32 %v10401_v54, 0.0 }
 0x931   : > { %10459 = vst [vmem:[%s15579_s12 + $0x8] sm:$0xff] %v10427_v11  ;;  %v10373_v27 = vmul.f32 %v15543_v46, %v15289_v12  ;;  %v10406_v20 = vadd.f32 %v15545_v23, %v10371_v6  ;;  %v10434_v24 = vmax.f32 %v10402_v25, 0.0  ;;  %v10374_v32 = vmul.f32 %v15543_v46, %v15292_v9 }
 0x932   : > { %10460 = vst [vmem:[%s15579_s12 + $0x10] sm:$0xff] %v10428_v5  ;;  %v10407_v34 = vadd.f32 %v15545_v23, %v10372_v41  ;;  %v10435_v50 = vmax.f32 %v10403_v38, 0.0  ;;  %v10375_v14 = vmul.f32 %v15543_v46, %v15295_v21  ;;  %v10436_v42 = vmax.f32 %v10404_v45, 0.0 }
 0x933   : > { %10461 = vst [vmem:[%s15579_s12 + $0x18] sm:$0xff] %v10429_v16  ;;  %v10408_v43 = vadd.f32 %v15545_v23, %v10373_v27  ;;  %v10376_v12 = vmul.f32 %v15543_v46, %v15300_v60  ;;  %v10409_v47 = vadd.f32 %v15545_v23, %v10374_v32  ;;  %v10437_v40 = vmax.f32 %v10405_v33, 0.0 }
 0x934   : > { %10462 = vst [vmem:[%s15579_s12 + $0x20] sm:$0xff] %v10430_v63  ;;  %v10377_v9 = vmul.f32 %v15543_v46, %v15305_v3  ;;  %v10410_v4 = vadd.f32 %v15545_v23, %v10375_v14  ;;  %v10438_v49 = vmax.f32 %v10406_v20, 0.0  ;;  %v10378_v21 = vmul.f32 %v15543_v46, %v15314_v1 }
 0x935   : > { %10463 = vst [vmem:[%s15579_s12 + $0x28] sm:$0xff] %v10431_v59  ;;  %v10411_v26 = vadd.f32 %v15545_v23, %v10376_v12  ;;  %v10439_v28 = vmax.f32 %v10407_v34, 0.0  ;;  %v10379_v60 = vmul.f32 %v15543_v46, %v15323_v39  ;;  %v10440_v53 = vmax.f32 %v10408_v43, 0.0 }
 0x936   : > { %10464 = vst [vmem:[%s15579_s12 + $0x30] sm:$0xff] %v10432_v62  ;;  %v10412_v57 = vadd.f32 %v15545_v23, %v10377_v9  ;;  %v10380_v3 = vmul.f32 %v15543_v46, %v15448_v29  ;;  %v10413_v15 = vadd.f32 %v15545_v23, %v10378_v21  ;;  %v10441_v19 = vmax.f32 %v10409_v47, 0.0 }
 0x937   : > { %10465 = vst [vmem:[%s15579_s12 + $0x38] sm:$0xff] %v10433_v51  ;;  %v10381_v1 = vmul.f32 %v15543_v46, %v15458_v37  ;;  %v10414_v56 = vadd.f32 %v15545_v23, %v10379_v60  ;;  %v10442_v30 = vmax.f32 %v10410_v4, 0.0  ;;  %v10382_v39 = vmul.f32 %v15543_v46, %v15468_v35 }
 0x938   : > { %10466 = vst [vmem:[%s15579_s12 + $0x40] sm:$0xff] %v10434_v24  ;;  %v10415_v31 = vadd.f32 %v15545_v23, %v10380_v3  ;;  %v10443_v48 = vmax.f32 %v10411_v26, 0.0  ;;  %v10383_v29 = vmul.f32 %v15543_v46, %v15477_v61  ;;  %v10444_v44 = vmax.f32 %v10412_v57, 0.0 }
 0x939   : > { %10467 = vst [vmem:[%s15579_s12 + $0x48] sm:$0xff] %v10435_v50  ;;  %v10416_v52 = vadd.f32 %v15545_v23, %v10381_v1  ;;  %v10384_v37 = vmul.f32 %v15543_v46, %v15486_v8  ;;  %v10417_v11 = vadd.f32 %v15545_v23, %v10382_v39  ;;  %v10445_v55 = vmax.f32 %v10413_v15, 0.0 }
 0x93a   : > { %10468 = vst [vmem:[%s15579_s12 + $0x50] sm:$0xff] %v10436_v42  ;;  %v10385_v35 = vmul.f32 %v15543_v46, %v15493_v17  ;;  %v10418_v54 = vadd.f32 %v15545_v23, %v10383_v29  ;;  %v10446_v5 = vmax.f32 %v10414_v56, 0.0  ;;  %v10386_v61 = vmul.f32 %v15543_v46, %v15501_v7 }
 0x93b   : > { %10469 = vst [vmem:[%s15579_s12 + $0x58] sm:$0xff] %v10437_v40  ;;  %v10419_v16 = vadd.f32 %v15545_v23, %v10384_v37  ;;  %v10447_v8 = vmax.f32 %v10415_v31, 0.0  ;;  %v10387_v10 = vmul.f32 %v15543_v46, %v15507_v36  ;;  %v10448_v17 = vmax.f32 %v10416_v52, 0.0 }
 0x93c   : > { %10470 = vst [vmem:[%s15579_s12 + $0x60] sm:$0xff] %v10438_v49  ;;  %v10420_v0 = vadd.f32 %v15545_v23, %v10385_v35  ;;  %v10388_v25 = vmul.f32 %v15543_v46, %v15512_v58  ;;  %v10421_v63 = vadd.f32 %v15545_v23, %v10386_v61  ;;  %v10449_v7 = vmax.f32 %v10417_v11, 0.0 }
 0x93d   : > { %10471 = vst [vmem:[%s15579_s12 + $0x68] sm:$0xff] %v10439_v28  ;;  %v10389_v13 = vmul.f32 %v15543_v46, %v15517_v22  ;;  %v10422_v18 = vadd.f32 %v15545_v23, %v10387_v10  ;;  %v10450_v36 = vmax.f32 %v10418_v54, 0.0  ;;  %v10390_v38 = vmul.f32 %v15543_v46, %v15524_v2 }
 0x93e   : > { %10472 = vst [vmem:[%s15579_s12 + $0x70] sm:$0xff] %v10440_v53  ;;  %v10423_v58 = vadd.f32 %v15545_v23, %v10388_v25  ;;  %v10451_v59 = vmax.f32 %v10419_v16, 0.0  ;;  %v10452_v22 = vmax.f32 %v10420_v0, 0.0  ;;  %v10453_v62 = vmax.f32 %v10421_v63, 0.0 }
 0x93f   : > { %10473 = vst [vmem:[%s15579_s12 + $0x78] sm:$0xff] %v10441_v19  ;;  %v10424_v6 = vadd.f32 %v15545_v23, %v10389_v13  ;;  %v10425_v45 = vadd.f32 %v15545_v23, %v10390_v38  ;;  %v10454_v2 = vmax.f32 %v10422_v18, 0.0 }
 0x940   : > { %10474 = vst [vmem:[%s15579_s12 + $0x80] sm:$0xff] %v10442_v30  ;;  %v10455_v46 = vmax.f32 %v10423_v58, 0.0 }
 0x941   : > { %10475 = vst [vmem:[%s15579_s12 + $0x88] sm:$0xff] %v10443_v48  ;;  %v10456_v41 = vmax.f32 %v10424_v6, 0.0  ;;  %v10457_v23 = vmax.f32 %v10425_v45, 0.0 }
 0x942   : > { %10476 = vst [vmem:[%s15579_s12 + $0x90] sm:$0xff] %v10444_v44 }
 0x943   : > { %10477 = vst [vmem:[%s15579_s12 + $0x98] sm:$0xff] %v10445_v55 }
 0x944   : > { %10478 = vst [vmem:[%s15579_s12 + $0xa0] sm:$0xff] %v10446_v5 }
 0x945   : > { %10479 = vst [vmem:[%s15579_s12 + $0xa8] sm:$0xff] %v10447_v8 }
 0x946   : > { %10480 = vst [vmem:[%s15579_s12 + $0xb0] sm:$0xff] %v10448_v17 }
 0x947   : > { %10481 = vst [vmem:[%s15579_s12 + $0xb8] sm:$0xff] %v10449_v7 }
 0x948   : > { %10482 = vst [vmem:[%s15579_s12 + $0xc0] sm:$0xff] %v10450_v36 }
 0x949   : > { %10483 = vst [vmem:[%s15579_s12 + $0xc8] sm:$0xff] %v10451_v59 }
 0x94a   : > { %10484 = vst [vmem:[%s15579_s12 + $0xd0] sm:$0xff] %v10452_v22 }
 0x94b   : > { %10485 = vst [vmem:[%s15579_s12 + $0xd8] sm:$0xff] %v10453_v62 }
 0x94c   : > { %10486 = vst [vmem:[%s15579_s12 + $0xe0] sm:$0xff] %v10454_v2 }
 0x94d   : > { %10487 = vst [vmem:[%s15579_s12 + $0xe8] sm:$0xff] %v10455_v46 }
 0x94e   : > { %10488 = vst [vmem:[%s15579_s12 + $0xf0] sm:$0xff] %v10456_v41 }
 0x94f   : > { %10489 = vst [vmem:[%s15579_s12 + $0xf8] sm:$0xff] %v10457_v23 }
 0x950   : > { %12194 = shalt.err (!%p12191_p10)
}
 0x951   : > { %s12246_s14 = smov 128   ;;  %s12247_s12 = smov 8  }
 0x952   : > { %11954 = dma.vmem_to_hbm [thread:$0]  (%p12360_p3), %s10504_s15, 4096, %s10506_s17, %s10491_s11, %s12246_s14, %s12246_s14, %s12247_s12  }
 0x953 PF: > { %s10520_s21 = sand.u32 1, %s12225_s24   ;;  %p15915_p12 = scmp.ge.s32.totalorder %s12237_s27, 2 }
 0x954   : > { %s10521_s28 = scalar_lea.sflag [#allocation6], %s10520_s21 }
 0x955   : > { %p11968_p13 = pnand %p15915_p12, %p12323_p6 }
 0x957   : > { %p11969_p0 = pneg %p11968_p13 }
 0x959   : > { %12220 = dma.done.wait (%p11969_p0), %s10521_s28, 4096  }
 0x95a   : > { %12222 = vsyncadd (%p11969_p0), %s10521_s28, 4294963200  ;;  %p21_p5 = scmp.ge.s32.totalorder %s12350_s22, 4   ;;  %s15916_s24 = smov %s12229_s25 }
 0x95b   : > { %s15917_s25 = smov %s12233_s26  ;;  %s15918_s26 = smov %s12366_s10 }
 0x95c   : > { %s15919_s27 = smov %s12350_s22  ;;  %23 = sbr.rel (!%p21_p5) target bundleno = 8 (0x8), region = 123 }
 0x961   :  { %10527 = vsyncpa [#allocation5], 1 }
 0x962   :  { %10529 = vsyncpa [#allocation5 + $0x1], 1 }
 0x963   :  { %10530 = vsyncpa [#allocation8], 1 }
 0x964   :  { %10531 = vsyncpa [#allocation6], 1 }
 0x965   :  { %10533 = vsyncpa [#allocation6 + $0x1], 1 }

</bundles_post_ra>
